<compile_context>
chip_gen: v6e
topology: v6e:2x2x1
jax: 0.10.0
libtpu: 0.0.40
codegen_flags: <defaults>
</compile_context>

<pallas_src>
import jax
import jax.numpy as jnp
from jax.experimental import pallas as pl
from jax.experimental.pallas import tpu as pltpu


LEAKY_SLOPE = 0.2


def _round_up(x, m):
    return (x + m - 1) // m * m


# ----------------------------------------------------------------------------
# Kernel 1: fused (im2col) matmul + bias + LeakyReLU        (conv0 layers)
# ----------------------------------------------------------------------------
def _matmul_bias_lrelu_kernel(x_ref, w_ref, b_ref, o_ref):
    # x_ref: (1, TM, Kd) bf16   w_ref: (Kd, Cout) bf16   b_ref: (1, Cout) f32
    acc = jnp.dot(x_ref[0], w_ref[...], preferred_element_type=jnp.float32)
    acc = acc + b_ref[...]
    acc = jnp.where(acc >= 0, acc, jnp.float32(LEAKY_SLOPE) * acc)
    o_ref[0] = acc.astype(o_ref.dtype)


def conv3x3_s2_lrelu_pallas(x_nhwc, w_oihw, bias):
    """3x3 / stride-2 / pad-1 conv + bias + LeakyReLU(0.2).  NHWC, bf16 out."""
    N, H, W, Cin = x_nhwc.shape
    Cout, _, K, _ = w_oihw.shape
    pad, stride = 1, 2
    Ho = (H + 2 * pad - K) // stride + 1
    Wo = (W + 2 * pad - K) // stride + 1

    # stride-2 im2col (layout-only work in XLA): only needed taps are gathered.
    xp = jnp.pad(x_nhwc.astype(jnp.bfloat16),
                 ((0, 0), (pad, pad), (pad, pad), (0, 0)))
    cols = [xp[:, kh:kh + stride * Ho:stride, kw:kw + stride * Wo:stride, :]
            for kh in range(K) for kw in range(K)]
    Kd = K * K * Cin
    patches = jnp.concatenate(cols, axis=-1).reshape(N, Ho * Wo, Kd)

    w_mat = (jnp.transpose(w_oihw, (2, 3, 1, 0))
             .reshape(Kd, Cout).astype(jnp.bfloat16))
    b_row = bias.reshape(1, Cout).astype(jnp.float32)

    M = Ho * Wo
    # M-band tiling keeps VMEM blocks bounded at large resolutions
    # (v7x: 64 MiB VMEM); small inputs use a single full block.
    TM = min(_round_up(M, 16), 512)
    Mp = _round_up(M, TM)
    if Mp != M:
        patches = jnp.pad(patches, ((0, 0), (0, Mp - M), (0, 0)))

    out = pl.pallas_call(
        _matmul_bias_lrelu_kernel,
        out_shape=jax.ShapeDtypeStruct((N, Mp, Cout), jnp.bfloat16),
        grid=(N, Mp // TM),
        in_specs=[
            pl.BlockSpec((1, TM, Kd), lambda n, m: (n, m, 0)),
            pl.BlockSpec((Kd, Cout), lambda n, m: (0, 0)),
            pl.BlockSpec((1, Cout), lambda n, m: (0, 0)),
        ],
        out_specs=pl.BlockSpec((1, TM, Cout), lambda n, m: (n, m, 0)),
        compiler_params=pltpu.CompilerParams(
            dimension_semantics=("parallel", "parallel")),
    )(patches, w_mat, b_row)

    return out[:, :M, :].reshape(N, Ho, Wo, Cout)


# ----------------------------------------------------------------------------
# Kernel 2: fused 8 x ResConv + folded (ConvTranspose2d + PixelShuffle)
# ----------------------------------------------------------------------------
def _make_resblock_lastconv_kernel(n_layers, Wp, Mv, C, Cl):
    """Kernel factory.  The feature map lives in the VMEM scratch `fbuf` in a
    zero-padded, spatially-flattened layout (rows = padded H*W, lanes = C):
    a 3x3 conv tap is then a simple contiguous 2-D slice of `fbuf`, and each
    tap is one big (Mv, C) x (C, Cout) MXU matmul.  The Wp-Wf extra "garbage"
    columns per row are forced back to zero every layer so the zero padding
    stays intact for the next layer's taps."""

    def kernel(x_ref, cmask_ref, rbw_ref, rbb_ref, rbbeta_ref,
               lcw_ref, lcb_ref, o_ref, fbuf):
        fbuf[...] = x_ref[0]                       # padded feature -> VMEM
        cmask = cmask_ref[...]                     # (Mv, 1) column validity

        # ---- 8 x ResConv:  leaky_relu((W x + b) * beta + x) --------------
        for l in range(n_layers):
            acc = jnp.broadcast_to(rbb_ref[l], (Mv, C)).astype(jnp.float32)
            for kh in range(3):
                for kw in range(3):
                    tap = fbuf[pl.ds(kh * Wp + kw, Mv), :]     # (Mv, C) bf16
                    acc = acc + jnp.dot(
                        tap, rbw_ref[l * 9 + kh * 3 + kw],
                        preferred_element_type=jnp.float32)
            res = fbuf[pl.ds(Wp + 1, Mv), :].astype(jnp.float32)
            y = acc * rbbeta_ref[l] + res
            y = jnp.where(y >= 0, y, jnp.float32(LEAKY_SLOPE) * y)
            y = y * cmask                           # keep padding exactly 0
            fbuf[pl.ds(Wp + 1, Mv), :] = y.astype(jnp.bfloat16)

        # ---- lastconv: ConvTranspose2d(4,2,1) + PixelShuffle(2) folded into
        #      one 3x3 stride-1 conv with Cl = 208 output channels ----------
        acc = jnp.broadcast_to(lcb_ref[...], (Mv, Cl)).astype(jnp.float32)
        for kh in range(3):
            for kw in range(3):
                tap = fbuf[pl.ds(kh * Wp + kw, Mv), :]
                acc = acc + jnp.dot(tap, lcw_ref[kh * 3 + kw],
                                    preferred_element_type=jnp.float32)
        o_ref[0] = acc

    return kernel


def _fold_lastconv_weights(w_ct, b_ct):
    """Fold ConvTranspose2d(Cin, 4*G, 4, stride=2, pad=1) + PixelShuffle(2)
    into an equivalent 3x3 / stride-1 / pad-1 conv with 16*G output channels.

    w_ct: (Cin, 4*G, 4, 4) PyTorch ConvTranspose2d layout;  b_ct: (4*G,)
    Output channel order is (g, t, s) where (t, s) indexes the 4x4 block of
    final output pixels produced around each input pixel.
    """
    Cin = w_ct.shape[0]
    G = w_ct.shape[1] // 4
    w_r = w_ct.reshape(Cin, G, 2, 2, 4, 4)          # [ic, g, dr, dc, kh, kw]
    w_eq = jnp.zeros((3, 3, Cin, G, 4, 4), w_ct.dtype)
    for ah in range(3):                              # conv tap row = dh + 1
        for t in range(4):
            kh = t // 2 + 1 - 2 * (ah - 1)
            if not 0 <= kh < 4:
                continue
            for aw in range(3):                      # conv tap col = dw + 1
                for s in range(4):
                    kw = s // 2 + 1 - 2 * (aw - 1)
                    if not 0 <= kw < 4:
                        continue
                    w_eq = w_eq.at[ah, aw, :, :, t, s].set(
                        w_r[:, :, t % 2, s % 2, kh, kw])
    w_eq = w_eq.reshape(3, 3, Cin, G * 16)
    b_eq = jnp.tile(b_ct.reshape(G, 2, 2), (1, 2, 2)).reshape(G * 16)
    return w_eq, b_eq


def resblock_lastconv_pallas(feat_nhwc, params):
    """8 x ResConv + lastconv in one pallas_call.  Returns (N, 4Hf, 4Wf, 13) f32."""
    feat = feat_nhwc.astype(jnp.bfloat16)
    N, Hf, Wf, C = feat.shape
    Wp = Wf + 2                       # padded width
    Mv = Hf * Wp                      # rows per tap matmul (incl. 2 pad cols)
    Lbuf = (Hf + 3) * Wp              # padded H + one spare bottom row (tap guard)

    # zero-padded, spatially-flattened feature map  (N, Lbuf, C)
    fpad = jnp.pad(feat, ((0, 0), (1, 2), (1, 1), (0, 0))).reshape(N, Lbuf, C)

    # column-validity mask (the 2 padding columns of each flattened row carry
    # garbage conv values that are zeroed every layer)
    cmask = ((jnp.arange(Mv) % Wp) < Wf).astype(jnp.float32).reshape(Mv, 1)

    # ResConv weights, tap-major: (72, C, C) bf16; biases / betas f32
    rbw = jnp.stack(
        [jnp.transpose(params[f"rb{i}_w"], (2, 3, 1, 0)).reshape(9, C, C)
         for i in range(8)], axis=0).reshape(72, C, C).astype(jnp.bfloat16)
    rbb = jnp.stack([params[f"rb{i}_b"] for i in range(8)],
                    axis=0).reshape(8, 1, C).astype(jnp.float32)
    rbbeta = jnp.stack([params[f"rb{i}_beta"] for i in range(8)],
                       axis=0).reshape(8, 1, C).astype(jnp.float32)

    # folded lastconv weights: (9, C, 208) bf16, (1, 208) f32
    lw, lb = _fold_lastconv_weights(params["last_w"], params["last_b"])
    Cl = lw.shape[-1]
    lcw = lw.reshape(9, C, Cl).astype(jnp.bfloat16)
    lcb = lb.reshape(1, Cl).astype(jnp.float32)

    out = pl.pallas_call(
        _make_resblock_lastconv_kernel(8, Wp, Mv, C, Cl),
        out_shape=jax.ShapeDtypeStruct((N, Mv, Cl), jnp.float32),
        grid=(N,),
        in_specs=[
            pl.BlockSpec((1, Lbuf, C), lambda n: (n, 0, 0)),
            pl.BlockSpec((Mv, 1), lambda n: (0, 0)),
            pl.BlockSpec((72, C, C), lambda n: (0, 0, 0)),
            pl.BlockSpec((8, 1, C), lambda n: (0, 0, 0)),
            pl.BlockSpec((8, 1, C), lambda n: (0, 0, 0)),
            pl.BlockSpec((9, C, Cl), lambda n: (0, 0, 0)),
            pl.BlockSpec((1, Cl), lambda n: (0, 0)),
        ],
        out_specs=pl.BlockSpec((1, Mv, Cl), lambda n: (n, 0, 0)),
        scratch_shapes=[pltpu.VMEM((Lbuf, C), jnp.bfloat16)],
        compiler_params=pltpu.CompilerParams(
            dimension_semantics=("parallel",)),
        # TODO(synk): for large resolutions, tile over H bands (8-row halo for
        # the chained 3x3 convs) and set vmem_limit_bytes so the resident band
        # fits the v7x 64 MiB / v6e 128 MiB VMEM budget; the band axis also
        # gives v7x's 2nd TensorCore work when N == 1.
    )(fpad, cmask, rbw, rbb, rbbeta, lcw, lcb)

    # drop padding columns, then depth-to-space: channel (g, t, s) -> the
    # (4m+t, 4n+s) output pixel of group g.
    G = Cl // 16
    out = out.reshape(N, Hf, Wp, Cl)[:, :, :Wf, :]
    out = out.reshape(N, Hf, Wf, G, 4, 4)
    out = jnp.transpose(out, (0, 1, 4, 2, 5, 3)).reshape(N, 4 * Hf, 4 * Wf, G)
    return out


# ----------------------------------------------------------------------------
# Glue (plain JAX) + forward pass
# ----------------------------------------------------------------------------
def _interpolate_bilinear(x_nchw, scale):
    # TODO(synk): jax.image.resize(bilinear, antialias=False) matches
    # F.interpolate(align_corners=False) closely but not bit-exactly for
    # non-integer scales; identity when scale == 1 (demo path).
    if scale == 1:
        return x_nchw
    N, C, H, W = x_nchw.shape
    return jax.image.resize(x_nchw, (N, C, int(H * scale), int(W * scale)),
                            method="bilinear", antialias=False)


def ifblock_forward(params, x, flow=None, scale=1):
    """IFBlock forward.  x, flow: NCHW float32  ->  (flow, mask, feat) NCHW."""
    x = _interpolate_bilinear(x, 1.0 / scale)
    if flow is not None:
        fl = _interpolate_bilinear(flow, 1.0 / scale) * (1.0 / scale)
        x = jnp.concatenate([x, fl], axis=1)
    x = jnp.transpose(x, (0, 2, 3, 1))                       # NCHW -> NHWC

    # conv0: two stride-2 conv + LeakyReLU layers (fused Pallas matmuls)
    f = conv3x3_s2_lrelu_pallas(x, params["c00_w"], params["c00_b"])
    f = conv3x3_s2_lrelu_pallas(f, params["c01_w"], params["c01_b"])

    # convblock (8 x ResConv) + lastconv fused into one Pallas kernel
    tmp = resblock_lastconv_pallas(f, params)                # (N, H, W, 13)

    tmp = jnp.transpose(tmp, (0, 3, 1, 2))                   # NHWC -> NCHW
    tmp = _interpolate_bilinear(tmp, float(scale))

    flow_out = tmp[:, :4] * scale
    mask = tmp[:, 4:5]
    feat_out = tmp[:, 5:]
    return flow_out, mask, feat_out


# ----------------------------------------------------------------------------
# Parameters
# ----------------------------------------------------------------------------
def init_ifblock_params(key, in_planes, c=64):
    keys = jax.random.split(key, 64)
    it = iter(range(64))

    def nrm(shape, s):
        return (s * jax.random.normal(keys[next(it)], shape)).astype(jnp.float32)

    p = {}
    p["c00_w"] = nrm((c // 2, in_planes, 3, 3), 0.1)
    p["c00_b"] = nrm((c // 2,), 0.5)
    p["c01_w"] = nrm((c, c // 2, 3, 3), 0.1)
    p["c01_b"] = nrm((c,), 0.5)
    for i in range(8):
        p[f"rb{i}_w"] = nrm((c, c, 3, 3), 0.05)
        p[f"rb{i}_b"] = nrm((c,), 0.5)
        p[f"rb{i}_beta"] = 1.0 + nrm((c,), 0.25)
    p["last_w"] = nrm((c, 4 * 13, 4, 4), 0.1)   # ConvTranspose2d (Cin, Cout, K, K)
    p["last_b"] = nrm((4 * 13,), 0.5)
    return p


# ----------------------------------------------------------------------------
# Pure-JAX float32 reference (for the numerical check)
# ----------------------------------------------------------------------------
def _leaky_ref(x):
    return jnp.where(x >= 0, x, LEAKY_SLOPE * x)


def _conv_ref(x, w, b, stride, padding):
    y = jax.lax.conv_general_dilated(
        x, w, window_strides=(stride, stride),
        padding=((padding, padding), (padding, padding)),
        dimension_numbers=("NCHW", "OIHW", "NCHW"))
    return y + b.reshape(1, -1, 1, 1)


def ifblock_reference(params, x, flow=None, scale=1):
    x = _interpolate_bilinear(x, 1.0 / scale)
    if flow is not None:
        fl = _interpolate_bilinear(flow, 1.0 / scale) * (1.0 / scale)
        x = jnp.concatenate([x, fl], axis=1)
    f = _leaky_ref(_conv_ref(x, params["c00_w"], params["c00_b"], 2, 1))
    f = _leaky_ref(_conv_ref(f, params["c01_w"], params["c01_b"], 2, 1))
    for i in range(8):
        y = _conv_ref(f, params[f"rb{i}_w"], params[f"rb{i}_b"], 1, 1)
        f = _leaky_ref(y * params[f"rb{i}_beta"].reshape(1, -1, 1, 1) + f)
    # ConvTranspose2d(c, 52, 4, 2, 1) as lhs-dilated conv with flipped weights
    w_t = jnp.transpose(params["last_w"][:, :, ::-1, ::-1], (1, 0, 2, 3))
    ct = jax.lax.conv_general_dilated(
        f, w_t, window_strides=(1, 1), padding=((2, 2), (2, 2)),
        lhs_dilation=(2, 2), dimension_numbers=("NCHW", "OIHW", "NCHW"))
    ct = ct + params["last_b"].reshape(1, -1, 1, 1)
    # PixelShuffle(2), NCHW
    N, C, Hh, Ww = ct.shape
    t = ct.reshape(N, C // 4, 2, 2, Hh, Ww)
    t = jnp.transpose(t, (0, 1, 4, 2, 5, 3)).reshape(N, C // 4, 2 * Hh, 2 * Ww)
    t = _interpolate_bilinear(t, float(scale))
    return t[:, :4] * scale, t[:, 4:5], t[:, 5:]


# ----------------------------------------------------------------------------
if __name__ == "__main__":
    in_planes, c = 7, 64            # e.g. two RGB frames + timestep channel
    batch, H, W = 2, 16, 16

    key = jax.random.PRNGKey(0)
    pkey, xkey = jax.random.split(key)
    params = init_ifblock_params(pkey, in_planes, c)
    x = jax.random.normal(xkey, (batch, in_planes, H, W), jnp.float32)

    run = jax.jit(lambda p, xx: ifblock_forward(p, xx, flow=None, scale=1))
    flow, mask, feat = jax.block_until_ready(run(params, x))

    assert flow.shape == (batch, 4, H, W), flow.shape
    assert mask.shape == (batch, 1, H, W), mask.shape
    assert feat.shape == (batch, 8, H, W), feat.shape
    assert jnp.all(jnp.isfinite(flow)) and jnp.all(jnp.isfinite(mask)) \
        and jnp.all(jnp.isfinite(feat))

    # numerical check vs. a pure-JAX float32 reference (kernels use bf16 MXU
    # operands with f32 accumulation -> small, bounded drift is expected)
    rflow, rmask, rfeat = ifblock_reference(params, x, flow=None, scale=1)
    for got, ref in ((flow, rflow), (mask, rmask), (feat, rfeat)):
        denom = jnp.maximum(jnp.max(jnp.abs(ref)), 1.0)
        rel_err = float(jnp.max(jnp.abs(got - ref)) / denom)
        assert rel_err < 0.1, f"mismatch vs reference: rel_err={rel_err:.4f}"

    print("KERNEL_OK")
</pallas_src>

<mosaic_0001>
module attributes {stable_mosaic.version = 11 : i64} {
  func.func @_matmul_bias_lrelu_kernel(%arg0: i32, %arg1: i32, %arg2: memref<1x64x63xbf16, #tpu.memory_space<vmem>>, %arg3: memref<63x32xbf16, #tpu.memory_space<vmem>>, %arg4: memref<1x32xf32, #tpu.memory_space<vmem>>, %arg5: memref<1x64x32xbf16, #tpu.memory_space<vmem>>) attributes {dimension_semantics = [#tpu.dimension_semantics<parallel>, #tpu.dimension_semantics<parallel>], iteration_bounds = array<i64: 2, 1>, scalar_prefetch = 0 : i64, scratch_operands = 0 : i64, tpu.core_type = #tpu.core_type<tc>, window_params = [{transform_indices = @transform_0, window_bounds = array<i64: 1, 64, 63>}, {pipeline_mode = #tpu.pipeline_mode<synchronous>, transform_indices = @transform_1, window_bounds = array<i64: 63, 32>}, {pipeline_mode = #tpu.pipeline_mode<synchronous>, transform_indices = @transform_2, window_bounds = array<i64: 1, 32>}, {transform_indices = @transform_3, window_bounds = array<i64: 1, 64, 32>}]} {
    %c0 = arith.constant 0 : index
    %c0_0 = arith.constant 0 : index
    %c0_1 = arith.constant 0 : index
    %0 = vector.load %arg2[%c0, %c0_0, %c0_1] : memref<1x64x63xbf16, #tpu.memory_space<vmem>>, vector<1x64x63xbf16>
    %1 = vector.shape_cast %0 : vector<1x64x63xbf16> to vector<64x63xbf16>
    %c0_2 = arith.constant 0 : index
    %c0_3 = arith.constant 0 : index
    %2 = vector.load %arg3[%c0_2, %c0_3] : memref<63x32xbf16, #tpu.memory_space<vmem>>, vector<63x32xbf16>
    %cst = arith.constant dense<0.000000e+00> : vector<64x32xf32>
    %3 = tpu.matmul %1, %2, %cst {dimension_numbers = #tpu.dot_dimension_numbers<[1], [0], [0], [1], [0, 0, 1, 1], [], []>} : vector<64x63xbf16>, vector<63x32xbf16>, vector<64x32xf32> -> vector<64x32xf32>
    %c0_4 = arith.constant 0 : index
    %c0_5 = arith.constant 0 : index
    %4 = vector.load %arg4[%c0_4, %c0_5] : memref<1x32xf32, #tpu.memory_space<vmem>>, vector<1x32xf32>
    %5 = vector.broadcast %4 : vector<1x32xf32> to vector<64x32xf32>
    %6 = arith.addf %3, %5 : vector<64x32xf32>
    %cst_6 = arith.constant 0.000000e+00 : f32
    %7 = vector.broadcast %cst_6 : f32 to vector<64x32xf32>
    %8 = arith.cmpf oge, %6, %7 : vector<64x32xf32>
    %cst_7 = arith.constant 2.000000e-01 : f32
    %9 = vector.broadcast %cst_7 : f32 to vector<64x32xf32>
    %10 = arith.mulf %9, %6 : vector<64x32xf32>
    %11 = arith.select %8, %6, %10 : vector<64x32xi1>, vector<64x32xf32>
    %12 = arith.truncf %11 : vector<64x32xf32> to vector<64x32xbf16>
    %c0_8 = arith.constant 0 : index
    %c0_9 = arith.constant 0 : index
    %c0_10 = arith.constant 0 : index
    %13 = vector.load %arg5[%c0_8, %c0_9, %c0_10] : memref<1x64x32xbf16, #tpu.memory_space<vmem>>, vector<1x64x32xbf16>
    %14 = vector.shape_cast %13 : vector<1x64x32xbf16> to vector<64x32xbf16>
    %15 = vector.shape_cast %12 : vector<64x32xbf16> to vector<1x64x32xbf16>
    tpu.vector_store %arg5[%c0_8, %c0_9, %c0_10], %15 {strides = array<i32>} : memref<1x64x32xbf16, #tpu.memory_space<vmem>>, vector<1x64x32xbf16>,
    return
  }
  func.func @transform_0(%arg0: i32, %arg1: i32) -> (i32, i32, i32) {
    %c0_i32 = arith.constant 0 : i32
    %c0_i32_0 = arith.constant 0 : i32
    return %arg0, %arg1, %c0_i32 : i32, i32, i32
  }
  func.func @transform_1(%arg0: i32, %arg1: i32) -> (i32, i32) {
    %c0_i32 = arith.constant 0 : i32
    %c0_i32_0 = arith.constant 0 : i32
    %c0_i32_1 = arith.constant 0 : i32
    return %c0_i32, %c0_i32_0 : i32, i32
  }
  func.func @transform_2(%arg0: i32, %arg1: i32) -> (i32, i32) {
    %c0_i32 = arith.constant 0 : i32
    %c0_i32_0 = arith.constant 0 : i32
    %c0_i32_1 = arith.constant 0 : i32
    return %c0_i32, %c0_i32_0 : i32, i32
  }
  func.func @transform_3(%arg0: i32, %arg1: i32) -> (i32, i32, i32) {
    %c0_i32 = arith.constant 0 : i32
    %c0_i32_0 = arith.constant 0 : i32
    return %arg0, %arg1, %c0_i32 : i32, i32, i32
  }
}

module attributes {stable_mosaic.version = 11 : i64} {
  func.func @_matmul_bias_lrelu_kernel(%arg0: i32, %arg1: i32, %arg2: memref<1x16x288xbf16, #tpu.memory_space<vmem>>, %arg3: memref<288x64xbf16, #tpu.memory_space<vmem>>, %arg4: memref<1x64xf32, #tpu.memory_space<vmem>>, %arg5: memref<1x16x64xbf16, #tpu.memory_space<vmem>>) attributes {dimension_semantics = [#tpu.dimension_semantics<parallel>, #tpu.dimension_semantics<parallel>], iteration_bounds = array<i64: 2, 1>, scalar_prefetch = 0 : i64, scratch_operands = 0 : i64, tpu.core_type = #tpu.core_type<tc>, window_params = [{transform_indices = @transform_0, window_bounds = array<i64: 1, 16, 288>}, {pipeline_mode = #tpu.pipeline_mode<synchronous>, transform_indices = @transform_1, window_bounds = array<i64: 288, 64>}, {pipeline_mode = #tpu.pipeline_mode<synchronous>, transform_indices = @transform_2, window_bounds = array<i64: 1, 64>}, {transform_indices = @transform_3, window_bounds = array<i64: 1, 16, 64>}]} {
    %c0 = arith.constant 0 : index
    %c0_0 = arith.constant 0 : index
    %c0_1 = arith.constant 0 : index
    %0 = vector.load %arg2[%c0, %c0_0, %c0_1] : memref<1x16x288xbf16, #tpu.memory_space<vmem>>, vector<1x16x288xbf16>
    %1 = vector.shape_cast %0 : vector<1x16x288xbf16> to vector<16x288xbf16>
    %c0_2 = arith.constant 0 : index
    %c0_3 = arith.constant 0 : index
    %2 = vector.load %arg3[%c0_2, %c0_3] : memref<288x64xbf16, #tpu.memory_space<vmem>>, vector<288x64xbf16>
    %cst = arith.constant dense<0.000000e+00> : vector<16x64xf32>
    %3 = tpu.matmul %1, %2, %cst {dimension_numbers = #tpu.dot_dimension_numbers<[1], [0], [0], [1], [0, 0, 1, 1], [], []>} : vector<16x288xbf16>, vector<288x64xbf16>, vector<16x64xf32> -> vector<16x64xf32>
    %c0_4 = arith.constant 0 : index
    %c0_5 = arith.constant 0 : index
    %4 = vector.load %arg4[%c0_4, %c0_5] : memref<1x64xf32, #tpu.memory_space<vmem>>, vector<1x64xf32>
    %5 = vector.broadcast %4 : vector<1x64xf32> to vector<16x64xf32>
    %6 = arith.addf %3, %5 : vector<16x64xf32>
    %cst_6 = arith.constant 0.000000e+00 : f32
    %7 = vector.broadcast %cst_6 : f32 to vector<16x64xf32>
    %8 = arith.cmpf oge, %6, %7 : vector<16x64xf32>
    %cst_7 = arith.constant 2.000000e-01 : f32
    %9 = vector.broadcast %cst_7 : f32 to vector<16x64xf32>
    %10 = arith.mulf %9, %6 : vector<16x64xf32>
    %11 = arith.select %8, %6, %10 : vector<16x64xi1>, vector<16x64xf32>
    %12 = arith.truncf %11 : vector<16x64xf32> to vector<16x64xbf16>
    %c0_8 = arith.constant 0 : index
    %c0_9 = arith.constant 0 : index
    %c0_10 = arith.constant 0 : index
    %13 = vector.load %arg5[%c0_8, %c0_9, %c0_10] : memref<1x16x64xbf16, #tpu.memory_space<vmem>>, vector<1x16x64xbf16>
    %14 = vector.shape_cast %13 : vector<1x16x64xbf16> to vector<16x64xbf16>
    %15 = vector.shape_cast %12 : vector<16x64xbf16> to vector<1x16x64xbf16>
    tpu.vector_store %arg5[%c0_8, %c0_9, %c0_10], %15 {strides = array<i32>} : memref<1x16x64xbf16, #tpu.memory_space<vmem>>, vector<1x16x64xbf16>,
    return
  }
  func.func @transform_0(%arg0: i32, %arg1: i32) -> (i32, i32, i32) {
    %c0_i32 = arith.constant 0 : i32
    %c0_i32_0 = arith.constant 0 : i32
    return %arg0, %arg1, %c0_i32 : i32, i32, i32
  }
  func.func @transform_1(%arg0: i32, %arg1: i32) -> (i32, i32) {
    %c0_i32 = arith.constant 0 : i32
    %c0_i32_0 = arith.constant 0 : i32
    %c0_i32_1 = arith.constant 0 : i32
    return %c0_i32, %c0_i32_0 : i32, i32
  }
  func.func @transform_2(%arg0: i32, %arg1: i32) -> (i32, i32) {
    %c0_i32 = arith.constant 0 : i32
    %c0_i32_0 = arith.constant 0 : i32
    %c0_i32_1 = arith.constant 0 : i32
    return %c0_i32, %c0_i32_0 : i32, i32
  }
  func.func @transform_3(%arg0: i32, %arg1: i32) -> (i32, i32, i32) {
    %c0_i32 = arith.constant 0 : i32
    %c0_i32_0 = arith.constant 0 : i32
    return %arg0, %arg1, %c0_i32 : i32, i32, i32
  }
}

module attributes {stable_mosaic.version = 11 : i64} {
  func.func @kernel(%arg0: i32, %arg1: memref<1x42x64xbf16, #tpu.memory_space<vmem>>, %arg2: memref<24x1xf32, #tpu.memory_space<vmem>>, %arg3: memref<72x64x64xbf16, #tpu.memory_space<vmem>>, %arg4: memref<8x1x64xf32, #tpu.memory_space<vmem>>, %arg5: memref<8x1x64xf32, #tpu.memory_space<vmem>>, %arg6: memref<9x64x208xbf16, #tpu.memory_space<vmem>>, %arg7: memref<1x208xf32, #tpu.memory_space<vmem>>, %arg8: memref<1x24x208xf32, #tpu.memory_space<vmem>>, %arg9: memref<42x64xbf16, #tpu.memory_space<vmem>>) attributes {dimension_semantics = [#tpu.dimension_semantics<parallel>], iteration_bounds = array<i64: 2>, scalar_prefetch = 0 : i64, scratch_operands = 1 : i64, tpu.core_type = #tpu.core_type<tc>, window_params = [{transform_indices = @transform_0, window_bounds = array<i64: 1, 42, 64>}, {pipeline_mode = #tpu.pipeline_mode<synchronous>, transform_indices = @transform_1, window_bounds = array<i64: 24, 1>}, {pipeline_mode = #tpu.pipeline_mode<synchronous>, transform_indices = @transform_2, window_bounds = array<i64: 72, 64, 64>}, {pipeline_mode = #tpu.pipeline_mode<synchronous>, transform_indices = @transform_3, window_bounds = array<i64: 8, 1, 64>}, {pipeline_mode = #tpu.pipeline_mode<synchronous>, transform_indices = @transform_4, window_bounds = array<i64: 8, 1, 64>}, {pipeline_mode = #tpu.pipeline_mode<synchronous>, transform_indices = @transform_5, window_bounds = array<i64: 9, 64, 208>}, {pipeline_mode = #tpu.pipeline_mode<synchronous>, transform_indices = @transform_6, window_bounds = array<i64: 1, 208>}, {transform_indices = @transform_7, window_bounds = array<i64: 1, 24, 208>}]} {
    %c0 = arith.constant 0 : index
    %c0_0 = arith.constant 0 : index
    %c0_1 = arith.constant 0 : index
    %0 = vector.load %arg1[%c0, %c0_0, %c0_1] : memref<1x42x64xbf16, #tpu.memory_space<vmem>>, vector<1x42x64xbf16>
    %1 = vector.shape_cast %0 : vector<1x42x64xbf16> to vector<42x64xbf16>
    %c0_2 = arith.constant 0 : index
    %c0_3 = arith.constant 0 : index
    %2 = vector.load %arg9[%c0_2, %c0_3] : memref<42x64xbf16, #tpu.memory_space<vmem>>, vector<42x64xbf16>
    tpu.vector_store %arg9[%c0_2, %c0_3], %1 {strides = array<i32>} : memref<42x64xbf16, #tpu.memory_space<vmem>>, vector<42x64xbf16>,
    %c0_4 = arith.constant 0 : index
    %c0_5 = arith.constant 0 : index
    %3 = vector.load %arg2[%c0_4, %c0_5] : memref<24x1xf32, #tpu.memory_space<vmem>>, vector<24x1xf32>
    %c0_6 = arith.constant 0 : index
    %c0_7 = arith.constant 0 : index
    %c0_8 = arith.constant 0 : index
    %4 = vector.load %arg4[%c0_6, %c0_7, %c0_8] : memref<8x1x64xf32, #tpu.memory_space<vmem>>, vector<1x1x64xf32>
    %5 = vector.shape_cast %4 : vector<1x1x64xf32> to vector<1x64xf32>
    %6 = vector.shape_cast %5 : vector<1x64xf32> to vector<1x64xf32>
    %7 = vector.broadcast %6 : vector<1x64xf32> to vector<24x64xf32>
    %c0_9 = arith.constant 0 : index
    %c0_10 = arith.constant 0 : index
    %8 = vector.load %arg9[%c0_9, %c0_10] : memref<42x64xbf16, #tpu.memory_space<vmem>>, vector<24x64xbf16>
    %c0_11 = arith.constant 0 : index
    %c0_12 = arith.constant 0 : index
    %c0_13 = arith.constant 0 : index
    %9 = vector.load %arg3[%c0_11, %c0_12, %c0_13] : memref<72x64x64xbf16, #tpu.memory_space<vmem>>, vector<1x64x64xbf16>
    %10 = vector.shape_cast %9 : vector<1x64x64xbf16> to vector<64x64xbf16>
    %cst = arith.constant dense<0.000000e+00> : vector<24x64xf32>
    %11 = tpu.matmul %8, %10, %cst {dimension_numbers = #tpu.dot_dimension_numbers<[1], [0], [0], [1], [0, 0, 1, 1], [], []>} : vector<24x64xbf16>, vector<64x64xbf16>, vector<24x64xf32> -> vector<24x64xf32>
    %12 = arith.addf %7, %11 : vector<24x64xf32>
    %c1 = arith.constant 1 : index
    %c0_14 = arith.constant 0 : index
    %13 = vector.load %arg9[%c1, %c0_14] : memref<42x64xbf16, #tpu.memory_space<vmem>>, vector<24x64xbf16>
    %c1_15 = arith.constant 1 : index
    %c0_16 = arith.constant 0 : index
    %c0_17 = arith.constant 0 : index
    %14 = vector.load %arg3[%c1_15, %c0_16, %c0_17] : memref<72x64x64xbf16, #tpu.memory_space<vmem>>, vector<1x64x64xbf16>
    %15 = vector.shape_cast %14 : vector<1x64x64xbf16> to vector<64x64xbf16>
    %cst_18 = arith.constant dense<0.000000e+00> : vector<24x64xf32>
    %16 = tpu.matmul %13, %15, %cst_18 {dimension_numbers = #tpu.dot_dimension_numbers<[1], [0], [0], [1], [0, 0, 1, 1], [], []>} : vector<24x64xbf16>, vector<64x64xbf16>, vector<24x64xf32> -> vector<24x64xf32>
    %17 = arith.addf %12, %16 : vector<24x64xf32>
    %c2 = arith.constant 2 : index
    %c0_19 = arith.constant 0 : index
    %18 = vector.load %arg9[%c2, %c0_19] : memref<42x64xbf16, #tpu.memory_space<vmem>>, vector<24x64xbf16>
    %c2_20 = arith.constant 2 : index
    %c0_21 = arith.constant 0 : index
    %c0_22 = arith.constant 0 : index
    %19 = vector.load %arg3[%c2_20, %c0_21, %c0_22] : memref<72x64x64xbf16, #tpu.memory_space<vmem>>, vector<1x64x64xbf16>
    %20 = vector.shape_cast %19 : vector<1x64x64xbf16> to vector<64x64xbf16>
    %cst_23 = arith.constant dense<0.000000e+00> : vector<24x64xf32>
    %21 = tpu.matmul %18, %20, %cst_23 {dimension_numbers = #tpu.dot_dimension_numbers<[1], [0], [0], [1], [0, 0, 1, 1], [], []>} : vector<24x64xbf16>, vector<64x64xbf16>, vector<24x64xf32> -> vector<24x64xf32>
    %22 = arith.addf %17, %21 : vector<24x64xf32>
    %c6 = arith.constant 6 : index
    %c0_24 = arith.constant 0 : index
    %23 = vector.load %arg9[%c6, %c0_24] : memref<42x64xbf16, #tpu.memory_space<vmem>>, vector<24x64xbf16>
    %c3 = arith.constant 3 : index
    %c0_25 = arith.constant 0 : index
    %c0_26 = arith.constant 0 : index
    %24 = vector.load %arg3[%c3, %c0_25, %c0_26] : memref<72x64x64xbf16, #tpu.memory_space<vmem>>, vector<1x64x64xbf16>
    %25 = vector.shape_cast %24 : vector<1x64x64xbf16> to vector<64x64xbf16>
    %cst_27 = arith.constant dense<0.000000e+00> : vector<24x64xf32>
    %26 = tpu.matmul %23, %25, %cst_27 {dimension_numbers = #tpu.dot_dimension_numbers<[1], [0], [0], [1], [0, 0, 1, 1], [], []>} : vector<24x64xbf16>, vector<64x64xbf16>, vector<24x64xf32> -> vector<24x64xf32>
    %27 = arith.addf %22, %26 : vector<24x64xf32>
    %c7 = arith.constant 7 : index
    %c0_28 = arith.constant 0 : index
    %28 = vector.load %arg9[%c7, %c0_28] : memref<42x64xbf16, #tpu.memory_space<vmem>>, vector<24x64xbf16>
    %c4 = arith.constant 4 : index
    %c0_29 = arith.constant 0 : index
    %c0_30 = arith.constant 0 : index
    %29 = vector.load %arg3[%c4, %c0_29, %c0_30] : memref<72x64x64xbf16, #tpu.memory_space<vmem>>, vector<1x64x64xbf16>
    %30 = vector.shape_cast %29 : vector<1x64x64xbf16> to vector<64x64xbf16>
    %cst_31 = arith.constant dense<0.000000e+00> : vector<24x64xf32>
    %31 = tpu.matmul %28, %30, %cst_31 {dimension_numbers = #tpu.dot_dimension_numbers<[1], [0], [0], [1], [0, 0, 1, 1], [], []>} : vector<24x64xbf16>, vector<64x64xbf16>, vector<24x64xf32> -> vector<24x64xf32>
    %32 = arith.addf %27, %31 : vector<24x64xf32>
    %c8 = arith.constant 8 : index
    %c0_32 = arith.constant 0 : index
    %33 = vector.load %arg9[%c8, %c0_32] : memref<42x64xbf16, #tpu.memory_space<vmem>>, vector<24x64xbf16>
    %c5 = arith.constant 5 : index
    %c0_33 = arith.constant 0 : index
    %c0_34 = arith.constant 0 : index
    %34 = vector.load %arg3[%c5, %c0_33, %c0_34] : memref<72x64x64xbf16, #tpu.memory_space<vmem>>, vector<1x64x64xbf16>
    %35 = vector.shape_cast %34 : vector<1x64x64xbf16> to vector<64x64xbf16>
    %cst_35 = arith.constant dense<0.000000e+00> : vector<24x64xf32>
    %36 = tpu.matmul %33, %35, %cst_35 {dimension_numbers = #tpu.dot_dimension_numbers<[1], [0], [0], [1], [0, 0, 1, 1], [], []>} : vector<24x64xbf16>, vector<64x64xbf16>, vector<24x64xf32> -> vector<24x64xf32>
    %37 = arith.addf %32, %36 : vector<24x64xf32>
    %c12 = arith.constant 12 : index
    %c0_36 = arith.constant 0 : index
    %38 = vector.load %arg9[%c12, %c0_36] : memref<42x64xbf16, #tpu.memory_space<vmem>>, vector<24x64xbf16>
    %c6_37 = arith.constant 6 : index
    %c0_38 = arith.constant 0 : index
    %c0_39 = arith.constant 0 : index
    %39 = vector.load %arg3[%c6_37, %c0_38, %c0_39] : memref<72x64x64xbf16, #tpu.memory_space<vmem>>, vector<1x64x64xbf16>
    %40 = vector.shape_cast %39 : vector<1x64x64xbf16> to vector<64x64xbf16>
    %cst_40 = arith.constant dense<0.000000e+00> : vector<24x64xf32>
    %41 = tpu.matmul %38, %40, %cst_40 {dimension_numbers = #tpu.dot_dimension_numbers<[1], [0], [0], [1], [0, 0, 1, 1], [], []>} : vector<24x64xbf16>, vector<64x64xbf16>, vector<24x64xf32> -> vector<24x64xf32>
    %42 = arith.addf %37, %41 : vector<24x64xf32>
    %c13 = arith.constant 13 : index
    %c0_41 = arith.constant 0 : index
    %43 = vector.load %arg9[%c13, %c0_41] : memref<42x64xbf16, #tpu.memory_space<vmem>>, vector<24x64xbf16>
    %c7_42 = arith.constant 7 : index
    %c0_43 = arith.constant 0 : index
    %c0_44 = arith.constant 0 : index
    %44 = vector.load %arg3[%c7_42, %c0_43, %c0_44] : memref<72x64x64xbf16, #tpu.memory_space<vmem>>, vector<1x64x64xbf16>
    %45 = vector.shape_cast %44 : vector<1x64x64xbf16> to vector<64x64xbf16>
    %cst_45 = arith.constant dense<0.000000e+00> : vector<24x64xf32>
    %46 = tpu.matmul %43, %45, %cst_45 {dimension_numbers = #tpu.dot_dimension_numbers<[1], [0], [0], [1], [0, 0, 1, 1], [], []>} : vector<24x64xbf16>, vector<64x64xbf16>, vector<24x64xf32> -> vector<24x64xf32>
    %47 = arith.addf %42, %46 : vector<24x64xf32>
    %c14 = arith.constant 14 : index
    %c0_46 = arith.constant 0 : index
    %48 = vector.load %arg9[%c14, %c0_46] : memref<42x64xbf16, #tpu.memory_space<vmem>>, vector<24x64xbf16>
    %c8_47 = arith.constant 8 : index
    %c0_48 = arith.constant 0 : index
    %c0_49 = arith.constant 0 : index
    %49 = vector.load %arg3[%c8_47, %c0_48, %c0_49] : memref<72x64x64xbf16, #tpu.memory_space<vmem>>, vector<1x64x64xbf16>
    %50 = vector.shape_cast %49 : vector<1x64x64xbf16> to vector<64x64xbf16>
    %cst_50 = arith.constant dense<0.000000e+00> : vector<24x64xf32>
    %51 = tpu.matmul %48, %50, %cst_50 {dimension_numbers = #tpu.dot_dimension_numbers<[1], [0], [0], [1], [0, 0, 1, 1], [], []>} : vector<24x64xbf16>, vector<64x64xbf16>, vector<24x64xf32> -> vector<24x64xf32>
    %52 = arith.addf %47, %51 : vector<24x64xf32>
    %c7_51 = arith.constant 7 : index
    %c0_52 = arith.constant 0 : index
    %53 = vector.load %arg9[%c7_51, %c0_52] : memref<42x64xbf16, #tpu.memory_space<vmem>>, vector<24x64xbf16>
    %54 = arith.extf %53 : vector<24x64xbf16> to vector<24x64xf32>
    %c0_53 = arith.constant 0 : index
    %c0_54 = arith.constant 0 : index
    %c0_55 = arith.constant 0 : index
    %55 = vector.load %arg5[%c0_53, %c0_54, %c0_55] : memref<8x1x64xf32, #tpu.memory_space<vmem>>, vector<1x1x64xf32>
    %56 = vector.shape_cast %55 : vector<1x1x64xf32> to vector<1x64xf32>
    %57 = vector.broadcast %56 : vector<1x64xf32> to vector<24x64xf32>
    %58 = arith.mulf %52, %57 : vector<24x64xf32>
    %59 = arith.addf %58, %54 : vector<24x64xf32>
    %cst_56 = arith.constant 0.000000e+00 : f32
    %60 = vector.broadcast %cst_56 : f32 to vector<24x64xf32>
    %61 = arith.cmpf oge, %59, %60 : vector<24x64xf32>
    %cst_57 = arith.constant 2.000000e-01 : f32
    %62 = vector.broadcast %cst_57 : f32 to vector<24x64xf32>
    %63 = arith.mulf %62, %59 : vector<24x64xf32>
    %64 = arith.select %61, %59, %63 : vector<24x64xi1>, vector<24x64xf32>
    %65 = vector.broadcast %3 : vector<24x1xf32> to vector<24x64xf32>
    %66 = arith.mulf %64, %65 : vector<24x64xf32>
    %67 = arith.truncf %66 : vector<24x64xf32> to vector<24x64xbf16>
    %c7_58 = arith.constant 7 : index
    %c0_59 = arith.constant 0 : index
    %68 = vector.load %arg9[%c7_58, %c0_59] : memref<42x64xbf16, #tpu.memory_space<vmem>>, vector<24x64xbf16>
    tpu.vector_store %arg9[%c7_58, %c0_59], %67 {strides = array<i32>} : memref<42x64xbf16, #tpu.memory_space<vmem>>, vector<24x64xbf16>,
    %c1_60 = arith.constant 1 : index
    %c0_61 = arith.constant 0 : index
    %c0_62 = arith.constant 0 : index
    %69 = vector.load %arg4[%c1_60, %c0_61, %c0_62] : memref<8x1x64xf32, #tpu.memory_space<vmem>>, vector<1x1x64xf32>
    %70 = vector.shape_cast %69 : vector<1x1x64xf32> to vector<1x64xf32>
    %71 = vector.shape_cast %70 : vector<1x64xf32> to vector<1x64xf32>
    %72 = vector.broadcast %71 : vector<1x64xf32> to vector<24x64xf32>
    %c0_63 = arith.constant 0 : index
    %c0_64 = arith.constant 0 : index
    %73 = vector.load %arg9[%c0_63, %c0_64] : memref<42x64xbf16, #tpu.memory_space<vmem>>, vector<24x64xbf16>
    %c9 = arith.constant 9 : index
    %c0_65 = arith.constant 0 : index
    %c0_66 = arith.constant 0 : index
    %74 = vector.load %arg3[%c9, %c0_65, %c0_66] : memref<72x64x64xbf16, #tpu.memory_space<vmem>>, vector<1x64x64xbf16>
    %75 = vector.shape_cast %74 : vector<1x64x64xbf16> to vector<64x64xbf16>
    %cst_67 = arith.constant dense<0.000000e+00> : vector<24x64xf32>
    %76 = tpu.matmul %73, %75, %cst_67 {dimension_numbers = #tpu.dot_dimension_numbers<[1], [0], [0], [1], [0, 0, 1, 1], [], []>} : vector<24x64xbf16>, vector<64x64xbf16>, vector<24x64xf32> -> vector<24x64xf32>
    %77 = arith.addf %72, %76 : vector<24x64xf32>
    %c1_68 = arith.constant 1 : index
    %c0_69 = arith.constant 0 : index
    %78 = vector.load %arg9[%c1_68, %c0_69] : memref<42x64xbf16, #tpu.memory_space<vmem>>, vector<24x64xbf16>
    %c10 = arith.constant 10 : index
    %c0_70 = arith.constant 0 : index
    %c0_71 = arith.constant 0 : index
    %79 = vector.load %arg3[%c10, %c0_70, %c0_71] : memref<72x64x64xbf16, #tpu.memory_space<vmem>>, vector<1x64x64xbf16>
    %80 = vector.shape_cast %79 : vector<1x64x64xbf16> to vector<64x64xbf16>
    %cst_72 = arith.constant dense<0.000000e+00> : vector<24x64xf32>
    %81 = tpu.matmul %78, %80, %cst_72 {dimension_numbers = #tpu.dot_dimension_numbers<[1], [0], [0], [1], [0, 0, 1, 1], [], []>} : vector<24x64xbf16>, vector<64x64xbf16>, vector<24x64xf32> -> vector<24x64xf32>
    %82 = arith.addf %77, %81 : vector<24x64xf32>
    %c2_73 = arith.constant 2 : index
    %c0_74 = arith.constant 0 : index
    %83 = vector.load %arg9[%c2_73, %c0_74] : memref<42x64xbf16, #tpu.memory_space<vmem>>, vector<24x64xbf16>
    %c11 = arith.constant 11 : index
    %c0_75 = arith.constant 0 : index
    %c0_76 = arith.constant 0 : index
    %84 = vector.load %arg3[%c11, %c0_75, %c0_76] : memref<72x64x64xbf16, #tpu.memory_space<vmem>>, vector<1x64x64xbf16>
    %85 = vector.shape_cast %84 : vector<1x64x64xbf16> to vector<64x64xbf16>
    %cst_77 = arith.constant dense<0.000000e+00> : vector<24x64xf32>
    %86 = tpu.matmul %83, %85, %cst_77 {dimension_numbers = #tpu.dot_dimension_numbers<[1], [0], [0], [1], [0, 0, 1, 1], [], []>} : vector<24x64xbf16>, vector<64x64xbf16>, vector<24x64xf32> -> vector<24x64xf32>
    %87 = arith.addf %82, %86 : vector<24x64xf32>
    %c6_78 = arith.constant 6 : index
    %c0_79 = arith.constant 0 : index
    %88 = vector.load %arg9[%c6_78, %c0_79] : memref<42x64xbf16, #tpu.memory_space<vmem>>, vector<24x64xbf16>
    %c12_80 = arith.constant 12 : index
    %c0_81 = arith.constant 0 : index
    %c0_82 = arith.constant 0 : index
    %89 = vector.load %arg3[%c12_80, %c0_81, %c0_82] : memref<72x64x64xbf16, #tpu.memory_space<vmem>>, vector<1x64x64xbf16>
    %90 = vector.shape_cast %89 : vector<1x64x64xbf16> to vector<64x64xbf16>
    %cst_83 = arith.constant dense<0.000000e+00> : vector<24x64xf32>
    %91 = tpu.matmul %88, %90, %cst_83 {dimension_numbers = #tpu.dot_dimension_numbers<[1], [0], [0], [1], [0, 0, 1, 1], [], []>} : vector<24x64xbf16>, vector<64x64xbf16>, vector<24x64xf32> -> vector<24x64xf32>
    %92 = arith.addf %87, %91 : vector<24x64xf32>
    %c7_84 = arith.constant 7 : index
    %c0_85 = arith.constant 0 : index
    %93 = vector.load %arg9[%c7_84, %c0_85] : memref<42x64xbf16, #tpu.memory_space<vmem>>, vector<24x64xbf16>
    %c13_86 = arith.constant 13 : index
    %c0_87 = arith.constant 0 : index
    %c0_88 = arith.constant 0 : index
    %94 = vector.load %arg3[%c13_86, %c0_87, %c0_88] : memref<72x64x64xbf16, #tpu.memory_space<vmem>>, vector<1x64x64xbf16>
    %95 = vector.shape_cast %94 : vector<1x64x64xbf16> to vector<64x64xbf16>
    %cst_89 = arith.constant dense<0.000000e+00> : vector<24x64xf32>
    %96 = tpu.matmul %93, %95, %cst_89 {dimension_numbers = #tpu.dot_dimension_numbers<[1], [0], [0], [1], [0, 0, 1, 1], [], []>} : vector<24x64xbf16>, vector<64x64xbf16>, vector<24x64xf32> -> vector<24x64xf32>
    %97 = arith.addf %92, %96 : vector<24x64xf32>
    %c8_90 = arith.constant 8 : index
    %c0_91 = arith.constant 0 : index
    %98 = vector.load %arg9[%c8_90, %c0_91] : memref<42x64xbf16, #tpu.memory_space<vmem>>, vector<24x64xbf16>
    %c14_92 = arith.constant 14 : index
    %c0_93 = arith.constant 0 : index
    %c0_94 = arith.constant 0 : index
    %99 = vector.load %arg3[%c14_92, %c0_93, %c0_94] : memref<72x64x64xbf16, #tpu.memory_space<vmem>>, vector<1x64x64xbf16>
    %100 = vector.shape_cast %99 : vector<1x64x64xbf16> to vector<64x64xbf16>
    %cst_95 = arith.constant dense<0.000000e+00> : vector<24x64xf32>
    %101 = tpu.matmul %98, %100, %cst_95 {dimension_numbers = #tpu.dot_dimension_numbers<[1], [0], [0], [1], [0, 0, 1, 1], [], []>} : vector<24x64xbf16>, vector<64x64xbf16>, vector<24x64xf32> -> vector<24x64xf32>
    %102 = arith.addf %97, %101 : vector<24x64xf32>
    %c12_96 = arith.constant 12 : index
    %c0_97 = arith.constant 0 : index
    %103 = vector.load %arg9[%c12_96, %c0_97] : memref<42x64xbf16, #tpu.memory_space<vmem>>, vector<24x64xbf16>
    %c15 = arith.constant 15 : index
    %c0_98 = arith.constant 0 : index
    %c0_99 = arith.constant 0 : index
    %104 = vector.load %arg3[%c15, %c0_98, %c0_99] : memref<72x64x64xbf16, #tpu.memory_space<vmem>>, vector<1x64x64xbf16>
    %105 = vector.shape_cast %104 : vector<1x64x64xbf16> to vector<64x64xbf16>
    %cst_100 = arith.constant dense<0.000000e+00> : vector<24x64xf32>
    %106 = tpu.matmul %103, %105, %cst_100 {dimension_numbers = #tpu.dot_dimension_numbers<[1], [0], [0], [1], [0, 0, 1, 1], [], []>} : vector<24x64xbf16>, vector<64x64xbf16>, vector<24x64xf32> -> vector<24x64xf32>
    %107 = arith.addf %102, %106 : vector<24x64xf32>
    %c13_101 = arith.constant 13 : index
    %c0_102 = arith.constant 0 : index
    %108 = vector.load %arg9[%c13_101, %c0_102] : memref<42x64xbf16, #tpu.memory_space<vmem>>, vector<24x64xbf16>
    %c16 = arith.constant 16 : index
    %c0_103 = arith.constant 0 : index
    %c0_104 = arith.constant 0 : index
    %109 = vector.load %arg3[%c16, %c0_103, %c0_104] : memref<72x64x64xbf16, #tpu.memory_space<vmem>>, vector<1x64x64xbf16>
    %110 = vector.shape_cast %109 : vector<1x64x64xbf16> to vector<64x64xbf16>
    %cst_105 = arith.constant dense<0.000000e+00> : vector<24x64xf32>
    %111 = tpu.matmul %108, %110, %cst_105 {dimension_numbers = #tpu.dot_dimension_numbers<[1], [0], [0], [1], [0, 0, 1, 1], [], []>} : vector<24x64xbf16>, vector<64x64xbf16>, vector<24x64xf32> -> vector<24x64xf32>
    %112 = arith.addf %107, %111 : vector<24x64xf32>
    %c14_106 = arith.constant 14 : index
    %c0_107 = arith.constant 0 : index
    %113 = vector.load %arg9[%c14_106, %c0_107] : memref<42x64xbf16, #tpu.memory_space<vmem>>, vector<24x64xbf16>
    %c17 = arith.constant 17 : index
    %c0_108 = arith.constant 0 : index
    %c0_109 = arith.constant 0 : index
    %114 = vector.load %arg3[%c17, %c0_108, %c0_109] : memref<72x64x64xbf16, #tpu.memory_space<vmem>>, vector<1x64x64xbf16>
    %115 = vector.shape_cast %114 : vector<1x64x64xbf16> to vector<64x64xbf16>
    %cst_110 = arith.constant dense<0.000000e+00> : vector<24x64xf32>
    %116 = tpu.matmul %113, %115, %cst_110 {dimension_numbers = #tpu.dot_dimension_numbers<[1], [0], [0], [1], [0, 0, 1, 1], [], []>} : vector<24x64xbf16>, vector<64x64xbf16>, vector<24x64xf32> -> vector<24x64xf32>
    %117 = arith.addf %112, %116 : vector<24x64xf32>
    %c7_111 = arith.constant 7 : index
    %c0_112 = arith.constant 0 : index
    %118 = vector.load %arg9[%c7_111, %c0_112] : memref<42x64xbf16, #tpu.memory_space<vmem>>, vector<24x64xbf16>
    %119 = arith.extf %118 : vector<24x64xbf16> to vector<24x64xf32>
    %c1_113 = arith.constant 1 : index
    %c0_114 = arith.constant 0 : index
    %c0_115 = arith.constant 0 : index
    %120 = vector.load %arg5[%c1_113, %c0_114, %c0_115] : memref<8x1x64xf32, #tpu.memory_space<vmem>>, vector<1x1x64xf32>
    %121 = vector.shape_cast %120 : vector<1x1x64xf32> to vector<1x64xf32>
    %122 = vector.broadcast %121 : vector<1x64xf32> to vector<24x64xf32>
    %123 = arith.mulf %117, %122 : vector<24x64xf32>
    %124 = arith.addf %123, %119 : vector<24x64xf32>
    %cst_116 = arith.constant 0.000000e+00 : f32
    %125 = vector.broadcast %cst_116 : f32 to vector<24x64xf32>
    %126 = arith.cmpf oge, %124, %125 : vector<24x64xf32>
    %cst_117 = arith.constant 2.000000e-01 : f32
    %127 = vector.broadcast %cst_117 : f32 to vector<24x64xf32>
    %128 = arith.mulf %127, %124 : vector<24x64xf32>
    %129 = arith.select %126, %124, %128 : vector<24x64xi1>, vector<24x64xf32>
    %130 = vector.broadcast %3 : vector<24x1xf32> to vector<24x64xf32>
    %131 = arith.mulf %129, %130 : vector<24x64xf32>
    %132 = arith.truncf %131 : vector<24x64xf32> to vector<24x64xbf16>
    %c7_118 = arith.constant 7 : index
    %c0_119 = arith.constant 0 : index
    %133 = vector.load %arg9[%c7_118, %c0_119] : memref<42x64xbf16, #tpu.memory_space<vmem>>, vector<24x64xbf16>
    tpu.vector_store %arg9[%c7_118, %c0_119], %132 {strides = array<i32>} : memref<42x64xbf16, #tpu.memory_space<vmem>>, vector<24x64xbf16>,
    %c2_120 = arith.constant 2 : index
    %c0_121 = arith.constant 0 : index
    %c0_122 = arith.constant 0 : index
    %134 = vector.load %arg4[%c2_120, %c0_121, %c0_122] : memref<8x1x64xf32, #tpu.memory_space<vmem>>, vector<1x1x64xf32>
    %135 = vector.shape_cast %134 : vector<1x1x64xf32> to vector<1x64xf32>
    %136 = vector.shape_cast %135 : vector<1x64xf32> to vector<1x64xf32>
    %137 = vector.broadcast %136 : vector<1x64xf32> to vector<24x64xf32>
    %c0_123 = arith.constant 0 : index
    %c0_124 = arith.constant 0 : index
    %138 = vector.load %arg9[%c0_123, %c0_124] : memref<42x64xbf16, #tpu.memory_space<vmem>>, vector<24x64xbf16>
    %c18 = arith.constant 18 : index
    %c0_125 = arith.constant 0 : index
    %c0_126 = arith.constant 0 : index
    %139 = vector.load %arg3[%c18, %c0_125, %c0_126] : memref<72x64x64xbf16, #tpu.memory_space<vmem>>, vector<1x64x64xbf16>
    %140 = vector.shape_cast %139 : vector<1x64x64xbf16> to vector<64x64xbf16>
    %cst_127 = arith.constant dense<0.000000e+00> : vector<24x64xf32>
    %141 = tpu.matmul %138, %140, %cst_127 {dimension_numbers = #tpu.dot_dimension_numbers<[1], [0], [0], [1], [0, 0, 1, 1], [], []>} : vector<24x64xbf16>, vector<64x64xbf16>, vector<24x64xf32> -> vector<24x64xf32>
    %142 = arith.addf %137, %141 : vector<24x64xf32>
    %c1_128 = arith.constant 1 : index
    %c0_129 = arith.constant 0 : index
    %143 = vector.load %arg9[%c1_128, %c0_129] : memref<42x64xbf16, #tpu.memory_space<vmem>>, vector<24x64xbf16>
    %c19 = arith.constant 19 : index
    %c0_130 = arith.constant 0 : index
    %c0_131 = arith.constant 0 : index
    %144 = vector.load %arg3[%c19, %c0_130, %c0_131] : memref<72x64x64xbf16, #tpu.memory_space<vmem>>, vector<1x64x64xbf16>
    %145 = vector.shape_cast %144 : vector<1x64x64xbf16> to vector<64x64xbf16>
    %cst_132 = arith.constant dense<0.000000e+00> : vector<24x64xf32>
    %146 = tpu.matmul %143, %145, %cst_132 {dimension_numbers = #tpu.dot_dimension_numbers<[1], [0], [0], [1], [0, 0, 1, 1], [], []>} : vector<24x64xbf16>, vector<64x64xbf16>, vector<24x64xf32> -> vector<24x64xf32>
    %147 = arith.addf %142, %146 : vector<24x64xf32>
    %c2_133 = arith.constant 2 : index
    %c0_134 = arith.constant 0 : index
    %148 = vector.load %arg9[%c2_133, %c0_134] : memref<42x64xbf16, #tpu.memory_space<vmem>>, vector<24x64xbf16>
    %c20 = arith.constant 20 : index
    %c0_135 = arith.constant 0 : index
    %c0_136 = arith.constant 0 : index
    %149 = vector.load %arg3[%c20, %c0_135, %c0_136] : memref<72x64x64xbf16, #tpu.memory_space<vmem>>, vector<1x64x64xbf16>
    %150 = vector.shape_cast %149 : vector<1x64x64xbf16> to vector<64x64xbf16>
    %cst_137 = arith.constant dense<0.000000e+00> : vector<24x64xf32>
    %151 = tpu.matmul %148, %150, %cst_137 {dimension_numbers = #tpu.dot_dimension_numbers<[1], [0], [0], [1], [0, 0, 1, 1], [], []>} : vector<24x64xbf16>, vector<64x64xbf16>, vector<24x64xf32> -> vector<24x64xf32>
    %152 = arith.addf %147, %151 : vector<24x64xf32>
    %c6_138 = arith.constant 6 : index
    %c0_139 = arith.constant 0 : index
    %153 = vector.load %arg9[%c6_138, %c0_139] : memref<42x64xbf16, #tpu.memory_space<vmem>>, vector<24x64xbf16>
    %c21 = arith.constant 21 : index
    %c0_140 = arith.constant 0 : index
    %c0_141 = arith.constant 0 : index
    %154 = vector.load %arg3[%c21, %c0_140, %c0_141] : memref<72x64x64xbf16, #tpu.memory_space<vmem>>, vector<1x64x64xbf16>
    %155 = vector.shape_cast %154 : vector<1x64x64xbf16> to vector<64x64xbf16>
    %cst_142 = arith.constant dense<0.000000e+00> : vector<24x64xf32>
    %156 = tpu.matmul %153, %155, %cst_142 {dimension_numbers = #tpu.dot_dimension_numbers<[1], [0], [0], [1], [0, 0, 1, 1], [], []>} : vector<24x64xbf16>, vector<64x64xbf16>, vector<24x64xf32> -> vector<24x64xf32>
    %157 = arith.addf %152, %156 : vector<24x64xf32>
    %c7_143 = arith.constant 7 : index
    %c0_144 = arith.constant 0 : index
    %158 = vector.load %arg9[%c7_143, %c0_144] : memref<42x64xbf16, #tpu.memory_space<vmem>>, vector<24x64xbf16>
    %c22 = arith.constant 22 : index
    %c0_145 = arith.constant 0 : index
    %c0_146 = arith.constant 0 : index
    %159 = vector.load %arg3[%c22, %c0_145, %c0_146] : memref<72x64x64xbf16, #tpu.memory_space<vmem>>, vector<1x64x64xbf16>
    %160 = vector.shape_cast %159 : vector<1x64x64xbf16> to vector<64x64xbf16>
    %cst_147 = arith.constant dense<0.000000e+00> : vector<24x64xf32>
    %161 = tpu.matmul %158, %160, %cst_147 {dimension_numbers = #tpu.dot_dimension_numbers<[1], [0], [0], [1], [0, 0, 1, 1], [], []>} : vector<24x64xbf16>, vector<64x64xbf16>, vector<24x64xf32> -> vector<24x64xf32>
    %162 = arith.addf %157, %161 : vector<24x64xf32>
    %c8_148 = arith.constant 8 : index
    %c0_149 = arith.constant 0 : index
    %163 = vector.load %arg9[%c8_148, %c0_149] : memref<42x64xbf16, #tpu.memory_space<vmem>>, vector<24x64xbf16>
    %c23 = arith.constant 23 : index
    %c0_150 = arith.constant 0 : index
    %c0_151 = arith.constant 0 : index
    %164 = vector.load %arg3[%c23, %c0_150, %c0_151] : memref<72x64x64xbf16, #tpu.memory_space<vmem>>, vector<1x64x64xbf16>
    %165 = vector.shape_cast %164 : vector<1x64x64xbf16> to vector<64x64xbf16>
    %cst_152 = arith.constant dense<0.000000e+00> : vector<24x64xf32>
    %166 = tpu.matmul %163, %165, %cst_152 {dimension_numbers = #tpu.dot_dimension_numbers<[1], [0], [0], [1], [0, 0, 1, 1], [], []>} : vector<24x64xbf16>, vector<64x64xbf16>, vector<24x64xf32> -> vector<24x64xf32>
    %167 = arith.addf %162, %166 : vector<24x64xf32>
    %c12_153 = arith.constant 12 : index
    %c0_154 = arith.constant 0 : index
    %168 = vector.load %arg9[%c12_153, %c0_154] : memref<42x64xbf16, #tpu.memory_space<vmem>>, vector<24x64xbf16>
    %c24 = arith.constant 24 : index
    %c0_155 = arith.constant 0 : index
    %c0_156 = arith.constant 0 : index
    %169 = vector.load %arg3[%c24, %c0_155, %c0_156] : memref<72x64x64xbf16, #tpu.memory_space<vmem>>, vector<1x64x64xbf16>
    %170 = vector.shape_cast %169 : vector<1x64x64xbf16> to vector<64x64xbf16>
    %cst_157 = arith.constant dense<0.000000e+00> : vector<24x64xf32>
    %171 = tpu.matmul %168, %170, %cst_157 {dimension_numbers = #tpu.dot_dimension_numbers<[1], [0], [0], [1], [0, 0, 1, 1], [], []>} : vector<24x64xbf16>, vector<64x64xbf16>, vector<24x64xf32> -> vector<24x64xf32>
    %172 = arith.addf %167, %171 : vector<24x64xf32>
    %c13_158 = arith.constant 13 : index
    %c0_159 = arith.constant 0 : index
    %173 = vector.load %arg9[%c13_158, %c0_159] : memref<42x64xbf16, #tpu.memory_space<vmem>>, vector<24x64xbf16>
    %c25 = arith.constant 25 : index
    %c0_160 = arith.constant 0 : index
    %c0_161 = arith.constant 0 : index
    %174 = vector.load %arg3[%c25, %c0_160, %c0_161] : memref<72x64x64xbf16, #tpu.memory_space<vmem>>, vector<1x64x64xbf16>
    %175 = vector.shape_cast %174 : vector<1x64x64xbf16> to vector<64x64xbf16>
    %cst_162 = arith.constant dense<0.000000e+00> : vector<24x64xf32>
    %176 = tpu.matmul %173, %175, %cst_162 {dimension_numbers = #tpu.dot_dimension_numbers<[1], [0], [0], [1], [0, 0, 1, 1], [], []>} : vector<24x64xbf16>, vector<64x64xbf16>, vector<24x64xf32> -> vector<24x64xf32>
    %177 = arith.addf %172, %176 : vector<24x64xf32>
    %c14_163 = arith.constant 14 : index
    %c0_164 = arith.constant 0 : index
    %178 = vector.load %arg9[%c14_163, %c0_164] : memref<42x64xbf16, #tpu.memory_space<vmem>>, vector<24x64xbf16>
    %c26 = arith.constant 26 : index
    %c0_165 = arith.constant 0 : index
    %c0_166 = arith.constant 0 : index
    %179 = vector.load %arg3[%c26, %c0_165, %c0_166] : memref<72x64x64xbf16, #tpu.memory_space<vmem>>, vector<1x64x64xbf16>
    %180 = vector.shape_cast %179 : vector<1x64x64xbf16> to vector<64x64xbf16>
    %cst_167 = arith.constant dense<0.000000e+00> : vector<24x64xf32>
    %181 = tpu.matmul %178, %180, %cst_167 {dimension_numbers = #tpu.dot_dimension_numbers<[1], [0], [0], [1], [0, 0, 1, 1], [], []>} : vector<24x64xbf16>, vector<64x64xbf16>, vector<24x64xf32> -> vector<24x64xf32>
    %182 = arith.addf %177, %181 : vector<24x64xf32>
    %c7_168 = arith.constant 7 : index
    %c0_169 = arith.constant 0 : index
    %183 = vector.load %arg9[%c7_168, %c0_169] : memref<42x64xbf16, #tpu.memory_space<vmem>>, vector<24x64xbf16>
    %184 = arith.extf %183 : vector<24x64xbf16> to vector<24x64xf32>
    %c2_170 = arith.constant 2 : index
    %c0_171 = arith.constant 0 : index
    %c0_172 = arith.constant 0 : index
    %185 = vector.load %arg5[%c2_170, %c0_171, %c0_172] : memref<8x1x64xf32, #tpu.memory_space<vmem>>, vector<1x1x64xf32>
    %186 = vector.shape_cast %185 : vector<1x1x64xf32> to vector<1x64xf32>
    %187 = vector.broadcast %186 : vector<1x64xf32> to vector<24x64xf32>
    %188 = arith.mulf %182, %187 : vector<24x64xf32>
    %189 = arith.addf %188, %184 : vector<24x64xf32>
    %cst_173 = arith.constant 0.000000e+00 : f32
    %190 = vector.broadcast %cst_173 : f32 to vector<24x64xf32>
    %191 = arith.cmpf oge, %189, %190 : vector<24x64xf32>
    %cst_174 = arith.constant 2.000000e-01 : f32
    %192 = vector.broadcast %cst_174 : f32 to vector<24x64xf32>
    %193 = arith.mulf %192, %189 : vector<24x64xf32>
    %194 = arith.select %191, %189, %193 : vector<24x64xi1>, vector<24x64xf32>
    %195 = vector.broadcast %3 : vector<24x1xf32> to vector<24x64xf32>
    %196 = arith.mulf %194, %195 : vector<24x64xf32>
    %197 = arith.truncf %196 : vector<24x64xf32> to vector<24x64xbf16>
    %c7_175 = arith.constant 7 : index
    %c0_176 = arith.constant 0 : index
    %198 = vector.load %arg9[%c7_175, %c0_176] : memref<42x64xbf16, #tpu.memory_space<vmem>>, vector<24x64xbf16>
    tpu.vector_store %arg9[%c7_175, %c0_176], %197 {strides = array<i32>} : memref<42x64xbf16, #tpu.memory_space<vmem>>, vector<24x64xbf16>,
    %c3_177 = arith.constant 3 : index
    %c0_178 = arith.constant 0 : index
    %c0_179 = arith.constant 0 : index
    %199 = vector.load %arg4[%c3_177, %c0_178, %c0_179] : memref<8x1x64xf32, #tpu.memory_space<vmem>>, vector<1x1x64xf32>
    %200 = vector.shape_cast %199 : vector<1x1x64xf32> to vector<1x64xf32>
    %201 = vector.shape_cast %200 : vector<1x64xf32> to vector<1x64xf32>
    %202 = vector.broadcast %201 : vector<1x64xf32> to vector<24x64xf32>
    %c0_180 = arith.constant 0 : index
    %c0_181 = arith.constant 0 : index
    %203 = vector.load %arg9[%c0_180, %c0_181] : memref<42x64xbf16, #tpu.memory_space<vmem>>, vector<24x64xbf16>
    %c27 = arith.constant 27 : index
    %c0_182 = arith.constant 0 : index
    %c0_183 = arith.constant 0 : index
    %204 = vector.load %arg3[%c27, %c0_182, %c0_183] : memref<72x64x64xbf16, #tpu.memory_space<vmem>>, vector<1x64x64xbf16>
    %205 = vector.shape_cast %204 : vector<1x64x64xbf16> to vector<64x64xbf16>
    %cst_184 = arith.constant dense<0.000000e+00> : vector<24x64xf32>
    %206 = tpu.matmul %203, %205, %cst_184 {dimension_numbers = #tpu.dot_dimension_numbers<[1], [0], [0], [1], [0, 0, 1, 1], [], []>} : vector<24x64xbf16>, vector<64x64xbf16>, vector<24x64xf32> -> vector<24x64xf32>
    %207 = arith.addf %202, %206 : vector<24x64xf32>
    %c1_185 = arith.constant 1 : index
    %c0_186 = arith.constant 0 : index
    %208 = vector.load %arg9[%c1_185, %c0_186] : memref<42x64xbf16, #tpu.memory_space<vmem>>, vector<24x64xbf16>
    %c28 = arith.constant 28 : index
    %c0_187 = arith.constant 0 : index
    %c0_188 = arith.constant 0 : index
    %209 = vector.load %arg3[%c28, %c0_187, %c0_188] : memref<72x64x64xbf16, #tpu.memory_space<vmem>>, vector<1x64x64xbf16>
    %210 = vector.shape_cast %209 : vector<1x64x64xbf16> to vector<64x64xbf16>
    %cst_189 = arith.constant dense<0.000000e+00> : vector<24x64xf32>
    %211 = tpu.matmul %208, %210, %cst_189 {dimension_numbers = #tpu.dot_dimension_numbers<[1], [0], [0], [1], [0, 0, 1, 1], [], []>} : vector<24x64xbf16>, vector<64x64xbf16>, vector<24x64xf32> -> vector<24x64xf32>
    %212 = arith.addf %207, %211 : vector<24x64xf32>
    %c2_190 = arith.constant 2 : index
    %c0_191 = arith.constant 0 : index
    %213 = vector.load %arg9[%c2_190, %c0_191] : memref<42x64xbf16, #tpu.memory_space<vmem>>, vector<24x64xbf16>
    %c29 = arith.constant 29 : index
    %c0_192 = arith.constant 0 : index
    %c0_193 = arith.constant 0 : index
    %214 = vector.load %arg3[%c29, %c0_192, %c0_193] : memref<72x64x64xbf16, #tpu.memory_space<vmem>>, vector<1x64x64xbf16>
    %215 = vector.shape_cast %214 : vector<1x64x64xbf16> to vector<64x64xbf16>
    %cst_194 = arith.constant dense<0.000000e+00> : vector<24x64xf32>
    %216 = tpu.matmul %213, %215, %cst_194 {dimension_numbers = #tpu.dot_dimension_numbers<[1], [0], [0], [1], [0, 0, 1, 1], [], []>} : vector<24x64xbf16>, vector<64x64xbf16>, vector<24x64xf32> -> vector<24x64xf32>
    %217 = arith.addf %212, %216 : vector<24x64xf32>
    %c6_195 = arith.constant 6 : index
    %c0_196 = arith.constant 0 : index
    %218 = vector.load %arg9[%c6_195, %c0_196] : memref<42x64xbf16, #tpu.memory_space<vmem>>, vector<24x64xbf16>
    %c30 = arith.constant 30 : index
    %c0_197 = arith.constant 0 : index
    %c0_198 = arith.constant 0 : index
    %219 = vector.load %arg3[%c30, %c0_197, %c0_198] : memref<72x64x64xbf16, #tpu.memory_space<vmem>>, vector<1x64x64xbf16>
    %220 = vector.shape_cast %219 : vector<1x64x64xbf16> to vector<64x64xbf16>
    %cst_199 = arith.constant dense<0.000000e+00> : vector<24x64xf32>
    %221 = tpu.matmul %218, %220, %cst_199 {dimension_numbers = #tpu.dot_dimension_numbers<[1], [0], [0], [1], [0, 0, 1, 1], [], []>} : vector<24x64xbf16>, vector<64x64xbf16>, vector<24x64xf32> -> vector<24x64xf32>
    %222 = arith.addf %217, %221 : vector<24x64xf32>
    %c7_200 = arith.constant 7 : index
    %c0_201 = arith.constant 0 : index
    %223 = vector.load %arg9[%c7_200, %c0_201] : memref<42x64xbf16, #tpu.memory_space<vmem>>, vector<24x64xbf16>
    %c31 = arith.constant 31 : index
    %c0_202 = arith.constant 0 : index
    %c0_203 = arith.constant 0 : index
    %224 = vector.load %arg3[%c31, %c0_202, %c0_203] : memref<72x64x64xbf16, #tpu.memory_space<vmem>>, vector<1x64x64xbf16>
    %225 = vector.shape_cast %224 : vector<1x64x64xbf16> to vector<64x64xbf16>
    %cst_204 = arith.constant dense<0.000000e+00> : vector<24x64xf32>
    %226 = tpu.matmul %223, %225, %cst_204 {dimension_numbers = #tpu.dot_dimension_numbers<[1], [0], [0], [1], [0, 0, 1, 1], [], []>} : vector<24x64xbf16>, vector<64x64xbf16>, vector<24x64xf32> -> vector<24x64xf32>
    %227 = arith.addf %222, %226 : vector<24x64xf32>
    %c8_205 = arith.constant 8 : index
    %c0_206 = arith.constant 0 : index
    %228 = vector.load %arg9[%c8_205, %c0_206] : memref<42x64xbf16, #tpu.memory_space<vmem>>, vector<24x64xbf16>
    %c32 = arith.constant 32 : index
    %c0_207 = arith.constant 0 : index
    %c0_208 = arith.constant 0 : index
    %229 = vector.load %arg3[%c32, %c0_207, %c0_208] : memref<72x64x64xbf16, #tpu.memory_space<vmem>>, vector<1x64x64xbf16>
    %230 = vector.shape_cast %229 : vector<1x64x64xbf16> to vector<64x64xbf16>
    %cst_209 = arith.constant dense<0.000000e+00> : vector<24x64xf32>
    %231 = tpu.matmul %228, %230, %cst_209 {dimension_numbers = #tpu.dot_dimension_numbers<[1], [0], [0], [1], [0, 0, 1, 1], [], []>} : vector<24x64xbf16>, vector<64x64xbf16>, vector<24x64xf32> -> vector<24x64xf32>
    %232 = arith.addf %227, %231 : vector<24x64xf32>
    %c12_210 = arith.constant 12 : index
    %c0_211 = arith.constant 0 : index
    %233 = vector.load %arg9[%c12_210, %c0_211] : memref<42x64xbf16, #tpu.memory_space<vmem>>, vector<24x64xbf16>
    %c33 = arith.constant 33 : index
    %c0_212 = arith.constant 0 : index
    %c0_213 = arith.constant 0 : index
    %234 = vector.load %arg3[%c33, %c0_212, %c0_213] : memref<72x64x64xbf16, #tpu.memory_space<vmem>>, vector<1x64x64xbf16>
    %235 = vector.shape_cast %234 : vector<1x64x64xbf16> to vector<64x64xbf16>
    %cst_214 = arith.constant dense<0.000000e+00> : vector<24x64xf32>
    %236 = tpu.matmul %233, %235, %cst_214 {dimension_numbers = #tpu.dot_dimension_numbers<[1], [0], [0], [1], [0, 0, 1, 1], [], []>} : vector<24x64xbf16>, vector<64x64xbf16>, vector<24x64xf32> -> vector<24x64xf32>
    %237 = arith.addf %232, %236 : vector<24x64xf32>
    %c13_215 = arith.constant 13 : index
    %c0_216 = arith.constant 0 : index
    %238 = vector.load %arg9[%c13_215, %c0_216] : memref<42x64xbf16, #tpu.memory_space<vmem>>, vector<24x64xbf16>
    %c34 = arith.constant 34 : index
    %c0_217 = arith.constant 0 : index
    %c0_218 = arith.constant 0 : index
    %239 = vector.load %arg3[%c34, %c0_217, %c0_218] : memref<72x64x64xbf16, #tpu.memory_space<vmem>>, vector<1x64x64xbf16>
    %240 = vector.shape_cast %239 : vector<1x64x64xbf16> to vector<64x64xbf16>
    %cst_219 = arith.constant dense<0.000000e+00> : vector<24x64xf32>
    %241 = tpu.matmul %238, %240, %cst_219 {dimension_numbers = #tpu.dot_dimension_numbers<[1], [0], [0], [1], [0, 0, 1, 1], [], []>} : vector<24x64xbf16>, vector<64x64xbf16>, vector<24x64xf32> -> vector<24x64xf32>
    %242 = arith.addf %237, %241 : vector<24x64xf32>
    %c14_220 = arith.constant 14 : index
    %c0_221 = arith.constant 0 : index
    %243 = vector.load %arg9[%c14_220, %c0_221] : memref<42x64xbf16, #tpu.memory_space<vmem>>, vector<24x64xbf16>
    %c35 = arith.constant 35 : index
    %c0_222 = arith.constant 0 : index
    %c0_223 = arith.constant 0 : index
    %244 = vector.load %arg3[%c35, %c0_222, %c0_223] : memref<72x64x64xbf16, #tpu.memory_space<vmem>>, vector<1x64x64xbf16>
    %245 = vector.shape_cast %244 : vector<1x64x64xbf16> to vector<64x64xbf16>
    %cst_224 = arith.constant dense<0.000000e+00> : vector<24x64xf32>
    %246 = tpu.matmul %243, %245, %cst_224 {dimension_numbers = #tpu.dot_dimension_numbers<[1], [0], [0], [1], [0, 0, 1, 1], [], []>} : vector<24x64xbf16>, vector<64x64xbf16>, vector<24x64xf32> -> vector<24x64xf32>
    %247 = arith.addf %242, %246 : vector<24x64xf32>
    %c7_225 = arith.constant 7 : index
    %c0_226 = arith.constant 0 : index
    %248 = vector.load %arg9[%c7_225, %c0_226] : memref<42x64xbf16, #tpu.memory_space<vmem>>, vector<24x64xbf16>
    %249 = arith.extf %248 : vector<24x64xbf16> to vector<24x64xf32>
    %c3_227 = arith.constant 3 : index
    %c0_228 = arith.constant 0 : index
    %c0_229 = arith.constant 0 : index
    %250 = vector.load %arg5[%c3_227, %c0_228, %c0_229] : memref<8x1x64xf32, #tpu.memory_space<vmem>>, vector<1x1x64xf32>
    %251 = vector.shape_cast %250 : vector<1x1x64xf32> to vector<1x64xf32>
    %252 = vector.broadcast %251 : vector<1x64xf32> to vector<24x64xf32>
    %253 = arith.mulf %247, %252 : vector<24x64xf32>
    %254 = arith.addf %253, %249 : vector<24x64xf32>
    %cst_230 = arith.constant 0.000000e+00 : f32
    %255 = vector.broadcast %cst_230 : f32 to vector<24x64xf32>
    %256 = arith.cmpf oge, %254, %255 : vector<24x64xf32>
    %cst_231 = arith.constant 2.000000e-01 : f32
    %257 = vector.broadcast %cst_231 : f32 to vector<24x64xf32>
    %258 = arith.mulf %257, %254 : vector<24x64xf32>
    %259 = arith.select %256, %254, %258 : vector<24x64xi1>, vector<24x64xf32>
    %260 = vector.broadcast %3 : vector<24x1xf32> to vector<24x64xf32>
    %261 = arith.mulf %259, %260 : vector<24x64xf32>
    %262 = arith.truncf %261 : vector<24x64xf32> to vector<24x64xbf16>
    %c7_232 = arith.constant 7 : index
    %c0_233 = arith.constant 0 : index
    %263 = vector.load %arg9[%c7_232, %c0_233] : memref<42x64xbf16, #tpu.memory_space<vmem>>, vector<24x64xbf16>
    tpu.vector_store %arg9[%c7_232, %c0_233], %262 {strides = array<i32>} : memref<42x64xbf16, #tpu.memory_space<vmem>>, vector<24x64xbf16>,
    %c4_234 = arith.constant 4 : index
    %c0_235 = arith.constant 0 : index
    %c0_236 = arith.constant 0 : index
    %264 = vector.load %arg4[%c4_234, %c0_235, %c0_236] : memref<8x1x64xf32, #tpu.memory_space<vmem>>, vector<1x1x64xf32>
    %265 = vector.shape_cast %264 : vector<1x1x64xf32> to vector<1x64xf32>
    %266 = vector.shape_cast %265 : vector<1x64xf32> to vector<1x64xf32>
    %267 = vector.broadcast %266 : vector<1x64xf32> to vector<24x64xf32>
    %c0_237 = arith.constant 0 : index
    %c0_238 = arith.constant 0 : index
    %268 = vector.load %arg9[%c0_237, %c0_238] : memref<42x64xbf16, #tpu.memory_space<vmem>>, vector<24x64xbf16>
    %c36 = arith.constant 36 : index
    %c0_239 = arith.constant 0 : index
    %c0_240 = arith.constant 0 : index
    %269 = vector.load %arg3[%c36, %c0_239, %c0_240] : memref<72x64x64xbf16, #tpu.memory_space<vmem>>, vector<1x64x64xbf16>
    %270 = vector.shape_cast %269 : vector<1x64x64xbf16> to vector<64x64xbf16>
    %cst_241 = arith.constant dense<0.000000e+00> : vector<24x64xf32>
    %271 = tpu.matmul %268, %270, %cst_241 {dimension_numbers = #tpu.dot_dimension_numbers<[1], [0], [0], [1], [0, 0, 1, 1], [], []>} : vector<24x64xbf16>, vector<64x64xbf16>, vector<24x64xf32> -> vector<24x64xf32>
    %272 = arith.addf %267, %271 : vector<24x64xf32>
    %c1_242 = arith.constant 1 : index
    %c0_243 = arith.constant 0 : index
    %273 = vector.load %arg9[%c1_242, %c0_243] : memref<42x64xbf16, #tpu.memory_space<vmem>>, vector<24x64xbf16>
    %c37 = arith.constant 37 : index
    %c0_244 = arith.constant 0 : index
    %c0_245 = arith.constant 0 : index
    %274 = vector.load %arg3[%c37, %c0_244, %c0_245] : memref<72x64x64xbf16, #tpu.memory_space<vmem>>, vector<1x64x64xbf16>
    %275 = vector.shape_cast %274 : vector<1x64x64xbf16> to vector<64x64xbf16>
    %cst_246 = arith.constant dense<0.000000e+00> : vector<24x64xf32>
    %276 = tpu.matmul %273, %275, %cst_246 {dimension_numbers = #tpu.dot_dimension_numbers<[1], [0], [0], [1], [0, 0, 1, 1], [], []>} : vector<24x64xbf16>, vector<64x64xbf16>, vector<24x64xf32> -> vector<24x64xf32>
    %277 = arith.addf %272, %276 : vector<24x64xf32>
    %c2_247 = arith.constant 2 : index
    %c0_248 = arith.constant 0 : index
    %278 = vector.load %arg9[%c2_247, %c0_248] : memref<42x64xbf16, #tpu.memory_space<vmem>>, vector<24x64xbf16>
    %c38 = arith.constant 38 : index
    %c0_249 = arith.constant 0 : index
    %c0_250 = arith.constant 0 : index
    %279 = vector.load %arg3[%c38, %c0_249, %c0_250] : memref<72x64x64xbf16, #tpu.memory_space<vmem>>, vector<1x64x64xbf16>
    %280 = vector.shape_cast %279 : vector<1x64x64xbf16> to vector<64x64xbf16>
    %cst_251 = arith.constant dense<0.000000e+00> : vector<24x64xf32>
    %281 = tpu.matmul %278, %280, %cst_251 {dimension_numbers = #tpu.dot_dimension_numbers<[1], [0], [0], [1], [0, 0, 1, 1], [], []>} : vector<24x64xbf16>, vector<64x64xbf16>, vector<24x64xf32> -> vector<24x64xf32>
    %282 = arith.addf %277, %281 : vector<24x64xf32>
    %c6_252 = arith.constant 6 : index
    %c0_253 = arith.constant 0 : index
    %283 = vector.load %arg9[%c6_252, %c0_253] : memref<42x64xbf16, #tpu.memory_space<vmem>>, vector<24x64xbf16>
    %c39 = arith.constant 39 : index
    %c0_254 = arith.constant 0 : index
    %c0_255 = arith.constant 0 : index
    %284 = vector.load %arg3[%c39, %c0_254, %c0_255] : memref<72x64x64xbf16, #tpu.memory_space<vmem>>, vector<1x64x64xbf16>
    %285 = vector.shape_cast %284 : vector<1x64x64xbf16> to vector<64x64xbf16>
    %cst_256 = arith.constant dense<0.000000e+00> : vector<24x64xf32>
    %286 = tpu.matmul %283, %285, %cst_256 {dimension_numbers = #tpu.dot_dimension_numbers<[1], [0], [0], [1], [0, 0, 1, 1], [], []>} : vector<24x64xbf16>, vector<64x64xbf16>, vector<24x64xf32> -> vector<24x64xf32>
    %287 = arith.addf %282, %286 : vector<24x64xf32>
    %c7_257 = arith.constant 7 : index
    %c0_258 = arith.constant 0 : index
    %288 = vector.load %arg9[%c7_257, %c0_258] : memref<42x64xbf16, #tpu.memory_space<vmem>>, vector<24x64xbf16>
    %c40 = arith.constant 40 : index
    %c0_259 = arith.constant 0 : index
    %c0_260 = arith.constant 0 : index
    %289 = vector.load %arg3[%c40, %c0_259, %c0_260] : memref<72x64x64xbf16, #tpu.memory_space<vmem>>, vector<1x64x64xbf16>
    %290 = vector.shape_cast %289 : vector<1x64x64xbf16> to vector<64x64xbf16>
    %cst_261 = arith.constant dense<0.000000e+00> : vector<24x64xf32>
    %291 = tpu.matmul %288, %290, %cst_261 {dimension_numbers = #tpu.dot_dimension_numbers<[1], [0], [0], [1], [0, 0, 1, 1], [], []>} : vector<24x64xbf16>, vector<64x64xbf16>, vector<24x64xf32> -> vector<24x64xf32>
    %292 = arith.addf %287, %291 : vector<24x64xf32>
    %c8_262 = arith.constant 8 : index
    %c0_263 = arith.constant 0 : index
    %293 = vector.load %arg9[%c8_262, %c0_263] : memref<42x64xbf16, #tpu.memory_space<vmem>>, vector<24x64xbf16>
    %c41 = arith.constant 41 : index
    %c0_264 = arith.constant 0 : index
    %c0_265 = arith.constant 0 : index
    %294 = vector.load %arg3[%c41, %c0_264, %c0_265] : memref<72x64x64xbf16, #tpu.memory_space<vmem>>, vector<1x64x64xbf16>
    %295 = vector.shape_cast %294 : vector<1x64x64xbf16> to vector<64x64xbf16>
    %cst_266 = arith.constant dense<0.000000e+00> : vector<24x64xf32>
    %296 = tpu.matmul %293, %295, %cst_266 {dimension_numbers = #tpu.dot_dimension_numbers<[1], [0], [0], [1], [0, 0, 1, 1], [], []>} : vector<24x64xbf16>, vector<64x64xbf16>, vector<24x64xf32> -> vector<24x64xf32>
    %297 = arith.addf %292, %296 : vector<24x64xf32>
    %c12_267 = arith.constant 12 : index
    %c0_268 = arith.constant 0 : index
    %298 = vector.load %arg9[%c12_267, %c0_268] : memref<42x64xbf16, #tpu.memory_space<vmem>>, vector<24x64xbf16>
    %c42 = arith.constant 42 : index
    %c0_269 = arith.constant 0 : index
    %c0_270 = arith.constant 0 : index
    %299 = vector.load %arg3[%c42, %c0_269, %c0_270] : memref<72x64x64xbf16, #tpu.memory_space<vmem>>, vector<1x64x64xbf16>
    %300 = vector.shape_cast %299 : vector<1x64x64xbf16> to vector<64x64xbf16>
    %cst_271 = arith.constant dense<0.000000e+00> : vector<24x64xf32>
    %301 = tpu.matmul %298, %300, %cst_271 {dimension_numbers = #tpu.dot_dimension_numbers<[1], [0], [0], [1], [0, 0, 1, 1], [], []>} : vector<24x64xbf16>, vector<64x64xbf16>, vector<24x64xf32> -> vector<24x64xf32>
    %302 = arith.addf %297, %301 : vector<24x64xf32>
    %c13_272 = arith.constant 13 : index
    %c0_273 = arith.constant 0 : index
    %303 = vector.load %arg9[%c13_272, %c0_273] : memref<42x64xbf16, #tpu.memory_space<vmem>>, vector<24x64xbf16>
    %c43 = arith.constant 43 : index
    %c0_274 = arith.constant 0 : index
    %c0_275 = arith.constant 0 : index
    %304 = vector.load %arg3[%c43, %c0_274, %c0_275] : memref<72x64x64xbf16, #tpu.memory_space<vmem>>, vector<1x64x64xbf16>
    %305 = vector.shape_cast %304 : vector<1x64x64xbf16> to vector<64x64xbf16>
    %cst_276 = arith.constant dense<0.000000e+00> : vector<24x64xf32>
    %306 = tpu.matmul %303, %305, %cst_276 {dimension_numbers = #tpu.dot_dimension_numbers<[1], [0], [0], [1], [0, 0, 1, 1], [], []>} : vector<24x64xbf16>, vector<64x64xbf16>, vector<24x64xf32> -> vector<24x64xf32>
    %307 = arith.addf %302, %306 : vector<24x64xf32>
    %c14_277 = arith.constant 14 : index
    %c0_278 = arith.constant 0 : index
    %308 = vector.load %arg9[%c14_277, %c0_278] : memref<42x64xbf16, #tpu.memory_space<vmem>>, vector<24x64xbf16>
    %c44 = arith.constant 44 : index
    %c0_279 = arith.constant 0 : index
    %c0_280 = arith.constant 0 : index
    %309 = vector.load %arg3[%c44, %c0_279, %c0_280] : memref<72x64x64xbf16, #tpu.memory_space<vmem>>, vector<1x64x64xbf16>
    %310 = vector.shape_cast %309 : vector<1x64x64xbf16> to vector<64x64xbf16>
    %cst_281 = arith.constant dense<0.000000e+00> : vector<24x64xf32>
    %311 = tpu.matmul %308, %310, %cst_281 {dimension_numbers = #tpu.dot_dimension_numbers<[1], [0], [0], [1], [0, 0, 1, 1], [], []>} : vector<24x64xbf16>, vector<64x64xbf16>, vector<24x64xf32> -> vector<24x64xf32>
    %312 = arith.addf %307, %311 : vector<24x64xf32>
    %c7_282 = arith.constant 7 : index
    %c0_283 = arith.constant 0 : index
    %313 = vector.load %arg9[%c7_282, %c0_283] : memref<42x64xbf16, #tpu.memory_space<vmem>>, vector<24x64xbf16>
    %314 = arith.extf %313 : vector<24x64xbf16> to vector<24x64xf32>
    %c4_284 = arith.constant 4 : index
    %c0_285 = arith.constant 0 : index
    %c0_286 = arith.constant 0 : index
    %315 = vector.load %arg5[%c4_284, %c0_285, %c0_286] : memref<8x1x64xf32, #tpu.memory_space<vmem>>, vector<1x1x64xf32>
    %316 = vector.shape_cast %315 : vector<1x1x64xf32> to vector<1x64xf32>
    %317 = vector.broadcast %316 : vector<1x64xf32> to vector<24x64xf32>
    %318 = arith.mulf %312, %317 : vector<24x64xf32>
    %319 = arith.addf %318, %314 : vector<24x64xf32>
    %cst_287 = arith.constant 0.000000e+00 : f32
    %320 = vector.broadcast %cst_287 : f32 to vector<24x64xf32>
    %321 = arith.cmpf oge, %319, %320 : vector<24x64xf32>
    %cst_288 = arith.constant 2.000000e-01 : f32
    %322 = vector.broadcast %cst_288 : f32 to vector<24x64xf32>
    %323 = arith.mulf %322, %319 : vector<24x64xf32>
    %324 = arith.select %321, %319, %323 : vector<24x64xi1>, vector<24x64xf32>
    %325 = vector.broadcast %3 : vector<24x1xf32> to vector<24x64xf32>
    %326 = arith.mulf %324, %325 : vector<24x64xf32>
    %327 = arith.truncf %326 : vector<24x64xf32> to vector<24x64xbf16>
    %c7_289 = arith.constant 7 : index
    %c0_290 = arith.constant 0 : index
    %328 = vector.load %arg9[%c7_289, %c0_290] : memref<42x64xbf16, #tpu.memory_space<vmem>>, vector<24x64xbf16>
    tpu.vector_store %arg9[%c7_289, %c0_290], %327 {strides = array<i32>} : memref<42x64xbf16, #tpu.memory_space<vmem>>, vector<24x64xbf16>,
    %c5_291 = arith.constant 5 : index
    %c0_292 = arith.constant 0 : index
    %c0_293 = arith.constant 0 : index
    %329 = vector.load %arg4[%c5_291, %c0_292, %c0_293] : memref<8x1x64xf32, #tpu.memory_space<vmem>>, vector<1x1x64xf32>
    %330 = vector.shape_cast %329 : vector<1x1x64xf32> to vector<1x64xf32>
    %331 = vector.shape_cast %330 : vector<1x64xf32> to vector<1x64xf32>
    %332 = vector.broadcast %331 : vector<1x64xf32> to vector<24x64xf32>
    %c0_294 = arith.constant 0 : index
    %c0_295 = arith.constant 0 : index
    %333 = vector.load %arg9[%c0_294, %c0_295] : memref<42x64xbf16, #tpu.memory_space<vmem>>, vector<24x64xbf16>
    %c45 = arith.constant 45 : index
    %c0_296 = arith.constant 0 : index
    %c0_297 = arith.constant 0 : index
    %334 = vector.load %arg3[%c45, %c0_296, %c0_297] : memref<72x64x64xbf16, #tpu.memory_space<vmem>>, vector<1x64x64xbf16>
    %335 = vector.shape_cast %334 : vector<1x64x64xbf16> to vector<64x64xbf16>
    %cst_298 = arith.constant dense<0.000000e+00> : vector<24x64xf32>
    %336 = tpu.matmul %333, %335, %cst_298 {dimension_numbers = #tpu.dot_dimension_numbers<[1], [0], [0], [1], [0, 0, 1, 1], [], []>} : vector<24x64xbf16>, vector<64x64xbf16>, vector<24x64xf32> -> vector<24x64xf32>
    %337 = arith.addf %332, %336 : vector<24x64xf32>
    %c1_299 = arith.constant 1 : index
    %c0_300 = arith.constant 0 : index
    %338 = vector.load %arg9[%c1_299, %c0_300] : memref<42x64xbf16, #tpu.memory_space<vmem>>, vector<24x64xbf16>
    %c46 = arith.constant 46 : index
    %c0_301 = arith.constant 0 : index
    %c0_302 = arith.constant 0 : index
    %339 = vector.load %arg3[%c46, %c0_301, %c0_302] : memref<72x64x64xbf16, #tpu.memory_space<vmem>>, vector<1x64x64xbf16>
    %340 = vector.shape_cast %339 : vector<1x64x64xbf16> to vector<64x64xbf16>
    %cst_303 = arith.constant dense<0.000000e+00> : vector<24x64xf32>
    %341 = tpu.matmul %338, %340, %cst_303 {dimension_numbers = #tpu.dot_dimension_numbers<[1], [0], [0], [1], [0, 0, 1, 1], [], []>} : vector<24x64xbf16>, vector<64x64xbf16>, vector<24x64xf32> -> vector<24x64xf32>
    %342 = arith.addf %337, %341 : vector<24x64xf32>
    %c2_304 = arith.constant 2 : index
    %c0_305 = arith.constant 0 : index
    %343 = vector.load %arg9[%c2_304, %c0_305] : memref<42x64xbf16, #tpu.memory_space<vmem>>, vector<24x64xbf16>
    %c47 = arith.constant 47 : index
    %c0_306 = arith.constant 0 : index
    %c0_307 = arith.constant 0 : index
    %344 = vector.load %arg3[%c47, %c0_306, %c0_307] : memref<72x64x64xbf16, #tpu.memory_space<vmem>>, vector<1x64x64xbf16>
    %345 = vector.shape_cast %344 : vector<1x64x64xbf16> to vector<64x64xbf16>
    %cst_308 = arith.constant dense<0.000000e+00> : vector<24x64xf32>
    %346 = tpu.matmul %343, %345, %cst_308 {dimension_numbers = #tpu.dot_dimension_numbers<[1], [0], [0], [1], [0, 0, 1, 1], [], []>} : vector<24x64xbf16>, vector<64x64xbf16>, vector<24x64xf32> -> vector<24x64xf32>
    %347 = arith.addf %342, %346 : vector<24x64xf32>
    %c6_309 = arith.constant 6 : index
    %c0_310 = arith.constant 0 : index
    %348 = vector.load %arg9[%c6_309, %c0_310] : memref<42x64xbf16, #tpu.memory_space<vmem>>, vector<24x64xbf16>
    %c48 = arith.constant 48 : index
    %c0_311 = arith.constant 0 : index
    %c0_312 = arith.constant 0 : index
    %349 = vector.load %arg3[%c48, %c0_311, %c0_312] : memref<72x64x64xbf16, #tpu.memory_space<vmem>>, vector<1x64x64xbf16>
    %350 = vector.shape_cast %349 : vector<1x64x64xbf16> to vector<64x64xbf16>
    %cst_313 = arith.constant dense<0.000000e+00> : vector<24x64xf32>
    %351 = tpu.matmul %348, %350, %cst_313 {dimension_numbers = #tpu.dot_dimension_numbers<[1], [0], [0], [1], [0, 0, 1, 1], [], []>} : vector<24x64xbf16>, vector<64x64xbf16>, vector<24x64xf32> -> vector<24x64xf32>
    %352 = arith.addf %347, %351 : vector<24x64xf32>
    %c7_314 = arith.constant 7 : index
    %c0_315 = arith.constant 0 : index
    %353 = vector.load %arg9[%c7_314, %c0_315] : memref<42x64xbf16, #tpu.memory_space<vmem>>, vector<24x64xbf16>
    %c49 = arith.constant 49 : index
    %c0_316 = arith.constant 0 : index
    %c0_317 = arith.constant 0 : index
    %354 = vector.load %arg3[%c49, %c0_316, %c0_317] : memref<72x64x64xbf16, #tpu.memory_space<vmem>>, vector<1x64x64xbf16>
    %355 = vector.shape_cast %354 : vector<1x64x64xbf16> to vector<64x64xbf16>
    %cst_318 = arith.constant dense<0.000000e+00> : vector<24x64xf32>
    %356 = tpu.matmul %353, %355, %cst_318 {dimension_numbers = #tpu.dot_dimension_numbers<[1], [0], [0], [1], [0, 0, 1, 1], [], []>} : vector<24x64xbf16>, vector<64x64xbf16>, vector<24x64xf32> -> vector<24x64xf32>
    %357 = arith.addf %352, %356 : vector<24x64xf32>
    %c8_319 = arith.constant 8 : index
    %c0_320 = arith.constant 0 : index
    %358 = vector.load %arg9[%c8_319, %c0_320] : memref<42x64xbf16, #tpu.memory_space<vmem>>, vector<24x64xbf16>
    %c50 = arith.constant 50 : index
    %c0_321 = arith.constant 0 : index
    %c0_322 = arith.constant 0 : index
    %359 = vector.load %arg3[%c50, %c0_321, %c0_322] : memref<72x64x64xbf16, #tpu.memory_space<vmem>>, vector<1x64x64xbf16>
    %360 = vector.shape_cast %359 : vector<1x64x64xbf16> to vector<64x64xbf16>
    %cst_323 = arith.constant dense<0.000000e+00> : vector<24x64xf32>
    %361 = tpu.matmul %358, %360, %cst_323 {dimension_numbers = #tpu.dot_dimension_numbers<[1], [0], [0], [1], [0, 0, 1, 1], [], []>} : vector<24x64xbf16>, vector<64x64xbf16>, vector<24x64xf32> -> vector<24x64xf32>
    %362 = arith.addf %357, %361 : vector<24x64xf32>
    %c12_324 = arith.constant 12 : index
    %c0_325 = arith.constant 0 : index
    %363 = vector.load %arg9[%c12_324, %c0_325] : memref<42x64xbf16, #tpu.memory_space<vmem>>, vector<24x64xbf16>
    %c51 = arith.constant 51 : index
    %c0_326 = arith.constant 0 : index
    %c0_327 = arith.constant 0 : index
    %364 = vector.load %arg3[%c51, %c0_326, %c0_327] : memref<72x64x64xbf16, #tpu.memory_space<vmem>>, vector<1x64x64xbf16>
    %365 = vector.shape_cast %364 : vector<1x64x64xbf16> to vector<64x64xbf16>
    %cst_328 = arith.constant dense<0.000000e+00> : vector<24x64xf32>
    %366 = tpu.matmul %363, %365, %cst_328 {dimension_numbers = #tpu.dot_dimension_numbers<[1], [0], [0], [1], [0, 0, 1, 1], [], []>} : vector<24x64xbf16>, vector<64x64xbf16>, vector<24x64xf32> -> vector<24x64xf32>
    %367 = arith.addf %362, %366 : vector<24x64xf32>
    %c13_329 = arith.constant 13 : index
    %c0_330 = arith.constant 0 : index
    %368 = vector.load %arg9[%c13_329, %c0_330] : memref<42x64xbf16, #tpu.memory_space<vmem>>, vector<24x64xbf16>
    %c52 = arith.constant 52 : index
    %c0_331 = arith.constant 0 : index
    %c0_332 = arith.constant 0 : index
    %369 = vector.load %arg3[%c52, %c0_331, %c0_332] : memref<72x64x64xbf16, #tpu.memory_space<vmem>>, vector<1x64x64xbf16>
    %370 = vector.shape_cast %369 : vector<1x64x64xbf16> to vector<64x64xbf16>
    %cst_333 = arith.constant dense<0.000000e+00> : vector<24x64xf32>
    %371 = tpu.matmul %368, %370, %cst_333 {dimension_numbers = #tpu.dot_dimension_numbers<[1], [0], [0], [1], [0, 0, 1, 1], [], []>} : vector<24x64xbf16>, vector<64x64xbf16>, vector<24x64xf32> -> vector<24x64xf32>
    %372 = arith.addf %367, %371 : vector<24x64xf32>
    %c14_334 = arith.constant 14 : index
    %c0_335 = arith.constant 0 : index
    %373 = vector.load %arg9[%c14_334, %c0_335] : memref<42x64xbf16, #tpu.memory_space<vmem>>, vector<24x64xbf16>
    %c53 = arith.constant 53 : index
    %c0_336 = arith.constant 0 : index
    %c0_337 = arith.constant 0 : index
    %374 = vector.load %arg3[%c53, %c0_336, %c0_337] : memref<72x64x64xbf16, #tpu.memory_space<vmem>>, vector<1x64x64xbf16>
    %375 = vector.shape_cast %374 : vector<1x64x64xbf16> to vector<64x64xbf16>
    %cst_338 = arith.constant dense<0.000000e+00> : vector<24x64xf32>
    %376 = tpu.matmul %373, %375, %cst_338 {dimension_numbers = #tpu.dot_dimension_numbers<[1], [0], [0], [1], [0, 0, 1, 1], [], []>} : vector<24x64xbf16>, vector<64x64xbf16>, vector<24x64xf32> -> vector<24x64xf32>
    %377 = arith.addf %372, %376 : vector<24x64xf32>
    %c7_339 = arith.constant 7 : index
    %c0_340 = arith.constant 0 : index
    %378 = vector.load %arg9[%c7_339, %c0_340] : memref<42x64xbf16, #tpu.memory_space<vmem>>, vector<24x64xbf16>
    %379 = arith.extf %378 : vector<24x64xbf16> to vector<24x64xf32>
    %c5_341 = arith.constant 5 : index
    %c0_342 = arith.constant 0 : index
    %c0_343 = arith.constant 0 : index
    %380 = vector.load %arg5[%c5_341, %c0_342, %c0_343] : memref<8x1x64xf32, #tpu.memory_space<vmem>>, vector<1x1x64xf32>
    %381 = vector.shape_cast %380 : vector<1x1x64xf32> to vector<1x64xf32>
    %382 = vector.broadcast %381 : vector<1x64xf32> to vector<24x64xf32>
    %383 = arith.mulf %377, %382 : vector<24x64xf32>
    %384 = arith.addf %383, %379 : vector<24x64xf32>
    %cst_344 = arith.constant 0.000000e+00 : f32
    %385 = vector.broadcast %cst_344 : f32 to vector<24x64xf32>
    %386 = arith.cmpf oge, %384, %385 : vector<24x64xf32>
    %cst_345 = arith.constant 2.000000e-01 : f32
    %387 = vector.broadcast %cst_345 : f32 to vector<24x64xf32>
    %388 = arith.mulf %387, %384 : vector<24x64xf32>
    %389 = arith.select %386, %384, %388 : vector<24x64xi1>, vector<24x64xf32>
    %390 = vector.broadcast %3 : vector<24x1xf32> to vector<24x64xf32>
    %391 = arith.mulf %389, %390 : vector<24x64xf32>
    %392 = arith.truncf %391 : vector<24x64xf32> to vector<24x64xbf16>
    %c7_346 = arith.constant 7 : index
    %c0_347 = arith.constant 0 : index
    %393 = vector.load %arg9[%c7_346, %c0_347] : memref<42x64xbf16, #tpu.memory_space<vmem>>, vector<24x64xbf16>
    tpu.vector_store %arg9[%c7_346, %c0_347], %392 {strides = array<i32>} : memref<42x64xbf16, #tpu.memory_space<vmem>>, vector<24x64xbf16>,
    %c6_348 = arith.constant 6 : index
    %c0_349 = arith.constant 0 : index
    %c0_350 = arith.constant 0 : index
    %394 = vector.load %arg4[%c6_348, %c0_349, %c0_350] : memref<8x1x64xf32, #tpu.memory_space<vmem>>, vector<1x1x64xf32>
    %395 = vector.shape_cast %394 : vector<1x1x64xf32> to vector<1x64xf32>
    %396 = vector.shape_cast %395 : vector<1x64xf32> to vector<1x64xf32>
    %397 = vector.broadcast %396 : vector<1x64xf32> to vector<24x64xf32>
    %c0_351 = arith.constant 0 : index
    %c0_352 = arith.constant 0 : index
    %398 = vector.load %arg9[%c0_351, %c0_352] : memref<42x64xbf16, #tpu.memory_space<vmem>>, vector<24x64xbf16>
    %c54 = arith.constant 54 : index
    %c0_353 = arith.constant 0 : index
    %c0_354 = arith.constant 0 : index
    %399 = vector.load %arg3[%c54, %c0_353, %c0_354] : memref<72x64x64xbf16, #tpu.memory_space<vmem>>, vector<1x64x64xbf16>
    %400 = vector.shape_cast %399 : vector<1x64x64xbf16> to vector<64x64xbf16>
    %cst_355 = arith.constant dense<0.000000e+00> : vector<24x64xf32>
    %401 = tpu.matmul %398, %400, %cst_355 {dimension_numbers = #tpu.dot_dimension_numbers<[1], [0], [0], [1], [0, 0, 1, 1], [], []>} : vector<24x64xbf16>, vector<64x64xbf16>, vector<24x64xf32> -> vector<24x64xf32>
    %402 = arith.addf %397, %401 : vector<24x64xf32>
    %c1_356 = arith.constant 1 : index
    %c0_357 = arith.constant 0 : index
    %403 = vector.load %arg9[%c1_356, %c0_357] : memref<42x64xbf16, #tpu.memory_space<vmem>>, vector<24x64xbf16>
    %c55 = arith.constant 55 : index
    %c0_358 = arith.constant 0 : index
    %c0_359 = arith.constant 0 : index
    %404 = vector.load %arg3[%c55, %c0_358, %c0_359] : memref<72x64x64xbf16, #tpu.memory_space<vmem>>, vector<1x64x64xbf16>
    %405 = vector.shape_cast %404 : vector<1x64x64xbf16> to vector<64x64xbf16>
    %cst_360 = arith.constant dense<0.000000e+00> : vector<24x64xf32>
    %406 = tpu.matmul %403, %405, %cst_360 {dimension_numbers = #tpu.dot_dimension_numbers<[1], [0], [0], [1], [0, 0, 1, 1], [], []>} : vector<24x64xbf16>, vector<64x64xbf16>, vector<24x64xf32> -> vector<24x64xf32>
    %407 = arith.addf %402, %406 : vector<24x64xf32>
    %c2_361 = arith.constant 2 : index
    %c0_362 = arith.constant 0 : index
    %408 = vector.load %arg9[%c2_361, %c0_362] : memref<42x64xbf16, #tpu.memory_space<vmem>>, vector<24x64xbf16>
    %c56 = arith.constant 56 : index
    %c0_363 = arith.constant 0 : index
    %c0_364 = arith.constant 0 : index
    %409 = vector.load %arg3[%c56, %c0_363, %c0_364] : memref<72x64x64xbf16, #tpu.memory_space<vmem>>, vector<1x64x64xbf16>
    %410 = vector.shape_cast %409 : vector<1x64x64xbf16> to vector<64x64xbf16>
    %cst_365 = arith.constant dense<0.000000e+00> : vector<24x64xf32>
    %411 = tpu.matmul %408, %410, %cst_365 {dimension_numbers = #tpu.dot_dimension_numbers<[1], [0], [0], [1], [0, 0, 1, 1], [], []>} : vector<24x64xbf16>, vector<64x64xbf16>, vector<24x64xf32> -> vector<24x64xf32>
    %412 = arith.addf %407, %411 : vector<24x64xf32>
    %c6_366 = arith.constant 6 : index
    %c0_367 = arith.constant 0 : index
    %413 = vector.load %arg9[%c6_366, %c0_367] : memref<42x64xbf16, #tpu.memory_space<vmem>>, vector<24x64xbf16>
    %c57 = arith.constant 57 : index
    %c0_368 = arith.constant 0 : index
    %c0_369 = arith.constant 0 : index
    %414 = vector.load %arg3[%c57, %c0_368, %c0_369] : memref<72x64x64xbf16, #tpu.memory_space<vmem>>, vector<1x64x64xbf16>
    %415 = vector.shape_cast %414 : vector<1x64x64xbf16> to vector<64x64xbf16>
    %cst_370 = arith.constant dense<0.000000e+00> : vector<24x64xf32>
    %416 = tpu.matmul %413, %415, %cst_370 {dimension_numbers = #tpu.dot_dimension_numbers<[1], [0], [0], [1], [0, 0, 1, 1], [], []>} : vector<24x64xbf16>, vector<64x64xbf16>, vector<24x64xf32> -> vector<24x64xf32>
    %417 = arith.addf %412, %416 : vector<24x64xf32>
    %c7_371 = arith.constant 7 : index
    %c0_372 = arith.constant 0 : index
    %418 = vector.load %arg9[%c7_371, %c0_372] : memref<42x64xbf16, #tpu.memory_space<vmem>>, vector<24x64xbf16>
    %c58 = arith.constant 58 : index
    %c0_373 = arith.constant 0 : index
    %c0_374 = arith.constant 0 : index
    %419 = vector.load %arg3[%c58, %c0_373, %c0_374] : memref<72x64x64xbf16, #tpu.memory_space<vmem>>, vector<1x64x64xbf16>
    %420 = vector.shape_cast %419 : vector<1x64x64xbf16> to vector<64x64xbf16>
    %cst_375 = arith.constant dense<0.000000e+00> : vector<24x64xf32>
    %421 = tpu.matmul %418, %420, %cst_375 {dimension_numbers = #tpu.dot_dimension_numbers<[1], [0], [0], [1], [0, 0, 1, 1], [], []>} : vector<24x64xbf16>, vector<64x64xbf16>, vector<24x64xf32> -> vector<24x64xf32>
    %422 = arith.addf %417, %421 : vector<24x64xf32>
    %c8_376 = arith.constant 8 : index
    %c0_377 = arith.constant 0 : index
    %423 = vector.load %arg9[%c8_376, %c0_377] : memref<42x64xbf16, #tpu.memory_space<vmem>>, vector<24x64xbf16>
    %c59 = arith.constant 59 : index
    %c0_378 = arith.constant 0 : index
    %c0_379 = arith.constant 0 : index
    %424 = vector.load %arg3[%c59, %c0_378, %c0_379] : memref<72x64x64xbf16, #tpu.memory_space<vmem>>, vector<1x64x64xbf16>
    %425 = vector.shape_cast %424 : vector<1x64x64xbf16> to vector<64x64xbf16>
    %cst_380 = arith.constant dense<0.000000e+00> : vector<24x64xf32>
    %426 = tpu.matmul %423, %425, %cst_380 {dimension_numbers = #tpu.dot_dimension_numbers<[1], [0], [0], [1], [0, 0, 1, 1], [], []>} : vector<24x64xbf16>, vector<64x64xbf16>, vector<24x64xf32> -> vector<24x64xf32>
    %427 = arith.addf %422, %426 : vector<24x64xf32>
    %c12_381 = arith.constant 12 : index
    %c0_382 = arith.constant 0 : index
    %428 = vector.load %arg9[%c12_381, %c0_382] : memref<42x64xbf16, #tpu.memory_space<vmem>>, vector<24x64xbf16>
    %c60 = arith.constant 60 : index
    %c0_383 = arith.constant 0 : index
    %c0_384 = arith.constant 0 : index
    %429 = vector.load %arg3[%c60, %c0_383, %c0_384] : memref<72x64x64xbf16, #tpu.memory_space<vmem>>, vector<1x64x64xbf16>
    %430 = vector.shape_cast %429 : vector<1x64x64xbf16> to vector<64x64xbf16>
    %cst_385 = arith.constant dense<0.000000e+00> : vector<24x64xf32>
    %431 = tpu.matmul %428, %430, %cst_385 {dimension_numbers = #tpu.dot_dimension_numbers<[1], [0], [0], [1], [0, 0, 1, 1], [], []>} : vector<24x64xbf16>, vector<64x64xbf16>, vector<24x64xf32> -> vector<24x64xf32>
    %432 = arith.addf %427, %431 : vector<24x64xf32>
    %c13_386 = arith.constant 13 : index
    %c0_387 = arith.constant 0 : index
    %433 = vector.load %arg9[%c13_386, %c0_387] : memref<42x64xbf16, #tpu.memory_space<vmem>>, vector<24x64xbf16>
    %c61 = arith.constant 61 : index
    %c0_388 = arith.constant 0 : index
    %c0_389 = arith.constant 0 : index
    %434 = vector.load %arg3[%c61, %c0_388, %c0_389] : memref<72x64x64xbf16, #tpu.memory_space<vmem>>, vector<1x64x64xbf16>
    %435 = vector.shape_cast %434 : vector<1x64x64xbf16> to vector<64x64xbf16>
    %cst_390 = arith.constant dense<0.000000e+00> : vector<24x64xf32>
    %436 = tpu.matmul %433, %435, %cst_390 {dimension_numbers = #tpu.dot_dimension_numbers<[1], [0], [0], [1], [0, 0, 1, 1], [], []>} : vector<24x64xbf16>, vector<64x64xbf16>, vector<24x64xf32> -> vector<24x64xf32>
    %437 = arith.addf %432, %436 : vector<24x64xf32>
    %c14_391 = arith.constant 14 : index
    %c0_392 = arith.constant 0 : index
    %438 = vector.load %arg9[%c14_391, %c0_392] : memref<42x64xbf16, #tpu.memory_space<vmem>>, vector<24x64xbf16>
    %c62 = arith.constant 62 : index
    %c0_393 = arith.constant 0 : index
    %c0_394 = arith.constant 0 : index
    %439 = vector.load %arg3[%c62, %c0_393, %c0_394] : memref<72x64x64xbf16, #tpu.memory_space<vmem>>, vector<1x64x64xbf16>
    %440 = vector.shape_cast %439 : vector<1x64x64xbf16> to vector<64x64xbf16>
    %cst_395 = arith.constant dense<0.000000e+00> : vector<24x64xf32>
    %441 = tpu.matmul %438, %440, %cst_395 {dimension_numbers = #tpu.dot_dimension_numbers<[1], [0], [0], [1], [0, 0, 1, 1], [], []>} : vector<24x64xbf16>, vector<64x64xbf16>, vector<24x64xf32> -> vector<24x64xf32>
    %442 = arith.addf %437, %441 : vector<24x64xf32>
    %c7_396 = arith.constant 7 : index
    %c0_397 = arith.constant 0 : index
    %443 = vector.load %arg9[%c7_396, %c0_397] : memref<42x64xbf16, #tpu.memory_space<vmem>>, vector<24x64xbf16>
    %444 = arith.extf %443 : vector<24x64xbf16> to vector<24x64xf32>
    %c6_398 = arith.constant 6 : index
    %c0_399 = arith.constant 0 : index
    %c0_400 = arith.constant 0 : index
    %445 = vector.load %arg5[%c6_398, %c0_399, %c0_400] : memref<8x1x64xf32, #tpu.memory_space<vmem>>, vector<1x1x64xf32>
    %446 = vector.shape_cast %445 : vector<1x1x64xf32> to vector<1x64xf32>
    %447 = vector.broadcast %446 : vector<1x64xf32> to vector<24x64xf32>
    %448 = arith.mulf %442, %447 : vector<24x64xf32>
    %449 = arith.addf %448, %444 : vector<24x64xf32>
    %cst_401 = arith.constant 0.000000e+00 : f32
    %450 = vector.broadcast %cst_401 : f32 to vector<24x64xf32>
    %451 = arith.cmpf oge, %449, %450 : vector<24x64xf32>
    %cst_402 = arith.constant 2.000000e-01 : f32
    %452 = vector.broadcast %cst_402 : f32 to vector<24x64xf32>
    %453 = arith.mulf %452, %449 : vector<24x64xf32>
    %454 = arith.select %451, %449, %453 : vector<24x64xi1>, vector<24x64xf32>
    %455 = vector.broadcast %3 : vector<24x1xf32> to vector<24x64xf32>
    %456 = arith.mulf %454, %455 : vector<24x64xf32>
    %457 = arith.truncf %456 : vector<24x64xf32> to vector<24x64xbf16>
    %c7_403 = arith.constant 7 : index
    %c0_404 = arith.constant 0 : index
    %458 = vector.load %arg9[%c7_403, %c0_404] : memref<42x64xbf16, #tpu.memory_space<vmem>>, vector<24x64xbf16>
    tpu.vector_store %arg9[%c7_403, %c0_404], %457 {strides = array<i32>} : memref<42x64xbf16, #tpu.memory_space<vmem>>, vector<24x64xbf16>,
    %c7_405 = arith.constant 7 : index
    %c0_406 = arith.constant 0 : index
    %c0_407 = arith.constant 0 : index
    %459 = vector.load %arg4[%c7_405, %c0_406, %c0_407] : memref<8x1x64xf32, #tpu.memory_space<vmem>>, vector<1x1x64xf32>
    %460 = vector.shape_cast %459 : vector<1x1x64xf32> to vector<1x64xf32>
    %461 = vector.shape_cast %460 : vector<1x64xf32> to vector<1x64xf32>
    %462 = vector.broadcast %461 : vector<1x64xf32> to vector<24x64xf32>
    %c0_408 = arith.constant 0 : index
    %c0_409 = arith.constant 0 : index
    %463 = vector.load %arg9[%c0_408, %c0_409] : memref<42x64xbf16, #tpu.memory_space<vmem>>, vector<24x64xbf16>
    %c63 = arith.constant 63 : index
    %c0_410 = arith.constant 0 : index
    %c0_411 = arith.constant 0 : index
    %464 = vector.load %arg3[%c63, %c0_410, %c0_411] : memref<72x64x64xbf16, #tpu.memory_space<vmem>>, vector<1x64x64xbf16>
    %465 = vector.shape_cast %464 : vector<1x64x64xbf16> to vector<64x64xbf16>
    %cst_412 = arith.constant dense<0.000000e+00> : vector<24x64xf32>
    %466 = tpu.matmul %463, %465, %cst_412 {dimension_numbers = #tpu.dot_dimension_numbers<[1], [0], [0], [1], [0, 0, 1, 1], [], []>} : vector<24x64xbf16>, vector<64x64xbf16>, vector<24x64xf32> -> vector<24x64xf32>
    %467 = arith.addf %462, %466 : vector<24x64xf32>
    %c1_413 = arith.constant 1 : index
    %c0_414 = arith.constant 0 : index
    %468 = vector.load %arg9[%c1_413, %c0_414] : memref<42x64xbf16, #tpu.memory_space<vmem>>, vector<24x64xbf16>
    %c64 = arith.constant 64 : index
    %c0_415 = arith.constant 0 : index
    %c0_416 = arith.constant 0 : index
    %469 = vector.load %arg3[%c64, %c0_415, %c0_416] : memref<72x64x64xbf16, #tpu.memory_space<vmem>>, vector<1x64x64xbf16>
    %470 = vector.shape_cast %469 : vector<1x64x64xbf16> to vector<64x64xbf16>
    %cst_417 = arith.constant dense<0.000000e+00> : vector<24x64xf32>
    %471 = tpu.matmul %468, %470, %cst_417 {dimension_numbers = #tpu.dot_dimension_numbers<[1], [0], [0], [1], [0, 0, 1, 1], [], []>} : vector<24x64xbf16>, vector<64x64xbf16>, vector<24x64xf32> -> vector<24x64xf32>
    %472 = arith.addf %467, %471 : vector<24x64xf32>
    %c2_418 = arith.constant 2 : index
    %c0_419 = arith.constant 0 : index
    %473 = vector.load %arg9[%c2_418, %c0_419] : memref<42x64xbf16, #tpu.memory_space<vmem>>, vector<24x64xbf16>
    %c65 = arith.constant 65 : index
    %c0_420 = arith.constant 0 : index
    %c0_421 = arith.constant 0 : index
    %474 = vector.load %arg3[%c65, %c0_420, %c0_421] : memref<72x64x64xbf16, #tpu.memory_space<vmem>>, vector<1x64x64xbf16>
    %475 = vector.shape_cast %474 : vector<1x64x64xbf16> to vector<64x64xbf16>
    %cst_422 = arith.constant dense<0.000000e+00> : vector<24x64xf32>
    %476 = tpu.matmul %473, %475, %cst_422 {dimension_numbers = #tpu.dot_dimension_numbers<[1], [0], [0], [1], [0, 0, 1, 1], [], []>} : vector<24x64xbf16>, vector<64x64xbf16>, vector<24x64xf32> -> vector<24x64xf32>
    %477 = arith.addf %472, %476 : vector<24x64xf32>
    %c6_423 = arith.constant 6 : index
    %c0_424 = arith.constant 0 : index
    %478 = vector.load %arg9[%c6_423, %c0_424] : memref<42x64xbf16, #tpu.memory_space<vmem>>, vector<24x64xbf16>
    %c66 = arith.constant 66 : index
    %c0_425 = arith.constant 0 : index
    %c0_426 = arith.constant 0 : index
    %479 = vector.load %arg3[%c66, %c0_425, %c0_426] : memref<72x64x64xbf16, #tpu.memory_space<vmem>>, vector<1x64x64xbf16>
    %480 = vector.shape_cast %479 : vector<1x64x64xbf16> to vector<64x64xbf16>
    %cst_427 = arith.constant dense<0.000000e+00> : vector<24x64xf32>
    %481 = tpu.matmul %478, %480, %cst_427 {dimension_numbers = #tpu.dot_dimension_numbers<[1], [0], [0], [1], [0, 0, 1, 1], [], []>} : vector<24x64xbf16>, vector<64x64xbf16>, vector<24x64xf32> -> vector<24x64xf32>
    %482 = arith.addf %477, %481 : vector<24x64xf32>
    %c7_428 = arith.constant 7 : index
    %c0_429 = arith.constant 0 : index
    %483 = vector.load %arg9[%c7_428, %c0_429] : memref<42x64xbf16, #tpu.memory_space<vmem>>, vector<24x64xbf16>
    %c67 = arith.constant 67 : index
    %c0_430 = arith.constant 0 : index
    %c0_431 = arith.constant 0 : index
    %484 = vector.load %arg3[%c67, %c0_430, %c0_431] : memref<72x64x64xbf16, #tpu.memory_space<vmem>>, vector<1x64x64xbf16>
    %485 = vector.shape_cast %484 : vector<1x64x64xbf16> to vector<64x64xbf16>
    %cst_432 = arith.constant dense<0.000000e+00> : vector<24x64xf32>
    %486 = tpu.matmul %483, %485, %cst_432 {dimension_numbers = #tpu.dot_dimension_numbers<[1], [0], [0], [1], [0, 0, 1, 1], [], []>} : vector<24x64xbf16>, vector<64x64xbf16>, vector<24x64xf32> -> vector<24x64xf32>
    %487 = arith.addf %482, %486 : vector<24x64xf32>
    %c8_433 = arith.constant 8 : index
    %c0_434 = arith.constant 0 : index
    %488 = vector.load %arg9[%c8_433, %c0_434] : memref<42x64xbf16, #tpu.memory_space<vmem>>, vector<24x64xbf16>
    %c68 = arith.constant 68 : index
    %c0_435 = arith.constant 0 : index
    %c0_436 = arith.constant 0 : index
    %489 = vector.load %arg3[%c68, %c0_435, %c0_436] : memref<72x64x64xbf16, #tpu.memory_space<vmem>>, vector<1x64x64xbf16>
    %490 = vector.shape_cast %489 : vector<1x64x64xbf16> to vector<64x64xbf16>
    %cst_437 = arith.constant dense<0.000000e+00> : vector<24x64xf32>
    %491 = tpu.matmul %488, %490, %cst_437 {dimension_numbers = #tpu.dot_dimension_numbers<[1], [0], [0], [1], [0, 0, 1, 1], [], []>} : vector<24x64xbf16>, vector<64x64xbf16>, vector<24x64xf32> -> vector<24x64xf32>
    %492 = arith.addf %487, %491 : vector<24x64xf32>
    %c12_438 = arith.constant 12 : index
    %c0_439 = arith.constant 0 : index
    %493 = vector.load %arg9[%c12_438, %c0_439] : memref<42x64xbf16, #tpu.memory_space<vmem>>, vector<24x64xbf16>
    %c69 = arith.constant 69 : index
    %c0_440 = arith.constant 0 : index
    %c0_441 = arith.constant 0 : index
    %494 = vector.load %arg3[%c69, %c0_440, %c0_441] : memref<72x64x64xbf16, #tpu.memory_space<vmem>>, vector<1x64x64xbf16>
    %495 = vector.shape_cast %494 : vector<1x64x64xbf16> to vector<64x64xbf16>
    %cst_442 = arith.constant dense<0.000000e+00> : vector<24x64xf32>
    %496 = tpu.matmul %493, %495, %cst_442 {dimension_numbers = #tpu.dot_dimension_numbers<[1], [0], [0], [1], [0, 0, 1, 1], [], []>} : vector<24x64xbf16>, vector<64x64xbf16>, vector<24x64xf32> -> vector<24x64xf32>
    %497 = arith.addf %492, %496 : vector<24x64xf32>
    %c13_443 = arith.constant 13 : index
    %c0_444 = arith.constant 0 : index
    %498 = vector.load %arg9[%c13_443, %c0_444] : memref<42x64xbf16, #tpu.memory_space<vmem>>, vector<24x64xbf16>
    %c70 = arith.constant 70 : index
    %c0_445 = arith.constant 0 : index
    %c0_446 = arith.constant 0 : index
    %499 = vector.load %arg3[%c70, %c0_445, %c0_446] : memref<72x64x64xbf16, #tpu.memory_space<vmem>>, vector<1x64x64xbf16>
    %500 = vector.shape_cast %499 : vector<1x64x64xbf16> to vector<64x64xbf16>
    %cst_447 = arith.constant dense<0.000000e+00> : vector<24x64xf32>
    %501 = tpu.matmul %498, %500, %cst_447 {dimension_numbers = #tpu.dot_dimension_numbers<[1], [0], [0], [1], [0, 0, 1, 1], [], []>} : vector<24x64xbf16>, vector<64x64xbf16>, vector<24x64xf32> -> vector<24x64xf32>
    %502 = arith.addf %497, %501 : vector<24x64xf32>
    %c14_448 = arith.constant 14 : index
    %c0_449 = arith.constant 0 : index
    %503 = vector.load %arg9[%c14_448, %c0_449] : memref<42x64xbf16, #tpu.memory_space<vmem>>, vector<24x64xbf16>
    %c71 = arith.constant 71 : index
    %c0_450 = arith.constant 0 : index
    %c0_451 = arith.constant 0 : index
    %504 = vector.load %arg3[%c71, %c0_450, %c0_451] : memref<72x64x64xbf16, #tpu.memory_space<vmem>>, vector<1x64x64xbf16>
    %505 = vector.shape_cast %504 : vector<1x64x64xbf16> to vector<64x64xbf16>
    %cst_452 = arith.constant dense<0.000000e+00> : vector<24x64xf32>
    %506 = tpu.matmul %503, %505, %cst_452 {dimension_numbers = #tpu.dot_dimension_numbers<[1], [0], [0], [1], [0, 0, 1, 1], [], []>} : vector<24x64xbf16>, vector<64x64xbf16>, vector<24x64xf32> -> vector<24x64xf32>
    %507 = arith.addf %502, %506 : vector<24x64xf32>
    %c7_453 = arith.constant 7 : index
    %c0_454 = arith.constant 0 : index
    %508 = vector.load %arg9[%c7_453, %c0_454] : memref<42x64xbf16, #tpu.memory_space<vmem>>, vector<24x64xbf16>
    %509 = arith.extf %508 : vector<24x64xbf16> to vector<24x64xf32>
    %c7_455 = arith.constant 7 : index
    %c0_456 = arith.constant 0 : index
    %c0_457 = arith.constant 0 : index
    %510 = vector.load %arg5[%c7_455, %c0_456, %c0_457] : memref<8x1x64xf32, #tpu.memory_space<vmem>>, vector<1x1x64xf32>
    %511 = vector.shape_cast %510 : vector<1x1x64xf32> to vector<1x64xf32>
    %512 = vector.broadcast %511 : vector<1x64xf32> to vector<24x64xf32>
    %513 = arith.mulf %507, %512 : vector<24x64xf32>
    %514 = arith.addf %513, %509 : vector<24x64xf32>
    %cst_458 = arith.constant 0.000000e+00 : f32
    %515 = vector.broadcast %cst_458 : f32 to vector<24x64xf32>
    %516 = arith.cmpf oge, %514, %515 : vector<24x64xf32>
    %cst_459 = arith.constant 2.000000e-01 : f32
    %517 = vector.broadcast %cst_459 : f32 to vector<24x64xf32>
    %518 = arith.mulf %517, %514 : vector<24x64xf32>
    %519 = arith.select %516, %514, %518 : vector<24x64xi1>, vector<24x64xf32>
    %520 = vector.broadcast %3 : vector<24x1xf32> to vector<24x64xf32>
    %521 = arith.mulf %519, %520 : vector<24x64xf32>
    %522 = arith.truncf %521 : vector<24x64xf32> to vector<24x64xbf16>
    %c7_460 = arith.constant 7 : index
    %c0_461 = arith.constant 0 : index
    %523 = vector.load %arg9[%c7_460, %c0_461] : memref<42x64xbf16, #tpu.memory_space<vmem>>, vector<24x64xbf16>
    tpu.vector_store %arg9[%c7_460, %c0_461], %522 {strides = array<i32>} : memref<42x64xbf16, #tpu.memory_space<vmem>>, vector<24x64xbf16>,
    %c0_462 = arith.constant 0 : index
    %c0_463 = arith.constant 0 : index
    %524 = vector.load %arg7[%c0_462, %c0_463] : memref<1x208xf32, #tpu.memory_space<vmem>>, vector<1x208xf32>
    %525 = vector.shape_cast %524 : vector<1x208xf32> to vector<1x208xf32>
    %526 = vector.broadcast %525 : vector<1x208xf32> to vector<24x208xf32>
    %c0_464 = arith.constant 0 : index
    %c0_465 = arith.constant 0 : index
    %527 = vector.load %arg9[%c0_464, %c0_465] : memref<42x64xbf16, #tpu.memory_space<vmem>>, vector<24x64xbf16>
    %c0_466 = arith.constant 0 : index
    %c0_467 = arith.constant 0 : index
    %c0_468 = arith.constant 0 : index
    %528 = vector.load %arg6[%c0_466, %c0_467, %c0_468] : memref<9x64x208xbf16, #tpu.memory_space<vmem>>, vector<1x64x208xbf16>
    %529 = vector.shape_cast %528 : vector<1x64x208xbf16> to vector<64x208xbf16>
    %cst_469 = arith.constant dense<0.000000e+00> : vector<24x208xf32>
    %530 = tpu.matmul %527, %529, %cst_469 {dimension_numbers = #tpu.dot_dimension_numbers<[1], [0], [0], [1], [0, 0, 1, 1], [], []>} : vector<24x64xbf16>, vector<64x208xbf16>, vector<24x208xf32> -> vector<24x208xf32>
    %531 = arith.addf %526, %530 : vector<24x208xf32>
    %c1_470 = arith.constant 1 : index
    %c0_471 = arith.constant 0 : index
    %532 = vector.load %arg9[%c1_470, %c0_471] : memref<42x64xbf16, #tpu.memory_space<vmem>>, vector<24x64xbf16>
    %c1_472 = arith.constant 1 : index
    %c0_473 = arith.constant 0 : index
    %c0_474 = arith.constant 0 : index
    %533 = vector.load %arg6[%c1_472, %c0_473, %c0_474] : memref<9x64x208xbf16, #tpu.memory_space<vmem>>, vector<1x64x208xbf16>
    %534 = vector.shape_cast %533 : vector<1x64x208xbf16> to vector<64x208xbf16>
    %cst_475 = arith.constant dense<0.000000e+00> : vector<24x208xf32>
    %535 = tpu.matmul %532, %534, %cst_475 {dimension_numbers = #tpu.dot_dimension_numbers<[1], [0], [0], [1], [0, 0, 1, 1], [], []>} : vector<24x64xbf16>, vector<64x208xbf16>, vector<24x208xf32> -> vector<24x208xf32>
    %536 = arith.addf %531, %535 : vector<24x208xf32>
    %c2_476 = arith.constant 2 : index
    %c0_477 = arith.constant 0 : index
    %537 = vector.load %arg9[%c2_476, %c0_477] : memref<42x64xbf16, #tpu.memory_space<vmem>>, vector<24x64xbf16>
    %c2_478 = arith.constant 2 : index
    %c0_479 = arith.constant 0 : index
    %c0_480 = arith.constant 0 : index
    %538 = vector.load %arg6[%c2_478, %c0_479, %c0_480] : memref<9x64x208xbf16, #tpu.memory_space<vmem>>, vector<1x64x208xbf16>
    %539 = vector.shape_cast %538 : vector<1x64x208xbf16> to vector<64x208xbf16>
    %cst_481 = arith.constant dense<0.000000e+00> : vector<24x208xf32>
    %540 = tpu.matmul %537, %539, %cst_481 {dimension_numbers = #tpu.dot_dimension_numbers<[1], [0], [0], [1], [0, 0, 1, 1], [], []>} : vector<24x64xbf16>, vector<64x208xbf16>, vector<24x208xf32> -> vector<24x208xf32>
    %541 = arith.addf %536, %540 : vector<24x208xf32>
    %c6_482 = arith.constant 6 : index
    %c0_483 = arith.constant 0 : index
    %542 = vector.load %arg9[%c6_482, %c0_483] : memref<42x64xbf16, #tpu.memory_space<vmem>>, vector<24x64xbf16>
    %c3_484 = arith.constant 3 : index
    %c0_485 = arith.constant 0 : index
    %c0_486 = arith.constant 0 : index
    %543 = vector.load %arg6[%c3_484, %c0_485, %c0_486] : memref<9x64x208xbf16, #tpu.memory_space<vmem>>, vector<1x64x208xbf16>
    %544 = vector.shape_cast %543 : vector<1x64x208xbf16> to vector<64x208xbf16>
    %cst_487 = arith.constant dense<0.000000e+00> : vector<24x208xf32>
    %545 = tpu.matmul %542, %544, %cst_487 {dimension_numbers = #tpu.dot_dimension_numbers<[1], [0], [0], [1], [0, 0, 1, 1], [], []>} : vector<24x64xbf16>, vector<64x208xbf16>, vector<24x208xf32> -> vector<24x208xf32>
    %546 = arith.addf %541, %545 : vector<24x208xf32>
    %c7_488 = arith.constant 7 : index
    %c0_489 = arith.constant 0 : index
    %547 = vector.load %arg9[%c7_488, %c0_489] : memref<42x64xbf16, #tpu.memory_space<vmem>>, vector<24x64xbf16>
    %c4_490 = arith.constant 4 : index
    %c0_491 = arith.constant 0 : index
    %c0_492 = arith.constant 0 : index
    %548 = vector.load %arg6[%c4_490, %c0_491, %c0_492] : memref<9x64x208xbf16, #tpu.memory_space<vmem>>, vector<1x64x208xbf16>
    %549 = vector.shape_cast %548 : vector<1x64x208xbf16> to vector<64x208xbf16>
    %cst_493 = arith.constant dense<0.000000e+00> : vector<24x208xf32>
    %550 = tpu.matmul %547, %549, %cst_493 {dimension_numbers = #tpu.dot_dimension_numbers<[1], [0], [0], [1], [0, 0, 1, 1], [], []>} : vector<24x64xbf16>, vector<64x208xbf16>, vector<24x208xf32> -> vector<24x208xf32>
    %551 = arith.addf %546, %550 : vector<24x208xf32>
    %c8_494 = arith.constant 8 : index
    %c0_495 = arith.constant 0 : index
    %552 = vector.load %arg9[%c8_494, %c0_495] : memref<42x64xbf16, #tpu.memory_space<vmem>>, vector<24x64xbf16>
    %c5_496 = arith.constant 5 : index
    %c0_497 = arith.constant 0 : index
    %c0_498 = arith.constant 0 : index
    %553 = vector.load %arg6[%c5_496, %c0_497, %c0_498] : memref<9x64x208xbf16, #tpu.memory_space<vmem>>, vector<1x64x208xbf16>
    %554 = vector.shape_cast %553 : vector<1x64x208xbf16> to vector<64x208xbf16>
    %cst_499 = arith.constant dense<0.000000e+00> : vector<24x208xf32>
    %555 = tpu.matmul %552, %554, %cst_499 {dimension_numbers = #tpu.dot_dimension_numbers<[1], [0], [0], [1], [0, 0, 1, 1], [], []>} : vector<24x64xbf16>, vector<64x208xbf16>, vector<24x208xf32> -> vector<24x208xf32>
    %556 = arith.addf %551, %555 : vector<24x208xf32>
    %c12_500 = arith.constant 12 : index
    %c0_501 = arith.constant 0 : index
    %557 = vector.load %arg9[%c12_500, %c0_501] : memref<42x64xbf16, #tpu.memory_space<vmem>>, vector<24x64xbf16>
    %c6_502 = arith.constant 6 : index
    %c0_503 = arith.constant 0 : index
    %c0_504 = arith.constant 0 : index
    %558 = vector.load %arg6[%c6_502, %c0_503, %c0_504] : memref<9x64x208xbf16, #tpu.memory_space<vmem>>, vector<1x64x208xbf16>
    %559 = vector.shape_cast %558 : vector<1x64x208xbf16> to vector<64x208xbf16>
    %cst_505 = arith.constant dense<0.000000e+00> : vector<24x208xf32>
    %560 = tpu.matmul %557, %559, %cst_505 {dimension_numbers = #tpu.dot_dimension_numbers<[1], [0], [0], [1], [0, 0, 1, 1], [], []>} : vector<24x64xbf16>, vector<64x208xbf16>, vector<24x208xf32> -> vector<24x208xf32>
    %561 = arith.addf %556, %560 : vector<24x208xf32>
    %c13_506 = arith.constant 13 : index
    %c0_507 = arith.constant 0 : index
    %562 = vector.load %arg9[%c13_506, %c0_507] : memref<42x64xbf16, #tpu.memory_space<vmem>>, vector<24x64xbf16>
    %c7_508 = arith.constant 7 : index
    %c0_509 = arith.constant 0 : index
    %c0_510 = arith.constant 0 : index
    %563 = vector.load %arg6[%c7_508, %c0_509, %c0_510] : memref<9x64x208xbf16, #tpu.memory_space<vmem>>, vector<1x64x208xbf16>
    %564 = vector.shape_cast %563 : vector<1x64x208xbf16> to vector<64x208xbf16>
    %cst_511 = arith.constant dense<0.000000e+00> : vector<24x208xf32>
    %565 = tpu.matmul %562, %564, %cst_511 {dimension_numbers = #tpu.dot_dimension_numbers<[1], [0], [0], [1], [0, 0, 1, 1], [], []>} : vector<24x64xbf16>, vector<64x208xbf16>, vector<24x208xf32> -> vector<24x208xf32>
    %566 = arith.addf %561, %565 : vector<24x208xf32>
    %c14_512 = arith.constant 14 : index
    %c0_513 = arith.constant 0 : index
    %567 = vector.load %arg9[%c14_512, %c0_513] : memref<42x64xbf16, #tpu.memory_space<vmem>>, vector<24x64xbf16>
    %c8_514 = arith.constant 8 : index
    %c0_515 = arith.constant 0 : index
    %c0_516 = arith.constant 0 : index
    %568 = vector.load %arg6[%c8_514, %c0_515, %c0_516] : memref<9x64x208xbf16, #tpu.memory_space<vmem>>, vector<1x64x208xbf16>
    %569 = vector.shape_cast %568 : vector<1x64x208xbf16> to vector<64x208xbf16>
    %cst_517 = arith.constant dense<0.000000e+00> : vector<24x208xf32>
    %570 = tpu.matmul %567, %569, %cst_517 {dimension_numbers = #tpu.dot_dimension_numbers<[1], [0], [0], [1], [0, 0, 1, 1], [], []>} : vector<24x64xbf16>, vector<64x208xbf16>, vector<24x208xf32> -> vector<24x208xf32>
    %571 = arith.addf %566, %570 : vector<24x208xf32>
    %c0_518 = arith.constant 0 : index
    %c0_519 = arith.constant 0 : index
    %c0_520 = arith.constant 0 : index
    %572 = vector.load %arg8[%c0_518, %c0_519, %c0_520] : memref<1x24x208xf32, #tpu.memory_space<vmem>>, vector<1x24x208xf32>
    %573 = vector.shape_cast %572 : vector<1x24x208xf32> to vector<24x208xf32>
    %574 = vector.shape_cast %571 : vector<24x208xf32> to vector<1x24x208xf32>
    tpu.vector_store %arg8[%c0_518, %c0_519, %c0_520], %574 {strides = array<i32>} : memref<1x24x208xf32, #tpu.memory_space<vmem>>, vector<1x24x208xf32>,
    return
  }
  func.func @transform_0(%arg0: i32) -> (i32, i32, i32) {
    %c0_i32 = arith.constant 0 : i32
    %c0_i32_0 = arith.constant 0 : i32
    %c0_i32_1 = arith.constant 0 : i32
    return %arg0, %c0_i32, %c0_i32_0 : i32, i32, i32
  }
  func.func @transform_1(%arg0: i32) -> (i32, i32) {
    %c0_i32 = arith.constant 0 : i32
    %c0_i32_0 = arith.constant 0 : i32
    %c0_i32_1 = arith.constant 0 : i32
    return %c0_i32, %c0_i32_0 : i32, i32
  }
  func.func @transform_2(%arg0: i32) -> (i32, i32, i32) {
    %c0_i32 = arith.constant 0 : i32
    %c0_i32_0 = arith.constant 0 : i32
    %c0_i32_1 = arith.constant 0 : i32
    %c0_i32_2 = arith.constant 0 : i32
    return %c0_i32, %c0_i32_0, %c0_i32_1 : i32, i32, i32
  }
  func.func @transform_3(%arg0: i32) -> (i32, i32, i32) {
    %c0_i32 = arith.constant 0 : i32
    %c0_i32_0 = arith.constant 0 : i32
    %c0_i32_1 = arith.constant 0 : i32
    %c0_i32_2 = arith.constant 0 : i32
    return %c0_i32, %c0_i32_0, %c0_i32_1 : i32, i32, i32
  }
  func.func @transform_4(%arg0: i32) -> (i32, i32, i32) {
    %c0_i32 = arith.constant 0 : i32
    %c0_i32_0 = arith.constant 0 : i32
    %c0_i32_1 = arith.constant 0 : i32
    %c0_i32_2 = arith.constant 0 : i32
    return %c0_i32, %c0_i32_0, %c0_i32_1 : i32, i32, i32
  }
  func.func @transform_5(%arg0: i32) -> (i32, i32, i32) {
    %c0_i32 = arith.constant 0 : i32
    %c0_i32_0 = arith.constant 0 : i32
    %c0_i32_1 = arith.constant 0 : i32
    %c0_i32_2 = arith.constant 0 : i32
    return %c0_i32, %c0_i32_0, %c0_i32_1 : i32, i32, i32
  }
  func.func @transform_6(%arg0: i32) -> (i32, i32) {
    %c0_i32 = arith.constant 0 : i32
    %c0_i32_0 = arith.constant 0 : i32
    %c0_i32_1 = arith.constant 0 : i32
    return %c0_i32, %c0_i32_0 : i32, i32
  }
  func.func @transform_7(%arg0: i32) -> (i32, i32, i32) {
    %c0_i32 = arith.constant 0 : i32
    %c0_i32_0 = arith.constant 0 : i32
    %c0_i32_1 = arith.constant 0 : i32
    return %arg0, %c0_i32, %c0_i32_0 : i32, i32, i32
  }
}

</mosaic_0001>

<bundles_post_ra>
// kernel: _lambda_.3
= control target key start
LH: loop header
LB: loop body
LE: loop exit
PB: predicated region body
PF: predicated region fallthrough
CT: control target
= control target key end

     0   :  { %s666_s12 = smov 0   ;;  %s668_s13 = smov 0   ;;  %s743_s0 = inlined_call_operand.vmem [shape: bf16[2,64,63], index: 0, kind: input, shape index: {}]   ;;  %s744_s1 = inlined_call_operand.vmem [shape: bf16[63,32], index: 1, kind: input, shape index: {}]   ;;  %s745_s2 = inlined_call_operand.vmem [shape: f32[1,32], index: 2, kind: input, shape index: {}]   ;;  %s746_s3 = inlined_call_operand.vmem [shape: bf16[2,64,32], index: 3, kind: output, shape index: {}]  }
   0x1   :  { %s670_s14 = smov 0  }
   0x2 LB: > { %s25_s15 = sadd.s32 1, %s639_s13  ;;  %p518_p0 = scmp.ge.s32.totalorder %s643_s14, 1  ;;  %s643_s14 = sphi %s670_s14, %s13_s14   ;;  %s639_s13 = sphi %s668_s13, %s748_s13   ;;  %s635_s12 = sphi %s666_s12, %s747_s12  }
   0x3   : > { %p27_p1 = scmp.ge.s32.totalorder %s25_s15, 2  ;;  %p158_p2 = scmp.lt.s32.totalorder %s643_s14, 3 }
   0x5   : > { %s750_s15 = smov (%p27_p1, %s25_s15), 0  ;;  %p159_p3 = pnand %p518_p0, %p158_p2 }
   0x6   : > { %p191_p4 = scmp.lt.s32.totalorder (!%p159_p3), %s635_s12, 1 }
   0x7   : > { %162 = sbr.rel (%p159_p3) target bundleno = 242 (0xf2), region = 32 }
   0xc   : > { %v613_v0 = vld [vmem:[%s744_s1 + $0x18] sm:$0xff]   ;;  %vm290_vm0 = vcmask 1046528   ;;  %vm291_vm1 = vcmask 1047552   ;;  %v645_v1 = vmov 65535   ;;  %v614_v5 = vld [vmem:[%s744_s1 + $0x10] sm:$0xff]   ;;  %s752_s12 = smov (!%p191_p4, %s635_s12), 1 }
   0xd   : > { %v292_v2 = vsel %vm290_vm0, 4294967295, %v645_v1  ;;  %v615_v6 = vld [vmem:[%s744_s1 + $0x8] sm:$0xff]   ;;  %s546_s22 = sshll.u32 %s752_s12, 5  ;;  %vm277_vm2 = vcmask 515072   ;;  %v616_v9 = vld [vmem:[%s744_s1] sm:$0xff]   ;;  %vm418_vm5 = vcmask 257024  }
   0xe   : > { %v293_v3 = vsel %vm291_vm1, %v292_v2, 0  ;;  %s198_s25 = scalar_lea.vmem %s743_s0, %s546_s22  ;;  %v523_v12 = vld [vmem:[%s745_s2] ss:$0 sm:$0xff]  ;;  %s716_s5 = scalar_lea.vmem %s746_s3, %s546_s22 }
   0xf   : > { %v295_v4 = vand.u32 %v613_v0, %v293_v3  ;;  %v617_v7 = vld [vmem:[%s198_s25] sm:$0xff]   ;;  %v618_v8 = vld [vmem:[%s198_s25 + $0x10] sm:$0xff]   ;;  %v619_v10 = vld [vmem:[%s198_s25 + $0x8] sm:$0xff]  }
  0x10   : > { %572 = vmatprep.mubr.msk.bf16.mxu0 %vm277_vm2, %v617_v7  ;;  %576 = vmatprep.mubr.msk.bf16.mxu1 %vm277_vm2, %v618_v8  ;;  %v620_v11 = vld [vmem:[%s198_s25 + $0x18] sm:$0xff]  }
  0x11   : > { %564 = vmatprep.subr.bf16.mxu0 %v295_v4  ;;  %580 = vmatprep.subr.bf16.mxu1 %v295_v4 }
  0x12   : > { %565 = vmatpush3.bf16.msra.mxu0 %v295_v4  ;;  %584 = vmatpush3.bf16.msra.mxu1 %v295_v4 }
  0x13   : > { %566 = vmatprep.subr.bf16.mxu0 %v614_v5  ;;  %581 = vmatprep.subr.bf16.mxu1 %v614_v5 }
  0x16   : > { %567 = vmatpush3.bf16.msra.mxu0 %v614_v5  ;;  %585 = vmatpush3.bf16.msra.mxu1 %v614_v5 }
  0x17   : > { %568 = vmatprep.subr.bf16.mxu0 %v615_v6  ;;  %582 = vmatprep.subr.bf16.mxu1 %v615_v6 }
  0x1a   : > { %569 = vmatpush3.bf16.msra.mxu0 %v615_v6  ;;  %586 = vmatpush3.bf16.msra.mxu1 %v615_v6 }
  0x1b   : > { %570 = vmatprep.subr.bf16.mxu0 %v616_v9  ;;  %583 = vmatprep.subr.bf16.mxu1 %v616_v9 }
  0x1e   : > { %571 = vmatpush3.bf16.msra.mxu0 %v616_v9  ;;  %587 = vmatpush3.bf16.msra.mxu1 %v616_v9 }
  0x21   : > { %573 = vmatmul.mubr.msk.bf16.vlgmr.msra.gmra.mxu0 %vm277_vm2, %v619_v10  ;;  %577 = vmatmul.mubr.msk.bf16.vlgmr.msra.gmra.mxu1 %vm277_vm2, %v620_v11 }
  0xe1   : > { %v574_v13 = vpop.f32.mrf.mxu0  ;;  %v578_v14 = vpop.f32.mrf.mxu1 }
  0xe2   : > { %v340_v15 = vadd.f32 %v574_v13, %v523_v12  ;;  %v356_v16 = vadd.f32 %v578_v14, %v523_v12 }
  0xe3   : > { %v331_v17 = vpop.f32.mrf.mxu0  ;;  %v347_v18 = vpop.f32.mrf.mxu1 }
  0xe4   : > { %vm364_vm3 = vcmp.ge.f32.partialorder %v340_v15, 0.0  ;;  %v372_v19 = vmul.f32 0.2, %v340_v15  ;;  %vm368_vm4 = vcmp.ge.f32.partialorder %v356_v16, 0.0  ;;  %v376_v20 = vmul.f32 0.2, %v356_v16 }
  0xe5   : > { %v332_v21 = vadd.f32 %v523_v12, %v331_v17  ;;  %v348_v22 = vadd.f32 %v523_v12, %v347_v18  ;;  %v575_v23 = vpop.f32.mrf.mxu0  ;;  %v579_v24 = vpop.f32.mrf.mxu1 }
  0xe6   : > { %v380_v25 = vsel %vm364_vm3, %v340_v15, %v372_v19  ;;  %v384_v26 = vsel %vm368_vm4, %v356_v16, %v376_v20  ;;  %v343_v27 = vadd.f32 %v575_v23, %v523_v12  ;;  %v359_v28 = vadd.f32 %v579_v24, %v523_v12 }
  0xe7   : > { %v550_v29 = vpack.c.bf16 %v380_v25, %v380_v25  ;;  %v554_v30 = vpack.c.bf16 %v384_v26, %v384_v26  ;;  %vm362_vm6 = vcmp.ge.f32.partialorder %v332_v21, 0.0  ;;  %v370_v31 = vmul.f32 0.2, %v332_v21  ;;  %v334_v32 = vpop.f32.mrf.mxu0  ;;  %v350_v33 = vpop.f32.mrf.mxu1 }
  0xe8   : > { %vm366_vm7 = vcmp.ge.f32.partialorder %v348_v22, 0.0  ;;  %v374_v34 = vmul.f32 0.2, %v348_v22  ;;  %vm365_vm8 = vcmp.ge.f32.partialorder %v343_v27, 0.0  ;;  %v373_v35 = vmul.f32 0.2, %v343_v27 }
  0xe9   : > { %421 = vst.msk [vmem:[%s716_s5 + $0x8] sm:$0xf] %vm418_vm5, %v550_v29  ;;  %425 = vst.msk [vmem:[%s716_s5 + $0x18] sm:$0xf] %vm418_vm5, %v554_v30  ;;  %v378_v36 = vsel %vm362_vm6, %v332_v21, %v370_v31  ;;  %vm369_vm9 = vcmp.ge.f32.partialorder %v359_v28, 0.0  ;;  %v335_v38 = vadd.f32 %v523_v12, %v334_v32  ;;  %v351_v42 = vadd.f32 %v523_v12, %v350_v33 }
  0xea   : > { %v377_v37 = vmul.f32 0.2, %v359_v28  ;;  %v548_v39 = vpack.c.bf16 %v378_v36, %v378_v36  ;;  %v382_v40 = vsel %vm366_vm7, %v348_v22, %v374_v34  ;;  %v381_v41 = vsel %vm365_vm8, %v343_v27, %v373_v35 }
  0xeb   : > { %v552_v43 = vpack.c.bf16 %v382_v40, %v382_v40  ;;  %v551_v44 = vpack.c.bf16 %v381_v41, %v381_v41  ;;  %vm363_vm10 = vcmp.ge.f32.partialorder %v335_v38, 0.0  ;;  %v371_v47 = vmul.f32 0.2, %v335_v38 }
  0xec   : > { %v385_v45 = vsel %vm369_vm9, %v359_v28, %v377_v37  ;;  %419 = vst.msk [vmem:[%s716_s5] sm:$0xf] %vm418_vm5, %v548_v39  ;;  %vm367_vm11 = vcmp.ge.f32.partialorder %v351_v42, 0.0  ;;  %v375_v48 = vmul.f32 0.2, %v351_v42 }
  0xed   : > { %v555_v46 = vpack.c.bf16 %v385_v45, %v385_v45  ;;  %423 = vst.msk [vmem:[%s716_s5 + $0x10] sm:$0xf] %vm418_vm5, %v552_v43  ;;  %422 = vst.msk [vmem:[%s716_s5 + $0xc] sm:$0xf] %vm418_vm5, %v551_v44  ;;  %v379_v49 = vsel %vm363_vm10, %v335_v38, %v371_v47 }
  0xee   : > { %v383_v50 = vsel %vm367_vm11, %v351_v42, %v375_v48  ;;  %v549_v51 = vpack.c.bf16 %v379_v49, %v379_v49 }
  0xef   : > { %426 = vst.msk [vmem:[%s716_s5 + $0x1c] sm:$0xf] %vm418_vm5, %v555_v46  ;;  %v553_v52 = vpack.c.bf16 %v383_v50, %v383_v50 }
  0xf0   : > { %420 = vst.msk [vmem:[%s716_s5 + $0x4] sm:$0xf] %vm418_vm5, %v549_v51 }
  0xf1   : > { %424 = vst.msk [vmem:[%s716_s5 + $0x14] sm:$0xf] %vm418_vm5, %v553_v52 }
  0xf2 PF: > { %s13_s14 = sadd.s32 1, %s643_s14   ;;  %s747_s12 = smov %s639_s13 }
  0xf3   : > { %p10_p5 = scmp.ge.s32.totalorder %s13_s14, 4   ;;  %s748_s13 = smov %s750_s15 }
  0xf5   :  { %12 = sbr.rel (!%p10_p5) target bundleno = 2 (0x2), region = 62 }

// kernel: _lambda_.4
= control target key start
LH: loop header
LB: loop body
LE: loop exit
PB: predicated region body
PF: predicated region fallthrough
CT: control target
= control target key end

     0   :  { %s743_s12 = smov 0   ;;  %s745_s13 = smov 0   ;;  %s837_s0 = inlined_call_operand.vmem [shape: bf16[2,16,288], index: 0, kind: input, shape index: {}]   ;;  %s838_s1 = inlined_call_operand.vmem [shape: bf16[288,64], index: 1, kind: input, shape index: {}]   ;;  %s839_s2 = inlined_call_operand.vmem [shape: f32[1,64], index: 2, kind: input, shape index: {}]   ;;  %s840_s3 = inlined_call_operand.vmem [shape: bf16[2,16,64], index: 3, kind: output, shape index: {}]  }
   0x1   :  { %s747_s14 = smov 0  }
   0x2 LB: > { %s25_s15 = sadd.s32 1, %s715_s13  ;;  %p581_p0 = scmp.ge.s32.totalorder %s719_s14, 1  ;;  %s719_s14 = sphi %s747_s14, %s13_s14   ;;  %s715_s13 = sphi %s745_s13, %s842_s13   ;;  %s711_s12 = sphi %s743_s12, %s841_s12  }
   0x3   : > { %p27_p1 = scmp.ge.s32.totalorder %s25_s15, 2  ;;  %p159_p2 = scmp.lt.s32.totalorder %s719_s14, 3 }
   0x5   : > { %s844_s15 = smov (%p27_p1, %s25_s15), 0  ;;  %p160_p3 = pnand %p581_p0, %p159_p2 }
   0x6   : > { %p193_p4 = scmp.lt.s32.totalorder (!%p160_p3), %s711_s12, 1 }
   0x7   : > { %163 = sbr.rel (%p160_p3) target bundleno = 256 (0x100), region = 32 }
   0xc   : > { %v675_v0 = vld [vmem:[%s838_s1 + $0x78] sm:$0xff]   ;;  %v721_v2 = vmov 0.0   ;;  %v677_v3 = vld [vmem:[%s838_s1 + $0x70] sm:$0xff]   ;;  %vm722_vm0 = vmmov 0   ;;  %v679_v5 = vld [vmem:[%s838_s1 + $0x68] sm:$0xff]   ;;  %s846_s12 = smov (!%p193_p4, %s711_s12), 1 }
   0xd   : > { %v676_v1 = vld [vmem:[%s838_s1 + $0x38] sm:$0xff]   ;;  %640 = vmatprep.subr.bf16.mxu1 %v721_v2  ;;  %615 = vmatprep.subr.bf16.mxu0 %v675_v0  ;;  %v678_v4 = vld [vmem:[%s838_s1 + $0x30] sm:$0xff]   ;;  %v680_v6 = vld [vmem:[%s838_s1 + $0x28] sm:$0xff]   ;;  %s648_s7 = smul.u32 24, %s846_s12  ;;  %vm384_vm1 = vcmask 261120   ;;  %s612_s8 = sshll.u32 %s846_s12, 3 }
   0xe   : > { %616 = vmatpush3.bf16.msra.mxu0 %v676_v1  ;;  %644 = vmatprep.mubr.msk.bf16.mxu1 %vm722_vm0, %v721_v2  ;;  %v681_v7 = vld [vmem:[%s838_s1 + $0x60] sm:$0xff]   ;;  %v683_v9 = vld [vmem:[%s838_s1 + $0x58] sm:$0xff]   ;;  %v689_v10 = vld [vmem:[%s838_s1 + $0x88] sm:$0xff]   ;;  %s211_s11 = scalar_lea.vmem %s840_s3, %s612_s8  ;;  %vm484_vm3 = vcmask 519168  }
   0xf   : > { %617 = vmatprep.subr.bf16.mxu0 %v677_v3  ;;  %v682_v8 = vld [vmem:[%s838_s1 + $0x20] sm:$0xff]   ;;  %v684_v11 = vld [vmem:[%s838_s1 + $0x18] sm:$0xff]   ;;  %v685_v12 = vld [vmem:[%s838_s1 + $0x50] sm:$0xff]   ;;  %641 = vmatpush3.bf16.msra.mxu1 %v689_v10  ;;  %s201_s20 = scalar_lea.vmem %s837_s0, %s648_s7 }
  0x10   : > { %642 = vmatprep.subr.bf16.mxu1 %v721_v2  ;;  %v692_v13 = vld [vmem:[%s838_s1 + $0x80] sm:$0xff]   ;;  %v686_v14 = vld [vmem:[%s838_s1 + $0x10] sm:$0xff]   ;;  %v687_v16 = vld [vmem:[%s838_s1 + $0x48] sm:$0xff]  }
  0x11   : > { %v695_v15 = vld [vmem:[%s201_s20 + $0x4] ss:$12 sps:$4 sm:$0xff]   ;;  %v696_v17 = vld [vmem:[%s201_s20 + $0x8] ss:$12 sps:$4 sm:$0xff]   ;;  %v693_v21 = vld [vmem:[%s201_s20] ss:$12 sps:$4 sm:$0xff]  }
  0x12   : > { %618 = vmatpush3.bf16.msra.mxu0 %v678_v4  ;;  %420 = vmatprep.mubr.bf16.mxu0 %v695_v15  ;;  %v688_v18 = vld [vmem:[%s838_s1 + $0x8] sm:$0xff]   ;;  %v690_v19 = vld [vmem:[%s838_s1 + $0x40] sm:$0xff]  }
  0x13   : > { %619 = vmatprep.subr.bf16.mxu0 %v679_v5  ;;  %643 = vmatpush3.bf16.msra.mxu1 %v692_v13  ;;  %v691_v20 = vld [vmem:[%s838_s1] sm:$0xff]  }
  0x14   : > { %v585_v27 = vld [vmem:[%s839_s2] ss:$0 sm:$0xff] }
  0x16   : > { %620 = vmatpush3.bf16.msra.mxu0 %v680_v6  ;;  %645 = vmatmul.mubr.msk.bf16.vlgmr.msra.gmra.mxu1 %vm384_vm1, %v696_v17 }
  0x17   : > { %621 = vmatprep.subr.bf16.mxu0 %v681_v7 }
  0x1a   : > { %622 = vmatpush3.bf16.msra.mxu0 %v682_v8 }
  0x1b   : > { %623 = vmatprep.subr.bf16.mxu0 %v683_v9 }
  0x1e   : > { %624 = vmatpush3.bf16.msra.mxu0 %v684_v11 }
  0x1f   : > { %625 = vmatprep.subr.bf16.mxu0 %v685_v12 }
  0x22   : > { %626 = vmatpush3.bf16.msra.mxu0 %v686_v14 }
  0x23   : > { %627 = vmatprep.subr.bf16.mxu0 %v687_v16 }
  0x26   : > { %628 = vmatpush3.bf16.msra.mxu0 %v688_v18 }
  0x27   : > { %629 = vmatprep.subr.bf16.mxu0 %v690_v19 }
  0x2a   : > { %630 = vmatpush3.bf16.msra.mxu0 %v691_v20 }
  0x2d   : > { %421 = vmatmul.mubr.bf16.vlgmr.msra.gmra.mxu0 %v693_v21 }
  0xd6   : > { %v463_v22 = vpop.f32.mrf.mxu1 }
  0xd8   : > { %v646_v23 = vpop.f32.mrf.mxu1 }
  0xda   : > { %v466_v24 = vpop.f32.mrf.mxu1 }
  0xdc   : > { %v647_v25 = vpop.f32.mrf.mxu1 }
  0xed   : > { %v631_v26 = vpop.f32.mrf.mxu0 }
  0xef   : > { %v632_v28 = vpop.f32.mrf.mxu0 }
  0xf0   : > { %v633_v29 = vadd.f32 %v632_v28, %v631_v26 }
  0xf1   : > { %v634_v30 = vpop.f32.mrf.mxu0 }
  0xf2   : > { %v423_v31 = vadd.f32 %v633_v29, %v585_v27 }
  0xf3   : > { %v635_v32 = vpop.f32.mrf.mxu0 }
  0xf4   : > { %v464_v33 = vadd.f32 %v463_v22, %v423_v31  ;;  %v636_v34 = vadd.f32 %v635_v32, %v634_v30 }
  0xf6   : > { %vm470_vm2 = vcmp.ge.f32.partialorder %v464_v33, 0.0  ;;  %v472_v35 = vmul.f32 0.2, %v464_v33  ;;  %v426_v36 = vadd.f32 %v636_v34, %v585_v27 }
  0xf8   : > { %v474_v37 = vsel %vm470_vm2, %v464_v33, %v472_v35  ;;  %v467_v38 = vadd.f32 %v466_v24, %v426_v36 }
  0xf9   : > { %v613_v39 = vpack.c.bf16 %v474_v37, %v474_v37 }
  0xfa   : > { %vm471_vm4 = vcmp.ge.f32.partialorder %v467_v38, 0.0  ;;  %v473_v40 = vmul.f32 0.2, %v467_v38 }
  0xfb   : > { %485 = vst.msk [vmem:[%s211_s11] sm:$0xf] %vm484_vm3, %v613_v39 }
  0xfc   : > { %v475_v41 = vsel %vm471_vm4, %v467_v38, %v473_v40 }
  0xfd   : > { %v614_v42 = vpack.c.bf16 %v475_v41, %v475_v41 }
  0xff   : > { %486 = vst.msk [vmem:[%s211_s11 + $0x4] sm:$0xf] %vm484_vm3, %v614_v42 }
 0x100 PF: > { %s13_s14 = sadd.s32 1, %s719_s14   ;;  %s841_s12 = smov %s715_s13 }
 0x101   : > { %p10_p5 = scmp.ge.s32.totalorder %s13_s14, 4   ;;  %s842_s13 = smov %s844_s15 }
 0x103   :  { %12 = sbr.rel (!%p10_p5) target bundleno = 2 (0x2), region = 62 }

// kernel: _lambda_.5
= control target key start
LH: loop header
LB: loop body
LE: loop exit
PB: predicated region body
PF: predicated region fallthrough
CT: control target
= control target key end

     0   :  { %s13095_s24 = smov 0   ;;  %s15060_s0 = inlined_call_operand.vmem [shape: bf16[2,42,64], index: 0, kind: input, shape index: {}]   ;;  %s15061_s1 = inlined_call_operand.vmem [shape: f32[24,1], index: 1, kind: input, shape index: {}]   ;;  %s15062_s2 = inlined_call_operand.vmem [shape: bf16[72,64,64], index: 2, kind: input, shape index: {}]   ;;  %s15063_s3 = inlined_call_operand.vmem [shape: f32[8,1,64], index: 3, kind: input, shape index: {}]   ;;  %s15064_s4 = inlined_call_operand.vmem [shape: f32[8,1,64], index: 4, kind: input, shape index: {}]   ;;  %s15065_s5 = inlined_call_operand.vmem [shape: bf16[9,64,208], index: 5, kind: input, shape index: {}]   ;;  %s15066_s6 = inlined_call_operand.vmem [shape: f32[1,208], index: 6, kind: input, shape index: {}]   ;;  %s15067_s7 = inlined_call_operand.vmem [shape: f32[2,24,208], index: 7, kind: output, shape index: {}]  }
   0x1 LB: > { %s9836_s25 = sadd.s32 4294967295, %s13052_s24   ;;  %p9840_p0 = scmp.ge.s32.totalorder %s13052_s24, 1  ;;  %s13052_s24 = sphi %s13095_s24, %s17_s24  }
   0x2   : > { %p237_p1 = scmp.lt.s32.totalorder %s13052_s24, 3 }
   0x4   : > { %p238_p2 = pnand %p9840_p0, %p237_p1 }
   0x5   : > { %p269_p3 = scmp.lt.s32.totalorder (!%p238_p2), %s9836_s25, 1 }
   0x6   : > { %241 = sbr.rel (%p238_p2) target bundleno = 2650 (0xa5a), region = 48 }
   0xb   : > { %v12520_v0 = vld [vmem:[%s15062_s2 + $0x18] sm:$0xff]   ;;  %v12521_v1 = vld [vmem:[%s15062_s2 + $0x10] sm:$0xff]   ;;  %s15075_s25 = smov (!%p269_p3, %s9836_s25), 1  ;;  %v12523_v3 = vld [vmem:[%s15062_s2 + $0x8] sm:$0xff]   ;;  %vm286_vm0 = vcmask 519168   ;;  %vm347_vm1 = vcmask 523264  }
   0xc   : > { %11635 = vmatprep.subr.bf16.mxu0 %v12520_v0  ;;  %v12522_v2 = vld [vmem:[%s15062_s2 + $0x38] sm:$0xff]   ;;  %v12524_v4 = vld [vmem:[%s15062_s2 + $0x30] sm:$0xff]   ;;  %s12507_s13 = smul.u32 24, %s15075_s25  ;;  %v12525_v5 = vld [vmem:[%s15062_s2] sm:$0xff]   ;;  %v13054_v15 = vmov 0   ;;  %vm538_vm2 = vcmask 1046528  }
   0xd   : > { %11636 = vmatpush3.bf16.msra.mxu0 %v12520_v0  ;;  %11647 = vmatprep.subr.bf16.mxu1 %v12522_v2  ;;  %v12526_v6 = vld [vmem:[%s15062_s2 + $0x28] sm:$0xff]   ;;  %v12530_v10 = vld [vmem:[%s15062_s2 + $0x20] sm:$0xff]   ;;  %v12529_v11 = vld [vmem:[%s15062_s2 + $0x58] sm:$0xff]   ;;  %vm428_vm3 = vsmask.f32 7424  ;;  %vm640_vm4 = vcmask 1044480  }
   0xe   : > { %11637 = vmatprep.subr.bf16.mxu0 %v12521_v1  ;;  %11648 = vmatpush3.bf16.msra.mxu1 %v12522_v2  ;;  %s13130_s20 = scalar_lea.vmem %s15060_s0, %s12507_s13  ;;  %v12531_v13 = vld [vmem:[%s15062_s2 + $0x50] sm:$0xff]   ;;  %v12534_v14 = vld [vmem:[%s15062_s2 + $0x78] sm:$0xff]   ;;  %v12535_v23 = vld [vmem:[%s15062_s2 + $0x48] sm:$0xff]   ;;  %vm738_vm5 = vsmask.f32 4352  ;;  %vm952_vm6 = vcmask 1045504  }
   0xf   : > { %11649 = vmatprep.subr.bf16.mxu1 %v12524_v4  ;;  %v280_v7 = vld [vmem:[%s13130_s20] sm:$0xf]  ;;  %v281_v8 = vld [vmem:[%s13130_s20 + $0x4] sm:$0xf]  ;;  %v282_v9 = vld [vmem:[%s13130_s20 + $0x8] sm:$0xf]  ;;  %12518 = vset.pattern.permute.xlu0 %v13054_v15 }
  0x10   : > { %287 = vst.msk [vmem:[#allocation2] sm:$0xf] %vm286_vm0, %v280_v7  ;;  %288 = vst.msk [vmem:[#allocation2 + $0x4] sm:$0xf] %vm286_vm0, %v281_v8  ;;  %v283_v12 = vld [vmem:[%s13130_s20 + $0xc] sm:$0xf]  ;;  %12519 = vset.pattern.permute.xlu1 %v13054_v15 }
  0x11   : > { %11638 = vmatpush3.bf16.msra.mxu0 %v12521_v1  ;;  %289 = vst.msk [vmem:[#allocation2 + $0x8] sm:$0xf] %vm286_vm0, %v282_v9  ;;  %290 = vst.msk [vmem:[#allocation2 + $0xc] sm:$0xf] %vm286_vm0, %v283_v12  ;;  %v12536_v36 = vld [vmem:[%s15062_s2 + $0x70] sm:$0xff]   ;;  %v12537_v37 = vld [vmem:[%s15062_s2 + $0x40] sm:$0xff]  }
  0x12   : > { %11639 = vmatprep.subr.bf16.mxu0 %v12523_v3  ;;  %11650 = vmatpush3.bf16.msra.mxu1 %v12524_v4  ;;  %v12540_v45 = vld [vmem:[%s15062_s2 + $0x98] sm:$0xff]   ;;  %v12538_v51 = vld [vmem:[%s15062_s2 + $0x68] sm:$0xff]   ;;  %v12541_v55 = vld [vmem:[%s15062_s2 + $0x60] sm:$0xff]   ;;  %vm1050_vm7 = vsmask.f32 5376  ;;  %vm1264_vm8 = vcmask 1040384  }
  0x13   : > { %11651 = vmatprep.subr.bf16.mxu1 %v12526_v6  ;;  %v12542_v56 = vld [vmem:[%s15062_s2 + $0x90] sm:$0xff]   ;;  %v12546_v63 = vld [vmem:[%s15062_s2 + $0x88] sm:$0xff]   ;;  %v12545_v1 = vld [vmem:[%s15062_s2 + $0xb8] sm:$0xff]   ;;  %vm1351_vm12 = vcmask 519171   ;;  %vm1352_vm13 = vsmask.f32 7950 }
  0x14   : > { %v12547_v9 = vld [vmem:[%s15062_s2 + $0xb0] sm:$0xff]   ;;  %vm1315_vm14 = vsmask.f32 3328  ;;  %vm13343_vm15 = vmand %vm1351_vm12, %vm1352_vm13  ;;  %s12508_s11 = smul.u32 48, %s15075_s25 }
  0x15   : > { %11640 = vmatpush3.bf16.msra.mxu0 %v12523_v3  ;;  %v284_v3 = vld [vmem:[%s13130_s20 + $0x10] sm:$0xf] }
  0x16   : > { %11641 = vmatprep.subr.bf16.mxu0 %v12525_v5  ;;  %11652 = vmatpush3.bf16.msra.mxu1 %v12526_v6  ;;  %291 = vst.msk [vmem:[#allocation2 + $0x10] sm:$0xf] %vm286_vm0, %v284_v3  ;;  %v12548_v6 = vld [vmem:[%s15062_s2 + $0x80] sm:$0xff]   ;;  %s15041_s13 = scalar_lea.vmem %s15067_s7, %s12508_s11 }
  0x17   : > { %11653 = vmatprep.subr.bf16.mxu1 %v12530_v10  ;;  %v12527_v16 = vld [vmem:[#allocation2] sm:$0xff]  }
  0x18   : > { %v12528_v17 = vld [vmem:[#allocation2 + $0x8] ss:$0 sps:$4 sm:$0xff]   ;;  %v405_v18 = vld [vmem:[#allocation2] sm:$0xf]  ;;  %11643 = vmatprep.mubr.msk.bf16.mxu0 %vm347_vm1, %v12527_v16  ;;  %v13155_v19 = vld [vmem:[#allocation2 + $0x4] sm:$0xf] }
  0x19   : > { %11642 = vmatpush3.bf16.msra.mxu0 %v12525_v5  ;;  %v13157_v20 = vld [vmem:[#allocation2 + $0x8] sm:$0xf]  ;;  %v9860_v21 = vcombine.low %v405_v18, %v13155_v19  ;;  %v408_v22 = vld [vmem:[#allocation2 + $0xc] sm:$0x1]  ;;  %v525_v24 = vld [vmem:[#allocation2] sm:$0xe] }
  0x1a   : > { %11659 = vmatprep.subr.bf16.mxu0 %v12529_v11  ;;  %11654 = vmatpush3.bf16.msra.mxu1 %v12530_v10  ;;  %v9861_v25 = vcombine.low %v13157_v20, %v408_v22  ;;  %v9876_v28 = vcombine.low %v525_v24, %v13155_v19  ;;  %v623_v38 = vld [vmem:[#allocation2] sm:$0x8]  ;;  %v624_v39 = vld [vmem:[#allocation2 + $0xc] sm:$0x7]  ;;  %v929_v4 = vld [vmem:[#allocation2 + $0x4] sm:$0xc]  ;;  %v9922_v7 = vcombine.low %v13155_v19, %v13157_v20 }
  0x1b   : > { %11671 = vmatprep.subr.bf16.mxu1 %v12534_v14  ;;  %v430_v26 = vshrl.u32 %v9860_v21, 16  ;;  %v432_v27 = vshll.u32 %v9860_v21, 16  ;;  %v9891_v41 = vcombine.low %v623_v38, %v13155_v19  ;;  %v9892_v42 = vcombine.low %v13157_v20, %v624_v39  ;;  %v13183_v49 = vld [vmem:[#allocation2 + $0xc] sm:$0xf]  ;;  %v930_v5 = vld [vmem:[#allocation2 + $0x8] sm:$0xf] }
  0x1c   : > { %11644 = vmatmul.mubr.msk.bf16.vlgmr.msra.gmra.mxu0 %vm347_vm1, %v12528_v17  ;;  %v437_v30 = vshll.u32 %v9861_v25, 16  ;;  %v441_v31 = vshrl.u32 %v9861_v25, 16  ;;  %v539_v32 = vrot.slane %v9876_v28, 1  ;;  %v540_v33 = vrot.slane %v9861_v25, 1  ;;  %v12551_v10 = vld [vmem:[%s15062_s2 + $0xd8] sm:$0xff]   ;;  %v294_v17 = vld [vmem:[%s15061_s1] sm:$0xff] }
  0x1d   : > { %11660 = vmatpush3.bf16.msra.mxu0 %v12529_v11  ;;  %v434_v29 = vrot.slane %v432_v27, 1  ;;  %v641_v46 = vrot.slane %v9891_v41, 3  ;;  %v642_v47 = vrot.slane %v9892_v42, 3  ;;  %v740_v50 = vshrl.u32 %v9891_v41, 16  ;;  %v1149_v16 = vld [vmem:[#allocation2 + $0x4] sm:$0x8]  ;;  %1289 = vperm.xlu0 %12518, %v294_v17  }
  0x1e   : > { %11661 = vmatprep.subr.bf16.mxu0 %v12531_v13  ;;  %v439_v35 = vrot.slane %v437_v30, 1  ;;  %v541_v40 = vsel %vm538_vm2, %v539_v32, %v540_v33  ;;  %v9907_v52 = vcombine.low %v13157_v20, %v13183_v49  ;;  %v743_v53 = vshll.u32 %v9891_v41, 16  ;;  %v932_v18 = vld [vmem:[#allocation2 + $0x10] sm:$0x3]  ;;  %v295_v28 = vld [vmem:[%s15061_s1 + $0x8] sm:$0xff]  ;;  %v12556_v39 = vld [vmem:[%s15062_s2 + $0xf8] sm:$0xff]  }
  0x1f   : > { %v435_v34 = vor.u32 %v434_v29, %v430_v26  ;;  %11667 = vmatprep.mubr.msk.bf16.mxu0 %vm347_vm1, %v541_v40  ;;  %v643_v48 = vsel %vm640_vm4, %v641_v46, %v642_v47  ;;  %v742_v54 = vrot.slane %v740_v50, 3  ;;  %v9938_v8 = vcombine.low %v929_v4, %v930_v5  ;;  %v1037_v20 = vld [vmem:[#allocation2 + $0x10] sm:$0x7]  ;;  %v12552_v29 = vld [vmem:[%s15062_s2 + $0xa0] sm:$0xff]  }
  0x20   : > { %v443_v44 = vor.u32 %v441_v31, %v439_v35  ;;  %v745_v57 = vrot.slane %v743_v53, 4  ;;  %v748_v58 = vshrl.u32 %v9907_v52, 16  ;;  %v751_v59 = vshll.u32 %v9907_v52, 16  ;;  %v296_v22 = vld [vmem:[%s15061_s1 + $0x10] sm:$0xff]  ;;  %v12559_v40 = vld [vmem:[%s15062_s2 + $0xc0] sm:$0xff]   ;;  %v12570_v53 = vld [vmem:[%s15062_s2 + $0x138] sm:$0xff]  }
  0x21   : > { %11662 = vmatpush3.bf16.msra.mxu0 %v12531_v13  ;;  %v440_v43 = vsel %vm428_vm3, %v435_v34, %v439_v35  ;;  %v1052_v11 = vshrl.u32 %v9938_v8, 16  ;;  %v1055_v12 = vshll.u32 %v9938_v8, 16  ;;  %v931_v13 = vld [vmem:[#allocation2 + $0xc] sm:$0xf]  ;;  %v953_v19 = vrot.slane %v9938_v8, 2  ;;  %1299 = vperm.xlu1 %12519, %v296_v22   ;;  %v12568_v52 = vld [vmem:[%s15062_s2 + $0x100] sm:$0xff]  }
  0x22   : > { %11663 = vmatprep.subr.bf16.mxu0 %v12535_v23  ;;  %11655 = vmatprep.mubr.msk.bf16.mxu1 %vm347_vm1, %v440_v43  ;;  %v746_v60 = vor.u32 %v745_v57, %v742_v54  ;;  %v750_v61 = vrot.slane %v748_v58, 3  ;;  %v753_v62 = vrot.slane %v751_v59, 4  ;;  %v9969_v21 = vcombine.low %v1149_v16, %v930_v5  ;;  %v12557_v35 = vld [vmem:[%s15062_s2 + $0xc8] sm:$0xff]   ;;  %v12571_v54 = vld [vmem:[%s15062_s2 + $0x130] sm:$0xff]   ;;  %v12575_v58 = vld [vmem:[%s15062_s2 + $0x120] sm:$0xff]  }
  0x23   : > { %11656 = vmatmul.mubr.msk.bf16.vlgmr.msra.gmra.mxu1 %vm347_vm1, %v443_v44  ;;  %v9939_v24 = vcombine.low %v931_v13, %v932_v18  ;;  %v13233_v25 = vcombine.low %v931_v13, %v1037_v20  ;;  %v1054_v26 = vrot.slane %v1052_v11, 2  ;;  %v1057_v27 = vrot.slane %v1055_v12, 3  ;;  %1294 = vperm.xlu0 %12518, %v295_v28   ;;  %v12558_v44 = vld [vmem:[%s15062_s2 + $0xf0] sm:$0xff]   ;;  %v12577_v59 = vld [vmem:[%s15062_s2 + $0x148] sm:$0xff]   ;;  %v9843_v20 = vld [vmem:[%s15063_s3] ss:$0 sm:$0xff] }
  0x24   : > { %11672 = vmatpush3.bf16.msra.mxu1 %v12534_v14  ;;  %11679 = vmatprep.mubr.msk.bf16.mxu1 %vm347_vm1, %v643_v48  ;;  %v754_v0 = vor.u32 %v753_v62, %v750_v61  ;;  %v12549_v14 = vld [vmem:[%s15062_s2 + $0xa8] sm:$0xff]   ;;  %v1162_v30 = vrot.slane %v9969_v21, 3  ;;  %v9923_v43 = vcombine.low %v13183_v49, %v13183_v49  ;;  %v12565_v48 = vld [vmem:[%s15062_s2 + $0x110] sm:$0xff]   ;;  %v12564_v49 = vld [vmem:[%s15062_s2 + $0xe0] sm:$0xff]  }
  0x25   : > { %11664 = vmatpush3.bf16.msra.mxu0 %v12535_v23  ;;  %11673 = vmatprep.subr.bf16.mxu1 %v12536_v36  ;;  %v12553_v23 = vld [vmem:[%s15062_s2 + $0xd0] sm:$0xff]   ;;  %v954_v31 = vrot.slane %v9939_v24, 2  ;;  %v1060_v32 = vshrl.u32 %v13233_v25, 16  ;;  %v1163_v34 = vrot.slane %v13233_v25, 3  ;;  %v1058_v41 = vor.u32 %v1057_v27, %v1054_v26  ;;  %v12580_v61 = vld [vmem:[%s15062_s2 + $0x140] sm:$0xff]   ;;  %v13320_v62 = vld [vmem:[%s15062_s2 + $0x198] sm:$0xff]  }
  0x26   : > { %11665 = vmatprep.subr.bf16.mxu0 %v12537_v37  ;;  %v755_v2 = vsel %vm738_vm5, %v746_v60, %v754_v0  ;;  %v12574_v57 = vld [vmem:[%s15062_s2 + $0x150] sm:$0xff]   ;;  %v13311_v60 = vld [vmem:[%s15062_s2 + $0x178] sm:$0xff]  }
  0x27   : > { %v1164_v50 = vsel %vm640_vm4, %v1162_v30, %v1163_v34 }
  0x28   : > { %11674 = vmatpush3.bf16.msra.mxu1 %v12536_v36  ;;  %v955_v36 = vsel %vm952_vm6, %v953_v19, %v954_v31 }
  0x29   : > { %11666 = vmatpush3.bf16.msra.mxu0 %v12537_v37  ;;  %11675 = vmatprep.subr.bf16.mxu1 %v12538_v51  ;;  %v1062_v37 = vrot.slane %v1060_v32, 2 }
  0x2a   : > { %11683 = vmatprep.subr.bf16.mxu0 %v12540_v45 }
  0x2c   : > { %11668 = vmatmul.mubr.msk.bf16.vlgmr.msra.gmra.mxu0 %vm347_vm1, %v540_v33  ;;  %11676 = vmatpush3.bf16.msra.mxu1 %v12538_v51  ;;  %v1063_v33 = vshll.u32 %v13233_v25, 16  ;;  %v12567_v51 = vld [vmem:[%s15062_s2 + $0x108] sm:$0xff]  }
  0x2d   : > { %11684 = vmatpush3.bf16.msra.mxu0 %v12540_v45  ;;  %11677 = vmatprep.subr.bf16.mxu1 %v12541_v55  ;;  %v12563_v45 = vld [vmem:[%s15062_s2 + $0x118] sm:$0xff]  }
  0x2e   : > { %11685 = vmatprep.subr.bf16.mxu0 %v12542_v56  ;;  %11691 = vmatprep.mubr.msk.bf16.mxu0 %vm347_vm1, %v755_v2  ;;  %v1065_v38 = vrot.slane %v1063_v33, 3 }
  0x30   : > { %11678 = vmatpush3.bf16.msra.mxu1 %v12541_v55  ;;  %v1066_v42 = vor.u32 %v1065_v38, %v1062_v37  ;;  %v12572_v55 = vld [vmem:[%s15062_s2 + $0x158] sm:$0xff]  }
  0x31   : > { %11686 = vmatpush3.bf16.msra.mxu0 %v12542_v56  ;;  %11695 = vmatprep.subr.bf16.mxu1 %v12545_v1  ;;  %v12573_v56 = vld [vmem:[%s15062_s2 + $0x128] sm:$0xff]  }
  0x32   : > { %11687 = vmatprep.subr.bf16.mxu0 %v12546_v63  ;;  %v1067_v46 = vsel %vm1050_vm7, %v1058_v41, %v1066_v42 }
  0x33   : > { %11680 = vmatmul.mubr.msk.bf16.vlgmr.msra.gmra.mxu1 %vm347_vm1, %v642_v47  ;;  %v12560_v47 = vld [vmem:[%s15062_s2 + $0xe8] sm:$0xff]  }
  0x34   : > { %11696 = vmatpush3.bf16.msra.mxu1 %v12545_v1  ;;  %11703 = vmatprep.mubr.msk.bf16.mxu1 %vm347_vm1, %v9922_v7 }
  0x35   : > { %11688 = vmatpush3.bf16.msra.mxu0 %v12546_v63  ;;  %11697 = vmatprep.subr.bf16.mxu1 %v12547_v9 }
  0x36   : > { %11689 = vmatprep.subr.bf16.mxu0 %v12548_v6 }
  0x38   : > { %11698 = vmatpush3.bf16.msra.mxu1 %v12547_v9 }
  0x39   : > { %11690 = vmatpush3.bf16.msra.mxu0 %v12548_v6  ;;  %11699 = vmatprep.subr.bf16.mxu1 %v12549_v14 }
  0x3a   : > { %11707 = vmatprep.subr.bf16.mxu0 %v12551_v10 }
  0x3c   : > { %11692 = vmatmul.mubr.msk.bf16.vlgmr.msra.gmra.mxu0 %vm347_vm1, %v754_v0  ;;  %11700 = vmatpush3.bf16.msra.mxu1 %v12549_v14 }
  0x3d   : > { %11708 = vmatpush3.bf16.msra.mxu0 %v12551_v10  ;;  %11715 = vmatprep.mubr.msk.bf16.mxu0 %vm347_vm1, %v955_v36 }
  0x3e   : > { %11709 = vmatprep.subr.bf16.mxu0 %v12553_v23  ;;  %11701 = vmatprep.subr.bf16.mxu1 %v12552_v29 }
  0x40   : > { %11702 = vmatpush3.bf16.msra.mxu1 %v12552_v29 }
  0x41   : > { %11710 = vmatpush3.bf16.msra.mxu0 %v12553_v23  ;;  %11719 = vmatprep.subr.bf16.mxu1 %v12556_v39 }
  0x42   : > { %11711 = vmatprep.subr.bf16.mxu0 %v12557_v35 }
  0x43   : > { %11704 = vmatmul.mubr.msk.bf16.vlgmr.msra.gmra.mxu1 %vm347_vm1, %v9923_v43 }
  0x44   : > { %11720 = vmatpush3.bf16.msra.mxu1 %v12556_v39  ;;  %11727 = vmatprep.mubr.msk.bf16.mxu1 %vm347_vm1, %v1067_v46 }
  0x45   : > { %11712 = vmatpush3.bf16.msra.mxu0 %v12557_v35  ;;  %11721 = vmatprep.subr.bf16.mxu1 %v12558_v44 }
  0x46   : > { %11713 = vmatprep.subr.bf16.mxu0 %v12559_v40 }
  0x48   : > { %11722 = vmatpush3.bf16.msra.mxu1 %v12558_v44 }
  0x49   : > { %11714 = vmatpush3.bf16.msra.mxu0 %v12559_v40  ;;  %11723 = vmatprep.subr.bf16.mxu1 %v12560_v47  ;;  %v13042_v40 = vld [vmem:[#allocation2 + $0x8] sm:$0xf] }
  0x4a   : > { %11731 = vmatprep.subr.bf16.mxu0 %v12563_v45  ;;  %v1248_v41 = vunpack.c.l.bf16 %v13042_v40 }
  0x4c   : > { %11716 = vmatmul.mubr.msk.bf16.vlgmr.msra.gmra.mxu0 %vm347_vm1, %v954_v31  ;;  %11724 = vmatpush3.bf16.msra.mxu1 %v12560_v47 }
  0x4d   : > { %11732 = vmatpush3.bf16.msra.mxu0 %v12563_v45  ;;  %11739 = vmatprep.mubr.msk.bf16.mxu0 %vm347_vm1, %v1164_v50  ;;  %v13045_v50 = vld [vmem:[#allocation2 + $0x4] sm:$0xf] }
  0x4e   : > { %11733 = vmatprep.subr.bf16.mxu0 %v12565_v48  ;;  %11725 = vmatprep.subr.bf16.mxu1 %v12564_v49 }
  0x50   : > { %11726 = vmatpush3.bf16.msra.mxu1 %v12564_v49 }
  0x51   : > { %11734 = vmatpush3.bf16.msra.mxu0 %v12565_v48  ;;  %11743 = vmatprep.subr.bf16.mxu1 %v12570_v53  ;;  %v13326_v48 = vld [vmem:[#allocation2] sm:$0x8] }
  0x52   : > { %11735 = vmatprep.subr.bf16.mxu0 %v12567_v51  ;;  %v1246_v49 = vunpack.c.l.bf16 %v13326_v48 }
  0x53   : > { %11728 = vmatmul.mubr.msk.bf16.vlgmr.msra.gmra.mxu1 %vm347_vm1, %v1066_v42  ;;  %v13043_v42 = vld [vmem:[#allocation2 + $0xc] sm:$0xf] }
  0x54   : > { %11744 = vmatpush3.bf16.msra.mxu1 %v12570_v53  ;;  %v1249_v43 = vunpack.c.l.bf16 %v13043_v42 }
  0x55   : > { %11736 = vmatpush3.bf16.msra.mxu0 %v12567_v51  ;;  %11745 = vmatprep.subr.bf16.mxu1 %v12571_v54  ;;  %v1247_v51 = vunpack.c.l.bf16 %v13045_v50  ;;  %v12942_v50 = vld [vmem:[%s15065_s5 + $0xb0] ss:$8 sps:$4 sm:$0xff]  }
  0x56   : > { %11737 = vmatprep.subr.bf16.mxu0 %v12568_v52 }
  0x58   : > { %11746 = vmatpush3.bf16.msra.mxu1 %v12571_v54 }
  0x59   : > { %11738 = vmatpush3.bf16.msra.mxu0 %v12568_v52  ;;  %11747 = vmatprep.subr.bf16.mxu1 %v12573_v56 }
  0x5a   : > { %11755 = vmatprep.subr.bf16.mxu0 %v12572_v55 }
  0x5c   : > { %11740 = vmatmul.mubr.msk.bf16.vlgmr.msra.gmra.mxu0 %vm347_vm1, %v1163_v34  ;;  %11748 = vmatpush3.bf16.msra.mxu1 %v12573_v56 }
  0x5d   : > { %11756 = vmatpush3.bf16.msra.mxu0 %v12572_v55  ;;  %11749 = vmatprep.subr.bf16.mxu1 %v12575_v58 }
  0x5e   : > { %11757 = vmatprep.subr.bf16.mxu0 %v12574_v57 }
  0x60   : > { %11750 = vmatpush3.bf16.msra.mxu1 %v12575_v58  ;;  %v1270_v58 = vrot.slane %v1249_v43, 7 }
  0x61   : > { %11758 = vmatpush3.bf16.msra.mxu0 %v12574_v57  ;;  %11767 = vmatprep.subr.bf16.mxu1 %v13311_v60  ;;  %v1268_v57 = vrot.slane %v1248_v41, 7 }
  0x62   : > { %11759 = vmatprep.subr.bf16.mxu0 %v12577_v59 }
  0x65   : > { %11760 = vmatpush3.bf16.msra.mxu0 %v12577_v59 }
  0x66   : > { %11761 = vmatprep.subr.bf16.mxu0 %v12580_v61 }
  0x69   : > { %11762 = vmatpush3.bf16.msra.mxu0 %v12580_v61 }
  0x6a   : > { %11779 = vmatprep.subr.bf16.mxu0 %v13320_v62 }
  0xdc   : > { %v11645_v63 = vpop.f32.mrf.mxu0 }
  0xdd   : > { %v404_v25 = vadd.f32 %v11645_v63, %v9843_v20 }
  0xde   : > { %v388_v0 = vpop.f32.mrf.mxu0 }
  0xdf   : > { %v402_v27 = vadd.f32 %v9843_v20, %v388_v0 }
  0xe0   : > { %v11646_v1 = vpop.f32.mrf.mxu0 }
  0xe1   : > { %v9976_v1 = vld [vmem:[%s15064_s4] ss:$0 sm:$0xff] }
  0xe2   : > { %v391_v4 = vpop.f32.mrf.mxu0 }
  0xe3   : > { %v11657_v2 = vpop.f32.mrf.mxu1  ;;  %v403_v32 = vadd.f32 %v9843_v20, %v391_v4 }
  0xe4   : > { %v524_v28 = vadd.f32 %v11657_v2, %v404_v25  ;;  %v1265_v2 = vrot.slane %v1246_v49, 7 }
  0xe5   : > { %v508_v3 = vpop.f32.mrf.mxu1 }
  0xe6   : > { %v522_v30 = vadd.f32 %v508_v3, %v402_v27  ;;  %v1266_v3 = vrot.slane %v1247_v51, 7  ;;  %v1360_v51 = vld [vmem:[#allocation2 + $0xc] sm:$0xf] }
  0xe7   : > { %v11658_v5 = vpop.f32.mrf.mxu1 }
  0xe9   : > { %v511_v9 = vpop.f32.mrf.mxu1 }
  0xea   : > { %v523_v36 = vadd.f32 %v511_v9, %v403_v32 }
  0xec   : > { %v11669_v6 = vpop.f32.mrf.mxu0 }
  0xed   : > { %v622_v31 = vadd.f32 %v11669_v6, %v524_v28  ;;  %v13337_v28 = vpop.permute.xlu0 %1289 }
  0xee   : > { %v606_v7 = vpop.f32.mrf.mxu0 }
  0xef   : > { %v620_v33 = vadd.f32 %v606_v7, %v522_v30 }
  0xf0   : > { %v11670_v8 = vpop.f32.mrf.mxu0 }
  0xf1   : > { %v1271_v8 = vsel %vm1264_vm8, %v1268_v57, %v1270_v58  ;;  %v13341_v43 = vpop.permute.xlu0 %1294 }
  0xf2   : > { %v609_v12 = vpop.f32.mrf.mxu0 }
  0xf3   : > { %v11681_v10 = vpop.f32.mrf.mxu1  ;;  %v621_v44 = vadd.f32 %v609_v12, %v523_v36 }
  0xf4   : > { %v724_v34 = vadd.f32 %v11681_v10, %v622_v31 }
  0xf5   : > { %v708_v11 = vpop.f32.mrf.mxu1 }
  0xf6   : > { %v722_v37 = vadd.f32 %v708_v11, %v620_v33 }
  0xf7   : > { %v11682_v13 = vpop.f32.mrf.mxu1 }
  0xf8   : > { %v1267_v13 = vsel %vm1264_vm8, %v1265_v2, %v1266_v3 }
  0xf9   : > { %v711_v18 = vpop.f32.mrf.mxu1 }
  0xfa   : > { %v723_v52 = vadd.f32 %v711_v18, %v621_v44 }
  0xfc   : > { %v11693_v14 = vpop.f32.mrf.mxu0 }
  0xfd   : > { %v836_v38 = vadd.f32 %v11693_v14, %v724_v34 }
  0xfe   : > { %v820_v16 = vpop.f32.mrf.mxu0 }
  0xff   : > { %v834_v45 = vadd.f32 %v820_v16, %v722_v37 }
 0x100   : > { %v11694_v17 = vpop.f32.mrf.mxu0 }
 0x102   : > { %v823_v22 = vpop.f32.mrf.mxu0 }
 0x103   : > { %v11705_v19 = vpop.f32.mrf.mxu1  ;;  %v835_v59 = vadd.f32 %v823_v22, %v723_v52 }
 0x104   : > { %v928_v46 = vadd.f32 %v11705_v19, %v836_v38 }
 0x105   : > { %v912_v21 = vpop.f32.mrf.mxu1 }
 0x106   : > { %v926_v53 = vadd.f32 %v912_v21, %v834_v45 }
 0x107   : > { %v11706_v23 = vpop.f32.mrf.mxu1 }
 0x108   : > { %v13334_v23 = vpop.permute.xlu1 %1299 }
 0x109   : > { %v915_v35 = vpop.f32.mrf.mxu1 }
 0x10a   : > { %v927_v4 = vadd.f32 %v915_v35, %v835_v59  ;;  %v12948_v59 = vld [vmem:[%s15065_s5 + $0xa0] ss:$8 sps:$4 sm:$0xff]  }
 0x10c   : > { %v11717_v24 = vpop.f32.mrf.mxu0 }
 0x10d   : > { %v1036_v54 = vadd.f32 %v11717_v24, %v928_v46  ;;  %v1269_v24 = vsel %vm1264_vm8, %v1266_v3, %v1268_v57 }
 0x10e   : > { %v1020_v26 = vpop.f32.mrf.mxu0 }
 0x10f   : > { %v1034_v61 = vadd.f32 %v1020_v26, %v926_v53 }
 0x110   : > { %v11718_v29 = vpop.f32.mrf.mxu0 }
 0x112   : > { %v1023_v55 = vpop.f32.mrf.mxu0 }
 0x113   : > { %v11729_v39 = vpop.f32.mrf.mxu1  ;;  %v1035_v10 = vadd.f32 %v1023_v55, %v927_v4 }
 0x114   : > { %v1148_v63 = vadd.f32 %v11729_v39, %v1036_v54 }
 0x115   : > { %v1132_v47 = vpop.f32.mrf.mxu1 }
 0x116   : > { %v1146_v5 = vadd.f32 %v1132_v47, %v1034_v61 }
 0x117   : > { %v11730_v56 = vpop.f32.mrf.mxu1 }
 0x119   : > { %v1135_v7 = vpop.f32.mrf.mxu1 }
 0x11a   : > { %v1147_v16 = vadd.f32 %v1135_v7, %v1035_v10 }
 0x11c   : > { %v11741_v0 = vpop.f32.mrf.mxu0 }
 0x11d   : > { %v1245_v6 = vadd.f32 %v11741_v0, %v1148_v63 }
 0x11e   : > { %v1229_v9 = vpop.f32.mrf.mxu0 }
 0x11f   : > { %v1259_v11 = vmul.f32 %v9976_v1, %v1245_v6  ;;  %v1243_v12 = vadd.f32 %v1229_v9, %v1146_v5  ;;  %v12581_v9 = vld [vmem:[%s15062_s2 + $0x170] sm:$0xff]  }
 0x120   : > { %v11742_v14 = vpop.f32.mrf.mxu0 }
 0x121   : > { %v1277_v17 = vadd.f32 %v1271_v8, %v1259_v11  ;;  %v1257_v18 = vmul.f32 %v9976_v1, %v1243_v12 }
 0x122   : > { %v1232_v19 = vpop.f32.mrf.mxu0 }
 0x123   : > { %vm1280_vm9 = vcmp.ge.f32.partialorder %v1277_v17, 0.0  ;;  %v1283_v20 = vmul.f32 0.2, %v1277_v17  ;;  %v1275_v21 = vadd.f32 %v1267_v13, %v1257_v18  ;;  %v1244_v22 = vadd.f32 %v1232_v19, %v1147_v16 }
 0x125   : > { %v1286_v25 = vsel %vm1280_vm9, %v1277_v17, %v1283_v20  ;;  %vm1278_vm10 = vcmp.ge.f32.partialorder %v1275_v21, 0.0  ;;  %v1281_v26 = vmul.f32 0.2, %v1275_v21  ;;  %v1258_v27 = vmul.f32 %v9976_v1, %v1244_v22 }
 0x126   : > { %v1304_v29 = vmul.f32 %v13334_v23, %v1286_v25  ;;  %vm1316_vm9 = vsmask.f32 7440 }
 0x127   : > { %v1284_v30 = vsel %vm1278_vm10, %v1275_v21, %v1281_v26  ;;  %v1276_v31 = vadd.f32 %v1269_v24, %v1258_v27  ;;  %vm13350_vm10 = vmand %vm286_vm0, %vm1315_vm14 }
 0x128   : > { %v1302_v32 = vmul.f32 %v13337_v28, %v1284_v30  ;;  %v11181_v33 = vpack.c.bf16 %v1304_v29, %v1304_v29 }
 0x129   : > { %vm1279_vm11 = vcmp.ge.f32.partialorder %v1276_v31, 0.0  ;;  %v1282_v34 = vmul.f32 0.2, %v1276_v31 }
 0x12a   : > { %v11179_v35 = vpack.c.bf16 %v1302_v32, %v1302_v32  ;;  %v1338_v36 = vshll.u32 %v11181_v33, 16  ;;  %v1342_v37 = vshrl.u32 %v11181_v33, 16 }
 0x12b   : > { %v1285_v38 = vsel %vm1279_vm11, %v1276_v31, %v1282_v34  ;;  %vm13358_vm11 = vmor %vm1315_vm14, %vm1316_vm9  ;;  %v12586_v31 = vld [vmem:[%s15062_s2 + $0x168] sm:$0xff]  }
 0x12c   : > { %v1319_v39 = vshll.u32 %v11179_v35, 16  ;;  %v1322_v40 = vshrl.u32 %v11179_v35, 16  ;;  %v1340_v41 = vrot.slane %v1338_v36, 5  ;;  %v1344_v42 = vrot.slane %v1342_v37, 4 }
 0x12d   : > { %v1303_v45 = vmul.f32 %v13341_v43, %v1285_v38 }
 0x12e   : > { %v1321_v46 = vrot.slane %v1319_v39, 5  ;;  %v1324_v47 = vrot.slane %v1322_v40, 4  ;;  %v1345_v49 = vor.u32 %v1344_v42, %v1340_v41  ;;  %v12589_v40 = vld [vmem:[%s15062_s2 + $0x190] sm:$0xff]  }
 0x12f   : > { %v11180_v52 = vpack.c.bf16 %v1303_v45, %v1303_v45 }
 0x130   : > { %v1325_v53 = vor.u32 %v1324_v47, %v1321_v46  ;;  %v1354_v54 = vsel %vm13343_vm15, %v1321_v46, %v13326_v48  ;;  %v1346_v55 = vrot.slane %v1345_v49, 4 }
 0x131   : > { %1355 = vst [vmem:[#allocation2] sm:$0x8] %v1354_v54  ;;  %v1328_v56 = vshll.u32 %v11180_v52, 16  ;;  %v1332_v57 = vshrl.u32 %v11180_v52, 16  ;;  %v12592_v52 = vld [vmem:[%s15062_s2 + $0x1b8] sm:$0xff]  }
 0x132   : > { %v1326_v58 = vrot.slane %v1325_v53, 4  ;;  %v1361_v61 = vsel %vm13350_vm10, %v1346_v55, %v1360_v51  ;;  %v12591_v51 = vld [vmem:[%s15062_s2 + $0x188] sm:$0xff]  }
 0x133   : > { %1362 = vst [vmem:[#allocation2 + $0xc] sm:$0xf] %v1361_v61  ;;  %v1330_v63 = vrot.slane %v1328_v56, 5  ;;  %v1334_v0 = vrot.slane %v1332_v57, 4  ;;  %v12594_v56 = vld [vmem:[%s15062_s2 + $0x180] sm:$0xff]   ;;  %v12595_v57 = vld [vmem:[%s15062_s2 + $0x1b0] sm:$0xff]  }
 0x134   : > { %v12596_v61 = vld [vmem:[%s15062_s2 + $0x1d8] sm:$0xff]  }
 0x135   : > { %v1331_v1 = vsel %vm13358_vm11, %v1326_v58, %v1330_v63  ;;  %v1335_v48 = vor.u32 %v1334_v0, %v1330_v63  ;;  %v12598_v63 = vld [vmem:[%s15062_s2 + $0x1a8] sm:$0xff]  }
 0x136   : > { %1356 = vst.msk [vmem:[#allocation2 + $0x4] sm:$0xf] %vm286_vm0, %v1331_v1  ;;  %v12599_v1 = vld [vmem:[%s15062_s2 + $0x1d0] sm:$0xff]  }
 0x137   : > { %v1336_v2 = vrot.slane %v1335_v48, 4  ;;  %v2099_v48 = vld [vmem:[#allocation2 + $0x10] sm:$0x7] }
 0x138   : > { %v1472_v4 = vld [vmem:[#allocation2] sm:$0xf] }
 0x139   : > { %v1341_v3 = vsel %vm13358_vm11, %v1336_v2, %v1340_v41  ;;  %v1591_v8 = vld [vmem:[#allocation2] sm:$0xe] }
 0x13a   : > { %1357 = vst.msk [vmem:[#allocation2 + $0x8] sm:$0xf] %vm286_vm0, %v1341_v3  ;;  %v1475_v10 = vld [vmem:[#allocation2 + $0xc] sm:$0x1]  ;;  %v13385_v22 = vld [vmem:[#allocation2] sm:$0x8] }
 0x13b   : > { %v1689_v13 = vld [vmem:[#allocation2 + $0xc] sm:$0x7]  ;;  %v12590_v41 = vld [vmem:[%s15062_s2 + $0x160] sm:$0xff]  }
 0x13c   : > { %v13382_v20 = vld [vmem:[#allocation2 + $0xc] sm:$0xf]  ;;  %v12600_v3 = vld [vmem:[%s15062_s2 + $0x1a0] sm:$0xff]  }
 0x13d   : > { %v12576_v5 = vld [vmem:[#allocation2] sm:$0xff]  }
 0x13e   : > { %v13370_v6 = vld [vmem:[#allocation2 + $0x4] sm:$0xf]  ;;  %11751 = vmatprep.mubr.msk.bf16.mxu1 %vm347_vm1, %v12576_v5  ;;  %v1994_v5 = vld [vmem:[#allocation2 + $0xc] sm:$0xf] }
 0x13f   : > { %v10006_v7 = vcombine.low %v1472_v4, %v13370_v6  ;;  %v10022_v11 = vcombine.low %v1591_v8, %v13370_v6  ;;  %v10037_v29 = vcombine.low %v13385_v22, %v13370_v6  ;;  %v1992_v4 = vld [vmem:[#allocation2 + $0x4] sm:$0xc] }
 0x141   : > { %v1498_v12 = vshll.u32 %v10006_v7, 16  ;;  %v12579_v14 = vld [vmem:[#allocation2 + $0x8] ss:$0 sps:$4 sm:$0xff]   ;;  %v1496_v21 = vshrl.u32 %v10006_v7, 16  ;;  %v1604_v25 = vrot.slane %v10022_v11, 1  ;;  %v1705_v39 = vrot.slane %v10037_v29, 3 }
 0x142   : > { %v13378_v16 = vld [vmem:[#allocation2 + $0x8] sm:$0xf]  ;;  %11752 = vmatmul.mubr.msk.bf16.vlgmr.msra.gmra.mxu1 %vm347_vm1, %v12579_v14  ;;  %v1803_v42 = vshrl.u32 %v10037_v29, 16  ;;  %v1806_v45 = vshll.u32 %v10037_v29, 16  ;;  %v1995_v7 = vld [vmem:[#allocation2 + $0x10] sm:$0x3] }
 0x143   : > { %v10007_v17 = vcombine.low %v13378_v16, %v1475_v10  ;;  %v1500_v18 = vrot.slane %v1498_v12, 1  ;;  %v10038_v19 = vcombine.low %v13378_v16, %v1689_v13  ;;  %v10053_v24 = vcombine.low %v13378_v16, %v13382_v20  ;;  %11768 = vmatpush3.bf16.msra.mxu1 %v13311_v60  ;;  %v13430_v0 = vld [vmem:[#allocation2 + $0x8] sm:$0xf]  ;;  %v12602_v11 = vld [vmem:[%s15062_s2 + $0x1f8] sm:$0xff]  }
 0x144   : > { %11769 = vmatprep.subr.bf16.mxu1 %v12581_v9  ;;  %v1805_v53 = vrot.slane %v1803_v42, 3  ;;  %v1808_v54 = vrot.slane %v1806_v45, 4  ;;  %v10068_v2 = vcombine.low %v13370_v6, %v13378_v16  ;;  %v10084_v8 = vcombine.low %v1992_v4, %v13430_v0  ;;  %v12614_v42 = vld [vmem:[%s15062_s2 + $0x238] sm:$0xff]  }
 0x145   : > { %v1605_v26 = vrot.slane %v10007_v17, 1  ;;  %v1503_v27 = vshll.u32 %v10007_v17, 16  ;;  %v1501_v30 = vor.u32 %v1500_v18, %v1496_v21  ;;  %v1507_v34 = vshrl.u32 %v10007_v17, 16 }
 0x146   : > { %v1706_v35 = vrot.slane %v10038_v19, 3  ;;  %v1811_v60 = vshrl.u32 %v10053_v24, 16  ;;  %v1814_v36 = vshll.u32 %v10053_v24, 16  ;;  %v13446_v10 = vcombine.low %v1994_v5, %v2099_v48  ;;  %v12605_v24 = vld [vmem:[%s15062_s2 + $0x1c0] sm:$0xff]  }
 0x147   : > { %v1606_v32 = vsel %vm538_vm2, %v1604_v25, %v1605_v26  ;;  %v1505_v33 = vrot.slane %v1503_v27, 1  ;;  %11770 = vmatpush3.bf16.msra.mxu1 %v12581_v9  ;;  %v12601_v9 = vld [vmem:[%s15062_s2 + $0x1c8] sm:$0xff]   ;;  %v10085_v12 = vcombine.low %v1994_v5, %v1995_v7  ;;  %v2113_v13 = vshrl.u32 %v10084_v8, 16  ;;  %v12606_v25 = vld [vmem:[%s15062_s2 + $0x1f0] sm:$0xff]  }
 0x148   : > { %11775 = vmatprep.mubr.msk.bf16.mxu1 %vm347_vm1, %v1606_v32  ;;  %11771 = vmatprep.subr.bf16.mxu1 %v12586_v31  ;;  %v1707_v46 = vsel %vm640_vm4, %v1705_v39, %v1706_v35  ;;  %v1813_v47 = vrot.slane %v1811_v60, 3  ;;  %v1816_v49 = vrot.slane %v1814_v36, 4  ;;  %v2116_v14 = vshll.u32 %v10084_v8, 16  ;;  %v12611_v36 = vld [vmem:[%s15062_s2 + $0x210] sm:$0xff]   ;;  %v2210_v39 = vld [vmem:[#allocation2 + $0x4] sm:$0x8] }
 0x149   : > { %v1506_v37 = vsel %vm428_vm3, %v1501_v30, %v1505_v33  ;;  %v1509_v38 = vor.u32 %v1507_v34, %v1505_v33  ;;  %v2015_v17 = vrot.slane %v10084_v8, 2  ;;  %v2121_v18 = vshrl.u32 %v13446_v10, 16  ;;  %v12608_v30 = vld [vmem:[%s15062_s2 + $0x218] sm:$0xff]   ;;  %v12610_v33 = vld [vmem:[%s15062_s2 + $0x1e8] sm:$0xff]  }
 0x14a   : > { %11763 = vmatprep.mubr.msk.bf16.mxu0 %vm347_vm1, %v1506_v37  ;;  %v1817_v55 = vor.u32 %v1816_v49, %v1813_v47  ;;  %v2124_v19 = vshll.u32 %v13446_v10, 16  ;;  %v2016_v21 = vrot.slane %v10085_v12, 2  ;;  %v2118_v27 = vrot.slane %v2116_v14, 3  ;;  %v12612_v37 = vld [vmem:[%s15062_s2 + $0x1e0] sm:$0xff]   ;;  %v12617_v49 = vld [vmem:[%s15062_s2 + $0x230] sm:$0xff]  }
 0x14b   : > { %11764 = vmatmul.mubr.msk.bf16.vlgmr.msra.gmra.mxu0 %vm347_vm1, %v1509_v38  ;;  %11772 = vmatpush3.bf16.msra.mxu1 %v12586_v31  ;;  %v2123_v31 = vrot.slane %v2121_v18, 2  ;;  %v12616_v47 = vld [vmem:[%s15062_s2 + $0x200] sm:$0xff]  }
 0x14c   : > { %11780 = vmatpush3.bf16.msra.mxu0 %v13320_v62  ;;  %11787 = vmatprep.mubr.msk.bf16.mxu0 %vm347_vm1, %v1707_v46  ;;  %v1809_v62 = vor.u32 %v1808_v54, %v1805_v53  ;;  %v2017_v29 = vsel %vm952_vm6, %v2015_v17, %v2016_v21  ;;  %v2126_v32 = vrot.slane %v2124_v19, 3  ;;  %v2224_v46 = vrot.slane %v13446_v10, 3  ;;  %v12619_v53 = vld [vmem:[%s15062_s2 + $0x220] sm:$0xff]   ;;  %v12620_v54 = vld [vmem:[%s15062_s2 + $0x258] sm:$0xff]  }
 0x14d   : > { %11781 = vmatprep.subr.bf16.mxu0 %v12589_v40  ;;  %11773 = vmatprep.subr.bf16.mxu1 %v12590_v41 }
 0x14e   : > { %v1818_v58 = vsel %vm738_vm5, %v1809_v62, %v1817_v55  ;;  %v2127_v60 = vor.u32 %v2126_v32, %v2123_v31  ;;  %v12622_v62 = vld [vmem:[%s15062_s2 + $0x278] sm:$0xff]  }
 0x14f   : > { %11774 = vmatpush3.bf16.msra.mxu1 %v12590_v41  ;;  %v12613_v41 = vld [vmem:[%s15062_s2 + $0x208] sm:$0xff]  }
 0x150   : > { %11782 = vmatpush3.bf16.msra.mxu0 %v12589_v40  ;;  %11791 = vmatprep.subr.bf16.mxu1 %v12592_v52  ;;  %v10115_v40 = vcombine.low %v2210_v39, %v13430_v0  ;;  %v12630_v0 = vld [vmem:[%s15062_s2 + $0x260] sm:$0xff]  }
 0x151   : > { %11783 = vmatprep.subr.bf16.mxu0 %v12591_v51 }
 0x152   : > { %11776 = vmatmul.mubr.msk.bf16.vlgmr.msra.gmra.mxu1 %vm347_vm1, %v1605_v26  ;;  %v2115_v26 = vrot.slane %v2113_v13, 2  ;;  %v2223_v45 = vrot.slane %v10115_v40, 3 }
 0x153   : > { %11792 = vmatpush3.bf16.msra.mxu1 %v12592_v52  ;;  %11799 = vmatprep.mubr.msk.bf16.mxu1 %vm347_vm1, %v1818_v58  ;;  %v12618_v52 = vld [vmem:[%s15062_s2 + $0x228] sm:$0xff]  }
 0x154   : > { %11784 = vmatpush3.bf16.msra.mxu0 %v12591_v51  ;;  %11793 = vmatprep.subr.bf16.mxu1 %v12595_v57  ;;  %v2119_v34 = vor.u32 %v2118_v27, %v2115_v26  ;;  %v2225_v51 = vsel %vm640_vm4, %v2223_v45, %v2224_v46  ;;  %v12627_v58 = vld [vmem:[%s15062_s2 + $0x268] sm:$0xff]  }
 0x155   : > { %11785 = vmatprep.subr.bf16.mxu0 %v12594_v56 }
 0x156   : > { %v2128_v38 = vsel %vm1050_vm7, %v2119_v34, %v2127_v60 }
 0x157   : > { %11794 = vmatpush3.bf16.msra.mxu1 %v12595_v57  ;;  %v12623_v57 = vld [vmem:[%s15062_s2 + $0x248] sm:$0xff]  }
 0x158   : > { %11786 = vmatpush3.bf16.msra.mxu0 %v12594_v56  ;;  %11795 = vmatprep.subr.bf16.mxu1 %v12598_v63  ;;  %v12624_v56 = vld [vmem:[%s15062_s2 + $0x270] sm:$0xff]  }
 0x159   : > { %11803 = vmatprep.subr.bf16.mxu0 %v12596_v61 }
 0x15b   : > { %11788 = vmatmul.mubr.msk.bf16.vlgmr.msra.gmra.mxu0 %vm347_vm1, %v1706_v35  ;;  %11796 = vmatpush3.bf16.msra.mxu1 %v12598_v63  ;;  %v10069_v35 = vcombine.low %v13382_v20, %v13382_v20  ;;  %v13528_v63 = vld [vmem:[%s15062_s2 + $0x298] sm:$0xff]  }
 0x15c   : > { %11804 = vmatpush3.bf16.msra.mxu0 %v12596_v61  ;;  %11811 = vmatprep.mubr.msk.bf16.mxu0 %vm347_vm1, %v10068_v2  ;;  %v12625_v61 = vld [vmem:[%s15062_s2 + $0x240] sm:$0xff]  }
 0x15d   : > { %11805 = vmatprep.subr.bf16.mxu0 %v12599_v1  ;;  %11797 = vmatprep.subr.bf16.mxu1 %v12600_v3 }
 0x15f   : > { %11798 = vmatpush3.bf16.msra.mxu1 %v12600_v3 }
 0x160   : > { %11806 = vmatpush3.bf16.msra.mxu0 %v12599_v1  ;;  %11815 = vmatprep.subr.bf16.mxu1 %v12602_v11  ;;  %v13537_v1 = vld [vmem:[%s15062_s2 + $0x2b8] sm:$0xff]  }
 0x161   : > { %11807 = vmatprep.subr.bf16.mxu0 %v12601_v9 }
 0x162   : > { %11800 = vmatmul.mubr.msk.bf16.vlgmr.msra.gmra.mxu1 %vm347_vm1, %v1817_v55  ;;  %v12621_v55 = vld [vmem:[%s15062_s2 + $0x250] sm:$0xff]  }
 0x163   : > { %11816 = vmatpush3.bf16.msra.mxu1 %v12602_v11  ;;  %11823 = vmatprep.mubr.msk.bf16.mxu1 %vm347_vm1, %v2017_v29 }
 0x164   : > { %11808 = vmatpush3.bf16.msra.mxu0 %v12601_v9  ;;  %11817 = vmatprep.subr.bf16.mxu1 %v12606_v25 }
 0x165   : > { %11809 = vmatprep.subr.bf16.mxu0 %v12605_v24 }
 0x167   : > { %11818 = vmatpush3.bf16.msra.mxu1 %v12606_v25 }
 0x168   : > { %11810 = vmatpush3.bf16.msra.mxu0 %v12605_v24  ;;  %11819 = vmatprep.subr.bf16.mxu1 %v12610_v33 }
 0x169   : > { %11827 = vmatprep.subr.bf16.mxu0 %v12608_v30 }
 0x16b   : > { %11812 = vmatmul.mubr.msk.bf16.vlgmr.msra.gmra.mxu0 %vm347_vm1, %v10069_v35  ;;  %11820 = vmatpush3.bf16.msra.mxu1 %v12610_v33 }
 0x16c   : > { %11828 = vmatpush3.bf16.msra.mxu0 %v12608_v30  ;;  %11835 = vmatprep.mubr.msk.bf16.mxu0 %vm347_vm1, %v2128_v38  ;;  %v9981_v30 = vld [vmem:[%s15063_s3 + $0x1] ss:$0 sm:$0xff] }
 0x16d   : > { %11829 = vmatprep.subr.bf16.mxu0 %v12611_v36  ;;  %11821 = vmatprep.subr.bf16.mxu1 %v12612_v37 }
 0x16f   : > { %11822 = vmatpush3.bf16.msra.mxu1 %v12612_v37 }
 0x170   : > { %11830 = vmatpush3.bf16.msra.mxu0 %v12611_v36  ;;  %11839 = vmatprep.subr.bf16.mxu1 %v12614_v42 }
 0x171   : > { %11831 = vmatprep.subr.bf16.mxu0 %v12613_v41 }
 0x172   : > { %11824 = vmatmul.mubr.msk.bf16.vlgmr.msra.gmra.mxu1 %vm347_vm1, %v2016_v21 }
 0x173   : > { %11840 = vmatpush3.bf16.msra.mxu1 %v12614_v42  ;;  %11847 = vmatprep.mubr.msk.bf16.mxu1 %vm347_vm1, %v2225_v51 }
 0x174   : > { %11832 = vmatpush3.bf16.msra.mxu0 %v12613_v41  ;;  %11841 = vmatprep.subr.bf16.mxu1 %v12617_v49 }
 0x175   : > { %11833 = vmatprep.subr.bf16.mxu0 %v12616_v47 }
 0x177   : > { %11842 = vmatpush3.bf16.msra.mxu1 %v12617_v49 }
 0x178   : > { %11834 = vmatpush3.bf16.msra.mxu0 %v12616_v47  ;;  %11843 = vmatprep.subr.bf16.mxu1 %v12618_v52 }
 0x179   : > { %11851 = vmatprep.subr.bf16.mxu0 %v12620_v54 }
 0x17b   : > { %11836 = vmatmul.mubr.msk.bf16.vlgmr.msra.gmra.mxu0 %vm347_vm1, %v2127_v60  ;;  %11844 = vmatpush3.bf16.msra.mxu1 %v12618_v52 }
 0x17c   : > { %11845 = vmatprep.subr.bf16.mxu1 %v12619_v53  ;;  %11852 = vmatpush3.bf16.msra.mxu0 %v12620_v54 }
 0x17d   : > { %11853 = vmatprep.subr.bf16.mxu0 %v12621_v55 }
 0x17f   : > { %11846 = vmatpush3.bf16.msra.mxu1 %v12619_v53 }
 0x180   : > { %11863 = vmatprep.subr.bf16.mxu1 %v12622_v62  ;;  %11854 = vmatpush3.bf16.msra.mxu0 %v12621_v55 }
 0x181   : > { %11855 = vmatprep.subr.bf16.mxu0 %v12623_v57 }
 0x182   : > { %11848 = vmatmul.mubr.msk.bf16.vlgmr.msra.gmra.mxu1 %vm347_vm1, %v2224_v46 }
 0x183   : > { %11864 = vmatpush3.bf16.msra.mxu1 %v12622_v62  ;;  %v2309_v62 = vunpack.c.l.bf16 %v13378_v16 }
 0x184   : > { %11865 = vmatprep.subr.bf16.mxu1 %v12624_v56  ;;  %11856 = vmatpush3.bf16.msra.mxu0 %v12623_v57 }
 0x185   : > { %11857 = vmatprep.subr.bf16.mxu0 %v12625_v61 }
 0x187   : > { %11866 = vmatpush3.bf16.msra.mxu1 %v12624_v56 }
 0x188   : > { %11867 = vmatprep.subr.bf16.mxu1 %v12627_v58  ;;  %11858 = vmatpush3.bf16.msra.mxu0 %v12625_v61 }
 0x189   : > { %11875 = vmatprep.subr.bf16.mxu0 %v13528_v63 }
 0x18b   : > { %11868 = vmatpush3.bf16.msra.mxu1 %v12627_v58 }
 0x18c   : > { %11869 = vmatprep.subr.bf16.mxu1 %v12630_v0 }
 0x18f   : > { %11870 = vmatpush3.bf16.msra.mxu1 %v12630_v0  ;;  %v2310_v0 = vunpack.c.l.bf16 %v13382_v20 }
 0x190   : > { %11887 = vmatprep.subr.bf16.mxu1 %v13537_v1 }
 0x202   : > { %v11753_v48 = vpop.f32.mrf.mxu1 }
 0x203   : > { %v1471_v33 = vadd.f32 %v11753_v48, %v9981_v30  ;;  %v2308_v48 = vunpack.c.l.bf16 %v13370_v6 }
 0x204   : > { %v1455_v2 = vpop.f32.mrf.mxu1 }
 0x205   : > { %v1469_v35 = vadd.f32 %v9981_v30, %v1455_v2  ;;  %v2327_v20 = vrot.slane %v2308_v48, 7 }
 0x206   : > { %v11754_v3 = vpop.f32.mrf.mxu1 }
 0x208   : > { %v1458_v8 = vpop.f32.mrf.mxu1 }
 0x209   : > { %v1470_v40 = vadd.f32 %v9981_v30, %v1458_v8  ;;  %v2329_v8 = vrot.slane %v2309_v62, 7 }
 0x20b   : > { %v11765_v4 = vpop.f32.mrf.mxu0 }
 0x20c   : > { %v1590_v60 = vadd.f32 %v11765_v4, %v1471_v33 }
 0x20d   : > { %v1574_v5 = vpop.f32.mrf.mxu0 }
 0x20e   : > { %v1588_v37 = vadd.f32 %v1574_v5, %v1469_v35 }
 0x20f   : > { %v11766_v7 = vpop.f32.mrf.mxu0 }
 0x210   : > { %v10123_v7 = vld [vmem:[%s15064_s4 + $0x1] ss:$0 sm:$0xff] }
 0x211   : > { %v1577_v12 = vpop.f32.mrf.mxu0 }
 0x212   : > { %v11777_v9 = vpop.f32.mrf.mxu1  ;;  %v1589_v46 = vadd.f32 %v1577_v12, %v1470_v40 }
 0x213   : > { %v1687_v38 = vadd.f32 %v11777_v9, %v1590_v60  ;;  %v2307_v9 = vunpack.c.l.bf16 %v13385_v22 }
 0x214   : > { %v1671_v10 = vpop.f32.mrf.mxu1 }
 0x215   : > { %v1685_v41 = vadd.f32 %v1671_v10, %v1588_v37  ;;  %v2330_v37 = vsel %vm1264_vm8, %v2327_v20, %v2329_v8 }
 0x216   : > { %v11778_v11 = vpop.f32.mrf.mxu1 }
 0x218   : > { %v1674_v18 = vpop.f32.mrf.mxu1 }
 0x219   : > { %v1686_v52 = vadd.f32 %v1674_v18, %v1589_v46 }
 0x21b   : > { %v11789_v13 = vpop.f32.mrf.mxu0 }
 0x21c   : > { %v1788_v42 = vadd.f32 %v11789_v13, %v1687_v38  ;;  %v2331_v13 = vrot.slane %v2310_v0, 7 }
 0x21d   : > { %v1772_v14 = vpop.f32.mrf.mxu0 }
 0x21e   : > { %v1786_v47 = vadd.f32 %v1772_v14, %v1685_v41 }
 0x21f   : > { %v11790_v17 = vpop.f32.mrf.mxu0 }
 0x221   : > { %v1775_v25 = vpop.f32.mrf.mxu0 }
 0x222   : > { %v11801_v19 = vpop.f32.mrf.mxu1  ;;  %v1787_v56 = vadd.f32 %v1775_v25, %v1686_v52 }
 0x223   : > { %v1899_v49 = vadd.f32 %v11801_v19, %v1788_v42  ;;  %v2332_v19 = vsel %vm1264_vm8, %v2329_v8, %v2331_v13 }
 0x224   : > { %v1883_v21 = vpop.f32.mrf.mxu1 }
 0x225   : > { %v1897_v53 = vadd.f32 %v1883_v21, %v1786_v47  ;;  %v2326_v21 = vrot.slane %v2307_v9, 7 }
 0x226   : > { %v11802_v24 = vpop.f32.mrf.mxu1 }
 0x228   : > { %v1886_v31 = vpop.f32.mrf.mxu1 }
 0x229   : > { %v1898_v2 = vadd.f32 %v1886_v31, %v1787_v56 }
 0x22b   : > { %v11813_v26 = vpop.f32.mrf.mxu0 }
 0x22c   : > { %v1991_v54 = vadd.f32 %v11813_v26, %v1899_v49 }
 0x22d   : > { %v1975_v27 = vpop.f32.mrf.mxu0 }
 0x22e   : > { %v1989_v57 = vadd.f32 %v1975_v27, %v1897_v53 }
 0x22f   : > { %v11814_v29 = vpop.f32.mrf.mxu0 }
 0x230   : > { %v2328_v29 = vsel %vm1264_vm8, %v2326_v21, %v2327_v20 }
 0x231   : > { %v1978_v39 = vpop.f32.mrf.mxu0 }
 0x232   : > { %v11825_v32 = vpop.f32.mrf.mxu1  ;;  %v1990_v16 = vadd.f32 %v1978_v39, %v1898_v2  ;;  %v2398_v2 = vld [vmem:[#allocation2 + $0xc] sm:$0xf] }
 0x233   : > { %v2098_v58 = vadd.f32 %v11825_v32, %v1991_v54 }
 0x234   : > { %v2082_v34 = vpop.f32.mrf.mxu1 }
 0x235   : > { %v2096_v3 = vadd.f32 %v2082_v34, %v1989_v57 }
 0x236   : > { %v11826_v36 = vpop.f32.mrf.mxu1 }
 0x238   : > { %v2085_v61 = vpop.f32.mrf.mxu1 }
 0x239   : > { %v2097_v17 = vadd.f32 %v2085_v61, %v1990_v16 }
 0x23b   : > { %v11837_v45 = vpop.f32.mrf.mxu0 }
 0x23c   : > { %v2209_v4 = vadd.f32 %v11837_v45, %v2098_v58 }
 0x23d   : > { %v2193_v51 = vpop.f32.mrf.mxu0 }
 0x23e   : > { %v2207_v10 = vadd.f32 %v2193_v51, %v2096_v3 }
 0x23f   : > { %v11838_v55 = vpop.f32.mrf.mxu0 }
 0x241   : > { %v2196_v12 = vpop.f32.mrf.mxu0 }
 0x242   : > { %v11849_v5 = vpop.f32.mrf.mxu1  ;;  %v2208_v25 = vadd.f32 %v2196_v12, %v2097_v17 }
 0x243   : > { %v2306_v11 = vadd.f32 %v11849_v5, %v2209_v4 }
 0x244   : > { %v2290_v14 = vpop.f32.mrf.mxu1 }
 0x245   : > { %v2321_v6 = vmul.f32 %v10123_v7, %v2306_v11  ;;  %v2304_v18 = vadd.f32 %v2290_v14, %v2207_v10 }
 0x246   : > { %v11850_v24 = vpop.f32.mrf.mxu1 }
 0x247   : > { %v2338_v26 = vadd.f32 %v2332_v19, %v2321_v6  ;;  %v2319_v27 = vmul.f32 %v10123_v7, %v2304_v18  ;;  %v12631_v6 = vld [vmem:[%s15062_s2 + $0x290] sm:$0xff]  }
 0x248   : > { %v2293_v30 = vpop.f32.mrf.mxu1 }
 0x249   : > { %vm2341_vm12 = vcmp.ge.f32.partialorder %v2338_v26, 0.0  ;;  %v2344_v31 = vmul.f32 0.2, %v2338_v26  ;;  %v2336_v32 = vadd.f32 %v2328_v29, %v2319_v27  ;;  %v2305_v33 = vadd.f32 %v2293_v30, %v2208_v25 }
 0x24b   : > { %v2347_v34 = vsel %vm2341_vm12, %v2338_v26, %v2344_v31  ;;  %vm2339_vm13 = vcmp.ge.f32.partialorder %v2336_v32, 0.0  ;;  %v2342_v35 = vmul.f32 0.2, %v2336_v32  ;;  %v2320_v60 = vmul.f32 %v10123_v7, %v2305_v33 }
 0x24c   : > { %v2350_v36 = vmul.f32 %v2347_v34, %v13334_v23 }
 0x24d   : > { %v2345_v38 = vsel %vm2339_vm13, %v2336_v32, %v2342_v35  ;;  %v2337_v39 = vadd.f32 %v2330_v37, %v2320_v60 }
 0x24e   : > { %v11184_v40 = vpack.c.bf16 %v2350_v36, %v2350_v36  ;;  %v2348_v41 = vmul.f32 %v2345_v38, %v13337_v28 }
 0x24f   : > { %vm2340_vm14 = vcmp.ge.f32.partialorder %v2337_v39, 0.0  ;;  %v2343_v42 = vmul.f32 0.2, %v2337_v39 }
 0x250   : > { %v2381_v45 = vshll.u32 %v11184_v40, 16  ;;  %v2385_v46 = vshrl.u32 %v11184_v40, 16  ;;  %v11182_v47 = vpack.c.bf16 %v2348_v41, %v2348_v41 }
 0x251   : > { %v2346_v49 = vsel %vm2340_vm14, %v2337_v39, %v2343_v42  ;;  %v12636_v39 = vld [vmem:[%s15062_s2 + $0x288] sm:$0xff]  }
 0x252   : > { %v2383_v51 = vrot.slane %v2381_v45, 5  ;;  %v2387_v52 = vrot.slane %v2385_v46, 4  ;;  %v2362_v53 = vshll.u32 %v11182_v47, 16  ;;  %v2365_v54 = vshrl.u32 %v11182_v47, 16 }
 0x253   : > { %v2349_v55 = vmul.f32 %v2346_v49, %v13341_v43 }
 0x254   : > { %v2388_v62 = vor.u32 %v2387_v52, %v2383_v51  ;;  %v2364_v56 = vrot.slane %v2362_v53, 5  ;;  %v2367_v57 = vrot.slane %v2365_v54, 4  ;;  %v12639_v52 = vld [vmem:[%s15062_s2 + $0x2b0] sm:$0xff]   ;;  %v12640_v53 = vld [vmem:[%s15062_s2 + $0x280] sm:$0xff]  }
 0x255   : > { %v11183_v58 = vpack.c.bf16 %v2349_v55, %v2349_v55 }
 0x256   : > { %v2389_v61 = vrot.slane %v2388_v62, 4  ;;  %v2368_v0 = vor.u32 %v2367_v57, %v2364_v56  ;;  %v2394_v48 = vsel %vm13343_vm15, %v2364_v56, %v13385_v22 }
 0x257   : > { %2395 = vst [vmem:[#allocation2] sm:$0x8] %v2394_v48  ;;  %v2371_v3 = vshll.u32 %v11183_v58, 16  ;;  %v2375_v4 = vshrl.u32 %v11183_v58, 16  ;;  %v12641_v58 = vld [vmem:[%s15062_s2 + $0x2a8] sm:$0xff]  }
 0x258   : > { %v2399_v5 = vsel %vm13350_vm10, %v2389_v61, %v2398_v2  ;;  %v2369_v7 = vrot.slane %v2368_v0, 4  ;;  %v12642_v61 = vld [vmem:[%s15062_s2 + $0x2d8] sm:$0xff]  }
 0x259   : > { %2400 = vst [vmem:[#allocation2 + $0xc] sm:$0xf] %v2399_v5  ;;  %v2373_v8 = vrot.slane %v2371_v3, 5  ;;  %v2377_v9 = vrot.slane %v2375_v4, 4  ;;  %v12644_v3 = vld [vmem:[%s15062_s2 + $0x2a0] sm:$0xff]   ;;  %v12645_v4 = vld [vmem:[%s15062_s2 + $0x2d0] sm:$0xff]  }
 0x25b   : > { %v2374_v16 = vsel %vm13358_vm11, %v2369_v7, %v2373_v8  ;;  %v2378_v10 = vor.u32 %v2377_v9, %v2373_v8  ;;  %v12646_v7 = vld [vmem:[%s15062_s2 + $0x2f8] sm:$0xff]   ;;  %v12648_v8 = vld [vmem:[%s15062_s2 + $0x2c8] sm:$0xff]  }
 0x25c   : > { %2396 = vst.msk [vmem:[#allocation2 + $0x4] sm:$0xf] %vm286_vm0, %v2374_v16  ;;  %v12649_v16 = vld [vmem:[%s15062_s2 + $0x2f0] sm:$0xff]  }
 0x25d   : > { %v2379_v11 = vrot.slane %v2378_v10, 4  ;;  %v3137_v10 = vld [vmem:[#allocation2 + $0x10] sm:$0x7] }
 0x25e   : > { %v2510_v12 = vld [vmem:[#allocation2] sm:$0xf] }
 0x25f   : > { %v2384_v22 = vsel %vm13358_vm11, %v2379_v11, %v2383_v51  ;;  %v2629_v17 = vld [vmem:[#allocation2] sm:$0xe] }
 0x260   : > { %2397 = vst.msk [vmem:[#allocation2 + $0x8] sm:$0xf] %vm286_vm0, %v2384_v22  ;;  %v2513_v18 = vld [vmem:[#allocation2 + $0xc] sm:$0x1]  ;;  %v13582_v33 = vld [vmem:[#allocation2] sm:$0x8] }
 0x261   : > { %v2727_v24 = vld [vmem:[#allocation2 + $0xc] sm:$0x7]  ;;  %v12650_v22 = vld [vmem:[%s15062_s2 + $0x2c0] sm:$0xff]  }
 0x262   : > { %v13579_v31 = vld [vmem:[#allocation2 + $0xc] sm:$0xf] }
 0x263   : > { %v12626_v13 = vld [vmem:[#allocation2] sm:$0xff]  }
 0x264   : > { %v13567_v14 = vld [vmem:[#allocation2 + $0x4] sm:$0xf]  ;;  %11859 = vmatprep.mubr.msk.bf16.mxu0 %vm347_vm1, %v12626_v13  ;;  %v3032_v13 = vld [vmem:[#allocation2 + $0xc] sm:$0xf] }
 0x265   : > { %v10153_v20 = vcombine.low %v2510_v12, %v13567_v14  ;;  %v10169_v19 = vcombine.low %v2629_v17, %v13567_v14  ;;  %v10184_v37 = vcombine.low %v13582_v33, %v13567_v14  ;;  %v3030_v12 = vld [vmem:[#allocation2 + $0x4] sm:$0xc] }
 0x267   : > { %v2536_v21 = vshll.u32 %v10153_v20, 16  ;;  %v12629_v25 = vld [vmem:[#allocation2 + $0x8] ss:$0 sps:$4 sm:$0xff]   ;;  %v2534_v32 = vshrl.u32 %v10153_v20, 16  ;;  %v2642_v35 = vrot.slane %v10169_v19, 1  ;;  %v2743_v51 = vrot.slane %v10184_v37, 3 }
 0x268   : > { %v13575_v26 = vld [vmem:[#allocation2 + $0x8] sm:$0xf]  ;;  %11860 = vmatmul.mubr.msk.bf16.vlgmr.msra.gmra.mxu0 %vm347_vm1, %v12629_v25  ;;  %v2841_v54 = vshrl.u32 %v10184_v37, 16  ;;  %v2844_v55 = vshll.u32 %v10184_v37, 16  ;;  %v3033_v20 = vld [vmem:[#allocation2 + $0x10] sm:$0x3] }
 0x269   : > { %v10154_v27 = vcombine.low %v13575_v26, %v2513_v18  ;;  %v2538_v29 = vrot.slane %v2536_v21, 1  ;;  %v10185_v30 = vcombine.low %v13575_v26, %v2727_v24  ;;  %v10200_v34 = vcombine.low %v13575_v26, %v13579_v31  ;;  %11876 = vmatpush3.bf16.msra.mxu0 %v13528_v63  ;;  %v13627_v9 = vld [vmem:[#allocation2 + $0x8] sm:$0xf]  ;;  %v12652_v19 = vld [vmem:[%s15062_s2 + $0x318] sm:$0xff]  }
 0x26a   : > { %11877 = vmatprep.subr.bf16.mxu0 %v12631_v6  ;;  %v2843_v0 = vrot.slane %v2841_v54, 3  ;;  %v2846_v48 = vrot.slane %v2844_v55, 4  ;;  %v10215_v11 = vcombine.low %v13567_v14, %v13575_v26  ;;  %v10231_v17 = vcombine.low %v3030_v12, %v13627_v9  ;;  %v12664_v54 = vld [vmem:[%s15062_s2 + $0x358] sm:$0xff]  }
 0x26b   : > { %v2643_v60 = vrot.slane %v10154_v27, 1  ;;  %v2541_v36 = vshll.u32 %v10154_v27, 16  ;;  %v2539_v38 = vor.u32 %v2538_v29, %v2534_v32  ;;  %v2545_v42 = vshrl.u32 %v10154_v27, 16 }
 0x26c   : > { %v2744_v45 = vrot.slane %v10185_v30, 3  ;;  %v2849_v63 = vshrl.u32 %v10200_v34, 16  ;;  %v2852_v46 = vshll.u32 %v10200_v34, 16  ;;  %v13643_v18 = vcombine.low %v3032_v13, %v3137_v10  ;;  %v12655_v34 = vld [vmem:[%s15062_s2 + $0x2e0] sm:$0xff]  }
 0x26d   : > { %v2644_v40 = vsel %vm538_vm2, %v2642_v35, %v2643_v60  ;;  %v2543_v41 = vrot.slane %v2541_v36, 1  ;;  %11878 = vmatpush3.bf16.msra.mxu0 %v12631_v6  ;;  %v12651_v6 = vld [vmem:[%s15062_s2 + $0x2e8] sm:$0xff]   ;;  %v10232_v21 = vcombine.low %v3032_v13, %v3033_v20  ;;  %v3151_v24 = vshrl.u32 %v10231_v17, 16  ;;  %v12656_v35 = vld [vmem:[%s15062_s2 + $0x310] sm:$0xff]  }
 0x26e   : > { %11883 = vmatprep.mubr.msk.bf16.mxu0 %vm347_vm1, %v2644_v40  ;;  %11879 = vmatprep.subr.bf16.mxu0 %v12636_v39  ;;  %v2745_v62 = vsel %vm640_vm4, %v2743_v51, %v2744_v45  ;;  %v2851_v56 = vrot.slane %v2849_v63, 3  ;;  %v2854_v57 = vrot.slane %v2852_v46, 4  ;;  %v3154_v25 = vshll.u32 %v10231_v17, 16  ;;  %v12661_v46 = vld [vmem:[%s15062_s2 + $0x330] sm:$0xff]   ;;  %v3248_v51 = vld [vmem:[#allocation2 + $0x4] sm:$0x8] }
 0x26f   : > { %v2544_v47 = vsel %vm428_vm3, %v2539_v38, %v2543_v41  ;;  %v2547_v49 = vor.u32 %v2545_v42, %v2543_v41  ;;  %v3053_v27 = vrot.slane %v10231_v17, 2  ;;  %v3159_v29 = vshrl.u32 %v13643_v18, 16  ;;  %v12658_v38 = vld [vmem:[%s15062_s2 + $0x338] sm:$0xff]   ;;  %v12660_v41 = vld [vmem:[%s15062_s2 + $0x308] sm:$0xff]  }
 0x270   : > { %11871 = vmatprep.mubr.msk.bf16.mxu1 %vm347_vm1, %v2544_v47  ;;  %v2855_v2 = vor.u32 %v2854_v57, %v2851_v56  ;;  %v3162_v30 = vshll.u32 %v13643_v18, 16  ;;  %v3054_v32 = vrot.slane %v10232_v21, 2  ;;  %v3156_v36 = vrot.slane %v3154_v25, 3  ;;  %v12662_v47 = vld [vmem:[%s15062_s2 + $0x300] sm:$0xff]   ;;  %v12667_v57 = vld [vmem:[%s15062_s2 + $0x350] sm:$0xff]  }
 0x271   : > { %11872 = vmatmul.mubr.msk.bf16.vlgmr.msra.gmra.mxu1 %vm347_vm1, %v2547_v49  ;;  %11880 = vmatpush3.bf16.msra.mxu0 %v12636_v39  ;;  %v3161_v39 = vrot.slane %v3159_v29, 2  ;;  %v12666_v56 = vld [vmem:[%s15062_s2 + $0x320] sm:$0xff]  }
 0x272   : > { %11888 = vmatpush3.bf16.msra.mxu1 %v13537_v1  ;;  %11895 = vmatprep.mubr.msk.bf16.mxu1 %vm347_vm1, %v2745_v62  ;;  %v2847_v1 = vor.u32 %v2846_v48, %v2843_v0  ;;  %v3055_v37 = vsel %vm952_vm6, %v3053_v27, %v3054_v32  ;;  %v3164_v40 = vrot.slane %v3162_v30, 3  ;;  %v3262_v62 = vrot.slane %v13643_v18, 3  ;;  %v12669_v0 = vld [vmem:[%s15062_s2 + $0x340] sm:$0xff]   ;;  %v12670_v48 = vld [vmem:[%s15062_s2 + $0x378] sm:$0xff]  }
 0x273   : > { %11889 = vmatprep.subr.bf16.mxu1 %v12639_v52  ;;  %11881 = vmatprep.subr.bf16.mxu0 %v12640_v53 }
 0x274   : > { %v2856_v5 = vsel %vm738_vm5, %v2847_v1, %v2855_v2  ;;  %v3165_v63 = vor.u32 %v3164_v40, %v3161_v39  ;;  %v12672_v1 = vld [vmem:[%s15062_s2 + $0x398] sm:$0xff]  }
 0x275   : > { %11882 = vmatpush3.bf16.msra.mxu0 %v12640_v53  ;;  %v12663_v53 = vld [vmem:[%s15062_s2 + $0x328] sm:$0xff]  }
 0x276   : > { %11890 = vmatpush3.bf16.msra.mxu1 %v12639_v52  ;;  %11899 = vmatprep.subr.bf16.mxu0 %v12642_v61  ;;  %v10262_v52 = vcombine.low %v3248_v51, %v13627_v9  ;;  %v12680_v9 = vld [vmem:[%s15062_s2 + $0x380] sm:$0xff]  }
 0x277   : > { %11891 = vmatprep.subr.bf16.mxu1 %v12641_v58 }
 0x278   : > { %11884 = vmatmul.mubr.msk.bf16.vlgmr.msra.gmra.mxu0 %vm347_vm1, %v2643_v60  ;;  %v3153_v60 = vrot.slane %v3151_v24, 2  ;;  %v3261_v55 = vrot.slane %v10262_v52, 3 }
 0x279   : > { %11900 = vmatpush3.bf16.msra.mxu0 %v12642_v61  ;;  %11907 = vmatprep.mubr.msk.bf16.mxu0 %vm347_vm1, %v2856_v5  ;;  %v12668_v61 = vld [vmem:[%s15062_s2 + $0x348] sm:$0xff]  }
 0x27a   : > { %11892 = vmatpush3.bf16.msra.mxu1 %v12641_v58  ;;  %11901 = vmatprep.subr.bf16.mxu0 %v12645_v4  ;;  %v3157_v42 = vor.u32 %v3156_v36, %v3153_v60  ;;  %v3263_v58 = vsel %vm640_vm4, %v3261_v55, %v3262_v62  ;;  %v12677_v5 = vld [vmem:[%s15062_s2 + $0x388] sm:$0xff]  }
 0x27b   : > { %11893 = vmatprep.subr.bf16.mxu1 %v12644_v3 }
 0x27c   : > { %v3166_v49 = vsel %vm1050_vm7, %v3157_v42, %v3165_v63 }
 0x27d   : > { %11902 = vmatpush3.bf16.msra.mxu0 %v12645_v4  ;;  %v12673_v4 = vld [vmem:[%s15062_s2 + $0x368] sm:$0xff]  }
 0x27e   : > { %11894 = vmatpush3.bf16.msra.mxu1 %v12644_v3  ;;  %11903 = vmatprep.subr.bf16.mxu0 %v12648_v8  ;;  %v12674_v3 = vld [vmem:[%s15062_s2 + $0x390] sm:$0xff]  }
 0x27f   : > { %11911 = vmatprep.subr.bf16.mxu1 %v12646_v7 }
 0x281   : > { %11896 = vmatmul.mubr.msk.bf16.vlgmr.msra.gmra.mxu1 %vm347_vm1, %v2744_v45  ;;  %11904 = vmatpush3.bf16.msra.mxu0 %v12648_v8  ;;  %v10216_v45 = vcombine.low %v13579_v31, %v13579_v31  ;;  %v13725_v8 = vld [vmem:[%s15062_s2 + $0x3b8] sm:$0xff]  }
 0x282   : > { %11912 = vmatpush3.bf16.msra.mxu1 %v12646_v7  ;;  %11919 = vmatprep.mubr.msk.bf16.mxu1 %vm347_vm1, %v10215_v11  ;;  %v12675_v7 = vld [vmem:[%s15062_s2 + $0x360] sm:$0xff]  }
 0x283   : > { %11913 = vmatprep.subr.bf16.mxu1 %v12649_v16  ;;  %11905 = vmatprep.subr.bf16.mxu0 %v12650_v22 }
 0x285   : > { %11906 = vmatpush3.bf16.msra.mxu0 %v12650_v22 }
 0x286   : > { %11914 = vmatpush3.bf16.msra.mxu1 %v12649_v16  ;;  %11923 = vmatprep.subr.bf16.mxu0 %v12652_v19  ;;  %v13734_v16 = vld [vmem:[%s15062_s2 + $0x3d8] sm:$0xff]  }
 0x287   : > { %11915 = vmatprep.subr.bf16.mxu1 %v12651_v6 }
 0x288   : > { %11908 = vmatmul.mubr.msk.bf16.vlgmr.msra.gmra.mxu0 %vm347_vm1, %v2855_v2  ;;  %v12671_v2 = vld [vmem:[%s15062_s2 + $0x370] sm:$0xff]  }
 0x289   : > { %11924 = vmatpush3.bf16.msra.mxu0 %v12652_v19  ;;  %11931 = vmatprep.mubr.msk.bf16.mxu0 %vm347_vm1, %v3055_v37 }
 0x28a   : > { %11916 = vmatpush3.bf16.msra.mxu1 %v12651_v6  ;;  %11925 = vmatprep.subr.bf16.mxu0 %v12656_v35 }
 0x28b   : > { %11917 = vmatprep.subr.bf16.mxu1 %v12655_v34 }
 0x28d   : > { %11926 = vmatpush3.bf16.msra.mxu0 %v12656_v35 }
 0x28e   : > { %11918 = vmatpush3.bf16.msra.mxu1 %v12655_v34  ;;  %11927 = vmatprep.subr.bf16.mxu0 %v12660_v41 }
 0x28f   : > { %11935 = vmatprep.subr.bf16.mxu1 %v12658_v38 }
 0x291   : > { %11920 = vmatmul.mubr.msk.bf16.vlgmr.msra.gmra.mxu1 %vm347_vm1, %v10216_v45  ;;  %11928 = vmatpush3.bf16.msra.mxu0 %v12660_v41 }
 0x292   : > { %11936 = vmatpush3.bf16.msra.mxu1 %v12658_v38  ;;  %11943 = vmatprep.mubr.msk.bf16.mxu1 %vm347_vm1, %v3166_v49  ;;  %v10128_v38 = vld [vmem:[%s15063_s3 + $0x2] ss:$0 sm:$0xff] }
 0x293   : > { %11937 = vmatprep.subr.bf16.mxu1 %v12661_v46  ;;  %11929 = vmatprep.subr.bf16.mxu0 %v12662_v47 }
 0x295   : > { %11930 = vmatpush3.bf16.msra.mxu0 %v12662_v47 }
 0x296   : > { %11938 = vmatpush3.bf16.msra.mxu1 %v12661_v46  ;;  %11947 = vmatprep.subr.bf16.mxu0 %v12664_v54 }
 0x297   : > { %11939 = vmatprep.subr.bf16.mxu1 %v12663_v53 }
 0x298   : > { %11932 = vmatmul.mubr.msk.bf16.vlgmr.msra.gmra.mxu0 %vm347_vm1, %v3054_v32 }
 0x299   : > { %11948 = vmatpush3.bf16.msra.mxu0 %v12664_v54  ;;  %11955 = vmatprep.mubr.msk.bf16.mxu0 %vm347_vm1, %v3263_v58 }
 0x29a   : > { %11940 = vmatpush3.bf16.msra.mxu1 %v12663_v53  ;;  %11949 = vmatprep.subr.bf16.mxu0 %v12667_v57 }
 0x29b   : > { %11941 = vmatprep.subr.bf16.mxu1 %v12666_v56 }
 0x29d   : > { %11950 = vmatpush3.bf16.msra.mxu0 %v12667_v57 }
 0x29e   : > { %11942 = vmatpush3.bf16.msra.mxu1 %v12666_v56  ;;  %11951 = vmatprep.subr.bf16.mxu0 %v12668_v61 }
 0x29f   : > { %11959 = vmatprep.subr.bf16.mxu1 %v12670_v48 }
 0x2a1   : > { %11944 = vmatmul.mubr.msk.bf16.vlgmr.msra.gmra.mxu1 %vm347_vm1, %v3165_v63  ;;  %11952 = vmatpush3.bf16.msra.mxu0 %v12668_v61 }
 0x2a2   : > { %11953 = vmatprep.subr.bf16.mxu0 %v12669_v0  ;;  %11960 = vmatpush3.bf16.msra.mxu1 %v12670_v48 }
 0x2a3   : > { %11961 = vmatprep.subr.bf16.mxu1 %v12671_v2 }
 0x2a5   : > { %11954 = vmatpush3.bf16.msra.mxu0 %v12669_v0 }
 0x2a6   : > { %11971 = vmatprep.subr.bf16.mxu0 %v12672_v1  ;;  %11962 = vmatpush3.bf16.msra.mxu1 %v12671_v2 }
 0x2a7   : > { %11963 = vmatprep.subr.bf16.mxu1 %v12673_v4 }
 0x2a8   : > { %11956 = vmatmul.mubr.msk.bf16.vlgmr.msra.gmra.mxu0 %vm347_vm1, %v3262_v62 }
 0x2a9   : > { %11972 = vmatpush3.bf16.msra.mxu0 %v12672_v1  ;;  %v3347_v1 = vunpack.c.l.bf16 %v13575_v26 }
 0x2aa   : > { %11973 = vmatprep.subr.bf16.mxu0 %v12674_v3  ;;  %11964 = vmatpush3.bf16.msra.mxu1 %v12673_v4 }
 0x2ab   : > { %11965 = vmatprep.subr.bf16.mxu1 %v12675_v7 }
 0x2ad   : > { %11974 = vmatpush3.bf16.msra.mxu0 %v12674_v3 }
 0x2ae   : > { %11975 = vmatprep.subr.bf16.mxu0 %v12677_v5  ;;  %11966 = vmatpush3.bf16.msra.mxu1 %v12675_v7 }
 0x2af   : > { %11983 = vmatprep.subr.bf16.mxu1 %v13725_v8 }
 0x2b1   : > { %11976 = vmatpush3.bf16.msra.mxu0 %v12677_v5 }
 0x2b2   : > { %11977 = vmatprep.subr.bf16.mxu0 %v12680_v9 }
 0x2b5   : > { %11978 = vmatpush3.bf16.msra.mxu0 %v12680_v9  ;;  %v3348_v9 = vunpack.c.l.bf16 %v13579_v31 }
 0x2b6   : > { %11995 = vmatprep.subr.bf16.mxu0 %v13734_v16 }
 0x328   : > { %v11861_v10 = vpop.f32.mrf.mxu0 }
 0x329   : > { %v2509_v41 = vadd.f32 %v11861_v10, %v10128_v38  ;;  %v3346_v10 = vunpack.c.l.bf16 %v13567_v14 }
 0x32a   : > { %v2493_v11 = vpop.f32.mrf.mxu0 }
 0x32b   : > { %v2507_v45 = vadd.f32 %v10128_v38, %v2493_v11  ;;  %v3365_v31 = vrot.slane %v3346_v10, 7 }
 0x32c   : > { %v11862_v22 = vpop.f32.mrf.mxu0 }
 0x32e   : > { %v2496_v17 = vpop.f32.mrf.mxu0 }
 0x32f   : > { %v2508_v52 = vadd.f32 %v10128_v38, %v2496_v17  ;;  %v3367_v17 = vrot.slane %v3347_v1, 7 }
 0x331   : > { %v11873_v12 = vpop.f32.mrf.mxu1 }
 0x332   : > { %v2628_v63 = vadd.f32 %v11873_v12, %v2509_v41 }
 0x333   : > { %v2612_v13 = vpop.f32.mrf.mxu1 }
 0x334   : > { %v2626_v47 = vadd.f32 %v2612_v13, %v2507_v45 }
 0x335   : > { %v11874_v20 = vpop.f32.mrf.mxu1 }
 0x336   : > { %v10270_v20 = vld [vmem:[%s15064_s4 + $0x2] ss:$0 sm:$0xff] }
 0x337   : > { %v2615_v21 = vpop.f32.mrf.mxu1 }
 0x338   : > { %v11885_v6 = vpop.f32.mrf.mxu0  ;;  %v2627_v62 = vadd.f32 %v2615_v21, %v2508_v52 }
 0x339   : > { %v2725_v49 = vadd.f32 %v11885_v6, %v2628_v63  ;;  %v3345_v6 = vunpack.c.l.bf16 %v13582_v33 }
 0x33a   : > { %v2709_v18 = vpop.f32.mrf.mxu0 }
 0x33b   : > { %v2723_v53 = vadd.f32 %v2709_v18, %v2626_v47  ;;  %v3368_v47 = vsel %vm1264_vm8, %v3365_v31, %v3367_v17 }
 0x33c   : > { %v11886_v19 = vpop.f32.mrf.mxu0 }
 0x33e   : > { %v2712_v29 = vpop.f32.mrf.mxu0 }
 0x33f   : > { %v2724_v61 = vadd.f32 %v2712_v29, %v2627_v62 }
 0x341   : > { %v11897_v24 = vpop.f32.mrf.mxu1 }
 0x342   : > { %v2826_v54 = vadd.f32 %v11897_v24, %v2725_v49  ;;  %v3369_v24 = vrot.slane %v3348_v9, 7 }
 0x343   : > { %v2810_v25 = vpop.f32.mrf.mxu1 }
 0x344   : > { %v2824_v56 = vadd.f32 %v2810_v25, %v2723_v53 }
 0x345   : > { %v11898_v27 = vpop.f32.mrf.mxu1 }
 0x347   : > { %v2813_v35 = vpop.f32.mrf.mxu1 }
 0x348   : > { %v11909_v30 = vpop.f32.mrf.mxu0  ;;  %v2825_v3 = vadd.f32 %v2813_v35, %v2724_v61 }
 0x349   : > { %v2937_v57 = vadd.f32 %v11909_v30, %v2826_v54  ;;  %v3370_v30 = vsel %vm1264_vm8, %v3367_v17, %v3369_v24 }
 0x34a   : > { %v2921_v32 = vpop.f32.mrf.mxu0 }
 0x34b   : > { %v2935_v0 = vadd.f32 %v2921_v32, %v2824_v56  ;;  %v3364_v32 = vrot.slane %v3345_v6, 7 }
 0x34c   : > { %v11910_v34 = vpop.f32.mrf.mxu0 }
 0x34e   : > { %v2924_v39 = vpop.f32.mrf.mxu0 }
 0x34f   : > { %v2936_v11 = vadd.f32 %v2924_v39, %v2825_v3 }
 0x351   : > { %v11921_v60 = vpop.f32.mrf.mxu1 }
 0x352   : > { %v3029_v48 = vadd.f32 %v11921_v60, %v2937_v57 }
 0x353   : > { %v3013_v36 = vpop.f32.mrf.mxu1 }
 0x354   : > { %v3027_v4 = vadd.f32 %v3013_v36, %v2935_v0 }
 0x355   : > { %v11922_v37 = vpop.f32.mrf.mxu1 }
 0x356   : > { %v3366_v37 = vsel %vm1264_vm8, %v3364_v32, %v3365_v31 }
 0x357   : > { %v3016_v51 = vpop.f32.mrf.mxu1 }
 0x358   : > { %v11933_v40 = vpop.f32.mrf.mxu0  ;;  %v3028_v26 = vadd.f32 %v3016_v51, %v2936_v11  ;;  %v3436_v11 = vld [vmem:[#allocation2 + $0xc] sm:$0xf] }
 0x359   : > { %v3136_v5 = vadd.f32 %v11933_v40, %v3029_v48 }
 0x35a   : > { %v3120_v42 = vpop.f32.mrf.mxu0 }
 0x35b   : > { %v3134_v22 = vadd.f32 %v3120_v42, %v3027_v4 }
 0x35c   : > { %v11934_v46 = vpop.f32.mrf.mxu0 }
 0x35e   : > { %v3123_v7 = vpop.f32.mrf.mxu0 }
 0x35f   : > { %v3135_v27 = vadd.f32 %v3123_v7, %v3028_v26 }
 0x361   : > { %v11945_v55 = vpop.f32.mrf.mxu1 }
 0x362   : > { %v3247_v12 = vadd.f32 %v11945_v55, %v3136_v5 }
 0x363   : > { %v3231_v58 = vpop.f32.mrf.mxu1 }
 0x364   : > { %v3245_v18 = vadd.f32 %v3231_v58, %v3134_v22 }
 0x365   : > { %v11946_v2 = vpop.f32.mrf.mxu1 }
 0x367   : > { %v3234_v21 = vpop.f32.mrf.mxu1 }
 0x368   : > { %v11957_v13 = vpop.f32.mrf.mxu0  ;;  %v3246_v35 = vadd.f32 %v3234_v21, %v3135_v27 }
 0x369   : > { %v3344_v19 = vadd.f32 %v11957_v13, %v3247_v12 }
 0x36a   : > { %v3328_v25 = vpop.f32.mrf.mxu0 }
 0x36b   : > { %v3359_v14 = vmul.f32 %v10270_v20, %v3344_v19  ;;  %v3342_v29 = vadd.f32 %v3328_v25, %v3245_v18 }
 0x36c   : > { %v11958_v34 = vpop.f32.mrf.mxu0 }
 0x36d   : > { %v3376_v60 = vadd.f32 %v3370_v30, %v3359_v14  ;;  %v3357_v36 = vmul.f32 %v10270_v20, %v3342_v29  ;;  %v12681_v14 = vld [vmem:[%s15062_s2 + $0x3b0] sm:$0xff]  }
 0x36e   : > { %v3331_v38 = vpop.f32.mrf.mxu0 }
 0x36f   : > { %vm3379_vm9 = vcmp.ge.f32.partialorder %v3376_v60, 0.0  ;;  %v3382_v39 = vmul.f32 0.2, %v3376_v60  ;;  %v3374_v40 = vadd.f32 %v3366_v37, %v3357_v36  ;;  %v3343_v41 = vadd.f32 %v3331_v38, %v3246_v35 }
 0x371   : > { %v3385_v42 = vsel %vm3379_vm9, %v3376_v60, %v3382_v39  ;;  %vm3377_vm12 = vcmp.ge.f32.partialorder %v3374_v40, 0.0  ;;  %v3380_v45 = vmul.f32 0.2, %v3374_v40  ;;  %v3358_v63 = vmul.f32 %v10270_v20, %v3343_v41 }
 0x372   : > { %v3388_v46 = vmul.f32 %v3385_v42, %v13334_v23 }
 0x373   : > { %v3383_v49 = vsel %vm3377_vm12, %v3374_v40, %v3380_v45  ;;  %v3375_v51 = vadd.f32 %v3368_v47, %v3358_v63 }
 0x374   : > { %v11187_v52 = vpack.c.bf16 %v3388_v46, %v3388_v46  ;;  %v3386_v53 = vmul.f32 %v3383_v49, %v13337_v28 }
 0x375   : > { %vm3378_vm13 = vcmp.ge.f32.partialorder %v3375_v51, 0.0  ;;  %v3381_v54 = vmul.f32 0.2, %v3375_v51 }
 0x376   : > { %v3419_v55 = vshll.u32 %v11187_v52, 16  ;;  %v3423_v62 = vshrl.u32 %v11187_v52, 16  ;;  %v11185_v56 = vpack.c.bf16 %v3386_v53, %v3386_v53 }
 0x377   : > { %v3384_v57 = vsel %vm3378_vm13, %v3375_v51, %v3381_v54  ;;  %v12686_v51 = vld [vmem:[%s15062_s2 + $0x3a8] sm:$0xff]  }
 0x378   : > { %v3421_v58 = vrot.slane %v3419_v55, 5  ;;  %v3425_v61 = vrot.slane %v3423_v62, 4  ;;  %v3400_v0 = vshll.u32 %v11185_v56, 16  ;;  %v3403_v48 = vshrl.u32 %v11185_v56, 16 }
 0x379   : > { %v3387_v2 = vmul.f32 %v3384_v57, %v13341_v43 }
 0x37a   : > { %v3426_v1 = vor.u32 %v3425_v61, %v3421_v58  ;;  %v3402_v3 = vrot.slane %v3400_v0, 5  ;;  %v3405_v4 = vrot.slane %v3403_v48, 4  ;;  %v12689_v61 = vld [vmem:[%s15062_s2 + $0x3d0] sm:$0xff]   ;;  %v12690_v0 = vld [vmem:[%s15062_s2 + $0x3a0] sm:$0xff]  }
 0x37b   : > { %v11186_v5 = vpack.c.bf16 %v3387_v2, %v3387_v2 }
 0x37c   : > { %v3427_v7 = vrot.slane %v3426_v1, 4  ;;  %v3406_v9 = vor.u32 %v3405_v4, %v3402_v3  ;;  %v3432_v10 = vsel %vm13343_vm15, %v3402_v3, %v13582_v33 }
 0x37d   : > { %3433 = vst [vmem:[#allocation2] sm:$0x8] %v3432_v10  ;;  %v3409_v22 = vshll.u32 %v11186_v5, 16  ;;  %v3413_v12 = vshrl.u32 %v11186_v5, 16  ;;  %v12691_v5 = vld [vmem:[%s15062_s2 + $0x3c8] sm:$0xff]  }
 0x37e   : > { %v3437_v13 = vsel %vm13350_vm10, %v3427_v7, %v3436_v11  ;;  %v3407_v20 = vrot.slane %v3406_v9, 4  ;;  %v12692_v7 = vld [vmem:[%s15062_s2 + $0x3f8] sm:$0xff]  }
 0x37f   : > { %3438 = vst [vmem:[#allocation2 + $0xc] sm:$0xf] %v3437_v13  ;;  %v3411_v17 = vrot.slane %v3409_v22, 5  ;;  %v3415_v6 = vrot.slane %v3413_v12, 4  ;;  %v12694_v22 = vld [vmem:[%s15062_s2 + $0x3c0] sm:$0xff]   ;;  %v12695_v12 = vld [vmem:[%s15062_s2 + $0x3f0] sm:$0xff]  }
 0x381   : > { %v3412_v26 = vsel %vm13358_vm11, %v3407_v20, %v3411_v17  ;;  %v3416_v18 = vor.u32 %v3415_v6, %v3411_v17  ;;  %v12696_v20 = vld [vmem:[%s15062_s2 + $0x418] sm:$0xff]   ;;  %v12698_v17 = vld [vmem:[%s15062_s2 + $0x3e8] sm:$0xff]  }
 0x382   : > { %3434 = vst.msk [vmem:[#allocation2 + $0x4] sm:$0xf] %vm286_vm0, %v3412_v26  ;;  %v12699_v26 = vld [vmem:[%s15062_s2 + $0x410] sm:$0xff]  }
 0x383   : > { %v3417_v19 = vrot.slane %v3416_v18, 4  ;;  %v4175_v18 = vld [vmem:[#allocation2 + $0x10] sm:$0x7] }
 0x384   : > { %v3548_v21 = vld [vmem:[#allocation2] sm:$0xf] }
 0x385   : > { %v3422_v33 = vsel %vm13358_vm11, %v3417_v19, %v3421_v58  ;;  %v3667_v27 = vld [vmem:[#allocation2] sm:$0xe] }
 0x386   : > { %3435 = vst.msk [vmem:[#allocation2 + $0x8] sm:$0xf] %vm286_vm0, %v3422_v33  ;;  %v3551_v29 = vld [vmem:[#allocation2 + $0xc] sm:$0x1]  ;;  %v13779_v41 = vld [vmem:[#allocation2] sm:$0x8] }
 0x387   : > { %v3765_v34 = vld [vmem:[#allocation2 + $0xc] sm:$0x7]  ;;  %v12700_v33 = vld [vmem:[%s15062_s2 + $0x3e0] sm:$0xff]  }
 0x388   : > { %v13776_v39 = vld [vmem:[#allocation2 + $0xc] sm:$0xf] }
 0x389   : > { %v12676_v24 = vld [vmem:[#allocation2] sm:$0xff]  }
 0x38a   : > { %v13764_v25 = vld [vmem:[#allocation2 + $0x4] sm:$0xf]  ;;  %11967 = vmatprep.mubr.msk.bf16.mxu1 %vm347_vm1, %v12676_v24  ;;  %v4070_v24 = vld [vmem:[#allocation2 + $0xc] sm:$0xf] }
 0x38b   : > { %v10300_v31 = vcombine.low %v3548_v21, %v13764_v25  ;;  %v10316_v30 = vcombine.low %v3667_v27, %v13764_v25  ;;  %v10331_v47 = vcombine.low %v13779_v41, %v13764_v25  ;;  %v4068_v21 = vld [vmem:[#allocation2 + $0x4] sm:$0xc] }
 0x38d   : > { %v3574_v32 = vshll.u32 %v10300_v31, 16  ;;  %v12679_v35 = vld [vmem:[#allocation2 + $0x8] ss:$0 sps:$4 sm:$0xff]   ;;  %v3572_v40 = vshrl.u32 %v10300_v31, 16  ;;  %v3680_v45 = vrot.slane %v10316_v30, 1  ;;  %v3781_v58 = vrot.slane %v10331_v47, 3 }
 0x38e   : > { %v13772_v60 = vld [vmem:[#allocation2 + $0x8] sm:$0xf]  ;;  %11968 = vmatmul.mubr.msk.bf16.vlgmr.msra.gmra.mxu1 %vm347_vm1, %v12679_v35  ;;  %v3879_v48 = vshrl.u32 %v10331_v47, 16  ;;  %v3882_v2 = vshll.u32 %v10331_v47, 16  ;;  %v4071_v31 = vld [vmem:[#allocation2 + $0x10] sm:$0x3] }
 0x38f   : > { %v10301_v36 = vcombine.low %v13772_v60, %v3551_v29  ;;  %v3576_v37 = vrot.slane %v3574_v32, 1  ;;  %v10332_v38 = vcombine.low %v13772_v60, %v3765_v34  ;;  %v10347_v42 = vcombine.low %v13772_v60, %v13776_v39  ;;  %11984 = vmatpush3.bf16.msra.mxu1 %v13725_v8  ;;  %v13824_v6 = vld [vmem:[#allocation2 + $0x8] sm:$0xf]  ;;  %v12702_v30 = vld [vmem:[%s15062_s2 + $0x438] sm:$0xff]  }
 0x390   : > { %11985 = vmatprep.subr.bf16.mxu1 %v12681_v14  ;;  %v3881_v9 = vrot.slane %v3879_v48, 3  ;;  %v3884_v10 = vrot.slane %v3882_v2, 4  ;;  %v10362_v19 = vcombine.low %v13764_v25, %v13772_v60  ;;  %v10378_v27 = vcombine.low %v4068_v21, %v13824_v6  ;;  %v12714_v48 = vld [vmem:[%s15062_s2 + $0x478] sm:$0xff]  }
 0x391   : > { %v3681_v63 = vrot.slane %v10301_v36, 1  ;;  %v3579_v46 = vshll.u32 %v10301_v36, 16  ;;  %v3577_v49 = vor.u32 %v3576_v37, %v3572_v40  ;;  %v3583_v54 = vshrl.u32 %v10301_v36, 16 }
 0x392   : > { %v3782_v55 = vrot.slane %v10332_v38, 3  ;;  %v3887_v8 = vshrl.u32 %v10347_v42, 16  ;;  %v3890_v62 = vshll.u32 %v10347_v42, 16  ;;  %v13840_v29 = vcombine.low %v4070_v24, %v4175_v18  ;;  %v12705_v42 = vld [vmem:[%s15062_s2 + $0x400] sm:$0xff]  }
 0x393   : > { %v3682_v52 = vsel %vm538_vm2, %v3680_v45, %v3681_v63  ;;  %v3581_v53 = vrot.slane %v3579_v46, 1  ;;  %11986 = vmatpush3.bf16.msra.mxu1 %v12681_v14  ;;  %v12701_v14 = vld [vmem:[%s15062_s2 + $0x408] sm:$0xff]   ;;  %v10379_v32 = vcombine.low %v4070_v24, %v4071_v31  ;;  %v4189_v34 = vshrl.u32 %v10378_v27, 16  ;;  %v12706_v45 = vld [vmem:[%s15062_s2 + $0x430] sm:$0xff]  }
 0x394   : > { %11991 = vmatprep.mubr.msk.bf16.mxu1 %vm347_vm1, %v3682_v52  ;;  %11987 = vmatprep.subr.bf16.mxu1 %v12686_v51  ;;  %v3783_v1 = vsel %vm640_vm4, %v3781_v58, %v3782_v55  ;;  %v3889_v3 = vrot.slane %v3887_v8, 3  ;;  %v3892_v4 = vrot.slane %v3890_v62, 4  ;;  %v4192_v35 = vshll.u32 %v10378_v27, 16  ;;  %v12711_v62 = vld [vmem:[%s15062_s2 + $0x450] sm:$0xff]   ;;  %v4286_v58 = vld [vmem:[#allocation2 + $0x4] sm:$0x8] }
 0x395   : > { %v3582_v56 = vsel %vm428_vm3, %v3577_v49, %v3581_v53  ;;  %v3585_v57 = vor.u32 %v3583_v54, %v3581_v53  ;;  %v4091_v36 = vrot.slane %v10378_v27, 2  ;;  %v4197_v37 = vshrl.u32 %v13840_v29, 16  ;;  %v12708_v49 = vld [vmem:[%s15062_s2 + $0x458] sm:$0xff]   ;;  %v12710_v53 = vld [vmem:[%s15062_s2 + $0x428] sm:$0xff]  }
 0x396   : > { %11979 = vmatprep.mubr.msk.bf16.mxu0 %vm347_vm1, %v3582_v56  ;;  %v3893_v11 = vor.u32 %v3892_v4, %v3889_v3  ;;  %v4200_v38 = vshll.u32 %v13840_v29, 16  ;;  %v4092_v40 = vrot.slane %v10379_v32, 2  ;;  %v4194_v46 = vrot.slane %v4192_v35, 3  ;;  %v12712_v56 = vld [vmem:[%s15062_s2 + $0x420] sm:$0xff]   ;;  %v12717_v4 = vld [vmem:[%s15062_s2 + $0x470] sm:$0xff]  }
 0x397   : > { %11980 = vmatmul.mubr.msk.bf16.vlgmr.msra.gmra.mxu0 %vm347_vm1, %v3585_v57  ;;  %11988 = vmatpush3.bf16.msra.mxu1 %v12686_v51  ;;  %v4199_v51 = vrot.slane %v4197_v37, 2  ;;  %v12716_v3 = vld [vmem:[%s15062_s2 + $0x440] sm:$0xff]  }
 0x398   : > { %11996 = vmatpush3.bf16.msra.mxu0 %v13734_v16  ;;  %12003 = vmatprep.mubr.msk.bf16.mxu0 %vm347_vm1, %v3783_v1  ;;  %v3885_v16 = vor.u32 %v3884_v10, %v3881_v9  ;;  %v4093_v47 = vsel %vm952_vm6, %v4091_v36, %v4092_v40  ;;  %v4202_v52 = vrot.slane %v4200_v38, 3  ;;  %v4300_v1 = vrot.slane %v13840_v29, 3  ;;  %v12719_v9 = vld [vmem:[%s15062_s2 + $0x460] sm:$0xff]   ;;  %v12720_v10 = vld [vmem:[%s15062_s2 + $0x498] sm:$0xff]  }
 0x399   : > { %11997 = vmatprep.subr.bf16.mxu0 %v12689_v61  ;;  %11989 = vmatprep.subr.bf16.mxu1 %v12690_v0 }
 0x39a   : > { %v3894_v13 = vsel %vm738_vm5, %v3885_v16, %v3893_v11  ;;  %v4203_v8 = vor.u32 %v4202_v52, %v4199_v51  ;;  %v12722_v16 = vld [vmem:[%s15062_s2 + $0x4b8] sm:$0xff]  }
 0x39b   : > { %11990 = vmatpush3.bf16.msra.mxu1 %v12690_v0  ;;  %v12713_v0 = vld [vmem:[%s15062_s2 + $0x448] sm:$0xff]  }
 0x39c   : > { %11998 = vmatpush3.bf16.msra.mxu0 %v12689_v61  ;;  %12007 = vmatprep.subr.bf16.mxu1 %v12692_v7  ;;  %v10409_v61 = vcombine.low %v4286_v58, %v13824_v6  ;;  %v12730_v6 = vld [vmem:[%s15062_s2 + $0x4a0] sm:$0xff]  }
 0x39d   : > { %11999 = vmatprep.subr.bf16.mxu0 %v12691_v5 }
 0x39e   : > { %11992 = vmatmul.mubr.msk.bf16.vlgmr.msra.gmra.mxu1 %vm347_vm1, %v3681_v63  ;;  %v4191_v63 = vrot.slane %v4189_v34, 2  ;;  %v4299_v2 = vrot.slane %v10409_v61, 3 }
 0x39f   : > { %12008 = vmatpush3.bf16.msra.mxu1 %v12692_v7  ;;  %12015 = vmatprep.mubr.msk.bf16.mxu1 %vm347_vm1, %v3894_v13  ;;  %v12718_v7 = vld [vmem:[%s15062_s2 + $0x468] sm:$0xff]  }
 0x3a0   : > { %12000 = vmatpush3.bf16.msra.mxu0 %v12691_v5  ;;  %12009 = vmatprep.subr.bf16.mxu1 %v12695_v12  ;;  %v4195_v54 = vor.u32 %v4194_v46, %v4191_v63  ;;  %v4301_v5 = vsel %vm640_vm4, %v4299_v2, %v4300_v1  ;;  %v12727_v13 = vld [vmem:[%s15062_s2 + $0x4a8] sm:$0xff]  }
 0x3a1   : > { %12001 = vmatprep.subr.bf16.mxu0 %v12694_v22 }
 0x3a2   : > { %v4204_v57 = vsel %vm1050_vm7, %v4195_v54, %v4203_v8 }
 0x3a3   : > { %12010 = vmatpush3.bf16.msra.mxu1 %v12695_v12  ;;  %v12723_v12 = vld [vmem:[%s15062_s2 + $0x488] sm:$0xff]  }
 0x3a4   : > { %12002 = vmatpush3.bf16.msra.mxu0 %v12694_v22  ;;  %12011 = vmatprep.subr.bf16.mxu1 %v12698_v17  ;;  %v12724_v22 = vld [vmem:[%s15062_s2 + $0x4b0] sm:$0xff]  }
 0x3a5   : > { %12019 = vmatprep.subr.bf16.mxu0 %v12696_v20 }
 0x3a7   : > { %12004 = vmatmul.mubr.msk.bf16.vlgmr.msra.gmra.mxu0 %vm347_vm1, %v3782_v55  ;;  %12012 = vmatpush3.bf16.msra.mxu1 %v12698_v17  ;;  %v10363_v55 = vcombine.low %v13776_v39, %v13776_v39  ;;  %v13922_v17 = vld [vmem:[%s15062_s2 + $0x4d8] sm:$0xff]  }
 0x3a8   : > { %12020 = vmatpush3.bf16.msra.mxu0 %v12696_v20  ;;  %12027 = vmatprep.mubr.msk.bf16.mxu0 %vm347_vm1, %v10362_v19  ;;  %v12725_v20 = vld [vmem:[%s15062_s2 + $0x480] sm:$0xff]  }
 0x3a9   : > { %12021 = vmatprep.subr.bf16.mxu0 %v12699_v26  ;;  %12013 = vmatprep.subr.bf16.mxu1 %v12700_v33 }
 0x3ab   : > { %12014 = vmatpush3.bf16.msra.mxu1 %v12700_v33 }
 0x3ac   : > { %12022 = vmatpush3.bf16.msra.mxu0 %v12699_v26  ;;  %12031 = vmatprep.subr.bf16.mxu1 %v12702_v30  ;;  %v13931_v26 = vld [vmem:[%s15062_s2 + $0x4f8] sm:$0xff]  }
 0x3ad   : > { %12023 = vmatprep.subr.bf16.mxu0 %v12701_v14 }
 0x3ae   : > { %12016 = vmatmul.mubr.msk.bf16.vlgmr.msra.gmra.mxu1 %vm347_vm1, %v3893_v11  ;;  %v12721_v11 = vld [vmem:[%s15062_s2 + $0x490] sm:$0xff]  }
 0x3af   : > { %12032 = vmatpush3.bf16.msra.mxu1 %v12702_v30  ;;  %12039 = vmatprep.mubr.msk.bf16.mxu1 %vm347_vm1, %v4093_v47 }
 0x3b0   : > { %12024 = vmatpush3.bf16.msra.mxu0 %v12701_v14  ;;  %12033 = vmatprep.subr.bf16.mxu1 %v12706_v45 }
 0x3b1   : > { %12025 = vmatprep.subr.bf16.mxu0 %v12705_v42 }
 0x3b3   : > { %12034 = vmatpush3.bf16.msra.mxu1 %v12706_v45 }
 0x3b4   : > { %12026 = vmatpush3.bf16.msra.mxu0 %v12705_v42  ;;  %12035 = vmatprep.subr.bf16.mxu1 %v12710_v53 }
 0x3b5   : > { %12043 = vmatprep.subr.bf16.mxu0 %v12708_v49 }
 0x3b7   : > { %12028 = vmatmul.mubr.msk.bf16.vlgmr.msra.gmra.mxu0 %vm347_vm1, %v10363_v55  ;;  %12036 = vmatpush3.bf16.msra.mxu1 %v12710_v53 }
 0x3b8   : > { %12044 = vmatpush3.bf16.msra.mxu0 %v12708_v49  ;;  %12051 = vmatprep.mubr.msk.bf16.mxu0 %vm347_vm1, %v4204_v57  ;;  %v10275_v49 = vld [vmem:[%s15063_s3 + $0x3] ss:$0 sm:$0xff] }
 0x3b9   : > { %12045 = vmatprep.subr.bf16.mxu0 %v12711_v62  ;;  %12037 = vmatprep.subr.bf16.mxu1 %v12712_v56 }
 0x3bb   : > { %12038 = vmatpush3.bf16.msra.mxu1 %v12712_v56 }
 0x3bc   : > { %12046 = vmatpush3.bf16.msra.mxu0 %v12711_v62  ;;  %12055 = vmatprep.subr.bf16.mxu1 %v12714_v48 }
 0x3bd   : > { %12047 = vmatprep.subr.bf16.mxu0 %v12713_v0 }
 0x3be   : > { %12040 = vmatmul.mubr.msk.bf16.vlgmr.msra.gmra.mxu1 %vm347_vm1, %v4092_v40 }
 0x3bf   : > { %12056 = vmatpush3.bf16.msra.mxu1 %v12714_v48  ;;  %12063 = vmatprep.mubr.msk.bf16.mxu1 %vm347_vm1, %v4301_v5 }
 0x3c0   : > { %12048 = vmatpush3.bf16.msra.mxu0 %v12713_v0  ;;  %12057 = vmatprep.subr.bf16.mxu1 %v12717_v4 }
 0x3c1   : > { %12049 = vmatprep.subr.bf16.mxu0 %v12716_v3 }
 0x3c3   : > { %12058 = vmatpush3.bf16.msra.mxu1 %v12717_v4 }
 0x3c4   : > { %12050 = vmatpush3.bf16.msra.mxu0 %v12716_v3  ;;  %12059 = vmatprep.subr.bf16.mxu1 %v12718_v7 }
 0x3c5   : > { %12067 = vmatprep.subr.bf16.mxu0 %v12720_v10 }
 0x3c7   : > { %12052 = vmatmul.mubr.msk.bf16.vlgmr.msra.gmra.mxu0 %vm347_vm1, %v4203_v8  ;;  %12060 = vmatpush3.bf16.msra.mxu1 %v12718_v7 }
 0x3c8   : > { %12061 = vmatprep.subr.bf16.mxu1 %v12719_v9  ;;  %12068 = vmatpush3.bf16.msra.mxu0 %v12720_v10 }
 0x3c9   : > { %12069 = vmatprep.subr.bf16.mxu0 %v12721_v11 }
 0x3cb   : > { %12062 = vmatpush3.bf16.msra.mxu1 %v12719_v9 }
 0x3cc   : > { %12079 = vmatprep.subr.bf16.mxu1 %v12722_v16  ;;  %12070 = vmatpush3.bf16.msra.mxu0 %v12721_v11 }
 0x3cd   : > { %12071 = vmatprep.subr.bf16.mxu0 %v12723_v12 }
 0x3ce   : > { %12064 = vmatmul.mubr.msk.bf16.vlgmr.msra.gmra.mxu1 %vm347_vm1, %v4300_v1 }
 0x3cf   : > { %12080 = vmatpush3.bf16.msra.mxu1 %v12722_v16  ;;  %v4385_v16 = vunpack.c.l.bf16 %v13772_v60 }
 0x3d0   : > { %12081 = vmatprep.subr.bf16.mxu1 %v12724_v22  ;;  %12072 = vmatpush3.bf16.msra.mxu0 %v12723_v12 }
 0x3d1   : > { %12073 = vmatprep.subr.bf16.mxu0 %v12725_v20 }
 0x3d3   : > { %12082 = vmatpush3.bf16.msra.mxu1 %v12724_v22 }
 0x3d4   : > { %12083 = vmatprep.subr.bf16.mxu1 %v12727_v13  ;;  %12074 = vmatpush3.bf16.msra.mxu0 %v12725_v20 }
 0x3d5   : > { %12091 = vmatprep.subr.bf16.mxu0 %v13922_v17 }
 0x3d7   : > { %12084 = vmatpush3.bf16.msra.mxu1 %v12727_v13 }
 0x3d8   : > { %12085 = vmatprep.subr.bf16.mxu1 %v12730_v6 }
 0x3db   : > { %12086 = vmatpush3.bf16.msra.mxu1 %v12730_v6  ;;  %v4386_v6 = vunpack.c.l.bf16 %v13776_v39 }
 0x3dc   : > { %12103 = vmatprep.subr.bf16.mxu1 %v13931_v26 }
 0x44e   : > { %v11969_v18 = vpop.f32.mrf.mxu1 }
 0x44f   : > { %v3547_v53 = vadd.f32 %v11969_v18, %v10275_v49  ;;  %v4384_v18 = vunpack.c.l.bf16 %v13764_v25 }
 0x450   : > { %v3531_v19 = vpop.f32.mrf.mxu1 }
 0x451   : > { %v3545_v55 = vadd.f32 %v10275_v49, %v3531_v19  ;;  %v4403_v39 = vrot.slane %v4384_v18, 7 }
 0x452   : > { %v11970_v33 = vpop.f32.mrf.mxu1 }
 0x454   : > { %v3534_v27 = vpop.f32.mrf.mxu1 }
 0x455   : > { %v3546_v61 = vadd.f32 %v10275_v49, %v3534_v27  ;;  %v4405_v27 = vrot.slane %v4385_v16, 7 }
 0x457   : > { %v11981_v21 = vpop.f32.mrf.mxu0 }
 0x458   : > { %v3666_v8 = vadd.f32 %v11981_v21, %v3547_v53 }
 0x459   : > { %v3650_v24 = vpop.f32.mrf.mxu0 }
 0x45a   : > { %v3664_v56 = vadd.f32 %v3650_v24, %v3545_v55 }
 0x45b   : > { %v11982_v31 = vpop.f32.mrf.mxu0 }
 0x45c   : > { %v10417_v31 = vld [vmem:[%s15064_s4 + $0x3] ss:$0 sm:$0xff] }
 0x45d   : > { %v3653_v32 = vpop.f32.mrf.mxu0 }
 0x45e   : > { %v11993_v14 = vpop.f32.mrf.mxu1  ;;  %v3665_v1 = vadd.f32 %v3653_v32, %v3546_v61 }
 0x45f   : > { %v3763_v57 = vadd.f32 %v11993_v14, %v3666_v8  ;;  %v4383_v14 = vunpack.c.l.bf16 %v13779_v41 }
 0x460   : > { %v3747_v29 = vpop.f32.mrf.mxu1 }
 0x461   : > { %v3761_v0 = vadd.f32 %v3747_v29, %v3664_v56  ;;  %v4406_v56 = vsel %vm1264_vm8, %v4403_v39, %v4405_v27 }
 0x462   : > { %v11994_v30 = vpop.f32.mrf.mxu1 }
 0x464   : > { %v3750_v37 = vpop.f32.mrf.mxu1 }
 0x465   : > { %v3762_v7 = vadd.f32 %v3750_v37, %v3665_v1 }
 0x467   : > { %v12005_v34 = vpop.f32.mrf.mxu0 }
 0x468   : > { %v3864_v48 = vadd.f32 %v12005_v34, %v3763_v57  ;;  %v4407_v34 = vrot.slane %v4386_v6, 7 }
 0x469   : > { %v3848_v35 = vpop.f32.mrf.mxu0 }
 0x46a   : > { %v3862_v3 = vadd.f32 %v3848_v35, %v3761_v0 }
 0x46b   : > { %v12006_v36 = vpop.f32.mrf.mxu0 }
 0x46d   : > { %v3851_v45 = vpop.f32.mrf.mxu0 }
 0x46e   : > { %v12017_v38 = vpop.f32.mrf.mxu1  ;;  %v3863_v22 = vadd.f32 %v3851_v45, %v3762_v7 }
 0x46f   : > { %v3975_v4 = vadd.f32 %v12017_v38, %v3864_v48  ;;  %v4408_v38 = vsel %vm1264_vm8, %v4405_v27, %v4407_v34 }
 0x470   : > { %v3959_v40 = vpop.f32.mrf.mxu1 }
 0x471   : > { %v3973_v9 = vadd.f32 %v3959_v40, %v3862_v3  ;;  %v4402_v40 = vrot.slane %v4383_v14, 7 }
 0x472   : > { %v12018_v42 = vpop.f32.mrf.mxu1 }
 0x474   : > { %v3962_v51 = vpop.f32.mrf.mxu1 }
 0x475   : > { %v3974_v19 = vadd.f32 %v3962_v51, %v3863_v22 }
 0x477   : > { %v12029_v63 = vpop.f32.mrf.mxu0 }
 0x478   : > { %v4067_v10 = vadd.f32 %v12029_v63, %v3975_v4 }
 0x479   : > { %v4051_v46 = vpop.f32.mrf.mxu0 }
 0x47a   : > { %v4065_v12 = vadd.f32 %v4051_v46, %v3973_v9 }
 0x47b   : > { %v12030_v47 = vpop.f32.mrf.mxu0 }
 0x47c   : > { %v4404_v47 = vsel %vm1264_vm8, %v4402_v40, %v4403_v39 }
 0x47d   : > { %v4054_v58 = vpop.f32.mrf.mxu0 }
 0x47e   : > { %v12041_v52 = vpop.f32.mrf.mxu1  ;;  %v4066_v60 = vadd.f32 %v4054_v58, %v3974_v19  ;;  %v4474_v19 = vld [vmem:[#allocation2 + $0xc] sm:$0xf] }
 0x47f   : > { %v4174_v13 = vadd.f32 %v12041_v52, %v4067_v10 }
 0x480   : > { %v4158_v54 = vpop.f32.mrf.mxu1 }
 0x481   : > { %v4172_v33 = vadd.f32 %v4158_v54, %v4065_v12 }
 0x482   : > { %v12042_v62 = vpop.f32.mrf.mxu1 }
 0x484   : > { %v4161_v20 = vpop.f32.mrf.mxu1 }
 0x485   : > { %v4173_v36 = vadd.f32 %v4161_v20, %v4066_v60 }
 0x487   : > { %v12053_v2 = vpop.f32.mrf.mxu0 }
 0x488   : > { %v4285_v21 = vadd.f32 %v12053_v2, %v4174_v13 }
 0x489   : > { %v4269_v5 = vpop.f32.mrf.mxu0 }
 0x48a   : > { %v4283_v29 = vadd.f32 %v4269_v5, %v4172_v33 }
 0x48b   : > { %v12054_v11 = vpop.f32.mrf.mxu0 }
 0x48d   : > { %v4272_v32 = vpop.f32.mrf.mxu0 }
 0x48e   : > { %v12065_v24 = vpop.f32.mrf.mxu1  ;;  %v4284_v45 = vadd.f32 %v4272_v32, %v4173_v36 }
 0x48f   : > { %v4382_v30 = vadd.f32 %v12065_v24, %v4285_v21 }
 0x490   : > { %v4366_v35 = vpop.f32.mrf.mxu1 }
 0x491   : > { %v4397_v25 = vmul.f32 %v10417_v31, %v4382_v30  ;;  %v4380_v37 = vadd.f32 %v4366_v35, %v4283_v29 }
 0x492   : > { %v12066_v42 = vpop.f32.mrf.mxu1 }
 0x493   : > { %v4414_v63 = vadd.f32 %v4408_v38, %v4397_v25  ;;  %v4395_v46 = vmul.f32 %v10417_v31, %v4380_v37  ;;  %v12731_v25 = vld [vmem:[%s15062_s2 + $0x4d0] sm:$0xff]  }
 0x494   : > { %v4369_v49 = vpop.f32.mrf.mxu1 }
 0x495   : > { %vm4417_vm14 = vcmp.ge.f32.partialorder %v4414_v63, 0.0  ;;  %v4420_v51 = vmul.f32 0.2, %v4414_v63  ;;  %v4412_v52 = vadd.f32 %v4404_v47, %v4395_v46  ;;  %v4381_v53 = vadd.f32 %v4369_v49, %v4284_v45 }
 0x497   : > { %v4423_v54 = vsel %vm4417_vm14, %v4414_v63, %v4420_v51  ;;  %vm4415_vm9 = vcmp.ge.f32.partialorder %v4412_v52, 0.0  ;;  %v4418_v55 = vmul.f32 0.2, %v4412_v52  ;;  %v4396_v8 = vmul.f32 %v10417_v31, %v4381_v53 }
 0x498   : > { %v4426_v62 = vmul.f32 %v4423_v54, %v13334_v23 }
 0x499   : > { %v4421_v57 = vsel %vm4415_vm9, %v4412_v52, %v4418_v55  ;;  %v4413_v58 = vadd.f32 %v4406_v56, %v4396_v8 }
 0x49a   : > { %v11190_v61 = vpack.c.bf16 %v4426_v62, %v4426_v62  ;;  %v4424_v0 = vmul.f32 %v4421_v57, %v13337_v28 }
 0x49b   : > { %vm4416_vm12 = vcmp.ge.f32.partialorder %v4413_v58, 0.0  ;;  %v4419_v48 = vmul.f32 0.2, %v4413_v58 }
 0x49c   : > { %v4457_v2 = vshll.u32 %v11190_v61, 16  ;;  %v4461_v1 = vshrl.u32 %v11190_v61, 16  ;;  %v11188_v3 = vpack.c.bf16 %v4424_v0, %v4424_v0 }
 0x49d   : > { %v4422_v4 = vsel %vm4416_vm12, %v4413_v58, %v4419_v48  ;;  %v12736_v58 = vld [vmem:[%s15062_s2 + $0x4c8] sm:$0xff]  }
 0x49e   : > { %v4459_v5 = vrot.slane %v4457_v2, 5  ;;  %v4463_v7 = vrot.slane %v4461_v1, 4  ;;  %v4438_v9 = vshll.u32 %v11188_v3, 16  ;;  %v4441_v10 = vshrl.u32 %v11188_v3, 16 }
 0x49f   : > { %v4425_v11 = vmul.f32 %v4422_v4, %v13341_v43 }
 0x4a0   : > { %v4464_v16 = vor.u32 %v4463_v7, %v4459_v5  ;;  %v4440_v22 = vrot.slane %v4438_v9, 5  ;;  %v4443_v12 = vrot.slane %v4441_v10, 4  ;;  %v12739_v7 = vld [vmem:[%s15062_s2 + $0x4f0] sm:$0xff]   ;;  %v12740_v9 = vld [vmem:[%s15062_s2 + $0x4c0] sm:$0xff]  }
 0x4a1   : > { %v11189_v13 = vpack.c.bf16 %v4425_v11, %v4425_v11 }
 0x4a2   : > { %v4465_v20 = vrot.slane %v4464_v16, 4  ;;  %v4444_v6 = vor.u32 %v4443_v12, %v4440_v22  ;;  %v4470_v18 = vsel %vm13343_vm15, %v4440_v22, %v13779_v41 }
 0x4a3   : > { %4471 = vst [vmem:[#allocation2] sm:$0x8] %v4470_v18  ;;  %v4447_v33 = vshll.u32 %v11189_v13, 16  ;;  %v4451_v21 = vshrl.u32 %v11189_v13, 16  ;;  %v12741_v13 = vld [vmem:[%s15062_s2 + $0x4e8] sm:$0xff]  }
 0x4a4   : > { %v4475_v24 = vsel %vm13350_vm10, %v4465_v20, %v4474_v19  ;;  %v4445_v31 = vrot.slane %v4444_v6, 4  ;;  %v12742_v20 = vld [vmem:[%s15062_s2 + $0x518] sm:$0xff]  }
 0x4a5   : > { %4476 = vst [vmem:[#allocation2 + $0xc] sm:$0xf] %v4475_v24  ;;  %v4449_v27 = vrot.slane %v4447_v33, 5  ;;  %v4453_v14 = vrot.slane %v4451_v21, 4  ;;  %v12744_v33 = vld [vmem:[%s15062_s2 + $0x4e0] sm:$0xff]   ;;  %v12745_v21 = vld [vmem:[%s15062_s2 + $0x510] sm:$0xff]  }
 0x4a7   : > { %v4450_v60 = vsel %vm13358_vm11, %v4445_v31, %v4449_v27  ;;  %v4454_v29 = vor.u32 %v4453_v14, %v4449_v27  ;;  %v12746_v31 = vld [vmem:[%s15062_s2 + $0x538] sm:$0xff]   ;;  %v12748_v27 = vld [vmem:[%s15062_s2 + $0x508] sm:$0xff]  }
 0x4a8   : > { %4472 = vst.msk [vmem:[#allocation2 + $0x4] sm:$0xf] %vm286_vm0, %v4450_v60  ;;  %v12749_v60 = vld [vmem:[%s15062_s2 + $0x530] sm:$0xff]  }
 0x4a9   : > { %v4455_v30 = vrot.slane %v4454_v29, 4  ;;  %v5213_v29 = vld [vmem:[#allocation2 + $0x10] sm:$0x7] }
 0x4aa   : > { %v4586_v32 = vld [vmem:[#allocation2] sm:$0xf] }
 0x4ab   : > { %v4460_v41 = vsel %vm13358_vm11, %v4455_v30, %v4459_v5  ;;  %v4705_v36 = vld [vmem:[#allocation2] sm:$0xe] }
 0x4ac   : > { %4473 = vst.msk [vmem:[#allocation2 + $0x8] sm:$0xf] %vm286_vm0, %v4460_v41  ;;  %v4589_v37 = vld [vmem:[#allocation2 + $0xc] sm:$0x1]  ;;  %v13976_v53 = vld [vmem:[#allocation2] sm:$0x8] }
 0x4ad   : > { %v4803_v42 = vld [vmem:[#allocation2 + $0xc] sm:$0x7]  ;;  %v12750_v41 = vld [vmem:[%s15062_s2 + $0x500] sm:$0xff]  }
 0x4ae   : > { %v13973_v51 = vld [vmem:[#allocation2 + $0xc] sm:$0xf] }
 0x4af   : > { %v12726_v34 = vld [vmem:[#allocation2] sm:$0xff]  }
 0x4b0   : > { %v13961_v35 = vld [vmem:[#allocation2 + $0x4] sm:$0xf]  ;;  %12075 = vmatprep.mubr.msk.bf16.mxu0 %vm347_vm1, %v12726_v34  ;;  %v5108_v34 = vld [vmem:[#allocation2 + $0xc] sm:$0xf] }
 0x4b1   : > { %v10447_v39 = vcombine.low %v4586_v32, %v13961_v35  ;;  %v10463_v38 = vcombine.low %v4705_v36, %v13961_v35  ;;  %v10478_v56 = vcombine.low %v13976_v53, %v13961_v35  ;;  %v5106_v32 = vld [vmem:[#allocation2 + $0x4] sm:$0xc] }
 0x4b3   : > { %v4612_v40 = vshll.u32 %v10447_v39, 16  ;;  %v12729_v45 = vld [vmem:[#allocation2 + $0x8] ss:$0 sps:$4 sm:$0xff]   ;;  %v4610_v52 = vshrl.u32 %v10447_v39, 16  ;;  %v4718_v55 = vrot.slane %v10463_v38, 1  ;;  %v4819_v5 = vrot.slane %v10478_v56, 3 }
 0x4b4   : > { %v13969_v63 = vld [vmem:[#allocation2 + $0x8] sm:$0xf]  ;;  %12076 = vmatmul.mubr.msk.bf16.vlgmr.msra.gmra.mxu0 %vm347_vm1, %v12729_v45  ;;  %v4917_v10 = vshrl.u32 %v10478_v56, 16  ;;  %v4920_v11 = vshll.u32 %v10478_v56, 16  ;;  %v5109_v39 = vld [vmem:[#allocation2 + $0x10] sm:$0x3] }
 0x4b5   : > { %v10448_v46 = vcombine.low %v13969_v63, %v4589_v37  ;;  %v4614_v47 = vrot.slane %v4612_v40, 1  ;;  %v10479_v49 = vcombine.low %v13969_v63, %v4803_v42  ;;  %v10494_v54 = vcombine.low %v13969_v63, %v13973_v51  ;;  %12092 = vmatpush3.bf16.msra.mxu0 %v13922_v17  ;;  %v14021_v14 = vld [vmem:[#allocation2 + $0x8] sm:$0xf]  ;;  %v12752_v38 = vld [vmem:[%s15062_s2 + $0x558] sm:$0xff]  }
 0x4b6   : > { %12093 = vmatprep.subr.bf16.mxu0 %v12731_v25  ;;  %v4919_v6 = vrot.slane %v4917_v10, 3  ;;  %v4922_v18 = vrot.slane %v4920_v11, 4  ;;  %v10509_v30 = vcombine.low %v13961_v35, %v13969_v63  ;;  %v10525_v36 = vcombine.low %v5106_v32, %v14021_v14  ;;  %v12764_v10 = vld [vmem:[%s15062_s2 + $0x598] sm:$0xff]  }
 0x4b7   : > { %v4719_v8 = vrot.slane %v10448_v46, 1  ;;  %v4617_v62 = vshll.u32 %v10448_v46, 16  ;;  %v4615_v57 = vor.u32 %v4614_v47, %v4610_v52  ;;  %v4621_v48 = vshrl.u32 %v10448_v46, 16 }
 0x4b8   : > { %v4820_v2 = vrot.slane %v10479_v49, 3  ;;  %v4925_v17 = vshrl.u32 %v10494_v54, 16  ;;  %v4928_v1 = vshll.u32 %v10494_v54, 16  ;;  %v14037_v37 = vcombine.low %v5108_v34, %v5213_v29  ;;  %v12755_v54 = vld [vmem:[%s15062_s2 + $0x520] sm:$0xff]  }
 0x4b9   : > { %v4720_v61 = vsel %vm538_vm2, %v4718_v55, %v4719_v8  ;;  %v4619_v0 = vrot.slane %v4617_v62, 1  ;;  %12094 = vmatpush3.bf16.msra.mxu0 %v12731_v25  ;;  %v12751_v25 = vld [vmem:[%s15062_s2 + $0x528] sm:$0xff]   ;;  %v10526_v40 = vcombine.low %v5108_v34, %v5109_v39  ;;  %v5227_v42 = vshrl.u32 %v10525_v36, 16  ;;  %v12756_v55 = vld [vmem:[%s15062_s2 + $0x550] sm:$0xff]  }
 0x4ba   : > { %12099 = vmatprep.mubr.msk.bf16.mxu0 %vm347_vm1, %v4720_v61  ;;  %12095 = vmatprep.subr.bf16.mxu0 %v12736_v58  ;;  %v4821_v16 = vsel %vm640_vm4, %v4819_v5, %v4820_v2  ;;  %v4927_v22 = vrot.slane %v4925_v17, 3  ;;  %v4930_v12 = vrot.slane %v4928_v1, 4  ;;  %v5230_v45 = vshll.u32 %v10525_v36, 16  ;;  %v12761_v1 = vld [vmem:[%s15062_s2 + $0x570] sm:$0xff]   ;;  %v5324_v5 = vld [vmem:[#allocation2 + $0x4] sm:$0x8] }
 0x4bb   : > { %v4620_v3 = vsel %vm428_vm3, %v4615_v57, %v4619_v0  ;;  %v4623_v4 = vor.u32 %v4621_v48, %v4619_v0  ;;  %v5129_v46 = vrot.slane %v10525_v36, 2  ;;  %v5235_v47 = vshrl.u32 %v14037_v37, 16  ;;  %v12758_v57 = vld [vmem:[%s15062_s2 + $0x578] sm:$0xff]   ;;  %v12760_v0 = vld [vmem:[%s15062_s2 + $0x548] sm:$0xff]  }
 0x4bc   : > { %12087 = vmatprep.mubr.msk.bf16.mxu1 %vm347_vm1, %v4620_v3  ;;  %v4931_v19 = vor.u32 %v4930_v12, %v4927_v22  ;;  %v5238_v49 = vshll.u32 %v14037_v37, 16  ;;  %v5130_v52 = vrot.slane %v10526_v40, 2  ;;  %v5232_v62 = vrot.slane %v5230_v45, 3  ;;  %v12762_v3 = vld [vmem:[%s15062_s2 + $0x540] sm:$0xff]   ;;  %v12767_v12 = vld [vmem:[%s15062_s2 + $0x590] sm:$0xff]  }
 0x4bd   : > { %12088 = vmatmul.mubr.msk.bf16.vlgmr.msra.gmra.mxu1 %vm347_vm1, %v4623_v4  ;;  %12096 = vmatpush3.bf16.msra.mxu0 %v12736_v58  ;;  %v5237_v58 = vrot.slane %v5235_v47, 2  ;;  %v12766_v22 = vld [vmem:[%s15062_s2 + $0x560] sm:$0xff]  }
 0x4be   : > { %12104 = vmatpush3.bf16.msra.mxu1 %v13931_v26  ;;  %12111 = vmatprep.mubr.msk.bf16.mxu1 %vm347_vm1, %v4821_v16  ;;  %v4923_v26 = vor.u32 %v4922_v18, %v4919_v6  ;;  %v5131_v56 = vsel %vm952_vm6, %v5129_v46, %v5130_v52  ;;  %v5240_v61 = vrot.slane %v5238_v49, 3  ;;  %v5338_v16 = vrot.slane %v14037_v37, 3  ;;  %v12769_v6 = vld [vmem:[%s15062_s2 + $0x580] sm:$0xff]   ;;  %v12770_v18 = vld [vmem:[%s15062_s2 + $0x5b8] sm:$0xff]  }
 0x4bf   : > { %12105 = vmatprep.subr.bf16.mxu1 %v12739_v7  ;;  %12097 = vmatprep.subr.bf16.mxu0 %v12740_v9 }
 0x4c0   : > { %v4932_v24 = vsel %vm738_vm5, %v4923_v26, %v4931_v19  ;;  %v5241_v17 = vor.u32 %v5240_v61, %v5237_v58  ;;  %v12772_v26 = vld [vmem:[%s15062_s2 + $0x5d8] sm:$0xff]  }
 0x4c1   : > { %12098 = vmatpush3.bf16.msra.mxu0 %v12740_v9  ;;  %v12763_v9 = vld [vmem:[%s15062_s2 + $0x568] sm:$0xff]  }
 0x4c2   : > { %12106 = vmatpush3.bf16.msra.mxu1 %v12739_v7  ;;  %12115 = vmatprep.subr.bf16.mxu0 %v12742_v20  ;;  %v10556_v7 = vcombine.low %v5324_v5, %v14021_v14  ;;  %v12780_v14 = vld [vmem:[%s15062_s2 + $0x5c0] sm:$0xff]  }
 0x4c3   : > { %12107 = vmatprep.subr.bf16.mxu1 %v12741_v13 }
 0x4c4   : > { %12100 = vmatmul.mubr.msk.bf16.vlgmr.msra.gmra.mxu0 %vm347_vm1, %v4719_v8  ;;  %v5229_v8 = vrot.slane %v5227_v42, 2  ;;  %v5337_v11 = vrot.slane %v10556_v7, 3 }
 0x4c5   : > { %12116 = vmatpush3.bf16.msra.mxu0 %v12742_v20  ;;  %12123 = vmatprep.mubr.msk.bf16.mxu0 %vm347_vm1, %v4932_v24  ;;  %v12768_v20 = vld [vmem:[%s15062_s2 + $0x588] sm:$0xff]  }
 0x4c6   : > { %12108 = vmatpush3.bf16.msra.mxu1 %v12741_v13  ;;  %12117 = vmatprep.subr.bf16.mxu0 %v12745_v21  ;;  %v5233_v48 = vor.u32 %v5232_v62, %v5229_v8  ;;  %v5339_v13 = vsel %vm640_vm4, %v5337_v11, %v5338_v16  ;;  %v12777_v24 = vld [vmem:[%s15062_s2 + $0x5c8] sm:$0xff]  }
 0x4c7   : > { %12109 = vmatprep.subr.bf16.mxu1 %v12744_v33 }
 0x4c8   : > { %v5242_v4 = vsel %vm1050_vm7, %v5233_v48, %v5241_v17 }
 0x4c9   : > { %12118 = vmatpush3.bf16.msra.mxu0 %v12745_v21  ;;  %v12773_v21 = vld [vmem:[%s15062_s2 + $0x5a8] sm:$0xff]  }
 0x4ca   : > { %12110 = vmatpush3.bf16.msra.mxu1 %v12744_v33  ;;  %12119 = vmatprep.subr.bf16.mxu0 %v12748_v27  ;;  %v12774_v33 = vld [vmem:[%s15062_s2 + $0x5d0] sm:$0xff]  }
 0x4cb   : > { %12127 = vmatprep.subr.bf16.mxu1 %v12746_v31 }
 0x4cd   : > { %12112 = vmatmul.mubr.msk.bf16.vlgmr.msra.gmra.mxu1 %vm347_vm1, %v4820_v2  ;;  %12120 = vmatpush3.bf16.msra.mxu0 %v12748_v27  ;;  %v10510_v2 = vcombine.low %v13973_v51, %v13973_v51  ;;  %v14119_v27 = vld [vmem:[%s15062_s2 + $0x5f8] sm:$0xff]  }
 0x4ce   : > { %12128 = vmatpush3.bf16.msra.mxu1 %v12746_v31  ;;  %12135 = vmatprep.mubr.msk.bf16.mxu1 %vm347_vm1, %v10509_v30  ;;  %v12775_v31 = vld [vmem:[%s15062_s2 + $0x5a0] sm:$0xff]  }
 0x4cf   : > { %12129 = vmatprep.subr.bf16.mxu1 %v12749_v60  ;;  %12121 = vmatprep.subr.bf16.mxu0 %v12750_v41 }
 0x4d1   : > { %12122 = vmatpush3.bf16.msra.mxu0 %v12750_v41 }
 0x4d2   : > { %12130 = vmatpush3.bf16.msra.mxu1 %v12749_v60  ;;  %12139 = vmatprep.subr.bf16.mxu0 %v12752_v38  ;;  %v14128_v60 = vld [vmem:[%s15062_s2 + $0x618] sm:$0xff]  }
 0x4d3   : > { %12131 = vmatprep.subr.bf16.mxu1 %v12751_v25 }
 0x4d4   : > { %12124 = vmatmul.mubr.msk.bf16.vlgmr.msra.gmra.mxu0 %vm347_vm1, %v4931_v19  ;;  %v12771_v19 = vld [vmem:[%s15062_s2 + $0x5b0] sm:$0xff]  }
 0x4d5   : > { %12140 = vmatpush3.bf16.msra.mxu0 %v12752_v38  ;;  %12147 = vmatprep.mubr.msk.bf16.mxu0 %vm347_vm1, %v5131_v56 }
 0x4d6   : > { %12132 = vmatpush3.bf16.msra.mxu1 %v12751_v25  ;;  %12141 = vmatprep.subr.bf16.mxu0 %v12756_v55 }
 0x4d7   : > { %12133 = vmatprep.subr.bf16.mxu1 %v12755_v54 }
 0x4d9   : > { %12142 = vmatpush3.bf16.msra.mxu0 %v12756_v55 }
 0x4da   : > { %12134 = vmatpush3.bf16.msra.mxu1 %v12755_v54  ;;  %12143 = vmatprep.subr.bf16.mxu0 %v12760_v0 }
 0x4db   : > { %12151 = vmatprep.subr.bf16.mxu1 %v12758_v57 }
 0x4dd   : > { %12136 = vmatmul.mubr.msk.bf16.vlgmr.msra.gmra.mxu1 %vm347_vm1, %v10510_v2  ;;  %12144 = vmatpush3.bf16.msra.mxu0 %v12760_v0 }
 0x4de   : > { %12152 = vmatpush3.bf16.msra.mxu1 %v12758_v57  ;;  %12159 = vmatprep.mubr.msk.bf16.mxu1 %vm347_vm1, %v5242_v4  ;;  %v10422_v57 = vld [vmem:[%s15063_s3 + $0x4] ss:$0 sm:$0xff] }
 0x4df   : > { %12153 = vmatprep.subr.bf16.mxu1 %v12761_v1  ;;  %12145 = vmatprep.subr.bf16.mxu0 %v12762_v3 }
 0x4e1   : > { %12146 = vmatpush3.bf16.msra.mxu0 %v12762_v3 }
 0x4e2   : > { %12154 = vmatpush3.bf16.msra.mxu1 %v12761_v1  ;;  %12163 = vmatprep.subr.bf16.mxu0 %v12764_v10 }
 0x4e3   : > { %12155 = vmatprep.subr.bf16.mxu1 %v12763_v9 }
 0x4e4   : > { %12148 = vmatmul.mubr.msk.bf16.vlgmr.msra.gmra.mxu0 %vm347_vm1, %v5130_v52 }
 0x4e5   : > { %12164 = vmatpush3.bf16.msra.mxu0 %v12764_v10  ;;  %12171 = vmatprep.mubr.msk.bf16.mxu0 %vm347_vm1, %v5339_v13 }
 0x4e6   : > { %12156 = vmatpush3.bf16.msra.mxu1 %v12763_v9  ;;  %12165 = vmatprep.subr.bf16.mxu0 %v12767_v12 }
 0x4e7   : > { %12157 = vmatprep.subr.bf16.mxu1 %v12766_v22 }
 0x4e9   : > { %12166 = vmatpush3.bf16.msra.mxu0 %v12767_v12 }
 0x4ea   : > { %12158 = vmatpush3.bf16.msra.mxu1 %v12766_v22  ;;  %12167 = vmatprep.subr.bf16.mxu0 %v12768_v20 }
 0x4eb   : > { %12175 = vmatprep.subr.bf16.mxu1 %v12770_v18 }
 0x4ed   : > { %12160 = vmatmul.mubr.msk.bf16.vlgmr.msra.gmra.mxu1 %vm347_vm1, %v5241_v17  ;;  %12168 = vmatpush3.bf16.msra.mxu0 %v12768_v20 }
 0x4ee   : > { %12169 = vmatprep.subr.bf16.mxu0 %v12769_v6  ;;  %12176 = vmatpush3.bf16.msra.mxu1 %v12770_v18 }
 0x4ef   : > { %12177 = vmatprep.subr.bf16.mxu1 %v12771_v19 }
 0x4f1   : > { %12170 = vmatpush3.bf16.msra.mxu0 %v12769_v6 }
 0x4f2   : > { %12187 = vmatprep.subr.bf16.mxu0 %v12772_v26  ;;  %12178 = vmatpush3.bf16.msra.mxu1 %v12771_v19 }
 0x4f3   : > { %12179 = vmatprep.subr.bf16.mxu1 %v12773_v21 }
 0x4f4   : > { %12172 = vmatmul.mubr.msk.bf16.vlgmr.msra.gmra.mxu0 %vm347_vm1, %v5338_v16 }
 0x4f5   : > { %12188 = vmatpush3.bf16.msra.mxu0 %v12772_v26  ;;  %v5423_v26 = vunpack.c.l.bf16 %v13969_v63 }
 0x4f6   : > { %12189 = vmatprep.subr.bf16.mxu0 %v12774_v33  ;;  %12180 = vmatpush3.bf16.msra.mxu1 %v12773_v21 }
 0x4f7   : > { %12181 = vmatprep.subr.bf16.mxu1 %v12775_v31 }
 0x4f9   : > { %12190 = vmatpush3.bf16.msra.mxu0 %v12774_v33 }
 0x4fa   : > { %12191 = vmatprep.subr.bf16.mxu0 %v12777_v24  ;;  %12182 = vmatpush3.bf16.msra.mxu1 %v12775_v31 }
 0x4fb   : > { %12199 = vmatprep.subr.bf16.mxu1 %v14119_v27 }
 0x4fd   : > { %12192 = vmatpush3.bf16.msra.mxu0 %v12777_v24 }
 0x4fe   : > { %12193 = vmatprep.subr.bf16.mxu0 %v12780_v14 }
 0x501   : > { %12194 = vmatpush3.bf16.msra.mxu0 %v12780_v14  ;;  %v5424_v14 = vunpack.c.l.bf16 %v13973_v51 }
 0x502   : > { %12211 = vmatprep.subr.bf16.mxu0 %v14128_v60 }
 0x574   : > { %v12077_v29 = vpop.f32.mrf.mxu0 }
 0x575   : > { %v4585_v0 = vadd.f32 %v12077_v29, %v10422_v57  ;;  %v5422_v29 = vunpack.c.l.bf16 %v13961_v35 }
 0x576   : > { %v4569_v30 = vpop.f32.mrf.mxu0 }
 0x577   : > { %v4583_v2 = vadd.f32 %v10422_v57, %v4569_v30  ;;  %v5441_v51 = vrot.slane %v5422_v29, 7 }
 0x578   : > { %v12078_v41 = vpop.f32.mrf.mxu0 }
 0x57a   : > { %v4572_v36 = vpop.f32.mrf.mxu0 }
 0x57b   : > { %v4584_v7 = vadd.f32 %v10422_v57, %v4572_v36  ;;  %v5443_v36 = vrot.slane %v5423_v26, 7 }
 0x57d   : > { %v12089_v32 = vpop.f32.mrf.mxu1 }
 0x57e   : > { %v4704_v17 = vadd.f32 %v12089_v32, %v4585_v0 }
 0x57f   : > { %v4688_v34 = vpop.f32.mrf.mxu1 }
 0x580   : > { %v4702_v3 = vadd.f32 %v4688_v34, %v4583_v2 }
 0x581   : > { %v12090_v39 = vpop.f32.mrf.mxu1 }
 0x582   : > { %v10564_v39 = vld [vmem:[%s15064_s4 + $0x4] ss:$0 sm:$0xff] }
 0x583   : > { %v4691_v40 = vpop.f32.mrf.mxu1 }
 0x584   : > { %v12101_v25 = vpop.f32.mrf.mxu0  ;;  %v4703_v16 = vadd.f32 %v4691_v40, %v4584_v7 }
 0x585   : > { %v4801_v4 = vadd.f32 %v12101_v25, %v4704_v17  ;;  %v5421_v25 = vunpack.c.l.bf16 %v13976_v53 }
 0x586   : > { %v4785_v37 = vpop.f32.mrf.mxu0 }
 0x587   : > { %v4799_v9 = vadd.f32 %v4785_v37, %v4702_v3  ;;  %v5444_v3 = vsel %vm1264_vm8, %v5441_v51, %v5443_v36 }
 0x588   : > { %v12102_v38 = vpop.f32.mrf.mxu0 }
 0x58a   : > { %v4788_v47 = vpop.f32.mrf.mxu0 }
 0x58b   : > { %v4800_v20 = vadd.f32 %v4788_v47, %v4703_v16 }
 0x58d   : > { %v12113_v42 = vpop.f32.mrf.mxu1 }
 0x58e   : > { %v4902_v10 = vadd.f32 %v12113_v42, %v4801_v4  ;;  %v5445_v42 = vrot.slane %v5424_v14, 7 }
 0x58f   : > { %v4886_v45 = vpop.f32.mrf.mxu1 }
 0x590   : > { %v4900_v22 = vadd.f32 %v4886_v45, %v4799_v9 }
 0x591   : > { %v12114_v46 = vpop.f32.mrf.mxu1 }
 0x593   : > { %v4889_v55 = vpop.f32.mrf.mxu1 }
 0x594   : > { %v12125_v49 = vpop.f32.mrf.mxu0  ;;  %v4901_v33 = vadd.f32 %v4889_v55, %v4800_v20 }
 0x595   : > { %v5013_v12 = vadd.f32 %v12125_v49, %v4902_v10  ;;  %v5446_v49 = vsel %vm1264_vm8, %v5443_v36, %v5445_v42 }
 0x596   : > { %v4997_v52 = vpop.f32.mrf.mxu0 }
 0x597   : > { %v5011_v6 = vadd.f32 %v4997_v52, %v4900_v22  ;;  %v5440_v52 = vrot.slane %v5421_v25, 7 }
 0x598   : > { %v12126_v54 = vpop.f32.mrf.mxu0 }
 0x59a   : > { %v5000_v58 = vpop.f32.mrf.mxu0 }
 0x59b   : > { %v5012_v30 = vadd.f32 %v5000_v58, %v4901_v33 }
 0x59d   : > { %v12137_v8 = vpop.f32.mrf.mxu1 }
 0x59e   : > { %v5105_v18 = vadd.f32 %v12137_v8, %v5013_v12 }
 0x59f   : > { %v5089_v62 = vpop.f32.mrf.mxu1 }
 0x5a0   : > { %v5103_v21 = vadd.f32 %v5089_v62, %v5011_v6 }
 0x5a1   : > { %v12138_v56 = vpop.f32.mrf.mxu1 }
 0x5a2   : > { %v5442_v56 = vsel %vm1264_vm8, %v5440_v52, %v5441_v51 }
 0x5a3   : > { %v5092_v5 = vpop.f32.mrf.mxu1 }
 0x5a4   : > { %v12149_v61 = vpop.f32.mrf.mxu0  ;;  %v5104_v63 = vadd.f32 %v5092_v5, %v5012_v30  ;;  %v5512_v30 = vld [vmem:[#allocation2 + $0xc] sm:$0xf] }
 0x5a5   : > { %v5212_v24 = vadd.f32 %v12149_v61, %v5105_v18 }
 0x5a6   : > { %v5196_v48 = vpop.f32.mrf.mxu0 }
 0x5a7   : > { %v5210_v41 = vadd.f32 %v5196_v48, %v5103_v21 }
 0x5a8   : > { %v12150_v1 = vpop.f32.mrf.mxu0 }
 0x5aa   : > { %v5199_v31 = vpop.f32.mrf.mxu0 }
 0x5ab   : > { %v5211_v46 = vadd.f32 %v5199_v31, %v5104_v63 }
 0x5ad   : > { %v12161_v11 = vpop.f32.mrf.mxu1 }
 0x5ae   : > { %v5323_v32 = vadd.f32 %v12161_v11, %v5212_v24 }
 0x5af   : > { %v5307_v13 = vpop.f32.mrf.mxu1 }
 0x5b0   : > { %v5321_v37 = vadd.f32 %v5307_v13, %v5210_v41 }
 0x5b1   : > { %v12162_v19 = vpop.f32.mrf.mxu1 }
 0x5b3   : > { %v5310_v40 = vpop.f32.mrf.mxu1 }
 0x5b4   : > { %v12173_v34 = vpop.f32.mrf.mxu0  ;;  %v5322_v55 = vadd.f32 %v5310_v40, %v5211_v46 }
 0x5b5   : > { %v5420_v38 = vadd.f32 %v12173_v34, %v5323_v32 }
 0x5b6   : > { %v5404_v45 = vpop.f32.mrf.mxu0 }
 0x5b7   : > { %v5435_v35 = vmul.f32 %v10564_v39, %v5420_v38  ;;  %v5418_v47 = vadd.f32 %v5404_v45, %v5321_v37 }
 0x5b8   : > { %v12174_v54 = vpop.f32.mrf.mxu0 }
 0x5b9   : > { %v5452_v8 = vadd.f32 %v5446_v49, %v5435_v35  ;;  %v5433_v62 = vmul.f32 %v10564_v39, %v5418_v47  ;;  %v12781_v35 = vld [vmem:[%s15062_s2 + $0x5f0] sm:$0xff]  }
 0x5ba   : > { %v5407_v57 = vpop.f32.mrf.mxu0 }
 0x5bb   : > { %vm5455_vm13 = vcmp.ge.f32.partialorder %v5452_v8, 0.0  ;;  %v5458_v58 = vmul.f32 0.2, %v5452_v8  ;;  %v5450_v61 = vadd.f32 %v5442_v56, %v5433_v62  ;;  %v5419_v0 = vadd.f32 %v5407_v57, %v5322_v55 }
 0x5bd   : > { %v5461_v48 = vsel %vm5455_vm13, %v5452_v8, %v5458_v58  ;;  %vm5453_vm14 = vcmp.ge.f32.partialorder %v5450_v61, 0.0  ;;  %v5456_v2 = vmul.f32 0.2, %v5450_v61  ;;  %v5434_v17 = vmul.f32 %v10564_v39, %v5419_v0 }
 0x5be   : > { %v5464_v1 = vmul.f32 %v5461_v48, %v13334_v23 }
 0x5bf   : > { %v5459_v4 = vsel %vm5453_vm14, %v5450_v61, %v5456_v2  ;;  %v5451_v5 = vadd.f32 %v5444_v3, %v5434_v17 }
 0x5c0   : > { %v11193_v7 = vpack.c.bf16 %v5464_v1, %v5464_v1  ;;  %v5462_v9 = vmul.f32 %v5459_v4, %v13337_v28 }
 0x5c1   : > { %vm5454_vm9 = vcmp.ge.f32.partialorder %v5451_v5, 0.0  ;;  %v5457_v10 = vmul.f32 0.2, %v5451_v5 }
 0x5c2   : > { %v5495_v11 = vshll.u32 %v11193_v7, 16  ;;  %v5499_v16 = vshrl.u32 %v11193_v7, 16  ;;  %v11191_v22 = vpack.c.bf16 %v5462_v9, %v5462_v9 }
 0x5c3   : > { %v5460_v12 = vsel %vm5454_vm9, %v5451_v5, %v5457_v10  ;;  %v12786_v5 = vld [vmem:[%s15062_s2 + $0x5e8] sm:$0xff]  }
 0x5c4   : > { %v5497_v13 = vrot.slane %v5495_v11, 5  ;;  %v5501_v20 = vrot.slane %v5499_v16, 4  ;;  %v5476_v6 = vshll.u32 %v11191_v22, 16  ;;  %v5479_v18 = vshrl.u32 %v11191_v22, 16 }
 0x5c5   : > { %v5463_v19 = vmul.f32 %v5460_v12, %v13341_v43 }
 0x5c6   : > { %v5502_v26 = vor.u32 %v5501_v20, %v5497_v13  ;;  %v5478_v33 = vrot.slane %v5476_v6, 5  ;;  %v5481_v21 = vrot.slane %v5479_v18, 4  ;;  %v12789_v20 = vld [vmem:[%s15062_s2 + $0x610] sm:$0xff]   ;;  %v12790_v6 = vld [vmem:[%s15062_s2 + $0x5e0] sm:$0xff]  }
 0x5c7   : > { %v11192_v24 = vpack.c.bf16 %v5463_v19, %v5463_v19 }
 0x5c8   : > { %v5503_v31 = vrot.slane %v5502_v26, 4  ;;  %v5482_v14 = vor.u32 %v5481_v21, %v5478_v33  ;;  %v5508_v29 = vsel %vm13343_vm15, %v5478_v33, %v13976_v53 }
 0x5c9   : > { %5509 = vst [vmem:[#allocation2] sm:$0x8] %v5508_v29  ;;  %v5485_v41 = vshll.u32 %v11192_v24, 16  ;;  %v5489_v32 = vshrl.u32 %v11192_v24, 16  ;;  %v12791_v24 = vld [vmem:[%s15062_s2 + $0x608] sm:$0xff]  }
 0x5ca   : > { %v5513_v34 = vsel %vm13350_vm10, %v5503_v31, %v5512_v30  ;;  %v5483_v39 = vrot.slane %v5482_v14, 4  ;;  %v12792_v31 = vld [vmem:[%s15062_s2 + $0x638] sm:$0xff]  }
 0x5cb   : > { %5514 = vst [vmem:[#allocation2 + $0xc] sm:$0xf] %v5513_v34  ;;  %v5487_v36 = vrot.slane %v5485_v41, 5  ;;  %v5491_v25 = vrot.slane %v5489_v32, 4  ;;  %v12794_v41 = vld [vmem:[%s15062_s2 + $0x600] sm:$0xff]   ;;  %v12795_v32 = vld [vmem:[%s15062_s2 + $0x630] sm:$0xff]  }
 0x5cd   : > { %v5488_v63 = vsel %vm13358_vm11, %v5483_v39, %v5487_v36  ;;  %v5492_v37 = vor.u32 %v5491_v25, %v5487_v36  ;;  %v12796_v39 = vld [vmem:[%s15062_s2 + $0x658] sm:$0xff]   ;;  %v12798_v36 = vld [vmem:[%s15062_s2 + $0x628] sm:$0xff]  }
 0x5ce   : > { %5510 = vst.msk [vmem:[#allocation2 + $0x4] sm:$0xf] %vm286_vm0, %v5488_v63  ;;  %v12799_v63 = vld [vmem:[%s15062_s2 + $0x650] sm:$0xff]  }
 0x5cf   : > { %v5493_v38 = vrot.slane %v5492_v37, 4  ;;  %v6251_v37 = vld [vmem:[#allocation2 + $0x10] sm:$0x7] }
 0x5d0   : > { %v5624_v40 = vld [vmem:[#allocation2] sm:$0xf] }
 0x5d1   : > { %v5498_v53 = vsel %vm13358_vm11, %v5493_v38, %v5497_v13  ;;  %v5743_v46 = vld [vmem:[#allocation2] sm:$0xe] }
 0x5d2   : > { %5511 = vst.msk [vmem:[#allocation2 + $0x8] sm:$0xf] %vm286_vm0, %v5498_v53  ;;  %v5627_v47 = vld [vmem:[#allocation2 + $0xc] sm:$0x1]  ;;  %v14173_v0 = vld [vmem:[#allocation2] sm:$0x8] }
 0x5d3   : > { %v5841_v54 = vld [vmem:[#allocation2 + $0xc] sm:$0x7]  ;;  %v12800_v53 = vld [vmem:[%s15062_s2 + $0x620] sm:$0xff]  }
 0x5d4   : > { %v14170_v58 = vld [vmem:[#allocation2 + $0xc] sm:$0xf] }
 0x5d5   : > { %v12776_v42 = vld [vmem:[#allocation2] sm:$0xff]  }
 0x5d6   : > { %v14158_v45 = vld [vmem:[#allocation2 + $0x4] sm:$0xf]  ;;  %12183 = vmatprep.mubr.msk.bf16.mxu1 %vm347_vm1, %v12776_v42  ;;  %v6146_v42 = vld [vmem:[#allocation2 + $0xc] sm:$0xf] }
 0x5d7   : > { %v10594_v51 = vcombine.low %v5624_v40, %v14158_v45  ;;  %v10610_v49 = vcombine.low %v5743_v46, %v14158_v45  ;;  %v10625_v3 = vcombine.low %v14173_v0, %v14158_v45  ;;  %v6144_v40 = vld [vmem:[#allocation2 + $0x4] sm:$0xc] }
 0x5d9   : > { %v5650_v52 = vshll.u32 %v10594_v51, 16  ;;  %v12779_v55 = vld [vmem:[#allocation2 + $0x8] ss:$0 sps:$4 sm:$0xff]   ;;  %v5648_v61 = vshrl.u32 %v10594_v51, 16  ;;  %v5756_v2 = vrot.slane %v10610_v49, 1  ;;  %v5857_v13 = vrot.slane %v10625_v3, 3 }
 0x5da   : > { %v14166_v8 = vld [vmem:[#allocation2 + $0x8] sm:$0xf]  ;;  %12184 = vmatmul.mubr.msk.bf16.vlgmr.msra.gmra.mxu1 %vm347_vm1, %v12779_v55  ;;  %v5955_v18 = vshrl.u32 %v10625_v3, 16  ;;  %v5958_v19 = vshll.u32 %v10625_v3, 16  ;;  %v6147_v51 = vld [vmem:[#allocation2 + $0x10] sm:$0x3] }
 0x5db   : > { %v10595_v62 = vcombine.low %v14166_v8, %v5627_v47  ;;  %v5652_v56 = vrot.slane %v5650_v52, 1  ;;  %v10626_v57 = vcombine.low %v14166_v8, %v5841_v54  ;;  %v10641_v48 = vcombine.low %v14166_v8, %v14170_v58  ;;  %12200 = vmatpush3.bf16.msra.mxu1 %v14119_v27  ;;  %v14218_v25 = vld [vmem:[#allocation2 + $0x8] sm:$0xf]  ;;  %v12802_v49 = vld [vmem:[%s15062_s2 + $0x678] sm:$0xff]  }
 0x5dc   : > { %12201 = vmatprep.subr.bf16.mxu1 %v12781_v35  ;;  %v5957_v14 = vrot.slane %v5955_v18, 3  ;;  %v5960_v29 = vrot.slane %v5958_v19, 4  ;;  %v10656_v38 = vcombine.low %v14158_v45, %v14166_v8  ;;  %v10672_v46 = vcombine.low %v6144_v40, %v14218_v25  ;;  %v12814_v18 = vld [vmem:[%s15062_s2 + $0x6b8] sm:$0xff]  }
 0x5dd   : > { %v5757_v17 = vrot.slane %v10595_v62, 1  ;;  %v5655_v1 = vshll.u32 %v10595_v62, 16  ;;  %v5653_v4 = vor.u32 %v5652_v56, %v5648_v61  ;;  %v5659_v10 = vshrl.u32 %v10595_v62, 16 }
 0x5de   : > { %v5858_v11 = vrot.slane %v10626_v57, 3  ;;  %v5963_v27 = vshrl.u32 %v10641_v48, 16  ;;  %v5966_v16 = vshll.u32 %v10641_v48, 16  ;;  %v14234_v47 = vcombine.low %v6146_v42, %v6251_v37  ;;  %v12805_v48 = vld [vmem:[%s15062_s2 + $0x640] sm:$0xff]  }
 0x5df   : > { %v5758_v7 = vsel %vm538_vm2, %v5756_v2, %v5757_v17  ;;  %v5657_v9 = vrot.slane %v5655_v1, 1  ;;  %12202 = vmatpush3.bf16.msra.mxu1 %v12781_v35  ;;  %v12801_v35 = vld [vmem:[%s15062_s2 + $0x648] sm:$0xff]   ;;  %v10673_v52 = vcombine.low %v6146_v42, %v6147_v51  ;;  %v6265_v54 = vshrl.u32 %v10672_v46, 16  ;;  %v12806_v2 = vld [vmem:[%s15062_s2 + $0x670] sm:$0xff]  }
 0x5e0   : > { %12207 = vmatprep.mubr.msk.bf16.mxu1 %vm347_vm1, %v5758_v7  ;;  %12203 = vmatprep.subr.bf16.mxu1 %v12786_v5  ;;  %v5859_v26 = vsel %vm640_vm4, %v5857_v13, %v5858_v11  ;;  %v5965_v33 = vrot.slane %v5963_v27, 3  ;;  %v5968_v21 = vrot.slane %v5966_v16, 4  ;;  %v6268_v55 = vshll.u32 %v10672_v46, 16  ;;  %v12811_v16 = vld [vmem:[%s15062_s2 + $0x690] sm:$0xff]   ;;  %v6362_v13 = vld [vmem:[#allocation2 + $0x4] sm:$0x8] }
 0x5e1   : > { %v5658_v22 = vsel %vm428_vm3, %v5653_v4, %v5657_v9  ;;  %v5661_v12 = vor.u32 %v5659_v10, %v5657_v9  ;;  %v6167_v62 = vrot.slane %v10672_v46, 2  ;;  %v6273_v56 = vshrl.u32 %v14234_v47, 16  ;;  %v12808_v4 = vld [vmem:[%s15062_s2 + $0x698] sm:$0xff]   ;;  %v12810_v9 = vld [vmem:[%s15062_s2 + $0x668] sm:$0xff]  }
 0x5e2   : > { %12195 = vmatprep.mubr.msk.bf16.mxu0 %vm347_vm1, %v5658_v22  ;;  %v5969_v30 = vor.u32 %v5968_v21, %v5965_v33  ;;  %v6276_v57 = vshll.u32 %v14234_v47, 16  ;;  %v6168_v61 = vrot.slane %v10673_v52, 2  ;;  %v6270_v1 = vrot.slane %v6268_v55, 3  ;;  %v12812_v22 = vld [vmem:[%s15062_s2 + $0x660] sm:$0xff]   ;;  %v12817_v21 = vld [vmem:[%s15062_s2 + $0x6b0] sm:$0xff]  }
 0x5e3   : > { %12196 = vmatmul.mubr.msk.bf16.vlgmr.msra.gmra.mxu0 %vm347_vm1, %v5661_v12  ;;  %12204 = vmatpush3.bf16.msra.mxu1 %v12786_v5  ;;  %v6275_v5 = vrot.slane %v6273_v56, 2  ;;  %v12816_v33 = vld [vmem:[%s15062_s2 + $0x680] sm:$0xff]  }
 0x5e4   : > { %12212 = vmatpush3.bf16.msra.mxu0 %v14128_v60  ;;  %12219 = vmatprep.mubr.msk.bf16.mxu0 %vm347_vm1, %v5859_v26  ;;  %v5961_v60 = vor.u32 %v5960_v29, %v5957_v14  ;;  %v6169_v3 = vsel %vm952_vm6, %v6167_v62, %v6168_v61  ;;  %v6278_v7 = vrot.slane %v6276_v57, 3  ;;  %v6376_v26 = vrot.slane %v14234_v47, 3  ;;  %v12819_v14 = vld [vmem:[%s15062_s2 + $0x6a0] sm:$0xff]   ;;  %v12820_v29 = vld [vmem:[%s15062_s2 + $0x6d8] sm:$0xff]  }
 0x5e5   : > { %12213 = vmatprep.subr.bf16.mxu0 %v12789_v20  ;;  %12205 = vmatprep.subr.bf16.mxu1 %v12790_v6 }
 0x5e6   : > { %v5970_v34 = vsel %vm738_vm5, %v5961_v60, %v5969_v30  ;;  %v6279_v27 = vor.u32 %v6278_v7, %v6275_v5  ;;  %v12822_v60 = vld [vmem:[%s15062_s2 + $0x6f8] sm:$0xff]  }
 0x5e7   : > { %12206 = vmatpush3.bf16.msra.mxu1 %v12790_v6  ;;  %v12813_v6 = vld [vmem:[%s15062_s2 + $0x688] sm:$0xff]  }
 0x5e8   : > { %12214 = vmatpush3.bf16.msra.mxu0 %v12789_v20  ;;  %12223 = vmatprep.subr.bf16.mxu1 %v12792_v31  ;;  %v10703_v20 = vcombine.low %v6362_v13, %v14218_v25  ;;  %v12830_v25 = vld [vmem:[%s15062_s2 + $0x6e0] sm:$0xff]  }
 0x5e9   : > { %12215 = vmatprep.subr.bf16.mxu0 %v12791_v24 }
 0x5ea   : > { %12208 = vmatmul.mubr.msk.bf16.vlgmr.msra.gmra.mxu1 %vm347_vm1, %v5757_v17  ;;  %v6267_v17 = vrot.slane %v6265_v54, 2  ;;  %v6375_v19 = vrot.slane %v10703_v20, 3 }
 0x5eb   : > { %12224 = vmatpush3.bf16.msra.mxu1 %v12792_v31  ;;  %12231 = vmatprep.mubr.msk.bf16.mxu1 %vm347_vm1, %v5970_v34  ;;  %v12818_v31 = vld [vmem:[%s15062_s2 + $0x6a8] sm:$0xff]  }
 0x5ec   : > { %12216 = vmatpush3.bf16.msra.mxu0 %v12791_v24  ;;  %12225 = vmatprep.subr.bf16.mxu1 %v12795_v32  ;;  %v6271_v10 = vor.u32 %v6270_v1, %v6267_v17  ;;  %v6377_v24 = vsel %vm640_vm4, %v6375_v19, %v6376_v26  ;;  %v12827_v34 = vld [vmem:[%s15062_s2 + $0x6e8] sm:$0xff]  }
 0x5ed   : > { %12217 = vmatprep.subr.bf16.mxu0 %v12794_v41 }
 0x5ee   : > { %v6280_v12 = vsel %vm1050_vm7, %v6271_v10, %v6279_v27 }
 0x5ef   : > { %12226 = vmatpush3.bf16.msra.mxu1 %v12795_v32  ;;  %v12823_v32 = vld [vmem:[%s15062_s2 + $0x6c8] sm:$0xff]  }
 0x5f0   : > { %12218 = vmatpush3.bf16.msra.mxu0 %v12794_v41  ;;  %12227 = vmatprep.subr.bf16.mxu1 %v12798_v36  ;;  %v12824_v41 = vld [vmem:[%s15062_s2 + $0x6f0] sm:$0xff]  }
 0x5f1   : > { %12235 = vmatprep.subr.bf16.mxu0 %v12796_v39 }
 0x5f3   : > { %12220 = vmatmul.mubr.msk.bf16.vlgmr.msra.gmra.mxu0 %vm347_vm1, %v5858_v11  ;;  %12228 = vmatpush3.bf16.msra.mxu1 %v12798_v36  ;;  %v10657_v11 = vcombine.low %v14170_v58, %v14170_v58  ;;  %v14316_v36 = vld [vmem:[%s15062_s2 + $0x718] sm:$0xff]  }
 0x5f4   : > { %12236 = vmatpush3.bf16.msra.mxu0 %v12796_v39  ;;  %12243 = vmatprep.mubr.msk.bf16.mxu0 %vm347_vm1, %v10656_v38  ;;  %v12825_v39 = vld [vmem:[%s15062_s2 + $0x6c0] sm:$0xff]  }
 0x5f5   : > { %12237 = vmatprep.subr.bf16.mxu0 %v12799_v63  ;;  %12229 = vmatprep.subr.bf16.mxu1 %v12800_v53 }
 0x5f7   : > { %12230 = vmatpush3.bf16.msra.mxu1 %v12800_v53 }
 0x5f8   : > { %12238 = vmatpush3.bf16.msra.mxu0 %v12799_v63  ;;  %12247 = vmatprep.subr.bf16.mxu1 %v12802_v49  ;;  %v14325_v63 = vld [vmem:[%s15062_s2 + $0x738] sm:$0xff]  }
 0x5f9   : > { %12239 = vmatprep.subr.bf16.mxu0 %v12801_v35 }
 0x5fa   : > { %12232 = vmatmul.mubr.msk.bf16.vlgmr.msra.gmra.mxu1 %vm347_vm1, %v5969_v30  ;;  %v12821_v30 = vld [vmem:[%s15062_s2 + $0x6d0] sm:$0xff]  }
 0x5fb   : > { %12248 = vmatpush3.bf16.msra.mxu1 %v12802_v49  ;;  %12255 = vmatprep.mubr.msk.bf16.mxu1 %vm347_vm1, %v6169_v3 }
 0x5fc   : > { %12240 = vmatpush3.bf16.msra.mxu0 %v12801_v35  ;;  %12249 = vmatprep.subr.bf16.mxu1 %v12806_v2 }
 0x5fd   : > { %12241 = vmatprep.subr.bf16.mxu0 %v12805_v48 }
 0x5ff   : > { %12250 = vmatpush3.bf16.msra.mxu1 %v12806_v2 }
 0x600   : > { %12242 = vmatpush3.bf16.msra.mxu0 %v12805_v48  ;;  %12251 = vmatprep.subr.bf16.mxu1 %v12810_v9 }
 0x601   : > { %12259 = vmatprep.subr.bf16.mxu0 %v12808_v4 }
 0x603   : > { %12244 = vmatmul.mubr.msk.bf16.vlgmr.msra.gmra.mxu0 %vm347_vm1, %v10657_v11  ;;  %12252 = vmatpush3.bf16.msra.mxu1 %v12810_v9 }
 0x604   : > { %12260 = vmatpush3.bf16.msra.mxu0 %v12808_v4  ;;  %12267 = vmatprep.mubr.msk.bf16.mxu0 %vm347_vm1, %v6280_v12  ;;  %v10569_v4 = vld [vmem:[%s15063_s3 + $0x5] ss:$0 sm:$0xff] }
 0x605   : > { %12261 = vmatprep.subr.bf16.mxu0 %v12811_v16  ;;  %12253 = vmatprep.subr.bf16.mxu1 %v12812_v22 }
 0x607   : > { %12254 = vmatpush3.bf16.msra.mxu1 %v12812_v22 }
 0x608   : > { %12262 = vmatpush3.bf16.msra.mxu0 %v12811_v16  ;;  %12271 = vmatprep.subr.bf16.mxu1 %v12814_v18 }
 0x609   : > { %12263 = vmatprep.subr.bf16.mxu0 %v12813_v6 }
 0x60a   : > { %12256 = vmatmul.mubr.msk.bf16.vlgmr.msra.gmra.mxu1 %vm347_vm1, %v6168_v61 }
 0x60b   : > { %12272 = vmatpush3.bf16.msra.mxu1 %v12814_v18  ;;  %12279 = vmatprep.mubr.msk.bf16.mxu1 %vm347_vm1, %v6377_v24 }
 0x60c   : > { %12264 = vmatpush3.bf16.msra.mxu0 %v12813_v6  ;;  %12273 = vmatprep.subr.bf16.mxu1 %v12817_v21 }
 0x60d   : > { %12265 = vmatprep.subr.bf16.mxu0 %v12816_v33 }
 0x60f   : > { %12274 = vmatpush3.bf16.msra.mxu1 %v12817_v21 }
 0x610   : > { %12266 = vmatpush3.bf16.msra.mxu0 %v12816_v33  ;;  %12275 = vmatprep.subr.bf16.mxu1 %v12818_v31 }
 0x611   : > { %12283 = vmatprep.subr.bf16.mxu0 %v12820_v29 }
 0x613   : > { %12268 = vmatmul.mubr.msk.bf16.vlgmr.msra.gmra.mxu0 %vm347_vm1, %v6279_v27  ;;  %12276 = vmatpush3.bf16.msra.mxu1 %v12818_v31 }
 0x614   : > { %12277 = vmatprep.subr.bf16.mxu1 %v12819_v14  ;;  %12284 = vmatpush3.bf16.msra.mxu0 %v12820_v29 }
 0x615   : > { %12285 = vmatprep.subr.bf16.mxu0 %v12821_v30 }
 0x617   : > { %12278 = vmatpush3.bf16.msra.mxu1 %v12819_v14 }
 0x618   : > { %12295 = vmatprep.subr.bf16.mxu1 %v12822_v60  ;;  %12286 = vmatpush3.bf16.msra.mxu0 %v12821_v30 }
 0x619   : > { %12287 = vmatprep.subr.bf16.mxu0 %v12823_v32 }
 0x61a   : > { %12280 = vmatmul.mubr.msk.bf16.vlgmr.msra.gmra.mxu1 %vm347_vm1, %v6376_v26 }
 0x61b   : > { %12296 = vmatpush3.bf16.msra.mxu1 %v12822_v60  ;;  %v6461_v60 = vunpack.c.l.bf16 %v14166_v8 }
 0x61c   : > { %12297 = vmatprep.subr.bf16.mxu1 %v12824_v41  ;;  %12288 = vmatpush3.bf16.msra.mxu0 %v12823_v32 }
 0x61d   : > { %12289 = vmatprep.subr.bf16.mxu0 %v12825_v39 }
 0x61f   : > { %12298 = vmatpush3.bf16.msra.mxu1 %v12824_v41 }
 0x620   : > { %12299 = vmatprep.subr.bf16.mxu1 %v12827_v34  ;;  %12290 = vmatpush3.bf16.msra.mxu0 %v12825_v39 }
 0x621   : > { %12307 = vmatprep.subr.bf16.mxu0 %v14316_v36 }
 0x623   : > { %12300 = vmatpush3.bf16.msra.mxu1 %v12827_v34 }
 0x624   : > { %12301 = vmatprep.subr.bf16.mxu1 %v12830_v25 }
 0x627   : > { %12302 = vmatpush3.bf16.msra.mxu1 %v12830_v25  ;;  %v6462_v25 = vunpack.c.l.bf16 %v14170_v58 }
 0x628   : > { %12319 = vmatprep.subr.bf16.mxu1 %v14325_v63 }
 0x69a   : > { %v12185_v37 = vpop.f32.mrf.mxu1 }
 0x69b   : > { %v5623_v9 = vadd.f32 %v12185_v37, %v10569_v4  ;;  %v6460_v37 = vunpack.c.l.bf16 %v14158_v45 }
 0x69c   : > { %v5607_v38 = vpop.f32.mrf.mxu1 }
 0x69d   : > { %v5621_v11 = vadd.f32 %v10569_v4, %v5607_v38  ;;  %v6479_v58 = vrot.slane %v6460_v37, 7 }
 0x69e   : > { %v12186_v53 = vpop.f32.mrf.mxu1 }
 0x6a0   : > { %v5610_v46 = vpop.f32.mrf.mxu1 }
 0x6a1   : > { %v5622_v20 = vadd.f32 %v10569_v4, %v5610_v46  ;;  %v6481_v46 = vrot.slane %v6461_v60, 7 }
 0x6a3   : > { %v12197_v40 = vpop.f32.mrf.mxu0 }
 0x6a4   : > { %v5742_v27 = vadd.f32 %v12197_v40, %v5623_v9 }
 0x6a5   : > { %v5726_v42 = vpop.f32.mrf.mxu0 }
 0x6a6   : > { %v5740_v22 = vadd.f32 %v5726_v42, %v5621_v11 }
 0x6a7   : > { %v12198_v51 = vpop.f32.mrf.mxu0 }
 0x6a8   : > { %v10711_v51 = vld [vmem:[%s15064_s4 + $0x5] ss:$0 sm:$0xff] }
 0x6a9   : > { %v5729_v52 = vpop.f32.mrf.mxu0 }
 0x6aa   : > { %v12209_v35 = vpop.f32.mrf.mxu1  ;;  %v5741_v26 = vadd.f32 %v5729_v52, %v5622_v20 }
 0x6ab   : > { %v5839_v12 = vadd.f32 %v12209_v35, %v5742_v27  ;;  %v6459_v35 = vunpack.c.l.bf16 %v14173_v0 }
 0x6ac   : > { %v5823_v47 = vpop.f32.mrf.mxu1 }
 0x6ad   : > { %v5837_v6 = vadd.f32 %v5823_v47, %v5740_v22  ;;  %v6482_v22 = vsel %vm1264_vm8, %v6479_v58, %v6481_v46 }
 0x6ae   : > { %v12210_v49 = vpop.f32.mrf.mxu1 }
 0x6b0   : > { %v5826_v56 = vpop.f32.mrf.mxu1 }
 0x6b1   : > { %v5838_v31 = vadd.f32 %v5826_v56, %v5741_v26 }
 0x6b3   : > { %v12221_v54 = vpop.f32.mrf.mxu0 }
 0x6b4   : > { %v5940_v18 = vadd.f32 %v12221_v54, %v5839_v12  ;;  %v6483_v54 = vrot.slane %v6462_v25, 7 }
 0x6b5   : > { %v5924_v55 = vpop.f32.mrf.mxu0 }
 0x6b6   : > { %v5938_v33 = vadd.f32 %v5924_v55, %v5837_v6 }
 0x6b7   : > { %v12222_v62 = vpop.f32.mrf.mxu0 }
 0x6b9   : > { %v5927_v2 = vpop.f32.mrf.mxu0 }
 0x6ba   : > { %v12233_v57 = vpop.f32.mrf.mxu1  ;;  %v5939_v41 = vadd.f32 %v5927_v2, %v5838_v31 }
 0x6bb   : > { %v6051_v21 = vadd.f32 %v12233_v57, %v5940_v18  ;;  %v6484_v57 = vsel %vm1264_vm8, %v6481_v46, %v6483_v54 }
 0x6bc   : > { %v6035_v61 = vpop.f32.mrf.mxu1 }
 0x6bd   : > { %v6049_v14 = vadd.f32 %v6035_v61, %v5938_v33  ;;  %v6478_v61 = vrot.slane %v6459_v35, 7 }
 0x6be   : > { %v12234_v48 = vpop.f32.mrf.mxu1 }
 0x6c0   : > { %v6038_v5 = vpop.f32.mrf.mxu1 }
 0x6c1   : > { %v6050_v38 = vadd.f32 %v6038_v5, %v5939_v41 }
 0x6c3   : > { %v12245_v17 = vpop.f32.mrf.mxu0 }
 0x6c4   : > { %v6143_v29 = vadd.f32 %v12245_v17, %v6051_v21 }
 0x6c5   : > { %v6127_v1 = vpop.f32.mrf.mxu0 }
 0x6c6   : > { %v6141_v32 = vadd.f32 %v6127_v1, %v6049_v14 }
 0x6c7   : > { %v12246_v3 = vpop.f32.mrf.mxu0 }
 0x6c8   : > { %v6480_v3 = vsel %vm1264_vm8, %v6478_v61, %v6479_v58 }
 0x6c9   : > { %v6130_v13 = vpop.f32.mrf.mxu0 }
 0x6ca   : > { %v12257_v7 = vpop.f32.mrf.mxu1  ;;  %v6142_v8 = vadd.f32 %v6130_v13, %v6050_v38  ;;  %v6550_v38 = vld [vmem:[#allocation2 + $0xc] sm:$0xf] }
 0x6cb   : > { %v6250_v34 = vadd.f32 %v12257_v7, %v6143_v29 }
 0x6cc   : > { %v6234_v10 = vpop.f32.mrf.mxu1 }
 0x6cd   : > { %v6248_v53 = vadd.f32 %v6234_v10, %v6141_v32 }
 0x6ce   : > { %v12258_v16 = vpop.f32.mrf.mxu1 }
 0x6d0   : > { %v6237_v39 = vpop.f32.mrf.mxu1 }
 0x6d1   : > { %v6249_v62 = vadd.f32 %v6237_v39, %v6142_v8 }
 0x6d3   : > { %v12269_v19 = vpop.f32.mrf.mxu0 }
 0x6d4   : > { %v6361_v40 = vadd.f32 %v12269_v19, %v6250_v34 }
 0x6d5   : > { %v6345_v24 = vpop.f32.mrf.mxu0 }
 0x6d6   : > { %v6359_v47 = vadd.f32 %v6345_v24, %v6248_v53 }
 0x6d7   : > { %v12270_v30 = vpop.f32.mrf.mxu0 }
 0x6d9   : > { %v6348_v52 = vpop.f32.mrf.mxu0 }
 0x6da   : > { %v12281_v42 = vpop.f32.mrf.mxu1  ;;  %v6360_v2 = vadd.f32 %v6348_v52, %v6249_v62 }
 0x6db   : > { %v6458_v49 = vadd.f32 %v12281_v42, %v6361_v40 }
 0x6dc   : > { %v6442_v55 = vpop.f32.mrf.mxu1 }
 0x6dd   : > { %v6473_v45 = vmul.f32 %v10711_v51, %v6458_v49  ;;  %v6456_v56 = vadd.f32 %v6442_v55, %v6359_v47 }
 0x6de   : > { %v12282_v48 = vpop.f32.mrf.mxu1 }
 0x6df   : > { %v6490_v17 = vadd.f32 %v6484_v57, %v6473_v45  ;;  %v6471_v1 = vmul.f32 %v10711_v51, %v6456_v56  ;;  %v12831_v45 = vld [vmem:[%s15062_s2 + $0x710] sm:$0xff]  }
 0x6e0   : > { %v6445_v4 = vpop.f32.mrf.mxu1 }
 0x6e1   : > { %vm6493_vm12 = vcmp.ge.f32.partialorder %v6490_v17, 0.0  ;;  %v6496_v5 = vmul.f32 0.2, %v6490_v17  ;;  %v6488_v7 = vadd.f32 %v6480_v3, %v6471_v1  ;;  %v6457_v9 = vadd.f32 %v6445_v4, %v6360_v2 }
 0x6e3   : > { %v6499_v10 = vsel %vm6493_vm12, %v6490_v17, %v6496_v5  ;;  %vm6491_vm13 = vcmp.ge.f32.partialorder %v6488_v7, 0.0  ;;  %v6494_v11 = vmul.f32 0.2, %v6488_v7  ;;  %v6472_v27 = vmul.f32 %v10711_v51, %v6457_v9 }
 0x6e4   : > { %v6502_v16 = vmul.f32 %v6499_v10, %v13334_v23 }
 0x6e5   : > { %v6497_v12 = vsel %vm6491_vm13, %v6488_v7, %v6494_v11  ;;  %v6489_v13 = vadd.f32 %v6482_v22, %v6472_v27 }
 0x6e6   : > { %v11196_v20 = vpack.c.bf16 %v6502_v16, %v6502_v16  ;;  %v6500_v6 = vmul.f32 %v6497_v12, %v13337_v28 }
 0x6e7   : > { %vm6492_vm14 = vcmp.ge.f32.partialorder %v6489_v13, 0.0  ;;  %v6495_v18 = vmul.f32 0.2, %v6489_v13 }
 0x6e8   : > { %v6533_v19 = vshll.u32 %v11196_v20, 16  ;;  %v6537_v26 = vshrl.u32 %v11196_v20, 16  ;;  %v11194_v33 = vpack.c.bf16 %v6500_v6, %v6500_v6 }
 0x6e9   : > { %v6498_v21 = vsel %vm6492_vm14, %v6489_v13, %v6495_v18  ;;  %v12836_v13 = vld [vmem:[%s15062_s2 + $0x708] sm:$0xff]  }
 0x6ea   : > { %v6535_v24 = vrot.slane %v6533_v19, 5  ;;  %v6539_v31 = vrot.slane %v6537_v26, 4  ;;  %v6514_v14 = vshll.u32 %v11194_v33, 16  ;;  %v6517_v29 = vshrl.u32 %v11194_v33, 16 }
 0x6eb   : > { %v6501_v30 = vmul.f32 %v6498_v21, %v13341_v43 }
 0x6ec   : > { %v6540_v60 = vor.u32 %v6539_v31, %v6535_v24  ;;  %v6516_v41 = vrot.slane %v6514_v14, 5  ;;  %v6519_v32 = vrot.slane %v6517_v29, 4  ;;  %v12839_v31 = vld [vmem:[%s15062_s2 + $0x730] sm:$0xff]   ;;  %v12840_v14 = vld [vmem:[%s15062_s2 + $0x700] sm:$0xff]  }
 0x6ed   : > { %v11195_v34 = vpack.c.bf16 %v6501_v30, %v6501_v30 }
 0x6ee   : > { %v6541_v39 = vrot.slane %v6540_v60, 4  ;;  %v6520_v25 = vor.u32 %v6519_v32, %v6516_v41  ;;  %v6546_v37 = vsel %vm13343_vm15, %v6516_v41, %v14173_v0 }
 0x6ef   : > { %6547 = vst [vmem:[#allocation2] sm:$0x8] %v6546_v37  ;;  %v6523_v53 = vshll.u32 %v11195_v34, 16  ;;  %v6527_v40 = vshrl.u32 %v11195_v34, 16  ;;  %v12841_v34 = vld [vmem:[%s15062_s2 + $0x728] sm:$0xff]  }
 0x6f0   : > { %v6551_v42 = vsel %vm13350_vm10, %v6541_v39, %v6550_v38  ;;  %v6521_v51 = vrot.slane %v6520_v25, 4  ;;  %v12842_v39 = vld [vmem:[%s15062_s2 + $0x758] sm:$0xff]  }
 0x6f1   : > { %6552 = vst [vmem:[#allocation2 + $0xc] sm:$0xf] %v6551_v42  ;;  %v6525_v46 = vrot.slane %v6523_v53, 5  ;;  %v6529_v35 = vrot.slane %v6527_v40, 4  ;;  %v12844_v53 = vld [vmem:[%s15062_s2 + $0x720] sm:$0xff]   ;;  %v12845_v40 = vld [vmem:[%s15062_s2 + $0x750] sm:$0xff]  }
 0x6f3   : > { %v6526_v8 = vsel %vm13358_vm11, %v6521_v51, %v6525_v46  ;;  %v6530_v47 = vor.u32 %v6529_v35, %v6525_v46  ;;  %v12846_v51 = vld [vmem:[%s15062_s2 + $0x778] sm:$0xff]   ;;  %v12848_v46 = vld [vmem:[%s15062_s2 + $0x748] sm:$0xff]  }
 0x6f4   : > { %6548 = vst.msk [vmem:[#allocation2 + $0x4] sm:$0xf] %vm286_vm0, %v6526_v8  ;;  %v12849_v8 = vld [vmem:[%s15062_s2 + $0x770] sm:$0xff]  }
 0x6f5   : > { %v6531_v49 = vrot.slane %v6530_v47, 4  ;;  %v7289_v47 = vld [vmem:[#allocation2 + $0x10] sm:$0x7] }
 0x6f6   : > { %v6662_v52 = vld [vmem:[#allocation2] sm:$0xf] }
 0x6f7   : > { %v6536_v0 = vsel %vm13358_vm11, %v6531_v49, %v6535_v24  ;;  %v6781_v62 = vld [vmem:[#allocation2] sm:$0xe] }
 0x6f8   : > { %6549 = vst.msk [vmem:[#allocation2 + $0x8] sm:$0xf] %vm286_vm0, %v6536_v0  ;;  %v6665_v56 = vld [vmem:[#allocation2 + $0xc] sm:$0x1]  ;;  %v14370_v9 = vld [vmem:[#allocation2] sm:$0x8] }
 0x6f9   : > { %v6879_v48 = vld [vmem:[#allocation2 + $0xc] sm:$0x7]  ;;  %v12850_v0 = vld [vmem:[%s15062_s2 + $0x740] sm:$0xff]  }
 0x6fa   : > { %v14367_v5 = vld [vmem:[#allocation2 + $0xc] sm:$0xf] }
 0x6fb   : > { %v12826_v54 = vld [vmem:[#allocation2] sm:$0xff]  }
 0x6fc   : > { %v14355_v55 = vld [vmem:[#allocation2 + $0x4] sm:$0xf]  ;;  %12291 = vmatprep.mubr.msk.bf16.mxu0 %vm347_vm1, %v12826_v54  ;;  %v7184_v54 = vld [vmem:[#allocation2 + $0xc] sm:$0xf] }
 0x6fd   : > { %v10741_v58 = vcombine.low %v6662_v52, %v14355_v55  ;;  %v10757_v57 = vcombine.low %v6781_v62, %v14355_v55  ;;  %v10772_v22 = vcombine.low %v14370_v9, %v14355_v55  ;;  %v7182_v52 = vld [vmem:[#allocation2 + $0x4] sm:$0xc] }
 0x6ff   : > { %v6688_v61 = vshll.u32 %v10741_v58, 16  ;;  %v12829_v2 = vld [vmem:[#allocation2 + $0x8] ss:$0 sps:$4 sm:$0xff]   ;;  %v6686_v7 = vshrl.u32 %v10741_v58, 16  ;;  %v6794_v11 = vrot.slane %v10757_v57, 1  ;;  %v6895_v24 = vrot.slane %v10772_v22, 3 }
 0x700   : > { %v14363_v17 = vld [vmem:[#allocation2 + $0x8] sm:$0xf]  ;;  %12292 = vmatmul.mubr.msk.bf16.vlgmr.msra.gmra.mxu0 %vm347_vm1, %v12829_v2  ;;  %v6993_v29 = vshrl.u32 %v10772_v22, 16  ;;  %v6996_v30 = vshll.u32 %v10772_v22, 16  ;;  %v7185_v58 = vld [vmem:[#allocation2 + $0x10] sm:$0x3] }
 0x701   : > { %v10742_v1 = vcombine.low %v14363_v17, %v6665_v56  ;;  %v6690_v3 = vrot.slane %v6688_v61, 1  ;;  %v10773_v4 = vcombine.low %v14363_v17, %v6879_v48  ;;  %v10788_v10 = vcombine.low %v14363_v17, %v14367_v5  ;;  %12308 = vmatpush3.bf16.msra.mxu0 %v14316_v36  ;;  %v14415_v35 = vld [vmem:[#allocation2 + $0x8] sm:$0xf]  ;;  %v12852_v57 = vld [vmem:[%s15062_s2 + $0x798] sm:$0xff]  }
 0x702   : > { %12309 = vmatprep.subr.bf16.mxu0 %v12831_v45  ;;  %v6995_v25 = vrot.slane %v6993_v29, 3  ;;  %v6998_v37 = vrot.slane %v6996_v30, 4  ;;  %v10803_v49 = vcombine.low %v14355_v55, %v14363_v17  ;;  %v10819_v62 = vcombine.low %v7182_v52, %v14415_v35  ;;  %v12864_v29 = vld [vmem:[%s15062_s2 + $0x7d8] sm:$0xff]  }
 0x703   : > { %v6795_v27 = vrot.slane %v10742_v1, 1  ;;  %v6693_v16 = vshll.u32 %v10742_v1, 16  ;;  %v6691_v12 = vor.u32 %v6690_v3, %v6686_v7  ;;  %v6697_v18 = vshrl.u32 %v10742_v1, 16 }
 0x704   : > { %v6896_v19 = vrot.slane %v10773_v4, 3  ;;  %v7001_v36 = vshrl.u32 %v10788_v10, 16  ;;  %v7004_v26 = vshll.u32 %v10788_v10, 16  ;;  %v14431_v56 = vcombine.low %v7184_v54, %v7289_v47  ;;  %v12855_v10 = vld [vmem:[%s15062_s2 + $0x760] sm:$0xff]  }
 0x705   : > { %v6796_v20 = vsel %vm538_vm2, %v6794_v11, %v6795_v27  ;;  %v6695_v6 = vrot.slane %v6693_v16, 1  ;;  %12310 = vmatpush3.bf16.msra.mxu0 %v12831_v45  ;;  %v12851_v45 = vld [vmem:[%s15062_s2 + $0x768] sm:$0xff]   ;;  %v10820_v61 = vcombine.low %v7184_v54, %v7185_v58  ;;  %v7303_v48 = vshrl.u32 %v10819_v62, 16  ;;  %v12856_v11 = vld [vmem:[%s15062_s2 + $0x790] sm:$0xff]  }
 0x706   : > { %12315 = vmatprep.mubr.msk.bf16.mxu0 %vm347_vm1, %v6796_v20  ;;  %12311 = vmatprep.subr.bf16.mxu0 %v12836_v13  ;;  %v6897_v60 = vsel %vm640_vm4, %v6895_v24, %v6896_v19  ;;  %v7003_v41 = vrot.slane %v7001_v36, 3  ;;  %v7006_v32 = vrot.slane %v7004_v26, 4  ;;  %v7306_v2 = vshll.u32 %v10819_v62, 16  ;;  %v12861_v26 = vld [vmem:[%s15062_s2 + $0x7b0] sm:$0xff]   ;;  %v7400_v24 = vld [vmem:[#allocation2 + $0x4] sm:$0x8] }
 0x707   : > { %v6696_v33 = vsel %vm428_vm3, %v6691_v12, %v6695_v6  ;;  %v6699_v21 = vor.u32 %v6697_v18, %v6695_v6  ;;  %v7205_v1 = vrot.slane %v10819_v62, 2  ;;  %v7311_v3 = vshrl.u32 %v14431_v56, 16  ;;  %v12858_v12 = vld [vmem:[%s15062_s2 + $0x7b8] sm:$0xff]   ;;  %v12860_v6 = vld [vmem:[%s15062_s2 + $0x788] sm:$0xff]  }
 0x708   : > { %12303 = vmatprep.mubr.msk.bf16.mxu1 %vm347_vm1, %v6696_v33  ;;  %v7007_v38 = vor.u32 %v7006_v32, %v7003_v41  ;;  %v7314_v4 = vshll.u32 %v14431_v56, 16  ;;  %v7206_v7 = vrot.slane %v10820_v61, 2  ;;  %v7308_v16 = vrot.slane %v7306_v2, 3  ;;  %v12862_v33 = vld [vmem:[%s15062_s2 + $0x780] sm:$0xff]   ;;  %v12867_v32 = vld [vmem:[%s15062_s2 + $0x7d0] sm:$0xff]  }
 0x709   : > { %12304 = vmatmul.mubr.msk.bf16.vlgmr.msra.gmra.mxu1 %vm347_vm1, %v6699_v21  ;;  %12312 = vmatpush3.bf16.msra.mxu0 %v12836_v13  ;;  %v7313_v13 = vrot.slane %v7311_v3, 2  ;;  %v12866_v41 = vld [vmem:[%s15062_s2 + $0x7a0] sm:$0xff]  }
 0x70a   : > { %12320 = vmatpush3.bf16.msra.mxu1 %v14325_v63  ;;  %12327 = vmatprep.mubr.msk.bf16.mxu1 %vm347_vm1, %v6897_v60  ;;  %v6999_v63 = vor.u32 %v6998_v37, %v6995_v25  ;;  %v7207_v22 = vsel %vm952_vm6, %v7205_v1, %v7206_v7  ;;  %v7316_v20 = vrot.slane %v7314_v4, 3  ;;  %v7414_v60 = vrot.slane %v14431_v56, 3  ;;  %v12869_v25 = vld [vmem:[%s15062_s2 + $0x7c0] sm:$0xff]   ;;  %v12870_v37 = vld [vmem:[%s15062_s2 + $0x7f8] sm:$0xff]  }
 0x70b   : > { %12321 = vmatprep.subr.bf16.mxu1 %v12839_v31  ;;  %12313 = vmatprep.subr.bf16.mxu0 %v12840_v14 }
 0x70c   : > { %v7008_v42 = vsel %vm738_vm5, %v6999_v63, %v7007_v38  ;;  %v7317_v36 = vor.u32 %v7316_v20, %v7313_v13  ;;  %v12872_v63 = vld [vmem:[%s15062_s2 + $0x818] sm:$0xff]  }
 0x70d   : > { %12314 = vmatpush3.bf16.msra.mxu0 %v12840_v14  ;;  %v12863_v14 = vld [vmem:[%s15062_s2 + $0x7a8] sm:$0xff]  }
 0x70e   : > { %12322 = vmatpush3.bf16.msra.mxu1 %v12839_v31  ;;  %12331 = vmatprep.subr.bf16.mxu0 %v12842_v39  ;;  %v10850_v31 = vcombine.low %v7400_v24, %v14415_v35  ;;  %v12880_v35 = vld [vmem:[%s15062_s2 + $0x800] sm:$0xff]  }
 0x70f   : > { %12323 = vmatprep.subr.bf16.mxu1 %v12841_v34 }
 0x710   : > { %12316 = vmatmul.mubr.msk.bf16.vlgmr.msra.gmra.mxu0 %vm347_vm1, %v6795_v27  ;;  %v7305_v27 = vrot.slane %v7303_v48, 2  ;;  %v7413_v30 = vrot.slane %v10850_v31, 3 }
 0x711   : > { %12332 = vmatpush3.bf16.msra.mxu0 %v12842_v39  ;;  %12339 = vmatprep.mubr.msk.bf16.mxu0 %vm347_vm1, %v7008_v42  ;;  %v12868_v39 = vld [vmem:[%s15062_s2 + $0x7c8] sm:$0xff]  }
 0x712   : > { %12324 = vmatpush3.bf16.msra.mxu1 %v12841_v34  ;;  %12333 = vmatprep.subr.bf16.mxu0 %v12845_v40  ;;  %v7309_v18 = vor.u32 %v7308_v16, %v7305_v27  ;;  %v7415_v34 = vsel %vm640_vm4, %v7413_v30, %v7414_v60  ;;  %v12877_v42 = vld [vmem:[%s15062_s2 + $0x808] sm:$0xff]  }
 0x713   : > { %12325 = vmatprep.subr.bf16.mxu1 %v12844_v53 }
 0x714   : > { %v7318_v21 = vsel %vm1050_vm7, %v7309_v18, %v7317_v36 }
 0x715   : > { %12334 = vmatpush3.bf16.msra.mxu0 %v12845_v40  ;;  %v12873_v40 = vld [vmem:[%s15062_s2 + $0x7e8] sm:$0xff]  }
 0x716   : > { %12326 = vmatpush3.bf16.msra.mxu1 %v12844_v53  ;;  %12335 = vmatprep.subr.bf16.mxu0 %v12848_v46  ;;  %v12874_v53 = vld [vmem:[%s15062_s2 + $0x810] sm:$0xff]  }
 0x717   : > { %12343 = vmatprep.subr.bf16.mxu1 %v12846_v51 }
 0x719   : > { %12328 = vmatmul.mubr.msk.bf16.vlgmr.msra.gmra.mxu1 %vm347_vm1, %v6896_v19  ;;  %12336 = vmatpush3.bf16.msra.mxu0 %v12848_v46  ;;  %v10804_v19 = vcombine.low %v14367_v5, %v14367_v5  ;;  %v14513_v46 = vld [vmem:[%s15062_s2 + $0x838] sm:$0xff]  }
 0x71a   : > { %12344 = vmatpush3.bf16.msra.mxu1 %v12846_v51  ;;  %12351 = vmatprep.mubr.msk.bf16.mxu1 %vm347_vm1, %v10803_v49  ;;  %v12875_v51 = vld [vmem:[%s15062_s2 + $0x7e0] sm:$0xff]  }
 0x71b   : > { %12345 = vmatprep.subr.bf16.mxu1 %v12849_v8  ;;  %12337 = vmatprep.subr.bf16.mxu0 %v12850_v0 }
 0x71d   : > { %12338 = vmatpush3.bf16.msra.mxu0 %v12850_v0 }
 0x71e   : > { %12346 = vmatpush3.bf16.msra.mxu1 %v12849_v8  ;;  %12355 = vmatprep.subr.bf16.mxu0 %v12852_v57  ;;  %v14522_v8 = vld [vmem:[%s15062_s2 + $0x858] sm:$0xff]  }
 0x71f   : > { %12347 = vmatprep.subr.bf16.mxu1 %v12851_v45 }
 0x720   : > { %12340 = vmatmul.mubr.msk.bf16.vlgmr.msra.gmra.mxu0 %vm347_vm1, %v7007_v38  ;;  %v12871_v38 = vld [vmem:[%s15062_s2 + $0x7f0] sm:$0xff]  }
 0x721   : > { %12356 = vmatpush3.bf16.msra.mxu0 %v12852_v57  ;;  %12363 = vmatprep.mubr.msk.bf16.mxu0 %vm347_vm1, %v7207_v22 }
 0x722   : > { %12348 = vmatpush3.bf16.msra.mxu1 %v12851_v45  ;;  %12357 = vmatprep.subr.bf16.mxu0 %v12856_v11 }
 0x723   : > { %12349 = vmatprep.subr.bf16.mxu1 %v12855_v10 }
 0x725   : > { %12358 = vmatpush3.bf16.msra.mxu0 %v12856_v11 }
 0x726   : > { %12350 = vmatpush3.bf16.msra.mxu1 %v12855_v10  ;;  %12359 = vmatprep.subr.bf16.mxu0 %v12860_v6 }
 0x727   : > { %12367 = vmatprep.subr.bf16.mxu1 %v12858_v12 }
 0x729   : > { %12352 = vmatmul.mubr.msk.bf16.vlgmr.msra.gmra.mxu1 %vm347_vm1, %v10804_v19  ;;  %12360 = vmatpush3.bf16.msra.mxu0 %v12860_v6 }
 0x72a   : > { %12368 = vmatpush3.bf16.msra.mxu1 %v12858_v12  ;;  %12375 = vmatprep.mubr.msk.bf16.mxu1 %vm347_vm1, %v7318_v21  ;;  %v10716_v12 = vld [vmem:[%s15063_s3 + $0x6] ss:$0 sm:$0xff] }
 0x72b   : > { %12369 = vmatprep.subr.bf16.mxu1 %v12861_v26  ;;  %12361 = vmatprep.subr.bf16.mxu0 %v12862_v33 }
 0x72d   : > { %12362 = vmatpush3.bf16.msra.mxu0 %v12862_v33 }
 0x72e   : > { %12370 = vmatpush3.bf16.msra.mxu1 %v12861_v26  ;;  %12379 = vmatprep.subr.bf16.mxu0 %v12864_v29 }
 0x72f   : > { %12371 = vmatprep.subr.bf16.mxu1 %v12863_v14 }
 0x730   : > { %12364 = vmatmul.mubr.msk.bf16.vlgmr.msra.gmra.mxu0 %vm347_vm1, %v7206_v7 }
 0x731   : > { %12380 = vmatpush3.bf16.msra.mxu0 %v12864_v29  ;;  %12387 = vmatprep.mubr.msk.bf16.mxu0 %vm347_vm1, %v7415_v34 }
 0x732   : > { %12372 = vmatpush3.bf16.msra.mxu1 %v12863_v14  ;;  %12381 = vmatprep.subr.bf16.mxu0 %v12867_v32 }
 0x733   : > { %12373 = vmatprep.subr.bf16.mxu1 %v12866_v41 }
 0x735   : > { %12382 = vmatpush3.bf16.msra.mxu0 %v12867_v32 }
 0x736   : > { %12374 = vmatpush3.bf16.msra.mxu1 %v12866_v41  ;;  %12383 = vmatprep.subr.bf16.mxu0 %v12868_v39 }
 0x737   : > { %12391 = vmatprep.subr.bf16.mxu1 %v12870_v37 }
 0x739   : > { %12376 = vmatmul.mubr.msk.bf16.vlgmr.msra.gmra.mxu1 %vm347_vm1, %v7317_v36  ;;  %12384 = vmatpush3.bf16.msra.mxu0 %v12868_v39 }
 0x73a   : > { %12385 = vmatprep.subr.bf16.mxu0 %v12869_v25  ;;  %12392 = vmatpush3.bf16.msra.mxu1 %v12870_v37 }
 0x73b   : > { %12393 = vmatprep.subr.bf16.mxu1 %v12871_v38 }
 0x73d   : > { %12386 = vmatpush3.bf16.msra.mxu0 %v12869_v25 }
 0x73e   : > { %12403 = vmatprep.subr.bf16.mxu0 %v12872_v63  ;;  %12394 = vmatpush3.bf16.msra.mxu1 %v12871_v38 }
 0x73f   : > { %12395 = vmatprep.subr.bf16.mxu1 %v12873_v40 }
 0x740   : > { %12388 = vmatmul.mubr.msk.bf16.vlgmr.msra.gmra.mxu0 %vm347_vm1, %v7414_v60 }
 0x741   : > { %12404 = vmatpush3.bf16.msra.mxu0 %v12872_v63  ;;  %v7499_v63 = vunpack.c.l.bf16 %v14363_v17 }
 0x742   : > { %12405 = vmatprep.subr.bf16.mxu0 %v12874_v53  ;;  %12396 = vmatpush3.bf16.msra.mxu1 %v12873_v40 }
 0x743   : > { %12397 = vmatprep.subr.bf16.mxu1 %v12875_v51 }
 0x745   : > { %12406 = vmatpush3.bf16.msra.mxu0 %v12874_v53 }
 0x746   : > { %12407 = vmatprep.subr.bf16.mxu0 %v12877_v42  ;;  %12398 = vmatpush3.bf16.msra.mxu1 %v12875_v51 }
 0x747   : > { %12415 = vmatprep.subr.bf16.mxu1 %v14513_v46 }
 0x749   : > { %12408 = vmatpush3.bf16.msra.mxu0 %v12877_v42 }
 0x74a   : > { %12409 = vmatprep.subr.bf16.mxu0 %v12880_v35 }
 0x74d   : > { %12410 = vmatpush3.bf16.msra.mxu0 %v12880_v35  ;;  %v7500_v35 = vunpack.c.l.bf16 %v14367_v5 }
 0x74e   : > { %12427 = vmatprep.subr.bf16.mxu0 %v14522_v8 }
 0x7c0   : > { %v12293_v47 = vpop.f32.mrf.mxu0 }
 0x7c1   : > { %v6661_v6 = vadd.f32 %v12293_v47, %v10716_v12  ;;  %v7498_v47 = vunpack.c.l.bf16 %v14355_v55 }
 0x7c2   : > { %v6645_v49 = vpop.f32.mrf.mxu0 }
 0x7c3   : > { %v6659_v19 = vadd.f32 %v10716_v12, %v6645_v49  ;;  %v7517_v5 = vrot.slane %v7498_v47, 7 }
 0x7c4   : > { %v12294_v0 = vpop.f32.mrf.mxu0 }
 0x7c6   : > { %v6648_v62 = vpop.f32.mrf.mxu0 }
 0x7c7   : > { %v6660_v31 = vadd.f32 %v10716_v12, %v6648_v62  ;;  %v7519_v62 = vrot.slane %v7499_v63, 7 }
 0x7c9   : > { %v12305_v52 = vpop.f32.mrf.mxu1 }
 0x7ca   : > { %v6780_v36 = vadd.f32 %v12305_v52, %v6661_v6 }
 0x7cb   : > { %v6764_v54 = vpop.f32.mrf.mxu1 }
 0x7cc   : > { %v6778_v33 = vadd.f32 %v6764_v54, %v6659_v19 }
 0x7cd   : > { %v12306_v58 = vpop.f32.mrf.mxu1 }
 0x7ce   : > { %v10858_v58 = vld [vmem:[%s15064_s4 + $0x6] ss:$0 sm:$0xff] }
 0x7cf   : > { %v6767_v61 = vpop.f32.mrf.mxu1 }
 0x7d0   : > { %v12317_v45 = vpop.f32.mrf.mxu0  ;;  %v6779_v60 = vadd.f32 %v6767_v61, %v6660_v31 }
 0x7d1   : > { %v6877_v21 = vadd.f32 %v12317_v45, %v6780_v36  ;;  %v7497_v45 = vunpack.c.l.bf16 %v14370_v9 }
 0x7d2   : > { %v6861_v56 = vpop.f32.mrf.mxu0 }
 0x7d3   : > { %v6875_v14 = vadd.f32 %v6861_v56, %v6778_v33  ;;  %v7520_v33 = vsel %vm1264_vm8, %v7517_v5, %v7519_v62 }
 0x7d4   : > { %v12318_v57 = vpop.f32.mrf.mxu0 }
 0x7d6   : > { %v6864_v3 = vpop.f32.mrf.mxu0 }
 0x7d7   : > { %v6876_v39 = vadd.f32 %v6864_v3, %v6779_v60 }
 0x7d9   : > { %v12329_v48 = vpop.f32.mrf.mxu1 }
 0x7da   : > { %v6978_v29 = vadd.f32 %v12329_v48, %v6877_v21  ;;  %v7521_v48 = vrot.slane %v7500_v35, 7 }
 0x7db   : > { %v6962_v2 = vpop.f32.mrf.mxu1 }
 0x7dc   : > { %v6976_v41 = vadd.f32 %v6962_v2, %v6875_v14 }
 0x7dd   : > { %v12330_v1 = vpop.f32.mrf.mxu1 }
 0x7df   : > { %v6965_v11 = vpop.f32.mrf.mxu1 }
 0x7e0   : > { %v12341_v4 = vpop.f32.mrf.mxu0  ;;  %v6977_v53 = vadd.f32 %v6965_v11, %v6876_v39 }
 0x7e1   : > { %v7089_v32 = vadd.f32 %v12341_v4, %v6978_v29  ;;  %v7522_v4 = vsel %vm1264_vm8, %v7519_v62, %v7521_v48 }
 0x7e2   : > { %v7073_v7 = vpop.f32.mrf.mxu0 }
 0x7e3   : > { %v7087_v25 = vadd.f32 %v7073_v7, %v6976_v41  ;;  %v7516_v7 = vrot.slane %v7497_v45, 7 }
 0x7e4   : > { %v12342_v10 = vpop.f32.mrf.mxu0 }
 0x7e6   : > { %v7076_v13 = vpop.f32.mrf.mxu0 }
 0x7e7   : > { %v7088_v49 = vadd.f32 %v7076_v13, %v6977_v53 }
 0x7e9   : > { %v12353_v27 = vpop.f32.mrf.mxu1 }
 0x7ea   : > { %v7181_v37 = vadd.f32 %v12353_v27, %v7089_v32 }
 0x7eb   : > { %v7165_v16 = vpop.f32.mrf.mxu1 }
 0x7ec   : > { %v7179_v40 = vadd.f32 %v7165_v16, %v7087_v25 }
 0x7ed   : > { %v12354_v22 = vpop.f32.mrf.mxu1 }
 0x7ee   : > { %v7518_v22 = vsel %vm1264_vm8, %v7516_v7, %v7517_v5 }
 0x7ef   : > { %v7168_v24 = vpop.f32.mrf.mxu1 }
 0x7f0   : > { %v12365_v20 = vpop.f32.mrf.mxu0  ;;  %v7180_v17 = vadd.f32 %v7168_v24, %v7088_v49  ;;  %v7588_v49 = vld [vmem:[#allocation2 + $0xc] sm:$0xf] }
 0x7f1   : > { %v7288_v42 = vadd.f32 %v12365_v20, %v7181_v37 }
 0x7f2   : > { %v7272_v18 = vpop.f32.mrf.mxu0 }
 0x7f3   : > { %v7286_v0 = vadd.f32 %v7272_v18, %v7179_v40 }
 0x7f4   : > { %v12366_v26 = vpop.f32.mrf.mxu0 }
 0x7f6   : > { %v7275_v51 = vpop.f32.mrf.mxu0 }
 0x7f7   : > { %v7287_v1 = vadd.f32 %v7275_v51, %v7180_v17 }
 0x7f9   : > { %v12377_v30 = vpop.f32.mrf.mxu1 }
 0x7fa   : > { %v7399_v52 = vadd.f32 %v12377_v30, %v7288_v42 }
 0x7fb   : > { %v7383_v34 = vpop.f32.mrf.mxu1 }
 0x7fc   : > { %v7397_v56 = vadd.f32 %v7383_v34, %v7286_v0 }
 0x7fd   : > { %v12378_v38 = vpop.f32.mrf.mxu1 }
 0x7ff   : > { %v7386_v61 = vpop.f32.mrf.mxu1 }
 0x800   : > { %v12389_v54 = vpop.f32.mrf.mxu0  ;;  %v7398_v11 = vadd.f32 %v7386_v61, %v7287_v1 }
 0x801   : > { %v7496_v57 = vadd.f32 %v12389_v54, %v7399_v52 }
 0x802   : > { %v7480_v2 = vpop.f32.mrf.mxu0 }
 0x803   : > { %v7511_v55 = vmul.f32 %v10858_v58, %v7496_v57  ;;  %v7494_v3 = vadd.f32 %v7480_v2, %v7397_v56 }
 0x804   : > { %v12390_v10 = vpop.f32.mrf.mxu0 }
 0x805   : > { %v7528_v27 = vadd.f32 %v7522_v4, %v7511_v55  ;;  %v7509_v16 = vmul.f32 %v10858_v58, %v7494_v3  ;;  %v12881_v55 = vld [vmem:[%s15062_s2 + $0x830] sm:$0xff]  }
 0x806   : > { %v7483_v12 = vpop.f32.mrf.mxu0 }
 0x807   : > { %vm7531_vm9 = vcmp.ge.f32.partialorder %v7528_v27, 0.0  ;;  %v7534_v13 = vmul.f32 0.2, %v7528_v27  ;;  %v7526_v20 = vadd.f32 %v7518_v22, %v7509_v16  ;;  %v7495_v6 = vadd.f32 %v7483_v12, %v7398_v11 }
 0x809   : > { %v7537_v18 = vsel %vm7531_vm9, %v7528_v27, %v7534_v13  ;;  %vm7529_vm12 = vcmp.ge.f32.partialorder %v7526_v20, 0.0  ;;  %v7532_v19 = vmul.f32 0.2, %v7526_v20  ;;  %v7510_v36 = vmul.f32 %v10858_v58, %v7495_v6 }
 0x80a   : > { %v7540_v26 = vmul.f32 %v7537_v18, %v13334_v23 }
 0x80b   : > { %v7535_v21 = vsel %vm7529_vm12, %v7526_v20, %v7532_v19  ;;  %v7527_v24 = vadd.f32 %v7520_v33, %v7510_v36 }
 0x80c   : > { %v11199_v31 = vpack.c.bf16 %v7540_v26, %v7540_v26  ;;  %v7538_v14 = vmul.f32 %v7535_v21, %v13337_v28 }
 0x80d   : > { %vm7530_vm13 = vcmp.ge.f32.partialorder %v7527_v24, 0.0  ;;  %v7533_v29 = vmul.f32 0.2, %v7527_v24 }
 0x80e   : > { %v7571_v30 = vshll.u32 %v11199_v31, 16  ;;  %v7575_v60 = vshrl.u32 %v11199_v31, 16  ;;  %v11197_v41 = vpack.c.bf16 %v7538_v14, %v7538_v14 }
 0x80f   : > { %v7536_v32 = vsel %vm7530_vm13, %v7527_v24, %v7533_v29  ;;  %v12886_v24 = vld [vmem:[%s15062_s2 + $0x828] sm:$0xff]  }
 0x810   : > { %v7573_v34 = vrot.slane %v7571_v30, 5  ;;  %v7577_v39 = vrot.slane %v7575_v60, 4  ;;  %v7552_v25 = vshll.u32 %v11197_v41, 16  ;;  %v7555_v37 = vshrl.u32 %v11197_v41, 16 }
 0x811   : > { %v7539_v38 = vmul.f32 %v7536_v32, %v13341_v43 }
 0x812   : > { %v7578_v63 = vor.u32 %v7577_v39, %v7573_v34  ;;  %v7554_v53 = vrot.slane %v7552_v25, 5  ;;  %v7557_v40 = vrot.slane %v7555_v37, 4  ;;  %v12889_v39 = vld [vmem:[%s15062_s2 + $0x850] sm:$0xff]   ;;  %v12890_v25 = vld [vmem:[%s15062_s2 + $0x820] sm:$0xff]  }
 0x813   : > { %v11198_v42 = vpack.c.bf16 %v7539_v38, %v7539_v38 }
 0x814   : > { %v7579_v51 = vrot.slane %v7578_v63, 4  ;;  %v7558_v35 = vor.u32 %v7557_v40, %v7554_v53  ;;  %v7584_v47 = vsel %vm13343_vm15, %v7554_v53, %v14370_v9 }
 0x815   : > { %7585 = vst [vmem:[#allocation2] sm:$0x8] %v7584_v47  ;;  %v7561_v0 = vshll.u32 %v11198_v42, 16  ;;  %v7565_v52 = vshrl.u32 %v11198_v42, 16  ;;  %v12891_v42 = vld [vmem:[%s15062_s2 + $0x848] sm:$0xff]  }
 0x816   : > { %v7589_v54 = vsel %vm13350_vm10, %v7579_v51, %v7588_v49  ;;  %v7559_v58 = vrot.slane %v7558_v35, 4  ;;  %v12892_v51 = vld [vmem:[%s15062_s2 + $0x878] sm:$0xff]  }
 0x817   : > { %7590 = vst [vmem:[#allocation2 + $0xc] sm:$0xf] %v7589_v54  ;;  %v7563_v62 = vrot.slane %v7561_v0, 5  ;;  %v7567_v45 = vrot.slane %v7565_v52, 4  ;;  %v12894_v0 = vld [vmem:[%s15062_s2 + $0x840] sm:$0xff]   ;;  %v12895_v52 = vld [vmem:[%s15062_s2 + $0x870] sm:$0xff]  }
 0x819   : > { %v7564_v17 = vsel %vm13358_vm11, %v7559_v58, %v7563_v62  ;;  %v7568_v56 = vor.u32 %v7567_v45, %v7563_v62  ;;  %v12896_v58 = vld [vmem:[%s15062_s2 + $0x898] sm:$0xff]   ;;  %v12898_v62 = vld [vmem:[%s15062_s2 + $0x868] sm:$0xff]  }
 0x81a   : > { %7586 = vst.msk [vmem:[#allocation2 + $0x4] sm:$0xf] %vm286_vm0, %v7564_v17  ;;  %v12899_v17 = vld [vmem:[%s15062_s2 + $0x890] sm:$0xff]  }
 0x81b   : > { %v7569_v57 = vrot.slane %v7568_v56, 4  ;;  %v8327_v56 = vld [vmem:[#allocation2 + $0x10] sm:$0x7] }
 0x81c   : > { %v7700_v61 = vld [vmem:[#allocation2] sm:$0xf] }
 0x81d   : > { %v7574_v9 = vsel %vm13358_vm11, %v7569_v57, %v7573_v34  ;;  %v7819_v1 = vld [vmem:[#allocation2] sm:$0xe] }
 0x81e   : > { %7587 = vst.msk [vmem:[#allocation2 + $0x8] sm:$0xf] %vm286_vm0, %v7574_v9  ;;  %v7703_v3 = vld [vmem:[#allocation2 + $0xc] sm:$0x1]  ;;  %v14567_v6 = vld [vmem:[#allocation2] sm:$0x8] }
 0x81f   : > { %v7917_v10 = vld [vmem:[#allocation2 + $0xc] sm:$0x7]  ;;  %v12900_v9 = vld [vmem:[%s15062_s2 + $0x860] sm:$0xff]  }
 0x820   : > { %v14564_v13 = vld [vmem:[#allocation2 + $0xc] sm:$0xf] }
 0x821   : > { %v12876_v48 = vld [vmem:[#allocation2] sm:$0xff]  }
 0x822   : > { %v14552_v2 = vld [vmem:[#allocation2 + $0x4] sm:$0xf]  ;;  %12399 = vmatprep.mubr.msk.bf16.mxu1 %vm347_vm1, %v12876_v48  ;;  %v8222_v48 = vld [vmem:[#allocation2 + $0xc] sm:$0xf] }
 0x823   : > { %v10888_v5 = vcombine.low %v7700_v61, %v14552_v2  ;;  %v10904_v4 = vcombine.low %v7819_v1, %v14552_v2  ;;  %v10919_v33 = vcombine.low %v14567_v6, %v14552_v2  ;;  %v8220_v61 = vld [vmem:[#allocation2 + $0x4] sm:$0xc] }
 0x825   : > { %v7726_v7 = vshll.u32 %v10888_v5, 16  ;;  %v12879_v11 = vld [vmem:[#allocation2 + $0x8] ss:$0 sps:$4 sm:$0xff]   ;;  %v7724_v20 = vshrl.u32 %v10888_v5, 16  ;;  %v7832_v19 = vrot.slane %v10904_v4, 1  ;;  %v7933_v34 = vrot.slane %v10919_v33, 3 }
 0x826   : > { %v14560_v27 = vld [vmem:[#allocation2 + $0x8] sm:$0xf]  ;;  %12400 = vmatmul.mubr.msk.bf16.vlgmr.msra.gmra.mxu1 %vm347_vm1, %v12879_v11  ;;  %v8031_v37 = vshrl.u32 %v10919_v33, 16  ;;  %v8034_v38 = vshll.u32 %v10919_v33, 16  ;;  %v8223_v5 = vld [vmem:[#allocation2 + $0x10] sm:$0x3] }
 0x827   : > { %v10889_v16 = vcombine.low %v14560_v27, %v7703_v3  ;;  %v7728_v22 = vrot.slane %v7726_v7, 1  ;;  %v10920_v12 = vcombine.low %v14560_v27, %v7917_v10  ;;  %v10935_v18 = vcombine.low %v14560_v27, %v14564_v13  ;;  %12416 = vmatpush3.bf16.msra.mxu1 %v14513_v46  ;;  %v14612_v45 = vld [vmem:[#allocation2 + $0x8] sm:$0xf]  ;;  %v12902_v4 = vld [vmem:[%s15062_s2 + $0x8b8] sm:$0xff]  }
 0x828   : > { %12417 = vmatprep.subr.bf16.mxu1 %v12881_v55  ;;  %v8033_v35 = vrot.slane %v8031_v37, 3  ;;  %v8036_v47 = vrot.slane %v8034_v38, 4  ;;  %v10950_v57 = vcombine.low %v14552_v2, %v14560_v27  ;;  %v10966_v1 = vcombine.low %v8220_v61, %v14612_v45  ;;  %v12914_v37 = vld [vmem:[%s15062_s2 + $0x8f8] sm:$0xff]  }
 0x829   : > { %v7833_v36 = vrot.slane %v10889_v16, 1  ;;  %v7731_v26 = vshll.u32 %v10889_v16, 16  ;;  %v7729_v21 = vor.u32 %v7728_v22, %v7724_v20  ;;  %v7735_v29 = vshrl.u32 %v10889_v16, 16  ;;  %v12944_v61 = vld [vmem:[%s15065_s5 + $0xb4] ss:$8 sps:$4 sm:$0xff]  }
 0x82a   : > { %v7934_v30 = vrot.slane %v10920_v12, 3  ;;  %v8039_v46 = vshrl.u32 %v10935_v18, 16  ;;  %v8042_v60 = vshll.u32 %v10935_v18, 16  ;;  %v14628_v3 = vcombine.low %v8222_v48, %v8327_v56  ;;  %v12906_v18 = vld [vmem:[%s15062_s2 + $0x880] sm:$0xff]  }
 0x82b   : > { %v7834_v31 = vsel %vm538_vm2, %v7832_v19, %v7833_v36  ;;  %v7733_v14 = vrot.slane %v7731_v26, 1  ;;  %12418 = vmatpush3.bf16.msra.mxu1 %v12881_v55  ;;  %v12901_v55 = vld [vmem:[%s15062_s2 + $0x888] sm:$0xff]   ;;  %v10967_v7 = vcombine.low %v8222_v48, %v8223_v5  ;;  %v8341_v10 = vshrl.u32 %v10966_v1, 16  ;;  %v12907_v19 = vld [vmem:[%s15062_s2 + $0x8b0] sm:$0xff]  }
 0x82c   : > { %12423 = vmatprep.mubr.msk.bf16.mxu1 %vm347_vm1, %v7834_v31  ;;  %12419 = vmatprep.subr.bf16.mxu1 %v12886_v24  ;;  %v7935_v63 = vsel %vm640_vm4, %v7933_v34, %v7934_v30  ;;  %v8041_v53 = vrot.slane %v8039_v46, 3  ;;  %v8044_v40 = vrot.slane %v8042_v60, 4  ;;  %v8344_v11 = vshll.u32 %v10966_v1, 16  ;;  %v12911_v60 = vld [vmem:[%s15062_s2 + $0x8d0] sm:$0xff]   ;;  %v8438_v34 = vld [vmem:[#allocation2 + $0x4] sm:$0x8] }
 0x82d   : > { %v7734_v41 = vsel %vm428_vm3, %v7729_v21, %v7733_v14  ;;  %v7737_v32 = vor.u32 %v7735_v29, %v7733_v14  ;;  %v8243_v16 = vrot.slane %v10966_v1, 2  ;;  %v8349_v22 = vshrl.u32 %v14628_v3, 16  ;;  %v12909_v21 = vld [vmem:[%s15062_s2 + $0x8d8] sm:$0xff]   ;;  %v12910_v14 = vld [vmem:[%s15062_s2 + $0x8a8] sm:$0xff]  }
 0x82e   : > { %12411 = vmatprep.mubr.msk.bf16.mxu0 %vm347_vm1, %v7734_v41  ;;  %v8045_v49 = vor.u32 %v8044_v40, %v8041_v53  ;;  %v8352_v12 = vshll.u32 %v14628_v3, 16  ;;  %v8244_v20 = vrot.slane %v10967_v7, 2  ;;  %v8346_v26 = vrot.slane %v8344_v11, 3  ;;  %v12912_v41 = vld [vmem:[%s15062_s2 + $0x8a0] sm:$0xff]   ;;  %v12917_v40 = vld [vmem:[%s15062_s2 + $0x8f0] sm:$0xff]  }
 0x82f   : > { %12412 = vmatmul.mubr.msk.bf16.vlgmr.msra.gmra.mxu0 %vm347_vm1, %v7737_v32  ;;  %12420 = vmatpush3.bf16.msra.mxu1 %v12886_v24  ;;  %v8351_v24 = vrot.slane %v8349_v22, 2  ;;  %v12916_v53 = vld [vmem:[%s15062_s2 + $0x8c0] sm:$0xff]   ;;  %v12939_v48 = vld [vmem:[%s15065_s5 + $0x50] ss:$8 sps:$4 sm:$0xff]  }
 0x830   : > { %12428 = vmatpush3.bf16.msra.mxu0 %v14522_v8  ;;  %12435 = vmatprep.mubr.msk.bf16.mxu0 %vm347_vm1, %v7935_v63  ;;  %v8037_v8 = vor.u32 %v8036_v47, %v8033_v35  ;;  %v8245_v33 = vsel %vm952_vm6, %v8243_v16, %v8244_v20  ;;  %v8354_v31 = vrot.slane %v8352_v12, 3  ;;  %v8452_v63 = vrot.slane %v14628_v3, 3  ;;  %v12919_v35 = vld [vmem:[%s15062_s2 + $0x8e0] sm:$0xff]   ;;  %v12922_v47 = vld [vmem:[%s15065_s5 + $0x34] ss:$8 sps:$4 sm:$0xff]  }
 0x831   : > { %12429 = vmatprep.subr.bf16.mxu0 %v12889_v39  ;;  %12421 = vmatprep.subr.bf16.mxu1 %v12890_v25  ;;  %v12935_v56 = vld [vmem:[%s15065_s5 + $0x60] ss:$8 sps:$4 sm:$0xff]   ;;  %v12947_v5 = vld [vmem:[%s15065_s5 + $0x44] ss:$8 sps:$4 sm:$0xff]  }
 0x832   : > { %v8046_v54 = vsel %vm738_vm5, %v8037_v8, %v8045_v49  ;;  %v8355_v46 = vor.u32 %v8354_v31, %v8351_v24  ;;  %v12925_v8 = vld [vmem:[%s15065_s5 + $0x24] ss:$8 sps:$4 sm:$0xff]   ;;  %v12945_v1 = vld [vmem:[%s15065_s5 + $0x40] ss:$8 sps:$4 sm:$0xff]  }
 0x833   : > { %12422 = vmatpush3.bf16.msra.mxu1 %v12890_v25  ;;  %v12913_v25 = vld [vmem:[%s15062_s2 + $0x8c8] sm:$0xff]  }
 0x834   : > { %12430 = vmatpush3.bf16.msra.mxu0 %v12889_v39  ;;  %12439 = vmatprep.subr.bf16.mxu1 %v12892_v51  ;;  %v10997_v39 = vcombine.low %v8438_v34, %v14612_v45  ;;  %v12937_v45 = vld [vmem:[%s15065_s5 + $0x64] ss:$8 sps:$4 sm:$0xff]  }
 0x835   : > { %12431 = vmatprep.subr.bf16.mxu0 %v12891_v42 }
 0x836   : > { %12424 = vmatmul.mubr.msk.bf16.vlgmr.msra.gmra.mxu1 %vm347_vm1, %v7833_v36  ;;  %v8343_v36 = vrot.slane %v8341_v10, 2  ;;  %v8451_v38 = vrot.slane %v10997_v39, 3 }
 0x837   : > { %12440 = vmatpush3.bf16.msra.mxu1 %v12892_v51  ;;  %12447 = vmatprep.mubr.msk.bf16.mxu1 %vm347_vm1, %v8046_v54  ;;  %v12918_v51 = vld [vmem:[%s15062_s2 + $0x8e8] sm:$0xff]   ;;  %v12929_v54 = vld [vmem:[%s15065_s5 + $0x70] ss:$8 sps:$4 sm:$0xff]  }
 0x838   : > { %12432 = vmatpush3.bf16.msra.mxu0 %v12891_v42  ;;  %12441 = vmatprep.subr.bf16.mxu1 %v12895_v52  ;;  %v8347_v29 = vor.u32 %v8346_v26, %v8343_v36  ;;  %v8453_v42 = vsel %vm640_vm4, %v8451_v38, %v8452_v63 }
 0x839   : > { %12433 = vmatprep.subr.bf16.mxu0 %v12894_v0 }
 0x83a   : > { %v8356_v32 = vsel %vm1050_vm7, %v8347_v29, %v8355_v46 }
 0x83b   : > { %12442 = vmatpush3.bf16.msra.mxu1 %v12895_v52  ;;  %v12928_v52 = vld [vmem:[%s15065_s5 + $0x14] ss:$8 sps:$4 sm:$0xff]  }
 0x83c   : > { %12434 = vmatpush3.bf16.msra.mxu0 %v12894_v0  ;;  %12443 = vmatprep.subr.bf16.mxu1 %v12898_v62  ;;  %v12923_v0 = vld [vmem:[%s15065_s5 + $0x20] ss:$8 sps:$4 sm:$0xff]  }
 0x83d   : > { %12451 = vmatprep.subr.bf16.mxu0 %v12896_v58 }
 0x83f   : > { %12436 = vmatmul.mubr.msk.bf16.vlgmr.msra.gmra.mxu0 %vm347_vm1, %v7934_v30  ;;  %12444 = vmatpush3.bf16.msra.mxu1 %v12898_v62  ;;  %v10951_v30 = vcombine.low %v14564_v13, %v14564_v13  ;;  %v12926_v62 = vld [vmem:[%s15065_s5 + $0x10] ss:$8 sps:$4 sm:$0xff]  }
 0x840   : > { %12452 = vmatpush3.bf16.msra.mxu0 %v12896_v58  ;;  %12459 = vmatprep.mubr.msk.bf16.mxu0 %vm347_vm1, %v10950_v57  ;;  %v12931_v58 = vld [vmem:[%s15065_s5 + $0x74] ss:$8 sps:$4 sm:$0xff]  }
 0x841   : > { %12453 = vmatprep.subr.bf16.mxu0 %v12899_v17  ;;  %12445 = vmatprep.subr.bf16.mxu1 %v12900_v9  ;;  %v12941_v57 = vld [vmem:[%s15065_s5 + $0x54] ss:$8 sps:$4 sm:$0xff]  }
 0x843   : > { %12446 = vmatpush3.bf16.msra.mxu1 %v12900_v9  ;;  %v12932_v9 = vld [vmem:[%s15065_s5] ss:$8 sps:$4 sm:$0xff]  }
 0x844   : > { %12454 = vmatpush3.bf16.msra.mxu0 %v12899_v17  ;;  %12463 = vmatprep.subr.bf16.mxu1 %v12902_v4  ;;  %v12934_v17 = vld [vmem:[%s15065_s5 + $0x4] ss:$8 sps:$4 sm:$0xff]  }
 0x845   : > { %12455 = vmatprep.subr.bf16.mxu0 %v12901_v55 }
 0x846   : > { %12448 = vmatmul.mubr.msk.bf16.vlgmr.msra.gmra.mxu1 %vm347_vm1, %v8045_v49  ;;  %v12920_v49 = vld [vmem:[%s15065_s5 + $0x30] ss:$8 sps:$4 sm:$0xff]  }
 0x847   : > { %12464 = vmatpush3.bf16.msra.mxu1 %v12902_v4  ;;  %12471 = vmatprep.mubr.msk.bf16.mxu1 %vm347_vm1, %v8245_v33 }
 0x848   : > { %12456 = vmatpush3.bf16.msra.mxu0 %v12901_v55  ;;  %12465 = vmatprep.subr.bf16.mxu1 %v12907_v19  ;;  %v12957_v55 = vld [vmem:[%s15065_s5 + $0xf4] ss:$8 sps:$4 sm:$0xff]  }
 0x849   : > { %12457 = vmatprep.subr.bf16.mxu0 %v12906_v18 }
 0x84b   : > { %12466 = vmatpush3.bf16.msra.mxu1 %v12907_v19 }
 0x84c   : > { %12458 = vmatpush3.bf16.msra.mxu0 %v12906_v18  ;;  %12467 = vmatprep.subr.bf16.mxu1 %v12910_v14 }
 0x84d   : > { %12475 = vmatprep.subr.bf16.mxu0 %v12909_v21 }
 0x84f   : > { %12460 = vmatmul.mubr.msk.bf16.vlgmr.msra.gmra.mxu0 %vm347_vm1, %v10951_v30  ;;  %12468 = vmatpush3.bf16.msra.mxu1 %v12910_v14 }
 0x850   : > { %12476 = vmatpush3.bf16.msra.mxu0 %v12909_v21  ;;  %12483 = vmatprep.mubr.msk.bf16.mxu0 %vm347_vm1, %v8356_v32 }
 0x851   : > { %12477 = vmatprep.subr.bf16.mxu0 %v12911_v60  ;;  %12469 = vmatprep.subr.bf16.mxu1 %v12912_v41 }
 0x853   : > { %12470 = vmatpush3.bf16.msra.mxu1 %v12912_v41  ;;  %v10863_v41 = vld [vmem:[%s15063_s3 + $0x7] ss:$0 sm:$0xff] }
 0x854   : > { %12478 = vmatpush3.bf16.msra.mxu0 %v12911_v60  ;;  %12487 = vmatprep.subr.bf16.mxu1 %v12914_v37 }
 0x855   : > { %12479 = vmatprep.subr.bf16.mxu0 %v12913_v25 }
 0x856   : > { %12472 = vmatmul.mubr.msk.bf16.vlgmr.msra.gmra.mxu1 %vm347_vm1, %v8244_v20 }
 0x857   : > { %12488 = vmatpush3.bf16.msra.mxu1 %v12914_v37  ;;  %12495 = vmatprep.mubr.msk.bf16.mxu1 %vm347_vm1, %v8453_v42 }
 0x858   : > { %12480 = vmatpush3.bf16.msra.mxu0 %v12913_v25  ;;  %12489 = vmatprep.subr.bf16.mxu1 %v12917_v40 }
 0x859   : > { %12481 = vmatprep.subr.bf16.mxu0 %v12916_v53 }
 0x85b   : > { %12490 = vmatpush3.bf16.msra.mxu1 %v12917_v40 }
 0x85c   : > { %12482 = vmatpush3.bf16.msra.mxu0 %v12916_v53  ;;  %12491 = vmatprep.subr.bf16.mxu1 %v12918_v51 }
 0x85d   : > { %8714 = vmatprep.subr.bf16.mxu0 %v12922_v47 }
 0x85f   : > { %12484 = vmatmul.mubr.msk.bf16.vlgmr.msra.gmra.mxu0 %vm347_vm1, %v8355_v46  ;;  %12492 = vmatpush3.bf16.msra.mxu1 %v12918_v51 }
 0x860   : > { %8738 = vmatprep.mubr.bf16.mxu0 %v13054_v15  ;;  %12493 = vmatprep.subr.bf16.mxu1 %v12919_v35 }
 0x861   : > { %8715 = vmatpush1.bf16.msra.mxu0 %v12920_v49 }
 0x862   : > { %8716 = vmatprep.subr.bf16.mxu0 %v12925_v8 }
 0x863   : > { %12494 = vmatpush3.bf16.msra.mxu1 %v12919_v35 }
 0x864   : > { %8855 = vmatprep.subr.bf16.mxu1 %v12931_v58 }
 0x865   : > { %8717 = vmatpush1.bf16.msra.mxu0 %v12923_v0 }
 0x866   : > { %12496 = vmatmul.mubr.msk.bf16.vlgmr.msra.gmra.mxu1 %vm347_vm1, %v8452_v63  ;;  %8718 = vmatprep.subr.bf16.mxu0 %v12928_v52 }
 0x867   : > { %8879 = vmatprep.mubr.bf16.mxu1 %v13054_v15  ;;  %8856 = vmatpush1.bf16.msra.mxu1 %v12929_v54 }
 0x868   : > { %8857 = vmatprep.subr.bf16.mxu1 %v12937_v45 }
 0x869   : > { %8719 = vmatpush1.bf16.msra.mxu0 %v12926_v62 }
 0x86a   : > { %8720 = vmatprep.subr.bf16.mxu0 %v12934_v17 }
 0x86b   : > { %8858 = vmatpush1.bf16.msra.mxu1 %v12935_v56  ;;  %v8537_v56 = vunpack.c.l.bf16 %v14560_v27 }
 0x86c   : > { %8859 = vmatprep.subr.bf16.mxu1 %v12941_v57 }
 0x86d   : > { %8721 = vmatpush1.bf16.msra.mxu0 %v12932_v9 }
 0x86e   : > { %8974 = vmatprep.subr.bf16.mxu0 %v12944_v61 }
 0x86f   : > { %8860 = vmatpush1.bf16.msra.mxu1 %v12939_v48 }
 0x870   : > { %8861 = vmatprep.subr.bf16.mxu1 %v12947_v5  ;;  %v8538_v5 = vunpack.c.l.bf16 %v14564_v13 }
 0x873   : > { %8862 = vmatpush1.bf16.msra.mxu1 %v12945_v1  ;;  %v8536_v1 = vunpack.c.l.bf16 %v14552_v2 }
 0x874   : > { %9097 = vmatprep.subr.bf16.mxu1 %v12957_v55 }
 0x875   : > { %v8555_v13 = vrot.slane %v8536_v1, 7 }
 0x8e6   : > { %v12401_v3 = vpop.f32.mrf.mxu1 }
 0x8e7   : > { %v7699_v39 = vadd.f32 %v12401_v3, %v10863_v41 }
 0x8e8   : > { %v7683_v4 = vpop.f32.mrf.mxu1 }
 0x8e9   : > { %v7697_v37 = vadd.f32 %v10863_v41, %v7683_v4 }
 0x8ea   : > { %v12402_v7 = vpop.f32.mrf.mxu1 }
 0x8ec   : > { %v7686_v22 = vpop.f32.mrf.mxu1 }
 0x8ed   : > { %v7698_v51 = vadd.f32 %v10863_v41, %v7686_v22 }
 0x8ef   : > { %v12413_v10 = vpop.f32.mrf.mxu0 }
 0x8f0   : > { %v7818_v38 = vadd.f32 %v12413_v10, %v7699_v39  ;;  %v11005_v10 = vld [vmem:[%s15064_s4 + $0x7] ss:$0 sm:$0xff] }
 0x8f1   : > { %v7802_v11 = vpop.f32.mrf.mxu0 }
 0x8f2   : > { %v7816_v53 = vadd.f32 %v7802_v11, %v7697_v37  ;;  %v8557_v11 = vrot.slane %v8537_v56, 7 }
 0x8f3   : > { %v12414_v16 = vpop.f32.mrf.mxu0 }
 0x8f4   : > { %v8535_v16 = vunpack.c.l.bf16 %v14567_v6 }
 0x8f5   : > { %v7805_v19 = vpop.f32.mrf.mxu0 }
 0x8f6   : > { %v12425_v12 = vpop.f32.mrf.mxu1  ;;  %v7817_v8 = vadd.f32 %v7805_v19, %v7698_v51 }
 0x8f7   : > { %v7915_v40 = vadd.f32 %v12425_v12, %v7818_v38  ;;  %v8558_v38 = vsel %vm1264_vm8, %v8555_v13, %v8557_v11 }
 0x8f8   : > { %v7899_v20 = vpop.f32.mrf.mxu1 }
 0x8f9   : > { %v7913_v35 = vadd.f32 %v7899_v20, %v7816_v53 }
 0x8fa   : > { %v12426_v18 = vpop.f32.mrf.mxu1 }
 0x8fb   : > { %v8559_v18 = vrot.slane %v8538_v5, 7 }
 0x8fc   : > { %v7902_v21 = vpop.f32.mrf.mxu1 }
 0x8fd   : > { %v7914_v58 = vadd.f32 %v7902_v21, %v7817_v8  ;;  %v8554_v21 = vrot.slane %v8535_v16, 7 }
 0x8ff   : > { %v12437_v36 = vpop.f32.mrf.mxu0 }
 0x900   : > { %v8016_v47 = vadd.f32 %v12437_v36, %v7915_v40 }
 0x901   : > { %v8000_v26 = vpop.f32.mrf.mxu0 }
 0x902   : > { %v8014_v0 = vadd.f32 %v8000_v26, %v7913_v35 }
 0x903   : > { %v12438_v33 = vpop.f32.mrf.mxu0 }
 0x904   : > { %v8560_v33 = vsel %vm1264_vm8, %v8557_v11, %v8559_v18 }
 0x905   : > { %v8003_v29 = vpop.f32.mrf.mxu0 }
 0x906   : > { %v12449_v24 = vpop.f32.mrf.mxu1  ;;  %v8015_v57 = vadd.f32 %v8003_v29, %v7914_v58 }
 0x907   : > { %v8127_v52 = vadd.f32 %v12449_v24, %v8016_v47 }
 0x908   : > { %v8111_v31 = vpop.f32.mrf.mxu1 }
 0x909   : > { %v8125_v62 = vadd.f32 %v8111_v31, %v8014_v0 }
 0x90a   : > { %v12450_v14 = vpop.f32.mrf.mxu1 }
 0x90c   : > { %v8114_v32 = vpop.f32.mrf.mxu1 }
 0x90d   : > { %v8126_v55 = vadd.f32 %v8114_v32, %v8015_v57 }
 0x90f   : > { %v12461_v30 = vpop.f32.mrf.mxu0 }
 0x910   : > { %v8219_v45 = vadd.f32 %v12461_v30, %v8127_v52  ;;  %v8556_v30 = vsel %vm1264_vm8, %v8554_v21, %v8555_v13 }
 0x911   : > { %v8203_v46 = vpop.f32.mrf.mxu0 }
 0x912   : > { %v8217_v9 = vadd.f32 %v8203_v46, %v8125_v62 }
 0x913   : > { %v12462_v60 = vpop.f32.mrf.mxu0 }
 0x915   : > { %v8206_v42 = vpop.f32.mrf.mxu0 }
 0x916   : > { %v12473_v34 = vpop.f32.mrf.mxu1  ;;  %v8218_v27 = vadd.f32 %v8206_v42, %v8126_v55 }
 0x917   : > { %v8326_v61 = vadd.f32 %v12473_v34, %v8219_v45 }
 0x918   : > { %v8310_v25 = vpop.f32.mrf.mxu1 }
 0x919   : > { %v8324_v3 = vadd.f32 %v8310_v25, %v8217_v9 }
 0x91a   : > { %v12474_v63 = vpop.f32.mrf.mxu1 }
 0x91c   : > { %v8313_v48 = vpop.f32.mrf.mxu1 }
 0x91d   : > { %v8325_v36 = vadd.f32 %v8313_v48, %v8218_v27 }
 0x91f   : > { %v12485_v49 = vpop.f32.mrf.mxu0 }
 0x920   : > { %v8437_v4 = vadd.f32 %v12485_v49, %v8326_v61  ;;  %v8626_v61 = vld [vmem:[#allocation2 + $0xc] sm:$0xf] }
 0x921   : > { %v8421_v54 = vpop.f32.mrf.mxu0 }
 0x922   : > { %v8435_v22 = vadd.f32 %v8421_v54, %v8324_v3 }
 0x923   : > { %v12486_v17 = vpop.f32.mrf.mxu0 }
 0x925   : > { %v8424_v20 = vpop.f32.mrf.mxu0 }
 0x926   : > { %v12497_v7 = vpop.f32.mrf.mxu1  ;;  %v8436_v31 = vadd.f32 %v8424_v20, %v8325_v36 }
 0x927   : > { %v8534_v12 = vadd.f32 %v12497_v7, %v8437_v4 }
 0x928   : > { %v8518_v19 = vpop.f32.mrf.mxu1 }
 0x929   : > { %v8549_v2 = vmul.f32 %v11005_v10, %v8534_v12  ;;  %v8532_v26 = vadd.f32 %v8518_v19, %v8435_v22  ;;  %v12954_v12 = vld [vmem:[%s15065_s5 + $0x94] ss:$8 sps:$4 sm:$0xff]  }
 0x92a   : > { %v12498_v24 = vpop.f32.mrf.mxu1 }
 0x92b   : > { %v8566_v14 = vadd.f32 %v8560_v33, %v8549_v2  ;;  %v8547_v29 = vmul.f32 %v11005_v10, %v8532_v26  ;;  %v12952_v2 = vld [vmem:[%s15065_s5 + $0x90] ss:$8 sps:$4 sm:$0xff]   ;;  %v12962_v24 = vld [vmem:[%s15065_s5 + $0x84] ss:$8 sps:$4 sm:$0xff]  }
 0x92c   : > { %v8521_v46 = vpop.f32.mrf.mxu1 }
 0x92d   : > { %vm8569_vm14 = vcmp.ge.f32.partialorder %v8566_v14, 0.0  ;;  %v8572_v60 = vmul.f32 0.2, %v8566_v14  ;;  %v8564_v41 = vadd.f32 %v8556_v30, %v8547_v29  ;;  %v8533_v32 = vadd.f32 %v8521_v46, %v8436_v31  ;;  %v12955_v31 = vld [vmem:[%s15065_s5 + $0xf0] ss:$8 sps:$4 sm:$0xff]  }
 0x92e   : > { %v12965_v30 = vld [vmem:[%s15065_s5 + $0xe4] ss:$8 sps:$4 sm:$0xff]  }
 0x92f   : > { %v8575_v34 = vsel %vm8569_vm14, %v8566_v14, %v8572_v60  ;;  %vm8567_vm9 = vcmp.ge.f32.partialorder %v8564_v41, 0.0  ;;  %v8570_v39 = vmul.f32 0.2, %v8564_v41  ;;  %v8548_v25 = vmul.f32 %v11005_v10, %v8533_v32 }
 0x930   : > { %v8578_v37 = vmul.f32 %v8575_v34, %v13334_v23  ;;  %v12972_v34 = vld [vmem:[%s15065_s5 + $0x134] ss:$8 sps:$4 sm:$0xff]  }
 0x931   : > { %v8573_v63 = vsel %vm8567_vm9, %v8564_v41, %v8570_v39  ;;  %v8565_v53 = vadd.f32 %v8558_v38, %v8548_v25  ;;  %v12960_v41 = vld [vmem:[%s15065_s5 + $0x80] ss:$8 sps:$4 sm:$0xff]  }
 0x932   : > { %v11202_v40 = vpack.c.bf16 %v8578_v37, %v8578_v37  ;;  %v8576_v42 = vmul.f32 %v8573_v63, %v13337_v28  ;;  %v12963_v39 = vld [vmem:[%s15065_s5 + $0xe0] ss:$8 sps:$4 sm:$0xff]   ;;  %v12969_v37 = vld [vmem:[%s15065_s5 + $0xd4] ss:$8 sps:$4 sm:$0xff]   ;;  %v12970_v63 = vld [vmem:[%s15065_s5 + $0x130] ss:$8 sps:$4 sm:$0xff]  }
 0x933   : > { %vm8568_vm12 = vcmp.ge.f32.partialorder %v8565_v53, 0.0  ;;  %v8571_v51 = vmul.f32 0.2, %v8565_v53 }
 0x934   : > { %v8609_v35 = vshll.u32 %v11202_v40, 16  ;;  %v8613_v47 = vshrl.u32 %v11202_v40, 16  ;;  %v11200_v49 = vpack.c.bf16 %v8576_v42, %v8576_v42  ;;  %v12978_v40 = vld [vmem:[%s15065_s5 + $0x124] ss:$8 sps:$4 sm:$0xff]  }
 0x935   : > { %v8574_v8 = vsel %vm8568_vm12, %v8565_v53, %v8571_v51 }
 0x936   : > { %v8611_v0 = vrot.slane %v8609_v35, 5  ;;  %v8615_v52 = vrot.slane %v8613_v47, 4  ;;  %v8590_v54 = vshll.u32 %v11200_v49, 16  ;;  %v8593_v58 = vshrl.u32 %v11200_v49, 16  ;;  %v12967_v35 = vld [vmem:[%s15065_s5 + $0xd0] ss:$8 sps:$4 sm:$0xff]  }
 0x937   : > { %v8577_v62 = vmul.f32 %v8574_v8, %v13341_v43  ;;  %v12975_v8 = vld [vmem:[%s15065_s5 + $0xc4] ss:$8 sps:$4 sm:$0xff]  }
 0x938   : > { %v8616_v23 = vor.u32 %v8615_v52, %v8611_v0  ;;  %v8592_v45 = vrot.slane %v8590_v54, 5  ;;  %v8595_v17 = vrot.slane %v8593_v58, 4  ;;  %v12976_v54 = vld [vmem:[%s15065_s5 + $0x120] ss:$8 sps:$4 sm:$0xff]  }
 0x939   : > { %v11201_v56 = vpack.c.bf16 %v8577_v62, %v8577_v62 }
 0x93a   : > { %v8617_v57 = vrot.slane %v8616_v23, 4  ;;  %v8596_v9 = vor.u32 %v8595_v17, %v8592_v45  ;;  %v8622_v28 = vsel %vm13343_vm15, %v8592_v45, %v14567_v6  ;;  %v12950_v6 = vld [vmem:[%s15065_s5 + $0xa4] ss:$8 sps:$4 sm:$0xff]   ;;  %v12981_v23 = vld [vmem:[%s15065_s5 + $0x114] ss:$8 sps:$4 sm:$0xff]  }
 0x93b   : > { %8623 = vst [vmem:[#allocation2] sm:$0x8] %v8622_v28  ;;  %v8599_v48 = vshll.u32 %v11201_v56, 16  ;;  %v8603_v5 = vshrl.u32 %v11201_v56, 16  ;;  %v12973_v45 = vld [vmem:[%s15065_s5 + $0xc0] ss:$8 sps:$4 sm:$0xff]  }
 0x93c   : > { %v8627_v1 = vsel %vm13350_vm10, %v8617_v57, %v8626_v61  ;;  %v8597_v55 = vrot.slane %v8596_v9, 4  ;;  %v12984_v57 = vld [vmem:[%s15065_s5 + $0x174] ss:$8 sps:$4 sm:$0xff]   ;;  %v12979_v9 = vld [vmem:[%s15065_s5 + $0x110] ss:$8 sps:$4 sm:$0xff]  }
 0x93d   : > { %8628 = vst [vmem:[#allocation2 + $0xc] sm:$0xf] %v8627_v1  ;;  %v8601_v43 = vrot.slane %v8599_v48, 5  ;;  %v8605_v3 = vrot.slane %v8603_v5, 4  ;;  %v12989_v5 = vld [vmem:[%s15065_s5 + $0x104] ss:$8 sps:$4 sm:$0xff]  }
 0x93e   : > { %v12982_v1 = vld [vmem:[%s15065_s5 + $0x170] ss:$8 sps:$4 sm:$0xff]  }
 0x93f   : > { %v8602_v4 = vsel %vm13358_vm11, %v8597_v55, %v8601_v43  ;;  %v8606_v7 = vor.u32 %v8605_v3, %v8601_v43 }
 0x940   : > { %8624 = vst.msk [vmem:[#allocation2 + $0x4] sm:$0xf] %vm286_vm0, %v8602_v4  ;;  %v12992_v4 = vld [vmem:[%s15065_s5 + $0x164] ss:$8 sps:$4 sm:$0xff]  }
 0x941   : > { %v8607_v10 = vrot.slane %v8606_v7, 4 }
 0x942   : > { %v8763_v11 = vld [vmem:[#allocation2] sm:$0xf] }
 0x943   : > { %v8612_v44 = vsel %vm13358_vm11, %v8607_v10, %v8611_v0  ;;  %v8904_v46 = vld [vmem:[#allocation2] sm:$0xe] }
 0x944   : > { %8625 = vst.msk [vmem:[#allocation2 + $0x8] sm:$0xf] %vm286_vm0, %v8612_v44  ;;  %v8766_v19 = vld [vmem:[#allocation2 + $0xc] sm:$0x1]  ;;  %v9023_v0 = vld [vmem:[#allocation2] sm:$0x8] }
 0x945   : > { %v14830_v42 = vld [vmem:[#allocation2 + $0xc] sm:$0xf]  ;;  %v12987_v10 = vld [vmem:[%s15065_s5 + $0x100] ss:$8 sps:$4 sm:$0xff]   ;;  %vm9775_vm0 = vcmask 654336  }
 0x946   : > { %v9024_v52 = vld [vmem:[#allocation2 + $0xc] sm:$0x7] }
 0x947   : > { %v12938_v16 = vld [vmem:[#allocation2] sm:$0xff]  }
 0x948   : > { %v14775_v27 = vld [vmem:[#allocation2 + $0x4] sm:$0xf]  ;;  %11019 = vmatmul.mubr.msk.bf16.vlgmr.msra.gmra.mxu0 %vm347_vm1, %v12938_v16 }
 0x949   : > { %v11029_v22 = vcombine.low %v8763_v11, %v14775_v27  ;;  %8975 = vmatpush1.bf16.msra.mxu0 %v12942_v50  ;;  %8748 = vmatprep.mubr.bf16.mxu0 %v13054_v15  ;;  %v11049_v32 = vcombine.low %v8904_v46, %v14775_v27  ;;  %v11068_v58 = vcombine.low %v9023_v0, %v14775_v27  ;;  %v12990_v11 = vld [vmem:[%s15065_s5 + $0x160] ss:$8 sps:$4 sm:$0xff]   ;;  %v9395_v46 = vld [vmem:[#allocation2 + $0xc] sm:$0xf]  ;;  %v13022_v0 = vld [vmem:[%s15065_s5 + $0x1d0] ss:$8 sps:$4 sm:$0xff]  }
 0x94a   : > { %8976 = vmatprep.subr.bf16.mxu0 %v12950_v6  ;;  %v12999_v6 = vld [vmem:[%s15065_s5 + $0x1b4] ss:$8 sps:$4 sm:$0xff]  }
 0x94b   : > { %v8789_v20 = vshll.u32 %v11029_v22, 16  ;;  %v14786_v18 = vld [vmem:[#allocation2 + $0x8] sm:$0xf]  ;;  %v8787_v26 = vshrl.u32 %v11029_v22, 16  ;;  %v8917_v38 = vrot.slane %v11049_v32, 1  ;;  %v9160_v61 = vshrl.u32 %v11068_v58, 16 }
 0x94c   : > { %v14789_v13 = vcombine.low %v14786_v18, %v8766_v19  ;;  %v12951_v21 = vld [vmem:[#allocation2 + $0x8] ss:$0 sps:$4 sm:$0xff]   ;;  %v11088_v47 = vcombine.low %v14786_v18, %v14830_v42  ;;  %v11069_v62 = vcombine.low %v14786_v18, %v9024_v52  ;;  %v9163_v48 = vshll.u32 %v11068_v58, 16  ;;  %v12996_v22 = vld [vmem:[%s15065_s5 + $0x154] ss:$8 sps:$4 sm:$0xff]  }
 0x94d   : > { %v8791_v36 = vrot.slane %v8789_v20, 1  ;;  %8977 = vmatpush1.bf16.msra.mxu0 %v12948_v59  ;;  %v9040_v55 = vrot.slane %v11068_v58, 3  ;;  %v9162_v44 = vrot.slane %v9160_v61, 3  ;;  %v13005_v20 = vld [vmem:[%s15065_s5 + $0x1a4] ss:$8 sps:$4 sm:$0xff]   ;;  %v11107_v32 = vcombine.low %v14775_v27, %v14786_v18 }
 0x94e   : > { %v8794_v33 = vshll.u32 %v14789_v13, 16  ;;  %8978 = vmatprep.subr.bf16.mxu0 %v12954_v12  ;;  %v8918_v25 = vrot.slane %v14789_v13, 1  ;;  %v8798_v53 = vshrl.u32 %v14789_v13, 16  ;;  %v9168_v17 = vshrl.u32 %v11088_v47, 16  ;;  %v12997_v12 = vld [vmem:[%s15065_s5 + $0x1b0] ss:$8 sps:$4 sm:$0xff]  }
 0x94f   : > { %v8792_v14 = vor.u32 %v8791_v36, %v8787_v26  ;;  %v9171_v56 = vshll.u32 %v11088_v47, 16  ;;  %v9041_v28 = vrot.slane %v11069_v62, 3  ;;  %v9165_v50 = vrot.slane %v9163_v48, 4  ;;  %v12994_v13 = vld [vmem:[%s15065_s5 + $0x150] ss:$8 sps:$4 sm:$0xff]  }
 0x950   : > { %v8796_v29 = vrot.slane %v8794_v33, 1  ;;  %11020 = vmatmul.mubr.msk.bf16.gmra.mxu0 %vm347_vm1, %v12951_v21  ;;  %v8919_v51 = vsel %vm538_vm2, %v8917_v38, %v8918_v25  ;;  %v9170_v43 = vrot.slane %v9168_v17, 3  ;;  %v13002_v36 = vld [vmem:[%s15065_s5 + $0x144] ss:$8 sps:$4 sm:$0xff]   ;;  %v13008_v26 = vld [vmem:[%s15065_s5 + $0x194] ss:$8 sps:$4 sm:$0xff]   ;;  %v11108_v58 = vcombine.low %v14830_v42, %v14830_v42 }
 0x951   : > { %8979 = vmatpush1.bf16.msra.mxu0 %v12952_v2  ;;  %8998 = vmatprep.mubr.bf16.mxu0 %v13054_v15  ;;  %v9173_v3 = vrot.slane %v9171_v56, 4  ;;  %v9042_v7 = vsel %vm640_vm4, %v9040_v55, %v9041_v28  ;;  %v9166_v59 = vor.u32 %v9165_v50, %v9162_v44  ;;  %v13003_v2 = vld [vmem:[%s15065_s5 + $0x1a0] ss:$8 sps:$4 sm:$0xff]   ;;  %v13011_v21 = vld [vmem:[%s15065_s5 + $0x1f4] ss:$8 sps:$4 sm:$0xff]  }
 0x952   : > { %v8797_v60 = vsel %vm428_vm3, %v8792_v14, %v8796_v29  ;;  %8980 = vmatprep.subr.bf16.mxu0 %v12962_v24  ;;  %v8800_v49 = vor.u32 %v8798_v53, %v8796_v29  ;;  %v13000_v33 = vld [vmem:[%s15065_s5 + $0x140] ss:$8 sps:$4 sm:$0xff]   ;;  %v9396_v14 = vld [vmem:[#allocation2 + $0x10] sm:$0x3]  ;;  %v13015_v29 = vld [vmem:[%s15065_s5 + $0x184] ss:$8 sps:$4 sm:$0xff]  }
 0x953   : > { %11039 = vmatmul.mubr.msk.bf16.vlgmr.msra.gmra.mxu1 %vm347_vm1, %v8797_v60  ;;  %v9174_v16 = vor.u32 %v9173_v3, %v9170_v43  ;;  %v14917_v24 = vld [vmem:[#allocation2 + $0x8] sm:$0xf]  ;;  %v13009_v60 = vld [vmem:[%s15065_s5 + $0x1f0] ss:$8 sps:$4 sm:$0xff]   ;;  %v13027_v27 = vld [vmem:[%s15065_s5 + $0x234] ss:$8 sps:$4 sm:$0xff]  }
 0x954   : > { %9098 = vmatpush1.bf16.msra.mxu1 %v12955_v31  ;;  %8889 = vmatprep.mubr.bf16.mxu1 %v13054_v15  ;;  %v13006_v31 = vld [vmem:[%s15065_s5 + $0x190] ss:$8 sps:$4 sm:$0xff]   ;;  %v13016_v18 = vld [vmem:[%s15065_s5 + $0x1e0] ss:$8 sps:$4 sm:$0xff]   ;;  %v13024_v53 = vld [vmem:[%s15065_s5 + $0x1d4] ss:$8 sps:$4 sm:$0xff]  }
 0x955   : > { %9099 = vmatprep.subr.bf16.mxu1 %v12965_v30  ;;  %8981 = vmatpush1.bf16.msra.mxu0 %v12960_v41  ;;  %v9175_v19 = vsel %vm738_vm5, %v9166_v59, %v9174_v16  ;;  %v9393_v30 = vld [vmem:[#allocation2 + $0x4] sm:$0xc]  ;;  %v13037_v42 = vld [vmem:[%s15065_s5 + $0x214] ss:$8 sps:$4 sm:$0xff]   ;;  %v13029_v56 = vld [vmem:[%s15065_s5 + $0x1c0] ss:$8 sps:$4 sm:$0xff]  }
 0x956   : > { %9230 = vmatprep.subr.bf16.mxu0 %v12972_v34  ;;  %v11127_v41 = vcombine.low %v9393_v30, %v14917_v24  ;;  %v13018_v34 = vld [vmem:[%s15065_s5 + $0x1e4] ss:$8 sps:$4 sm:$0xff]   ;;  %v13038_v3 = vld [vmem:[%s15065_s5 + $0x200] ss:$8 sps:$4 sm:$0xff]  }
 0x957   : > { %v13031_v62 = vld [vmem:[%s15065_s5 + $0x1c4] ss:$8 sps:$4 sm:$0xff]  }
 0x958   : > { %9100 = vmatpush1.bf16.msra.mxu1 %v12963_v39  ;;  %11058 = vmatmul.mubr.msk.bf16.vlgmr.msra.gmra.mxu0 %vm347_vm1, %v8919_v51  ;;  %v9522_v39 = vld [vmem:[#allocation2 + $0x10] sm:$0x7]  ;;  %v9416_v38 = vrot.slane %v11127_v41, 2  ;;  %v9539_v47 = vshll.u32 %v11127_v41, 16  ;;  %v13040_v48 = vld [vmem:[%s15065_s5 + $0x204] ss:$8 sps:$4 sm:$0xff]  }
 0x959   : > { %9101 = vmatprep.subr.bf16.mxu1 %v12969_v37  ;;  %9231 = vmatpush1.bf16.msra.mxu0 %v12970_v63  ;;  %v11128_v37 = vcombine.low %v9395_v46, %v9396_v14  ;;  %v14947_v63 = vcombine.low %v9395_v46, %v9522_v39  ;;  %v13025_v51 = vld [vmem:[%s15065_s5 + $0x230] ss:$8 sps:$4 sm:$0xff]  }
 0x95a   : > { %9008 = vmatprep.mubr.bf16.mxu0 %v13054_v15  ;;  %9232 = vmatprep.subr.bf16.mxu0 %v12978_v40  ;;  %v9541_v17 = vrot.slane %v9539_v47, 3 }
 0x95b   : > { %11040 = vmatmul.mubr.msk.bf16.gmra.mxu1 %vm347_vm1, %v8800_v49  ;;  %v9417_v40 = vrot.slane %v11128_v37, 2  ;;  %v13034_v49 = vld [vmem:[%s15065_s5 + $0x224] ss:$8 sps:$4 sm:$0xff]   ;;  %v9544_v52 = vshrl.u32 %v14947_v63, 16  ;;  %v8631_v37 = vlaneseq }
 0x95c   : > { %9102 = vmatpush1.bf16.msra.mxu1 %v12967_v35  ;;  %9121 = vmatprep.mubr.bf16.mxu1 %v13054_v15  ;;  %v9536_v35 = vshrl.u32 %v11127_v41, 16 }
 0x95d   : > { %9103 = vmatprep.subr.bf16.mxu1 %v12975_v8  ;;  %9233 = vmatpush1.bf16.msra.mxu0 %v12976_v54  ;;  %v9418_v8 = vsel %vm952_vm6, %v9416_v38, %v9417_v40  ;;  %v9547_v54 = vshll.u32 %v14947_v63, 16 }
 0x95e   : > { %9234 = vmatprep.subr.bf16.mxu0 %v12981_v23  ;;  %v13032_v23 = vld [vmem:[%s15065_s5 + $0x220] ss:$8 sps:$4 sm:$0xff]  }
 0x960   : > { %9104 = vmatpush1.bf16.msra.mxu1 %v12973_v45  ;;  %11059 = vmatmul.mubr.msk.bf16.gmra.mxu0 %vm347_vm1, %v8918_v25  ;;  %v13013_v25 = vld [vmem:[%s15065_s5 + $0x180] ss:$8 sps:$4 sm:$0xff]   ;;  %v9538_v45 = vrot.slane %v9536_v35, 2 }
 0x961   : > { %9344 = vmatprep.subr.bf16.mxu1 %v12984_v57  ;;  %9235 = vmatpush1.bf16.msra.mxu0 %v12979_v9  ;;  %v9546_v57 = vrot.slane %v9544_v52, 2  ;;  %v9549_v9 = vrot.slane %v9547_v54, 3 }
 0x962   : > { %9254 = vmatprep.mubr.bf16.mxu0 %v13054_v15  ;;  %9236 = vmatprep.subr.bf16.mxu0 %v12989_v5  ;;  %v9542_v61 = vor.u32 %v9541_v17, %v9538_v45  ;;  %v9655_v5 = vld [vmem:[#allocation2 + $0x4] sm:$0x8] }
 0x963   : > { %11078 = vmatmul.mubr.msk.bf16.vlgmr.msra.gmra.mxu1 %vm347_vm1, %v9042_v7  ;;  %v11166_v55 = vcombine.low %v9655_v5, %v14917_v24  ;;  %v9669_v7 = vrot.slane %v14947_v63, 3 }
 0x964   : > { %9345 = vmatpush1.bf16.msra.mxu1 %v12982_v1  ;;  %9131 = vmatprep.mubr.bf16.mxu1 %v13054_v15  ;;  %v9550_v1 = vor.u32 %v9549_v9, %v9546_v57 }
 0x965   : > { %9346 = vmatprep.subr.bf16.mxu1 %v12992_v4  ;;  %9237 = vmatpush1.bf16.msra.mxu0 %v12987_v10  ;;  %v9668_v4 = vrot.slane %v11166_v55, 3 }
 0x966   : > { %9473 = vmatprep.subr.bf16.mxu0 %v12999_v6  ;;  %v9551_v43 = vsel %vm1050_vm7, %v9542_v61, %v9550_v1 }
 0x967   : > { %v9670_v10 = vsel %vm640_vm4, %v9668_v4, %v9669_v7 }
 0x968   : > { %9347 = vmatpush1.bf16.msra.mxu1 %v12990_v11  ;;  %11097 = vmatmul.mubr.msk.bf16.vlgmr.msra.gmra.mxu0 %vm347_vm1, %v9175_v19 }
 0x969   : > { %9348 = vmatprep.subr.bf16.mxu1 %v12996_v22  ;;  %9474 = vmatpush1.bf16.msra.mxu0 %v12997_v12 }
 0x96a   : > { %9264 = vmatprep.mubr.bf16.mxu0 %v13054_v15  ;;  %9475 = vmatprep.subr.bf16.mxu0 %v13005_v20 }
 0x96b   : > { %11079 = vmatmul.mubr.msk.bf16.gmra.mxu1 %vm347_vm1, %v9041_v28  ;;  %v13035_v28 = vld [vmem:[%s15065_s5 + $0x210] ss:$8 sps:$4 sm:$0xff]  }
 0x96c   : > { %9349 = vmatpush1.bf16.msra.mxu1 %v12994_v13  ;;  %9368 = vmatprep.mubr.bf16.mxu1 %v13054_v15 }
 0x96d   : > { %9350 = vmatprep.subr.bf16.mxu1 %v13002_v36  ;;  %9476 = vmatpush1.bf16.msra.mxu0 %v13003_v2 }
 0x96e   : > { %9477 = vmatprep.subr.bf16.mxu0 %v13008_v26 }
 0x970   : > { %9351 = vmatpush1.bf16.msra.mxu1 %v13000_v33  ;;  %11098 = vmatmul.mubr.msk.bf16.gmra.mxu0 %vm347_vm1, %v9174_v16 }
 0x971   : > { %9606 = vmatprep.subr.bf16.mxu1 %v13011_v21  ;;  %9478 = vmatpush1.bf16.msra.mxu0 %v13006_v31 }
 0x972   : > { %9497 = vmatprep.mubr.bf16.mxu0 %v13054_v15  ;;  %9479 = vmatprep.subr.bf16.mxu0 %v13015_v29 }
 0x973   : > { %11117 = vmatmul.mubr.msk.bf16.vlgmr.msra.gmra.mxu1 %vm347_vm1, %v11107_v32 }
 0x974   : > { %9607 = vmatpush1.bf16.msra.mxu1 %v13009_v60  ;;  %9378 = vmatprep.mubr.bf16.mxu1 %v13054_v15 }
 0x975   : > { %9608 = vmatprep.subr.bf16.mxu1 %v13018_v34  ;;  %9480 = vmatpush1.bf16.msra.mxu0 %v13013_v25 }
 0x976   : > { %9725 = vmatprep.subr.bf16.mxu0 %v13027_v27 }
 0x978   : > { %9609 = vmatpush1.bf16.msra.mxu1 %v13016_v18  ;;  %11137 = vmatmul.mubr.msk.bf16.vlgmr.msra.gmra.mxu0 %vm347_vm1, %v9418_v8  ;;  %v8629_v8 = vld [vmem:[%s15066_s6] sm:$0x3] }
 0x979   : > { %9610 = vmatprep.subr.bf16.mxu1 %v13024_v53  ;;  %9726 = vmatpush1.bf16.msra.mxu0 %v13025_v51  ;;  %v8632_v53 = vshrl.u32 %v8631_v37, 7 }
 0x97a   : > { %9507 = vmatprep.mubr.bf16.mxu0 %v13054_v15  ;;  %9727 = vmatprep.subr.bf16.mxu0 %v13034_v49 }
 0x97b   : > { %11118 = vmatmul.mubr.msk.bf16.gmra.mxu1 %vm347_vm1, %v11108_v58  ;;  %v8637_v54 = vsub.s32 1, %v8632_v53 }
 0x97c   : > { %9611 = vmatpush1.bf16.msra.mxu1 %v13022_v0  ;;  %9630 = vmatprep.mubr.bf16.mxu1 %v13054_v15 }
 0x97d   : > { %9612 = vmatprep.subr.bf16.mxu1 %v13031_v62  ;;  %9728 = vmatpush1.bf16.msra.mxu0 %v13032_v23 }
 0x97e   : > { %9729 = vmatprep.subr.bf16.mxu0 %v13037_v42 }
 0x980   : > { %9613 = vmatpush1.bf16.msra.mxu1 %v13029_v56  ;;  %11138 = vmatmul.mubr.msk.bf16.gmra.mxu0 %vm347_vm1, %v9417_v40 }
 0x981   : > { %12499 = vmatprep.subr.bf16.mxu1 %v13027_v27  ;;  %9730 = vmatpush1.bf16.msra.mxu0 %v13035_v28 }
 0x982   : > { %9749 = vmatprep.mubr.bf16.mxu0 %v13054_v15  ;;  %9731 = vmatprep.subr.bf16.mxu0 %v13040_v48 }
 0x983   : > { %11156 = vmatmul.mubr.msk.bf16.vlgmr.msra.gmra.mxu1 %vm347_vm1, %v9551_v43 }
 0x984   : > { %12503 = vmatpush1.bf16.msra.mxu1 %v13025_v51  ;;  %9640 = vmatprep.mubr.bf16.mxu1 %v13054_v15 }
 0x985   : > { %12500 = vmatprep.subr.bf16.mxu1 %v13034_v49  ;;  %9732 = vmatpush1.bf16.msra.mxu0 %v13038_v3  ;;  %v8633_v49 = vsub.s32 0, %v8632_v53 }
 0x988   : > { %12504 = vmatpush1.bf16.msra.mxu1 %v13032_v23  ;;  %11175 = vmatmul.mubr.msk.bf16.vlgmr.msra.gmra.mxu0 %vm347_vm1, %v9670_v10  ;;  %v8634_v23 = vrot.slane %v8629_v8, %v8633_v49 }
 0x989   : > { %12501 = vmatprep.subr.bf16.mxu1 %v13037_v42  ;;  %v8638_v42 = vrot.slane %v8629_v8, %v8637_v54 }
 0x98b   : > { %11157 = vmatmul.mubr.msk.bf16.gmra.mxu1 %vm347_vm1, %v9550_v1 }
 0x98c   : > { %12505 = vmatpush1.bf16.msra.mxu1 %v13035_v28  ;;  %9759 = vmatprep.mubr.bf16.mxu1 %v13054_v15 }
 0x98d   : > { %12502 = vmatprep.subr.bf16.mxu1 %v13040_v48 }
 0x990   : > { %12506 = vmatpush1.bf16.msra.mxu1 %v13038_v3 }
 0x993   : > { %11176 = vmatmul.mubr.msk.bf16.vlgmr.msra.gmra.mxu1 %vm347_vm1, %v9669_v7 }
 0xa08   : > { %v8740_v44 = vpop.f32.mrf.mxu0 }
 0xa09   : > { %v8757_v9 = vadd.f32 %v8740_v44, %v8634_v23 }
 0xa0a   : > { %v8742_v50 = vpop.f32.mrf.mxu0 }
 0xa0b   : > { %v8758_v48 = vadd.f32 %v8742_v50, %v8638_v42 }
 0xa0c   : > { %v8744_v6 = vpop.f32.mrf.mxu0 }
 0xa0d   : > { %v8759_v43 = vadd.f32 %v8744_v6, %v8634_v23 }
 0xa0e   : > { %v8746_v11 = vpop.f32.mrf.mxu0 }
 0xa10   : > { %v15003_v16 = vpop.f32.mrf.mxu0 }
 0xa12   : > { %v15005_v59 = vpop.f32.mrf.mxu0 }
 0xa13   : > { %v8881_v22 = vpop.f32.mrf.mxu1 }
 0xa14   : > { %v8754_v20 = vpop.f32.mrf.mxu0  ;;  %v8898_v5 = vadd.f32 %v8881_v22, %v8757_v9  ;;  %v8761_v22 = vadd.f32 %v15003_v16, %v8634_v23 }
 0xa15   : > { %v8883_v12 = vpop.f32.mrf.mxu1  ;;  %v8760_v20 = vadd.f32 %v8746_v11, %v8638_v42  ;;  %v8762_v11 = vadd.f32 %v15005_v59, %v8638_v42 }
 0xa16   : > { %v8755_v13 = vpop.f32.mrf.mxu0  ;;  %v8899_v3 = vadd.f32 %v8883_v12, %v8758_v48 }
 0xa17   : > { %v8885_v19 = vpop.f32.mrf.mxu1 }
 0xa18   : > { %v9000_v2 = vpop.f32.mrf.mxu0  ;;  %v8900_v13 = vadd.f32 %v8885_v19, %v8759_v43 }
 0xa19   : > { %v8887_v36 = vpop.f32.mrf.mxu1  ;;  %v9017_v4 = vadd.f32 %v9000_v2, %v8898_v5 }
 0xa1a   : > { %v9002_v26 = vpop.f32.mrf.mxu0  ;;  %v8901_v44 = vadd.f32 %v8887_v36, %v8760_v20 }
 0xa1b   : > { %v15007_v15 = vpop.f32.mrf.mxu1 }
 0xa1c   : > { %v9004_v21 = vpop.f32.mrf.mxu0  ;;  %v8902_v19 = vadd.f32 %v15007_v15, %v8761_v22 }
 0xa1d   : > { %v15009_v33 = vpop.f32.mrf.mxu1  ;;  %v9019_v37 = vadd.f32 %v9004_v21, %v8900_v13 }
 0xa1e   : > { %v9006_v31 = vpop.f32.mrf.mxu0 }
 0xa1f   : > { %v8895_v24 = vpop.f32.mrf.mxu1  ;;  %v9020_v6 = vadd.f32 %v9006_v31, %v8901_v44 }
 0xa20   : > { %v15011_v29 = vpop.f32.mrf.mxu0  ;;  %v9018_v24 = vadd.f32 %v9002_v26, %v8899_v3 }
 0xa21   : > { %v8896_v14 = vpop.f32.mrf.mxu1  ;;  %v9021_v16 = vadd.f32 %v15011_v29, %v8902_v19 }
 0xa22   : > { %v15013_v46 = vpop.f32.mrf.mxu0 }
 0xa23   : > { %v9123_v30 = vpop.f32.mrf.mxu1 }
 0xa24   : > { %v9014_v41 = vpop.f32.mrf.mxu0  ;;  %v9140_v14 = vadd.f32 %v9123_v30, %v9017_v4 }
 0xa25   : > { %v9125_v60 = vpop.f32.mrf.mxu1 }
 0xa26   : > { %v9015_v34 = vpop.f32.mrf.mxu0  ;;  %v9141_v53 = vadd.f32 %v9125_v60, %v9018_v24 }
 0xa27   : > { %v9127_v32 = vpop.f32.mrf.mxu1 }
 0xa28   : > { %v9256_v25 = vpop.f32.mrf.mxu0  ;;  %v9142_v12 = vadd.f32 %v9127_v32, %v9019_v37 }
 0xa29   : > { %v9129_v39 = vpop.f32.mrf.mxu1  ;;  %v9273_v50 = vadd.f32 %v9256_v25, %v9140_v14  ;;  %v8903_v25 = vadd.f32 %v15009_v33, %v8762_v11 }
 0xa2a   : > { %v9258_v18 = vpop.f32.mrf.mxu0  ;;  %v9143_v8 = vadd.f32 %v9129_v39, %v9020_v6 }
 0xa2b   : > { %v15015_v27 = vpop.f32.mrf.mxu1  ;;  %v9274_v2 = vadd.f32 %v9258_v18, %v9141_v53  ;;  %v9022_v59 = vadd.f32 %v15013_v46, %v8903_v25 }
 0xa2c   : > { %v9260_v63 = vpop.f32.mrf.mxu0  ;;  %v9144_v15 = vadd.f32 %v15015_v27, %v9021_v16 }
 0xa2d   : > { %v15017_v38 = vpop.f32.mrf.mxu1  ;;  %v9275_v36 = vadd.f32 %v9260_v63, %v9142_v12 }
 0xa2e   : > { %v9262_v51 = vpop.f32.mrf.mxu0 }
 0xa2f   : > { %v9137_v40 = vpop.f32.mrf.mxu1  ;;  %v9276_v32 = vadd.f32 %v9262_v51, %v9143_v8 }
 0xa30   : > { %v15019_v47 = vpop.f32.mrf.mxu0 }
 0xa31   : > { %v9138_v35 = vpop.f32.mrf.mxu1  ;;  %v9277_v46 = vadd.f32 %v15019_v47, %v9144_v15 }
 0xa32   : > { %v15024_v52 = vpop.f32.mrf.mxu0 }
 0xa33   : > { %v9370_v0 = vpop.f32.mrf.mxu1 }
 0xa34   : > { %v9270_v62 = vpop.f32.mrf.mxu0  ;;  %v9387_v49 = vadd.f32 %v9370_v0, %v9273_v50 }
 0xa35   : > { %v9372_v58 = vpop.f32.mrf.mxu1 }
 0xa36   : > { %v9271_v17 = vpop.f32.mrf.mxu0  ;;  %v9388_v21 = vadd.f32 %v9372_v58, %v9274_v2  ;;  %v9145_v58 = vadd.f32 %v15017_v38, %v9022_v59 }
 0xa37   : > { %v9374_v45 = vpop.f32.mrf.mxu1 }
 0xa38   : > { %v9499_v57 = vpop.f32.mrf.mxu0  ;;  %v9389_v18 = vadd.f32 %v9374_v45, %v9275_v36 }
 0xa39   : > { %v9376_v56 = vpop.f32.mrf.mxu1  ;;  %v9516_v60 = vadd.f32 %v9499_v57, %v9387_v49 }
 0xa3a   : > { %v9501_v61 = vpop.f32.mrf.mxu0  ;;  %v9390_v39 = vadd.f32 %v9376_v56, %v9276_v32  ;;  %v9278_v56 = vadd.f32 %v15024_v52, %v9145_v58 }
 0xa3b   : > { %v15026_v28 = vpop.f32.mrf.mxu1  ;;  %v9517_v0 = vadd.f32 %v9501_v61, %v9388_v21 }
 0xa3c   : > { %v9503_v55 = vpop.f32.mrf.mxu0  ;;  %v9391_v48 = vadd.f32 %v15026_v28, %v9277_v46 }
 0xa3d   : > { %v15028_v1 = vpop.f32.mrf.mxu1  ;;  %v9518_v29 = vadd.f32 %v9503_v55, %v9389_v18 }
 0xa3e   : > { %v9505_v10 = vpop.f32.mrf.mxu0  ;;  %v9392_v47 = vadd.f32 %v15028_v1, %v9278_v56 }
 0xa3f   : > { %v9384_v7 = vpop.f32.mrf.mxu1  ;;  %v9519_v27 = vadd.f32 %v9505_v10, %v9390_v39 }
 0xa40   : > { %v9509_v34 = vpop.f32.mrf.mxu0 }
 0xa41   : > { %v9385_v41 = vpop.f32.mrf.mxu1  ;;  %v9520_v3 = vadd.f32 %v9509_v34, %v9391_v48 }
 0xa42   : > { %v9511_v35 = vpop.f32.mrf.mxu0 }
 0xa43   : > { %v9632_v40 = vpop.f32.mrf.mxu1  ;;  %v9521_v10 = vadd.f32 %v9511_v35, %v9392_v47 }
 0xa44   : > { %v9513_v30 = vpop.f32.mrf.mxu0  ;;  %v9649_v62 = vadd.f32 %v9632_v40, %v9516_v60 }
 0xa45   : > { %v9634_v26 = vpop.f32.mrf.mxu1 }
 0xa46   : > { %v9514_v31 = vpop.f32.mrf.mxu0  ;;  %v9650_v63 = vadd.f32 %v9634_v26, %v9517_v0 }
 0xa47   : > { %v9636_v54 = vpop.f32.mrf.mxu1 }
 0xa48   : > { %v9751_v33 = vpop.f32.mrf.mxu0  ;;  %v9651_v42 = vadd.f32 %v9636_v54, %v9518_v29 }
 0xa49   : > { %v9638_v23 = vpop.f32.mrf.mxu1  ;;  %v9768_v51 = vadd.f32 %v9751_v33, %v9649_v62 }
 0xa4a   : > { %v9753_v17 = vpop.f32.mrf.mxu0  ;;  %v9652_v5 = vadd.f32 %v9638_v23, %v9519_v27 }
 0xa4b   : > { %v9642_v45 = vpop.f32.mrf.mxu1  ;;  %9774 = vst [vmem:[%s15041_s13] sm:$0xff] %v9768_v51  ;;  %v9769_v57 = vadd.f32 %v9753_v17, %v9650_v63 }
 0xa4c   : > { %v9755_v61 = vpop.f32.mrf.mxu0  ;;  %v9653_v20 = vadd.f32 %v9642_v45, %v9520_v3 }
 0xa4d   : > { %v9644_v9 = vpop.f32.mrf.mxu1  ;;  %9776 = vst.msk [vmem:[%s15041_s13 + $0x8] sm:$0xff] %vm9775_vm0, %v9769_v57  ;;  %v9770_v38 = vadd.f32 %v9755_v61, %v9651_v42 }
 0xa4e   : > { %v9757_v43 = vpop.f32.mrf.mxu0  ;;  %v9654_v28 = vadd.f32 %v9644_v9, %v9521_v10 }
 0xa4f   : > { %v9646_v55 = vpop.f32.mrf.mxu1  ;;  %9777 = vst [vmem:[%s15041_s13 + $0x10] sm:$0xff] %v9770_v38  ;;  %v9771_v4 = vadd.f32 %v9757_v43, %v9652_v5 }
 0xa51   : > { %v9647_v7 = vpop.f32.mrf.mxu1  ;;  %9778 = vst.msk [vmem:[%s15041_s13 + $0x18] sm:$0xff] %vm9775_vm0, %v9771_v4 }
 0xa53   : > { %v9761_v52 = vpop.f32.mrf.mxu1 }
 0xa54   : > { %v9772_v13 = vadd.f32 %v9761_v52, %v9653_v20 }
 0xa55   : > { %v9763_v24 = vpop.f32.mrf.mxu1 }
 0xa56   : > { %9779 = vst [vmem:[%s15041_s13 + $0x20] sm:$0xff] %v9772_v13  ;;  %v9773_v14 = vadd.f32 %v9763_v24, %v9654_v28 }
 0xa57   : > { %v9765_v41 = vpop.f32.mrf.mxu1 }
 0xa58   : > { %9780 = vst.msk [vmem:[%s15041_s13 + $0x28] sm:$0xff] %vm9775_vm0, %v9773_v14 }
 0xa59   : > { %v9766_v44 = vpop.f32.mrf.mxu1 }
 0xa5a PF: > { %s17_s24 = sadd.s32 1, %s13052_s24  }
 0xa5b   : > { %p14_p4 = scmp.ge.s32.totalorder %s17_s24, 4  }
 0xa5d   :  { %16 = sbr.rel (!%p14_p4) target bundleno = 1 (0x1), region = 171 }

</bundles_post_ra>
